<compile_context>
chip_gen: v6e
topology: v6e:2x2x1
jax: 0.10.0
libtpu: 0.0.40
codegen_flags: <defaults>
</compile_context>

<pallas_src>
import functools

import jax
import jax.numpy as jnp
from jax.experimental import pallas as pl
from jax.experimental.pallas import tpu as pltpu

EPS = 1e-5
ALPHA = 0.5
NEG = -3.0e38          # f32 "minus infinity" floor for columns without ReLU
MAX_TM = 512           # row tile (pixels per grid step)
MAX_TK = 512           # K tile (reduction grid axis when K is large)


# --------------------------------------------------------------------------
# Fused Pallas kernel:  out = max(((x @ w) [+ add]) * scale + bias [+ res], floor)
# --------------------------------------------------------------------------
def _fused_kernel(*refs, has_add, has_res):
    x_ref, w_ref, s_ref, b_ref, f_ref = refs[:5]
    i = 5
    add_ref = None
    res_ref = None
    if has_add:
        add_ref = refs[i]
        i += 1
    if has_res:
        res_ref = refs[i]
        i += 1
    o_ref, acc_ref = refs[i], refs[i + 1]

    k = pl.program_id(1)

    @pl.when(k == 0)
    def _():
        acc_ref[...] = jnp.zeros_like(acc_ref)

    acc_ref[...] += jnp.dot(x_ref[...], w_ref[...],
                            preferred_element_type=jnp.float32)

    @pl.when(k == pl.num_programs(1) - 1)
    def _():
        y = acc_ref[...]
        if has_add:
            y = y + add_ref[...].astype(jnp.float32)
        y = y * s_ref[...] + b_ref[...]
        if has_res:
            y = y + res_ref[...].astype(jnp.float32)
        o_ref[...] = jnp.maximum(y, f_ref[...]).astype(o_ref.dtype)


def _round_up(x, m):
    return ((x + m - 1) // m) * m


def fused_conv_matmul(x, w, scale, bias, floor, add=None, res=None):
    """x:[M,K] bf16, w:[K,N] bf16, scale/bias/floor:[N] f32, add/res:[M,N] bf16.

    Returns bf16 [M, N] = max(((x @ w) [+ add]) * scale + bias [+ res], floor).
    """
    M, K = x.shape
    K2, N = w.shape
    assert K == K2, (x.shape, w.shape)

    TM = _round_up(M, 8) if M <= MAX_TM else MAX_TM
    Mp = _round_up(M, TM)
    TK = K if K <= MAX_TK else MAX_TK
    Kp = _round_up(K, TK)

    def pad2(a, rows, cols):
        pr, pc = rows - a.shape[0], cols - a.shape[1]
        if pr or pc:
            a = jnp.pad(a, ((0, pr), (0, pc)))
        return a

    xp = pad2(x, Mp, Kp)
    wp = pad2(w, Kp, N)
    has_add = add is not None
    has_res = res is not None

    in_specs = [
        pl.BlockSpec((TM, TK), lambda i, k: (i, k)),
        pl.BlockSpec((TK, N), lambda i, k: (k, 0)),
        pl.BlockSpec((1, N), lambda i, k: (0, 0)),
        pl.BlockSpec((1, N), lambda i, k: (0, 0)),
        pl.BlockSpec((1, N), lambda i, k: (0, 0)),
    ]
    args = [xp, wp,
            scale.reshape(1, N).astype(jnp.float32),
            bias.reshape(1, N).astype(jnp.float32),
            floor.reshape(1, N).astype(jnp.float32)]
    if has_add:
        in_specs.append(pl.BlockSpec((TM, N), lambda i, k: (i, 0)))
        args.append(pad2(add, Mp, N))
    if has_res:
        in_specs.append(pl.BlockSpec((TM, N), lambda i, k: (i, 0)))
        args.append(pad2(res, Mp, N))

    kern = functools.partial(_fused_kernel, has_add=has_add, has_res=has_res)
    out = pl.pallas_call(
        kern,
        out_shape=jax.ShapeDtypeStruct((Mp, N), jnp.bfloat16),
        grid=(Mp // TM, Kp // TK),
        in_specs=in_specs,
        out_specs=pl.BlockSpec((TM, N), lambda i, k: (i, 0)),
        scratch_shapes=[pltpu.VMEM((TM, N), jnp.float32)],
        compiler_params=pltpu.CompilerParams(
            # M axis parallel (v7x 2-TC sharding); K reduction axis arbitrary.
            dimension_semantics=("parallel", "arbitrary")),
    )(*args)
    return out[:M]


# --------------------------------------------------------------------------
# JAX glue (layout plumbing only)
# --------------------------------------------------------------------------
def avgpool2(x):  # [N,H,W,C] -> [N,H/2,W/2,C], AvgPool2d(2,2)
    N, H, W, C = x.shape
    return x.reshape(N, H // 2, 2, W // 2, 2, C).mean(axis=(2, 4)).astype(x.dtype)


def upsample2(x):  # nearest x2, [N,H,W,C] -> [N,2H,2W,C]
    N, H, W, C = x.shape
    x = jnp.broadcast_to(x[:, :, None, :, None, :], (N, H, 2, W, 2, C))
    return x.reshape(N, 2 * H, 2 * W, C)


def _im2col_3x3(x):  # pad=1, stride=1
    N, H, W, C = x.shape
    xp = jnp.pad(x, ((0, 0), (1, 1), (1, 1), (0, 0)))
    cols = [xp[:, ky:ky + H, kx:kx + W, :] for ky in range(3) for kx in range(3)]
    return jnp.concatenate(cols, axis=-1).reshape(N * H * W, 9 * C)


def _patches(x, ksize):
    """Activation as a row-major pixel matrix for conv-as-matmul."""
    N, H, W, C = x.shape
    if ksize == 1:
        return x.reshape(N * H * W, C), C
    return _im2col_3x3(x), 9 * C


def _wmat(w_oihw, ksize):
    """OIHW conv weight -> [K, Cout] matmul weight (bf16)."""
    cout, cin = w_oihw.shape[0], w_oihw.shape[1]
    if ksize == 1:
        return w_oihw.reshape(cout, cin).T.astype(jnp.bfloat16)
    return jnp.transpose(w_oihw, (2, 3, 1, 0)).reshape(9 * cin, cout).astype(
        jnp.bfloat16)


def _bn_fold(p, tag):
    scale = p[f"gamma_{tag}"] * jax.lax.rsqrt(p[f"var_{tag}"] + EPS)
    bias = p[f"beta_{tag}"] - p[f"mean_{tag}"] * scale
    return scale, bias


# --------------------------------------------------------------------------
# One octave conv + BN (+ residual) (+ ReLU) block -> exactly two Pallas calls
# --------------------------------------------------------------------------
def octave_block(x_h, x_l, p, ksize, relu, res_h=None, res_l=None):
    N, H, W, _ = x_h.shape
    _, Hl, Wl, _ = x_l.shape
    ch_out = p["w_h2h"].shape[0]
    cl_out = p["w_l2l"].shape[0]
    m_low = N * Hl * Wl

    s_h, b_h = _bn_fold(p, "h")
    s_l, b_l = _bn_fold(p, "l")

    # ---- low-resolution fused matmul: columns [l2h_raw | y_l] -------------
    xh_pool = avgpool2(x_h)
    xp_h, kh = _patches(xh_pool, ksize)
    xp_l, kl = _patches(x_l, ksize)
    x_low = jnp.concatenate([xp_h, xp_l], axis=1)                # [M_low, kh+kl]

    w_h2l = _wmat(p["w_h2l"], ksize)                             # [kh, cl_out]
    w_l2h = _wmat(p["w_l2h"], ksize)                             # [kl, ch_out]
    w_l2l = _wmat(p["w_l2l"], ksize)                             # [kl, cl_out]
    w_low = jnp.concatenate(
        [jnp.concatenate([jnp.zeros((kh, ch_out), jnp.bfloat16), w_h2l], axis=1),
         jnp.concatenate([w_l2h, w_l2l], axis=1)], axis=0)       # [kh+kl, ch+cl]

    relu_low = relu or (res_l is not None)
    scale_low = jnp.concatenate([jnp.ones((ch_out,), jnp.float32), s_l])
    bias_low = jnp.concatenate([jnp.zeros((ch_out,), jnp.float32), b_l])
    floor_low = jnp.concatenate(
        [jnp.full((ch_out,), NEG, jnp.float32),
         jnp.zeros((cl_out,), jnp.float32) if relu_low
         else jnp.full((cl_out,), NEG, jnp.float32)])

    res_low = None
    if res_l is not None:
        res_low = jnp.concatenate(
            [jnp.zeros((m_low, ch_out), jnp.bfloat16),
             res_l.reshape(m_low, cl_out)], axis=1)

    out_low = fused_conv_matmul(x_low.astype(jnp.bfloat16), w_low,
                                scale_low, bias_low, floor_low, res=res_low)
    l2h_raw = out_low[:, :ch_out].reshape(N, Hl, Wl, ch_out)
    y_l = out_low[:, ch_out:].reshape(N, Hl, Wl, cl_out)

    # ---- high-resolution fused matmul: y_h = BN_h(h2h + up(l2h)) ----------
    x_high, _ = _patches(x_h, ksize)
    w_h2h = _wmat(p["w_h2h"], ksize)
    add_high = upsample2(l2h_raw).reshape(N * H * W, ch_out)
    relu_high = relu or (res_h is not None)
    floor_high = (jnp.zeros((ch_out,), jnp.float32) if relu_high
                  else jnp.full((ch_out,), NEG, jnp.float32))
    res_high = None if res_h is None else res_h.reshape(N * H * W, ch_out)

    y_h = fused_conv_matmul(x_high.astype(jnp.bfloat16), w_h2h, s_h, b_h,
                            floor_high, add=add_high, res=res_high)
    return y_h.reshape(N, H, W, ch_out), y_l


def bottleneck_forward(x_h_nchw, x_l_nchw, params):
    """Bottleneck.forward for First=False, stride=1, downsample=None."""
    x_h_res = jnp.transpose(x_h_nchw, (0, 2, 3, 1)).astype(jnp.bfloat16)
    x_l_res = jnp.transpose(x_l_nchw, (0, 2, 3, 1)).astype(jnp.bfloat16)

    xh, xl = octave_block(x_h_res, x_l_res, params["ocb1"], 1, True)
    xh, xl = octave_block(xh, xl, params["ocb2"], 3, True)
    # ocb3 (no block ReLU): residual add + final ReLU fused into its epilogue.
    xh, xl = octave_block(xh, xl, params["ocb3"], 1, False,
                          res_h=x_h_res, res_l=x_l_res)

    yh = jnp.transpose(xh, (0, 3, 1, 2)).astype(jnp.float32)
    yl = jnp.transpose(xl, (0, 3, 1, 2)).astype(jnp.float32)
    return yh, yl


# --------------------------------------------------------------------------
# Deterministic parameter construction
# --------------------------------------------------------------------------
def make_octave_params(key, cin, cout, ksize):
    cin_l = int(ALPHA * cin)
    cin_h = cin - cin_l
    cout_l = int(ALPHA * cout)
    cout_h = cout - cout_l
    ks = jax.random.split(key, 12)

    def w(k, co, ci):
        return jax.random.normal(k, (co, ci, ksize, ksize), jnp.float32) * 0.1

    def bn(k, c):
        a, b, c_, d = jax.random.split(k, 4)
        return dict(
            gamma=1.0 + 0.1 * jax.random.normal(a, (c,), jnp.float32),
            beta=0.1 * jax.random.normal(b, (c,), jnp.float32),
            mean=0.1 * jax.random.normal(c_, (c,), jnp.float32),
            var=0.5 + jnp.abs(jax.random.normal(d, (c,), jnp.float32)),
        )

    bn_h, bn_l = bn(ks[4], cout_h), bn(ks[5], cout_l)
    return dict(
        w_h2h=w(ks[0], cout_h, cin_h),
        w_l2h=w(ks[1], cout_h, cin_l),
        w_h2l=w(ks[2], cout_l, cin_h),
        w_l2l=w(ks[3], cout_l, cin_l),
        gamma_h=bn_h["gamma"], beta_h=bn_h["beta"],
        mean_h=bn_h["mean"], var_h=bn_h["var"],
        gamma_l=bn_l["gamma"], beta_l=bn_l["beta"],
        mean_l=bn_l["mean"], var_l=bn_l["var"],
    )


def make_bottleneck_params(key, inplanes, planes, base_width=64, groups=1):
    width = int(planes * (base_width / 64.0)) * groups
    expansion = 4
    k1, k2, k3 = jax.random.split(key, 3)
    return dict(
        ocb1=make_octave_params(k1, inplanes, width, 1),
        ocb2=make_octave_params(k2, width, width, 3),
        ocb3=make_octave_params(k3, width, planes * expansion, 1),
    )


# --------------------------------------------------------------------------
if __name__ == "__main__":
    key = jax.random.PRNGKey(0)
    k_param, k_h, k_l = jax.random.split(key, 3)

    # inplanes = planes * expansion so the residual add is valid without a
    # downsample module (standard non-first bottleneck configuration).
    inplanes, planes = 16, 4
    N, H, W = 2, 16, 16
    ch_h = inplanes - int(ALPHA * inplanes)   # 8 high-frequency channels
    ch_l = int(ALPHA * inplanes)              # 8 low-frequency channels

    x_h = jax.random.normal(k_h, (N, ch_h, H, W), jnp.float32)        # NCHW
    x_l = jax.random.normal(k_l, (N, ch_l, H // 2, W // 2), jnp.float32)

    params = make_bottleneck_params(k_param, inplanes, planes)

    fwd = jax.jit(lambda a, b: bottleneck_forward(a, b, params))
    y_h, y_l = fwd(x_h, x_l)
    jax.block_until_ready((y_h, y_l))

    assert y_h.shape == (N, planes * 4 - int(ALPHA * planes * 4), H, W)
    assert y_l.shape == (N, int(ALPHA * planes * 4), H // 2, W // 2)
    assert float(jnp.min(y_h)) >= 0.0 and float(jnp.min(y_l)) >= 0.0  # ReLU
    print("KERNEL_OK")
</pallas_src>

<mosaic_0001>
module attributes {stable_mosaic.version = 11 : i64} {
  func.func @_fused_kernel(%arg0: i32, %arg1: i32, %arg2: memref<128x16xbf16, #tpu.memory_space<vmem>>, %arg3: memref<16x4xbf16, #tpu.memory_space<vmem>>, %arg4: memref<1x4xf32, #tpu.memory_space<vmem>>, %arg5: memref<1x4xf32, #tpu.memory_space<vmem>>, %arg6: memref<1x4xf32, #tpu.memory_space<vmem>>, %arg7: memref<128x4xbf16, #tpu.memory_space<vmem>>, %arg8: memref<128x4xf32, #tpu.memory_space<vmem>>) attributes {dimension_semantics = [#tpu.dimension_semantics<parallel>, #tpu.dimension_semantics<arbitrary>], iteration_bounds = array<i64: 1, 1>, scalar_prefetch = 0 : i64, scratch_operands = 1 : i64, tpu.core_type = #tpu.core_type<tc>, window_params = [{transform_indices = @transform_0, window_bounds = array<i64: 128, 16>}, {transform_indices = @transform_1, window_bounds = array<i64: 16, 4>}, {pipeline_mode = #tpu.pipeline_mode<synchronous>, transform_indices = @transform_2, window_bounds = array<i64: 1, 4>}, {pipeline_mode = #tpu.pipeline_mode<synchronous>, transform_indices = @transform_3, window_bounds = array<i64: 1, 4>}, {pipeline_mode = #tpu.pipeline_mode<synchronous>, transform_indices = @transform_4, window_bounds = array<i64: 1, 4>}, {transform_indices = @transform_5, window_bounds = array<i64: 128, 4>}]} {
    %c0_i32 = arith.constant 0 : i32
    %0 = arith.cmpi eq, %arg1, %c0_i32 : i32
    %1 = arith.extui %0 : i1 to i32
    %c0_i32_0 = arith.constant 0 : i32
    %2 = arith.cmpi ne, %1, %c0_i32_0 : i32
    scf.if %2 {
      %cst_10 = arith.constant 0.000000e+00 : f32
      %12 = vector.broadcast %cst_10 : f32 to vector<128x4xf32>
      %c0_11 = arith.constant 0 : index
      %c0_12 = arith.constant 0 : index
      %13 = vector.load %arg8[%c0_11, %c0_12] : memref<128x4xf32, #tpu.memory_space<vmem>>, vector<128x4xf32>
      tpu.vector_store %arg8[%c0_11, %c0_12], %12 {strides = array<i32>} : memref<128x4xf32, #tpu.memory_space<vmem>>, vector<128x4xf32>,
    } else {
    }
    %c0 = arith.constant 0 : index
    %c0_1 = arith.constant 0 : index
    %3 = vector.load %arg8[%c0, %c0_1] : memref<128x4xf32, #tpu.memory_space<vmem>>, vector<128x4xf32>
    %c0_2 = arith.constant 0 : index
    %c0_3 = arith.constant 0 : index
    %4 = vector.load %arg2[%c0_2, %c0_3] : memref<128x16xbf16, #tpu.memory_space<vmem>>, vector<128x16xbf16>
    %c0_4 = arith.constant 0 : index
    %c0_5 = arith.constant 0 : index
    %5 = vector.load %arg3[%c0_4, %c0_5] : memref<16x4xbf16, #tpu.memory_space<vmem>>, vector<16x4xbf16>
    %cst = arith.constant dense<0.000000e+00> : vector<128x4xf32>
    %6 = tpu.matmul %4, %5, %cst {dimension_numbers = #tpu.dot_dimension_numbers<[1], [0], [0], [1], [0, 0, 1, 1], [], []>} : vector<128x16xbf16>, vector<16x4xbf16>, vector<128x4xf32> -> vector<128x4xf32>
    %7 = arith.addf %3, %6 : vector<128x4xf32>
    %c0_6 = arith.constant 0 : index
    %c0_7 = arith.constant 0 : index
    %8 = vector.load %arg8[%c0_6, %c0_7] : memref<128x4xf32, #tpu.memory_space<vmem>>, vector<128x4xf32>
    tpu.vector_store %arg8[%c0_6, %c0_7], %7 {strides = array<i32>} : memref<128x4xf32, #tpu.memory_space<vmem>>, vector<128x4xf32>,
    %c0_i32_8 = arith.constant 0 : i32
    %9 = arith.cmpi eq, %arg1, %c0_i32_8 : i32
    %10 = arith.extui %9 : i1 to i32
    %c0_i32_9 = arith.constant 0 : i32
    %11 = arith.cmpi ne, %10, %c0_i32_9 : i32
    scf.if %11 {
      %c0_10 = arith.constant 0 : index
      %c0_11 = arith.constant 0 : index
      %12 = vector.load %arg8[%c0_10, %c0_11] : memref<128x4xf32, #tpu.memory_space<vmem>>, vector<128x4xf32>
      %c0_12 = arith.constant 0 : index
      %c0_13 = arith.constant 0 : index
      %13 = vector.load %arg4[%c0_12, %c0_13] : memref<1x4xf32, #tpu.memory_space<vmem>>, vector<1x4xf32>
      %14 = vector.broadcast %13 : vector<1x4xf32> to vector<128x4xf32>
      %15 = arith.mulf %12, %14 : vector<128x4xf32>
      %c0_14 = arith.constant 0 : index
      %c0_15 = arith.constant 0 : index
      %16 = vector.load %arg5[%c0_14, %c0_15] : memref<1x4xf32, #tpu.memory_space<vmem>>, vector<1x4xf32>
      %17 = vector.broadcast %16 : vector<1x4xf32> to vector<128x4xf32>
      %18 = arith.addf %15, %17 : vector<128x4xf32>
      %c0_16 = arith.constant 0 : index
      %c0_17 = arith.constant 0 : index
      %19 = vector.load %arg6[%c0_16, %c0_17] : memref<1x4xf32, #tpu.memory_space<vmem>>, vector<1x4xf32>
      %20 = vector.broadcast %19 : vector<1x4xf32> to vector<128x4xf32>
      %21 = arith.maximumf %18, %20 : vector<128x4xf32>
      %22 = arith.truncf %21 : vector<128x4xf32> to vector<128x4xbf16>
      %c0_18 = arith.constant 0 : index
      %c0_19 = arith.constant 0 : index
      %23 = vector.load %arg7[%c0_18, %c0_19] : memref<128x4xbf16, #tpu.memory_space<vmem>>, vector<128x4xbf16>
      tpu.vector_store %arg7[%c0_18, %c0_19], %22 {strides = array<i32>} : memref<128x4xbf16, #tpu.memory_space<vmem>>, vector<128x4xbf16>,
    } else {
    }
    return
  }
  func.func @transform_0(%arg0: i32, %arg1: i32) -> (i32, i32) {
    %c0_i32 = arith.constant 0 : i32
    return %arg0, %arg1 : i32, i32
  }
  func.func @transform_1(%arg0: i32, %arg1: i32) -> (i32, i32) {
    %c0_i32 = arith.constant 0 : i32
    %c0_i32_0 = arith.constant 0 : i32
    return %arg1, %c0_i32 : i32, i32
  }
  func.func @transform_2(%arg0: i32, %arg1: i32) -> (i32, i32) {
    %c0_i32 = arith.constant 0 : i32
    %c0_i32_0 = arith.constant 0 : i32
    %c0_i32_1 = arith.constant 0 : i32
    return %c0_i32, %c0_i32_0 : i32, i32
  }
  func.func @transform_3(%arg0: i32, %arg1: i32) -> (i32, i32) {
    %c0_i32 = arith.constant 0 : i32
    %c0_i32_0 = arith.constant 0 : i32
    %c0_i32_1 = arith.constant 0 : i32
    return %c0_i32, %c0_i32_0 : i32, i32
  }
  func.func @transform_4(%arg0: i32, %arg1: i32) -> (i32, i32) {
    %c0_i32 = arith.constant 0 : i32
    %c0_i32_0 = arith.constant 0 : i32
    %c0_i32_1 = arith.constant 0 : i32
    return %c0_i32, %c0_i32_0 : i32, i32
  }
  func.func @transform_5(%arg0: i32, %arg1: i32) -> (i32, i32) {
    %c0_i32 = arith.constant 0 : i32
    %c0_i32_0 = arith.constant 0 : i32
    return %arg0, %c0_i32 : i32, i32
  }
}

module attributes {stable_mosaic.version = 11 : i64} {
  func.func @_fused_kernel(%arg0: i32, %arg1: i32, %arg2: memref<512x8xbf16, #tpu.memory_space<vmem>>, %arg3: memref<8x2xbf16, #tpu.memory_space<vmem>>, %arg4: memref<1x2xf32, #tpu.memory_space<vmem>>, %arg5: memref<1x2xf32, #tpu.memory_space<vmem>>, %arg6: memref<1x2xf32, #tpu.memory_space<vmem>>, %arg7: memref<512x2xbf16, #tpu.memory_space<vmem>>, %arg8: memref<512x2xbf16, #tpu.memory_space<vmem>>, %arg9: memref<512x2xf32, #tpu.memory_space<vmem>>) attributes {dimension_semantics = [#tpu.dimension_semantics<parallel>, #tpu.dimension_semantics<arbitrary>], iteration_bounds = array<i64: 1, 1>, scalar_prefetch = 0 : i64, scratch_operands = 1 : i64, tpu.core_type = #tpu.core_type<tc>, window_params = [{transform_indices = @transform_0, window_bounds = array<i64: 512, 8>}, {transform_indices = @transform_1, window_bounds = array<i64: 8, 2>}, {pipeline_mode = #tpu.pipeline_mode<synchronous>, transform_indices = @transform_2, window_bounds = array<i64: 1, 2>}, {pipeline_mode = #tpu.pipeline_mode<synchronous>, transform_indices = @transform_3, window_bounds = array<i64: 1, 2>}, {pipeline_mode = #tpu.pipeline_mode<synchronous>, transform_indices = @transform_4, window_bounds = array<i64: 1, 2>}, {transform_indices = @transform_5, window_bounds = array<i64: 512, 2>}, {transform_indices = @transform_6, window_bounds = array<i64: 512, 2>}]} {
    %c0_i32 = arith.constant 0 : i32
    %0 = arith.cmpi eq, %arg1, %c0_i32 : i32
    %1 = arith.extui %0 : i1 to i32
    %c0_i32_0 = arith.constant 0 : i32
    %2 = arith.cmpi ne, %1, %c0_i32_0 : i32
    scf.if %2 {
      %cst_10 = arith.constant 0.000000e+00 : f32
      %12 = vector.broadcast %cst_10 : f32 to vector<512x2xf32>
      %c0_11 = arith.constant 0 : index
      %c0_12 = arith.constant 0 : index
      %13 = vector.load %arg9[%c0_11, %c0_12] : memref<512x2xf32, #tpu.memory_space<vmem>>, vector<512x2xf32>
      tpu.vector_store %arg9[%c0_11, %c0_12], %12 {strides = array<i32>} : memref<512x2xf32, #tpu.memory_space<vmem>>, vector<512x2xf32>,
    } else {
    }
    %c0 = arith.constant 0 : index
    %c0_1 = arith.constant 0 : index
    %3 = vector.load %arg9[%c0, %c0_1] : memref<512x2xf32, #tpu.memory_space<vmem>>, vector<512x2xf32>
    %c0_2 = arith.constant 0 : index
    %c0_3 = arith.constant 0 : index
    %4 = vector.load %arg2[%c0_2, %c0_3] : memref<512x8xbf16, #tpu.memory_space<vmem>>, vector<512x8xbf16>
    %c0_4 = arith.constant 0 : index
    %c0_5 = arith.constant 0 : index
    %5 = vector.load %arg3[%c0_4, %c0_5] : memref<8x2xbf16, #tpu.memory_space<vmem>>, vector<8x2xbf16>
    %cst = arith.constant dense<0.000000e+00> : vector<512x2xf32>
    %6 = tpu.matmul %4, %5, %cst {dimension_numbers = #tpu.dot_dimension_numbers<[1], [0], [0], [1], [0, 0, 1, 1], [], []>} : vector<512x8xbf16>, vector<8x2xbf16>, vector<512x2xf32> -> vector<512x2xf32>
    %7 = arith.addf %3, %6 : vector<512x2xf32>
    %c0_6 = arith.constant 0 : index
    %c0_7 = arith.constant 0 : index
    %8 = vector.load %arg9[%c0_6, %c0_7] : memref<512x2xf32, #tpu.memory_space<vmem>>, vector<512x2xf32>
    tpu.vector_store %arg9[%c0_6, %c0_7], %7 {strides = array<i32>} : memref<512x2xf32, #tpu.memory_space<vmem>>, vector<512x2xf32>,
    %c0_i32_8 = arith.constant 0 : i32
    %9 = arith.cmpi eq, %arg1, %c0_i32_8 : i32
    %10 = arith.extui %9 : i1 to i32
    %c0_i32_9 = arith.constant 0 : i32
    %11 = arith.cmpi ne, %10, %c0_i32_9 : i32
    scf.if %11 {
      %c0_10 = arith.constant 0 : index
      %c0_11 = arith.constant 0 : index
      %12 = vector.load %arg9[%c0_10, %c0_11] : memref<512x2xf32, #tpu.memory_space<vmem>>, vector<512x2xf32>
      %c0_12 = arith.constant 0 : index
      %c0_13 = arith.constant 0 : index
      %13 = vector.load %arg7[%c0_12, %c0_13] : memref<512x2xbf16, #tpu.memory_space<vmem>>, vector<512x2xbf16>
      %14 = arith.extf %13 : vector<512x2xbf16> to vector<512x2xf32>
      %15 = arith.addf %12, %14 : vector<512x2xf32>
      %c0_14 = arith.constant 0 : index
      %c0_15 = arith.constant 0 : index
      %16 = vector.load %arg4[%c0_14, %c0_15] : memref<1x2xf32, #tpu.memory_space<vmem>>, vector<1x2xf32>
      %17 = vector.broadcast %16 : vector<1x2xf32> to vector<512x2xf32>
      %18 = arith.mulf %15, %17 : vector<512x2xf32>
      %c0_16 = arith.constant 0 : index
      %c0_17 = arith.constant 0 : index
      %19 = vector.load %arg5[%c0_16, %c0_17] : memref<1x2xf32, #tpu.memory_space<vmem>>, vector<1x2xf32>
      %20 = vector.broadcast %19 : vector<1x2xf32> to vector<512x2xf32>
      %21 = arith.addf %18, %20 : vector<512x2xf32>
      %c0_18 = arith.constant 0 : index
      %c0_19 = arith.constant 0 : index
      %22 = vector.load %arg6[%c0_18, %c0_19] : memref<1x2xf32, #tpu.memory_space<vmem>>, vector<1x2xf32>
      %23 = vector.broadcast %22 : vector<1x2xf32> to vector<512x2xf32>
      %24 = arith.maximumf %21, %23 : vector<512x2xf32>
      %25 = arith.truncf %24 : vector<512x2xf32> to vector<512x2xbf16>
      %c0_20 = arith.constant 0 : index
      %c0_21 = arith.constant 0 : index
      %26 = vector.load %arg8[%c0_20, %c0_21] : memref<512x2xbf16, #tpu.memory_space<vmem>>, vector<512x2xbf16>
      tpu.vector_store %arg8[%c0_20, %c0_21], %25 {strides = array<i32>} : memref<512x2xbf16, #tpu.memory_space<vmem>>, vector<512x2xbf16>,
    } else {
    }
    return
  }
  func.func @transform_0(%arg0: i32, %arg1: i32) -> (i32, i32) {
    %c0_i32 = arith.constant 0 : i32
    return %arg0, %arg1 : i32, i32
  }
  func.func @transform_1(%arg0: i32, %arg1: i32) -> (i32, i32) {
    %c0_i32 = arith.constant 0 : i32
    %c0_i32_0 = arith.constant 0 : i32
    return %arg1, %c0_i32 : i32, i32
  }
  func.func @transform_2(%arg0: i32, %arg1: i32) -> (i32, i32) {
    %c0_i32 = arith.constant 0 : i32
    %c0_i32_0 = arith.constant 0 : i32
    %c0_i32_1 = arith.constant 0 : i32
    return %c0_i32, %c0_i32_0 : i32, i32
  }
  func.func @transform_3(%arg0: i32, %arg1: i32) -> (i32, i32) {
    %c0_i32 = arith.constant 0 : i32
    %c0_i32_0 = arith.constant 0 : i32
    %c0_i32_1 = arith.constant 0 : i32
    return %c0_i32, %c0_i32_0 : i32, i32
  }
  func.func @transform_4(%arg0: i32, %arg1: i32) -> (i32, i32) {
    %c0_i32 = arith.constant 0 : i32
    %c0_i32_0 = arith.constant 0 : i32
    %c0_i32_1 = arith.constant 0 : i32
    return %c0_i32, %c0_i32_0 : i32, i32
  }
  func.func @transform_5(%arg0: i32, %arg1: i32) -> (i32, i32) {
    %c0_i32 = arith.constant 0 : i32
    %c0_i32_0 = arith.constant 0 : i32
    return %arg0, %c0_i32 : i32, i32
  }
  func.func @transform_6(%arg0: i32, %arg1: i32) -> (i32, i32) {
    %c0_i32 = arith.constant 0 : i32
    %c0_i32_0 = arith.constant 0 : i32
    return %arg0, %c0_i32 : i32, i32
  }
}

module attributes {stable_mosaic.version = 11 : i64} {
  func.func @_fused_kernel(%arg0: i32, %arg1: i32, %arg2: memref<128x36xbf16, #tpu.memory_space<vmem>>, %arg3: memref<36x4xbf16, #tpu.memory_space<vmem>>, %arg4: memref<1x4xf32, #tpu.memory_space<vmem>>, %arg5: memref<1x4xf32, #tpu.memory_space<vmem>>, %arg6: memref<1x4xf32, #tpu.memory_space<vmem>>, %arg7: memref<128x4xbf16, #tpu.memory_space<vmem>>, %arg8: memref<128x4xf32, #tpu.memory_space<vmem>>) attributes {dimension_semantics = [#tpu.dimension_semantics<parallel>, #tpu.dimension_semantics<arbitrary>], iteration_bounds = array<i64: 1, 1>, scalar_prefetch = 0 : i64, scratch_operands = 1 : i64, tpu.core_type = #tpu.core_type<tc>, window_params = [{transform_indices = @transform_0, window_bounds = array<i64: 128, 36>}, {transform_indices = @transform_1, window_bounds = array<i64: 36, 4>}, {pipeline_mode = #tpu.pipeline_mode<synchronous>, transform_indices = @transform_2, window_bounds = array<i64: 1, 4>}, {pipeline_mode = #tpu.pipeline_mode<synchronous>, transform_indices = @transform_3, window_bounds = array<i64: 1, 4>}, {pipeline_mode = #tpu.pipeline_mode<synchronous>, transform_indices = @transform_4, window_bounds = array<i64: 1, 4>}, {transform_indices = @transform_5, window_bounds = array<i64: 128, 4>}]} {
    %c0_i32 = arith.constant 0 : i32
    %0 = arith.cmpi eq, %arg1, %c0_i32 : i32
    %1 = arith.extui %0 : i1 to i32
    %c0_i32_0 = arith.constant 0 : i32
    %2 = arith.cmpi ne, %1, %c0_i32_0 : i32
    scf.if %2 {
      %cst_10 = arith.constant 0.000000e+00 : f32
      %12 = vector.broadcast %cst_10 : f32 to vector<128x4xf32>
      %c0_11 = arith.constant 0 : index
      %c0_12 = arith.constant 0 : index
      %13 = vector.load %arg8[%c0_11, %c0_12] : memref<128x4xf32, #tpu.memory_space<vmem>>, vector<128x4xf32>
      tpu.vector_store %arg8[%c0_11, %c0_12], %12 {strides = array<i32>} : memref<128x4xf32, #tpu.memory_space<vmem>>, vector<128x4xf32>,
    } else {
    }
    %c0 = arith.constant 0 : index
    %c0_1 = arith.constant 0 : index
    %3 = vector.load %arg8[%c0, %c0_1] : memref<128x4xf32, #tpu.memory_space<vmem>>, vector<128x4xf32>
    %c0_2 = arith.constant 0 : index
    %c0_3 = arith.constant 0 : index
    %4 = vector.load %arg2[%c0_2, %c0_3] : memref<128x36xbf16, #tpu.memory_space<vmem>>, vector<128x36xbf16>
    %c0_4 = arith.constant 0 : index
    %c0_5 = arith.constant 0 : index
    %5 = vector.load %arg3[%c0_4, %c0_5] : memref<36x4xbf16, #tpu.memory_space<vmem>>, vector<36x4xbf16>
    %cst = arith.constant dense<0.000000e+00> : vector<128x4xf32>
    %6 = tpu.matmul %4, %5, %cst {dimension_numbers = #tpu.dot_dimension_numbers<[1], [0], [0], [1], [0, 0, 1, 1], [], []>} : vector<128x36xbf16>, vector<36x4xbf16>, vector<128x4xf32> -> vector<128x4xf32>
    %7 = arith.addf %3, %6 : vector<128x4xf32>
    %c0_6 = arith.constant 0 : index
    %c0_7 = arith.constant 0 : index
    %8 = vector.load %arg8[%c0_6, %c0_7] : memref<128x4xf32, #tpu.memory_space<vmem>>, vector<128x4xf32>
    tpu.vector_store %arg8[%c0_6, %c0_7], %7 {strides = array<i32>} : memref<128x4xf32, #tpu.memory_space<vmem>>, vector<128x4xf32>,
    %c0_i32_8 = arith.constant 0 : i32
    %9 = arith.cmpi eq, %arg1, %c0_i32_8 : i32
    %10 = arith.extui %9 : i1 to i32
    %c0_i32_9 = arith.constant 0 : i32
    %11 = arith.cmpi ne, %10, %c0_i32_9 : i32
    scf.if %11 {
      %c0_10 = arith.constant 0 : index
      %c0_11 = arith.constant 0 : index
      %12 = vector.load %arg8[%c0_10, %c0_11] : memref<128x4xf32, #tpu.memory_space<vmem>>, vector<128x4xf32>
      %c0_12 = arith.constant 0 : index
      %c0_13 = arith.constant 0 : index
      %13 = vector.load %arg4[%c0_12, %c0_13] : memref<1x4xf32, #tpu.memory_space<vmem>>, vector<1x4xf32>
      %14 = vector.broadcast %13 : vector<1x4xf32> to vector<128x4xf32>
      %15 = arith.mulf %12, %14 : vector<128x4xf32>
      %c0_14 = arith.constant 0 : index
      %c0_15 = arith.constant 0 : index
      %16 = vector.load %arg5[%c0_14, %c0_15] : memref<1x4xf32, #tpu.memory_space<vmem>>, vector<1x4xf32>
      %17 = vector.broadcast %16 : vector<1x4xf32> to vector<128x4xf32>
      %18 = arith.addf %15, %17 : vector<128x4xf32>
      %c0_16 = arith.constant 0 : index
      %c0_17 = arith.constant 0 : index
      %19 = vector.load %arg6[%c0_16, %c0_17] : memref<1x4xf32, #tpu.memory_space<vmem>>, vector<1x4xf32>
      %20 = vector.broadcast %19 : vector<1x4xf32> to vector<128x4xf32>
      %21 = arith.maximumf %18, %20 : vector<128x4xf32>
      %22 = arith.truncf %21 : vector<128x4xf32> to vector<128x4xbf16>
      %c0_18 = arith.constant 0 : index
      %c0_19 = arith.constant 0 : index
      %23 = vector.load %arg7[%c0_18, %c0_19] : memref<128x4xbf16, #tpu.memory_space<vmem>>, vector<128x4xbf16>
      tpu.vector_store %arg7[%c0_18, %c0_19], %22 {strides = array<i32>} : memref<128x4xbf16, #tpu.memory_space<vmem>>, vector<128x4xbf16>,
    } else {
    }
    return
  }
  func.func @transform_0(%arg0: i32, %arg1: i32) -> (i32, i32) {
    %c0_i32 = arith.constant 0 : i32
    return %arg0, %arg1 : i32, i32
  }
  func.func @transform_1(%arg0: i32, %arg1: i32) -> (i32, i32) {
    %c0_i32 = arith.constant 0 : i32
    %c0_i32_0 = arith.constant 0 : i32
    return %arg1, %c0_i32 : i32, i32
  }
  func.func @transform_2(%arg0: i32, %arg1: i32) -> (i32, i32) {
    %c0_i32 = arith.constant 0 : i32
    %c0_i32_0 = arith.constant 0 : i32
    %c0_i32_1 = arith.constant 0 : i32
    return %c0_i32, %c0_i32_0 : i32, i32
  }
  func.func @transform_3(%arg0: i32, %arg1: i32) -> (i32, i32) {
    %c0_i32 = arith.constant 0 : i32
    %c0_i32_0 = arith.constant 0 : i32
    %c0_i32_1 = arith.constant 0 : i32
    return %c0_i32, %c0_i32_0 : i32, i32
  }
  func.func @transform_4(%arg0: i32, %arg1: i32) -> (i32, i32) {
    %c0_i32 = arith.constant 0 : i32
    %c0_i32_0 = arith.constant 0 : i32
    %c0_i32_1 = arith.constant 0 : i32
    return %c0_i32, %c0_i32_0 : i32, i32
  }
  func.func @transform_5(%arg0: i32, %arg1: i32) -> (i32, i32) {
    %c0_i32 = arith.constant 0 : i32
    %c0_i32_0 = arith.constant 0 : i32
    return %arg0, %c0_i32 : i32, i32
  }
}

module attributes {stable_mosaic.version = 11 : i64} {
  func.func @_fused_kernel(%arg0: i32, %arg1: i32, %arg2: memref<512x18xbf16, #tpu.memory_space<vmem>>, %arg3: memref<18x2xbf16, #tpu.memory_space<vmem>>, %arg4: memref<1x2xf32, #tpu.memory_space<vmem>>, %arg5: memref<1x2xf32, #tpu.memory_space<vmem>>, %arg6: memref<1x2xf32, #tpu.memory_space<vmem>>, %arg7: memref<512x2xbf16, #tpu.memory_space<vmem>>, %arg8: memref<512x2xbf16, #tpu.memory_space<vmem>>, %arg9: memref<512x2xf32, #tpu.memory_space<vmem>>) attributes {dimension_semantics = [#tpu.dimension_semantics<parallel>, #tpu.dimension_semantics<arbitrary>], iteration_bounds = array<i64: 1, 1>, scalar_prefetch = 0 : i64, scratch_operands = 1 : i64, tpu.core_type = #tpu.core_type<tc>, window_params = [{transform_indices = @transform_0, window_bounds = array<i64: 512, 18>}, {transform_indices = @transform_1, window_bounds = array<i64: 18, 2>}, {pipeline_mode = #tpu.pipeline_mode<synchronous>, transform_indices = @transform_2, window_bounds = array<i64: 1, 2>}, {pipeline_mode = #tpu.pipeline_mode<synchronous>, transform_indices = @transform_3, window_bounds = array<i64: 1, 2>}, {pipeline_mode = #tpu.pipeline_mode<synchronous>, transform_indices = @transform_4, window_bounds = array<i64: 1, 2>}, {transform_indices = @transform_5, window_bounds = array<i64: 512, 2>}, {transform_indices = @transform_6, window_bounds = array<i64: 512, 2>}]} {
    %c0_i32 = arith.constant 0 : i32
    %0 = arith.cmpi eq, %arg1, %c0_i32 : i32
    %1 = arith.extui %0 : i1 to i32
    %c0_i32_0 = arith.constant 0 : i32
    %2 = arith.cmpi ne, %1, %c0_i32_0 : i32
    scf.if %2 {
      %cst_10 = arith.constant 0.000000e+00 : f32
      %12 = vector.broadcast %cst_10 : f32 to vector<512x2xf32>
      %c0_11 = arith.constant 0 : index
      %c0_12 = arith.constant 0 : index
      %13 = vector.load %arg9[%c0_11, %c0_12] : memref<512x2xf32, #tpu.memory_space<vmem>>, vector<512x2xf32>
      tpu.vector_store %arg9[%c0_11, %c0_12], %12 {strides = array<i32>} : memref<512x2xf32, #tpu.memory_space<vmem>>, vector<512x2xf32>,
    } else {
    }
    %c0 = arith.constant 0 : index
    %c0_1 = arith.constant 0 : index
    %3 = vector.load %arg9[%c0, %c0_1] : memref<512x2xf32, #tpu.memory_space<vmem>>, vector<512x2xf32>
    %c0_2 = arith.constant 0 : index
    %c0_3 = arith.constant 0 : index
    %4 = vector.load %arg2[%c0_2, %c0_3] : memref<512x18xbf16, #tpu.memory_space<vmem>>, vector<512x18xbf16>
    %c0_4 = arith.constant 0 : index
    %c0_5 = arith.constant 0 : index
    %5 = vector.load %arg3[%c0_4, %c0_5] : memref<18x2xbf16, #tpu.memory_space<vmem>>, vector<18x2xbf16>
    %cst = arith.constant dense<0.000000e+00> : vector<512x2xf32>
    %6 = tpu.matmul %4, %5, %cst {dimension_numbers = #tpu.dot_dimension_numbers<[1], [0], [0], [1], [0, 0, 1, 1], [], []>} : vector<512x18xbf16>, vector<18x2xbf16>, vector<512x2xf32> -> vector<512x2xf32>
    %7 = arith.addf %3, %6 : vector<512x2xf32>
    %c0_6 = arith.constant 0 : index
    %c0_7 = arith.constant 0 : index
    %8 = vector.load %arg9[%c0_6, %c0_7] : memref<512x2xf32, #tpu.memory_space<vmem>>, vector<512x2xf32>
    tpu.vector_store %arg9[%c0_6, %c0_7], %7 {strides = array<i32>} : memref<512x2xf32, #tpu.memory_space<vmem>>, vector<512x2xf32>,
    %c0_i32_8 = arith.constant 0 : i32
    %9 = arith.cmpi eq, %arg1, %c0_i32_8 : i32
    %10 = arith.extui %9 : i1 to i32
    %c0_i32_9 = arith.constant 0 : i32
    %11 = arith.cmpi ne, %10, %c0_i32_9 : i32
    scf.if %11 {
      %c0_10 = arith.constant 0 : index
      %c0_11 = arith.constant 0 : index
      %12 = vector.load %arg9[%c0_10, %c0_11] : memref<512x2xf32, #tpu.memory_space<vmem>>, vector<512x2xf32>
      %c0_12 = arith.constant 0 : index
      %c0_13 = arith.constant 0 : index
      %13 = vector.load %arg7[%c0_12, %c0_13] : memref<512x2xbf16, #tpu.memory_space<vmem>>, vector<512x2xbf16>
      %14 = arith.extf %13 : vector<512x2xbf16> to vector<512x2xf32>
      %15 = arith.addf %12, %14 : vector<512x2xf32>
      %c0_14 = arith.constant 0 : index
      %c0_15 = arith.constant 0 : index
      %16 = vector.load %arg4[%c0_14, %c0_15] : memref<1x2xf32, #tpu.memory_space<vmem>>, vector<1x2xf32>
      %17 = vector.broadcast %16 : vector<1x2xf32> to vector<512x2xf32>
      %18 = arith.mulf %15, %17 : vector<512x2xf32>
      %c0_16 = arith.constant 0 : index
      %c0_17 = arith.constant 0 : index
      %19 = vector.load %arg5[%c0_16, %c0_17] : memref<1x2xf32, #tpu.memory_space<vmem>>, vector<1x2xf32>
      %20 = vector.broadcast %19 : vector<1x2xf32> to vector<512x2xf32>
      %21 = arith.addf %18, %20 : vector<512x2xf32>
      %c0_18 = arith.constant 0 : index
      %c0_19 = arith.constant 0 : index
      %22 = vector.load %arg6[%c0_18, %c0_19] : memref<1x2xf32, #tpu.memory_space<vmem>>, vector<1x2xf32>
      %23 = vector.broadcast %22 : vector<1x2xf32> to vector<512x2xf32>
      %24 = arith.maximumf %21, %23 : vector<512x2xf32>
      %25 = arith.truncf %24 : vector<512x2xf32> to vector<512x2xbf16>
      %c0_20 = arith.constant 0 : index
      %c0_21 = arith.constant 0 : index
      %26 = vector.load %arg8[%c0_20, %c0_21] : memref<512x2xbf16, #tpu.memory_space<vmem>>, vector<512x2xbf16>
      tpu.vector_store %arg8[%c0_20, %c0_21], %25 {strides = array<i32>} : memref<512x2xbf16, #tpu.memory_space<vmem>>, vector<512x2xbf16>,
    } else {
    }
    return
  }
  func.func @transform_0(%arg0: i32, %arg1: i32) -> (i32, i32) {
    %c0_i32 = arith.constant 0 : i32
    return %arg0, %arg1 : i32, i32
  }
  func.func @transform_1(%arg0: i32, %arg1: i32) -> (i32, i32) {
    %c0_i32 = arith.constant 0 : i32
    %c0_i32_0 = arith.constant 0 : i32
    return %arg1, %c0_i32 : i32, i32
  }
  func.func @transform_2(%arg0: i32, %arg1: i32) -> (i32, i32) {
    %c0_i32 = arith.constant 0 : i32
    %c0_i32_0 = arith.constant 0 : i32
    %c0_i32_1 = arith.constant 0 : i32
    return %c0_i32, %c0_i32_0 : i32, i32
  }
  func.func @transform_3(%arg0: i32, %arg1: i32) -> (i32, i32) {
    %c0_i32 = arith.constant 0 : i32
    %c0_i32_0 = arith.constant 0 : i32
    %c0_i32_1 = arith.constant 0 : i32
    return %c0_i32, %c0_i32_0 : i32, i32
  }
  func.func @transform_4(%arg0: i32, %arg1: i32) -> (i32, i32) {
    %c0_i32 = arith.constant 0 : i32
    %c0_i32_0 = arith.constant 0 : i32
    %c0_i32_1 = arith.constant 0 : i32
    return %c0_i32, %c0_i32_0 : i32, i32
  }
  func.func @transform_5(%arg0: i32, %arg1: i32) -> (i32, i32) {
    %c0_i32 = arith.constant 0 : i32
    %c0_i32_0 = arith.constant 0 : i32
    return %arg0, %c0_i32 : i32, i32
  }
  func.func @transform_6(%arg0: i32, %arg1: i32) -> (i32, i32) {
    %c0_i32 = arith.constant 0 : i32
    %c0_i32_0 = arith.constant 0 : i32
    return %arg0, %c0_i32 : i32, i32
  }
}

module attributes {stable_mosaic.version = 11 : i64} {
  func.func @_fused_kernel(%arg0: i32, %arg1: i32, %arg2: memref<128x4xbf16, #tpu.memory_space<vmem>>, %arg3: memref<4x16xbf16, #tpu.memory_space<vmem>>, %arg4: memref<1x16xf32, #tpu.memory_space<vmem>>, %arg5: memref<1x16xf32, #tpu.memory_space<vmem>>, %arg6: memref<1x16xf32, #tpu.memory_space<vmem>>, %arg7: memref<128x16xbf16, #tpu.memory_space<vmem>>, %arg8: memref<128x16xbf16, #tpu.memory_space<vmem>>, %arg9: memref<128x16xf32, #tpu.memory_space<vmem>>) attributes {dimension_semantics = [#tpu.dimension_semantics<parallel>, #tpu.dimension_semantics<arbitrary>], iteration_bounds = array<i64: 1, 1>, scalar_prefetch = 0 : i64, scratch_operands = 1 : i64, tpu.core_type = #tpu.core_type<tc>, window_params = [{transform_indices = @transform_0, window_bounds = array<i64: 128, 4>}, {transform_indices = @transform_1, window_bounds = array<i64: 4, 16>}, {pipeline_mode = #tpu.pipeline_mode<synchronous>, transform_indices = @transform_2, window_bounds = array<i64: 1, 16>}, {pipeline_mode = #tpu.pipeline_mode<synchronous>, transform_indices = @transform_3, window_bounds = array<i64: 1, 16>}, {pipeline_mode = #tpu.pipeline_mode<synchronous>, transform_indices = @transform_4, window_bounds = array<i64: 1, 16>}, {transform_indices = @transform_5, window_bounds = array<i64: 128, 16>}, {transform_indices = @transform_6, window_bounds = array<i64: 128, 16>}]} {
    %c0_i32 = arith.constant 0 : i32
    %0 = arith.cmpi eq, %arg1, %c0_i32 : i32
    %1 = arith.extui %0 : i1 to i32
    %c0_i32_0 = arith.constant 0 : i32
    %2 = arith.cmpi ne, %1, %c0_i32_0 : i32
    scf.if %2 {
      %cst_10 = arith.constant 0.000000e+00 : f32
      %12 = vector.broadcast %cst_10 : f32 to vector<128x16xf32>
      %c0_11 = arith.constant 0 : index
      %c0_12 = arith.constant 0 : index
      %13 = vector.load %arg9[%c0_11, %c0_12] : memref<128x16xf32, #tpu.memory_space<vmem>>, vector<128x16xf32>
      tpu.vector_store %arg9[%c0_11, %c0_12], %12 {strides = array<i32>} : memref<128x16xf32, #tpu.memory_space<vmem>>, vector<128x16xf32>,
    } else {
    }
    %c0 = arith.constant 0 : index
    %c0_1 = arith.constant 0 : index
    %3 = vector.load %arg9[%c0, %c0_1] : memref<128x16xf32, #tpu.memory_space<vmem>>, vector<128x16xf32>
    %c0_2 = arith.constant 0 : index
    %c0_3 = arith.constant 0 : index
    %4 = vector.load %arg2[%c0_2, %c0_3] : memref<128x4xbf16, #tpu.memory_space<vmem>>, vector<128x4xbf16>
    %c0_4 = arith.constant 0 : index
    %c0_5 = arith.constant 0 : index
    %5 = vector.load %arg3[%c0_4, %c0_5] : memref<4x16xbf16, #tpu.memory_space<vmem>>, vector<4x16xbf16>
    %cst = arith.constant dense<0.000000e+00> : vector<128x16xf32>
    %6 = tpu.matmul %4, %5, %cst {dimension_numbers = #tpu.dot_dimension_numbers<[1], [0], [0], [1], [0, 0, 1, 1], [], []>} : vector<128x4xbf16>, vector<4x16xbf16>, vector<128x16xf32> -> vector<128x16xf32>
    %7 = arith.addf %3, %6 : vector<128x16xf32>
    %c0_6 = arith.constant 0 : index
    %c0_7 = arith.constant 0 : index
    %8 = vector.load %arg9[%c0_6, %c0_7] : memref<128x16xf32, #tpu.memory_space<vmem>>, vector<128x16xf32>
    tpu.vector_store %arg9[%c0_6, %c0_7], %7 {strides = array<i32>} : memref<128x16xf32, #tpu.memory_space<vmem>>, vector<128x16xf32>,
    %c0_i32_8 = arith.constant 0 : i32
    %9 = arith.cmpi eq, %arg1, %c0_i32_8 : i32
    %10 = arith.extui %9 : i1 to i32
    %c0_i32_9 = arith.constant 0 : i32
    %11 = arith.cmpi ne, %10, %c0_i32_9 : i32
    scf.if %11 {
      %c0_10 = arith.constant 0 : index
      %c0_11 = arith.constant 0 : index
      %12 = vector.load %arg9[%c0_10, %c0_11] : memref<128x16xf32, #tpu.memory_space<vmem>>, vector<128x16xf32>
      %c0_12 = arith.constant 0 : index
      %c0_13 = arith.constant 0 : index
      %13 = vector.load %arg4[%c0_12, %c0_13] : memref<1x16xf32, #tpu.memory_space<vmem>>, vector<1x16xf32>
      %14 = vector.broadcast %13 : vector<1x16xf32> to vector<128x16xf32>
      %15 = arith.mulf %12, %14 : vector<128x16xf32>
      %c0_14 = arith.constant 0 : index
      %c0_15 = arith.constant 0 : index
      %16 = vector.load %arg5[%c0_14, %c0_15] : memref<1x16xf32, #tpu.memory_space<vmem>>, vector<1x16xf32>
      %17 = vector.broadcast %16 : vector<1x16xf32> to vector<128x16xf32>
      %18 = arith.addf %15, %17 : vector<128x16xf32>
      %c0_16 = arith.constant 0 : index
      %c0_17 = arith.constant 0 : index
      %19 = vector.load %arg7[%c0_16, %c0_17] : memref<128x16xbf16, #tpu.memory_space<vmem>>, vector<128x16xbf16>
      %20 = arith.extf %19 : vector<128x16xbf16> to vector<128x16xf32>
      %21 = arith.addf %18, %20 : vector<128x16xf32>
      %c0_18 = arith.constant 0 : index
      %c0_19 = arith.constant 0 : index
      %22 = vector.load %arg6[%c0_18, %c0_19] : memref<1x16xf32, #tpu.memory_space<vmem>>, vector<1x16xf32>
      %23 = vector.broadcast %22 : vector<1x16xf32> to vector<128x16xf32>
      %24 = arith.maximumf %21, %23 : vector<128x16xf32>
      %25 = arith.truncf %24 : vector<128x16xf32> to vector<128x16xbf16>
      %c0_20 = arith.constant 0 : index
      %c0_21 = arith.constant 0 : index
      %26 = vector.load %arg8[%c0_20, %c0_21] : memref<128x16xbf16, #tpu.memory_space<vmem>>, vector<128x16xbf16>
      tpu.vector_store %arg8[%c0_20, %c0_21], %25 {strides = array<i32>} : memref<128x16xbf16, #tpu.memory_space<vmem>>, vector<128x16xbf16>,
    } else {
    }
    return
  }
  func.func @transform_0(%arg0: i32, %arg1: i32) -> (i32, i32) {
    %c0_i32 = arith.constant 0 : i32
    return %arg0, %arg1 : i32, i32
  }
  func.func @transform_1(%arg0: i32, %arg1: i32) -> (i32, i32) {
    %c0_i32 = arith.constant 0 : i32
    %c0_i32_0 = arith.constant 0 : i32
    return %arg1, %c0_i32 : i32, i32
  }
  func.func @transform_2(%arg0: i32, %arg1: i32) -> (i32, i32) {
    %c0_i32 = arith.constant 0 : i32
    %c0_i32_0 = arith.constant 0 : i32
    %c0_i32_1 = arith.constant 0 : i32
    return %c0_i32, %c0_i32_0 : i32, i32
  }
  func.func @transform_3(%arg0: i32, %arg1: i32) -> (i32, i32) {
    %c0_i32 = arith.constant 0 : i32
    %c0_i32_0 = arith.constant 0 : i32
    %c0_i32_1 = arith.constant 0 : i32
    return %c0_i32, %c0_i32_0 : i32, i32
  }
  func.func @transform_4(%arg0: i32, %arg1: i32) -> (i32, i32) {
    %c0_i32 = arith.constant 0 : i32
    %c0_i32_0 = arith.constant 0 : i32
    %c0_i32_1 = arith.constant 0 : i32
    return %c0_i32, %c0_i32_0 : i32, i32
  }
  func.func @transform_5(%arg0: i32, %arg1: i32) -> (i32, i32) {
    %c0_i32 = arith.constant 0 : i32
    %c0_i32_0 = arith.constant 0 : i32
    return %arg0, %c0_i32 : i32, i32
  }
  func.func @transform_6(%arg0: i32, %arg1: i32) -> (i32, i32) {
    %c0_i32 = arith.constant 0 : i32
    %c0_i32_0 = arith.constant 0 : i32
    return %arg0, %c0_i32 : i32, i32
  }
}

module attributes {stable_mosaic.version = 11 : i64} {
  func.func @_fused_kernel(%arg0: i32, %arg1: i32, %arg2: memref<512x2xbf16, #tpu.memory_space<vmem>>, %arg3: memref<2x8xbf16, #tpu.memory_space<vmem>>, %arg4: memref<1x8xf32, #tpu.memory_space<vmem>>, %arg5: memref<1x8xf32, #tpu.memory_space<vmem>>, %arg6: memref<1x8xf32, #tpu.memory_space<vmem>>, %arg7: memref<512x8xbf16, #tpu.memory_space<vmem>>, %arg8: memref<512x8xbf16, #tpu.memory_space<vmem>>, %arg9: memref<512x8xbf16, #tpu.memory_space<vmem>>, %arg10: memref<512x8xf32, #tpu.memory_space<vmem>>) attributes {dimension_semantics = [#tpu.dimension_semantics<parallel>, #tpu.dimension_semantics<arbitrary>], iteration_bounds = array<i64: 1, 1>, scalar_prefetch = 0 : i64, scratch_operands = 1 : i64, tpu.core_type = #tpu.core_type<tc>, window_params = [{transform_indices = @transform_0, window_bounds = array<i64: 512, 2>}, {transform_indices = @transform_1, window_bounds = array<i64: 2, 8>}, {pipeline_mode = #tpu.pipeline_mode<synchronous>, transform_indices = @transform_2, window_bounds = array<i64: 1, 8>}, {pipeline_mode = #tpu.pipeline_mode<synchronous>, transform_indices = @transform_3, window_bounds = array<i64: 1, 8>}, {pipeline_mode = #tpu.pipeline_mode<synchronous>, transform_indices = @transform_4, window_bounds = array<i64: 1, 8>}, {transform_indices = @transform_5, window_bounds = array<i64: 512, 8>}, {transform_indices = @transform_6, window_bounds = array<i64: 512, 8>}, {transform_indices = @transform_7, window_bounds = array<i64: 512, 8>}]} {
    %c0_i32 = arith.constant 0 : i32
    %0 = arith.cmpi eq, %arg1, %c0_i32 : i32
    %1 = arith.extui %0 : i1 to i32
    %c0_i32_0 = arith.constant 0 : i32
    %2 = arith.cmpi ne, %1, %c0_i32_0 : i32
    scf.if %2 {
      %cst_10 = arith.constant 0.000000e+00 : f32
      %12 = vector.broadcast %cst_10 : f32 to vector<512x8xf32>
      %c0_11 = arith.constant 0 : index
      %c0_12 = arith.constant 0 : index
      %13 = vector.load %arg10[%c0_11, %c0_12] : memref<512x8xf32, #tpu.memory_space<vmem>>, vector<512x8xf32>
      tpu.vector_store %arg10[%c0_11, %c0_12], %12 {strides = array<i32>} : memref<512x8xf32, #tpu.memory_space<vmem>>, vector<512x8xf32>,
    } else {
    }
    %c0 = arith.constant 0 : index
    %c0_1 = arith.constant 0 : index
    %3 = vector.load %arg10[%c0, %c0_1] : memref<512x8xf32, #tpu.memory_space<vmem>>, vector<512x8xf32>
    %c0_2 = arith.constant 0 : index
    %c0_3 = arith.constant 0 : index
    %4 = vector.load %arg2[%c0_2, %c0_3] : memref<512x2xbf16, #tpu.memory_space<vmem>>, vector<512x2xbf16>
    %c0_4 = arith.constant 0 : index
    %c0_5 = arith.constant 0 : index
    %5 = vector.load %arg3[%c0_4, %c0_5] : memref<2x8xbf16, #tpu.memory_space<vmem>>, vector<2x8xbf16>
    %cst = arith.constant dense<0.000000e+00> : vector<512x8xf32>
    %6 = tpu.matmul %4, %5, %cst {dimension_numbers = #tpu.dot_dimension_numbers<[1], [0], [0], [1], [0, 0, 1, 1], [], []>} : vector<512x2xbf16>, vector<2x8xbf16>, vector<512x8xf32> -> vector<512x8xf32>
    %7 = arith.addf %3, %6 : vector<512x8xf32>
    %c0_6 = arith.constant 0 : index
    %c0_7 = arith.constant 0 : index
    %8 = vector.load %arg10[%c0_6, %c0_7] : memref<512x8xf32, #tpu.memory_space<vmem>>, vector<512x8xf32>
    tpu.vector_store %arg10[%c0_6, %c0_7], %7 {strides = array<i32>} : memref<512x8xf32, #tpu.memory_space<vmem>>, vector<512x8xf32>,
    %c0_i32_8 = arith.constant 0 : i32
    %9 = arith.cmpi eq, %arg1, %c0_i32_8 : i32
    %10 = arith.extui %9 : i1 to i32
    %c0_i32_9 = arith.constant 0 : i32
    %11 = arith.cmpi ne, %10, %c0_i32_9 : i32
    scf.if %11 {
      %c0_10 = arith.constant 0 : index
      %c0_11 = arith.constant 0 : index
      %12 = vector.load %arg10[%c0_10, %c0_11] : memref<512x8xf32, #tpu.memory_space<vmem>>, vector<512x8xf32>
      %c0_12 = arith.constant 0 : index
      %c0_13 = arith.constant 0 : index
      %13 = vector.load %arg7[%c0_12, %c0_13] : memref<512x8xbf16, #tpu.memory_space<vmem>>, vector<512x8xbf16>
      %14 = arith.extf %13 : vector<512x8xbf16> to vector<512x8xf32>
      %15 = arith.addf %12, %14 : vector<512x8xf32>
      %c0_14 = arith.constant 0 : index
      %c0_15 = arith.constant 0 : index
      %16 = vector.load %arg4[%c0_14, %c0_15] : memref<1x8xf32, #tpu.memory_space<vmem>>, vector<1x8xf32>
      %17 = vector.broadcast %16 : vector<1x8xf32> to vector<512x8xf32>
      %18 = arith.mulf %15, %17 : vector<512x8xf32>
      %c0_16 = arith.constant 0 : index
      %c0_17 = arith.constant 0 : index
      %19 = vector.load %arg5[%c0_16, %c0_17] : memref<1x8xf32, #tpu.memory_space<vmem>>, vector<1x8xf32>
      %20 = vector.broadcast %19 : vector<1x8xf32> to vector<512x8xf32>
      %21 = arith.addf %18, %20 : vector<512x8xf32>
      %c0_18 = arith.constant 0 : index
      %c0_19 = arith.constant 0 : index
      %22 = vector.load %arg8[%c0_18, %c0_19] : memref<512x8xbf16, #tpu.memory_space<vmem>>, vector<512x8xbf16>
      %23 = arith.extf %22 : vector<512x8xbf16> to vector<512x8xf32>
      %24 = arith.addf %21, %23 : vector<512x8xf32>
      %c0_20 = arith.constant 0 : index
      %c0_21 = arith.constant 0 : index
      %25 = vector.load %arg6[%c0_20, %c0_21] : memref<1x8xf32, #tpu.memory_space<vmem>>, vector<1x8xf32>
      %26 = vector.broadcast %25 : vector<1x8xf32> to vector<512x8xf32>
      %27 = arith.maximumf %24, %26 : vector<512x8xf32>
      %28 = arith.truncf %27 : vector<512x8xf32> to vector<512x8xbf16>
      %c0_22 = arith.constant 0 : index
      %c0_23 = arith.constant 0 : index
      %29 = vector.load %arg9[%c0_22, %c0_23] : memref<512x8xbf16, #tpu.memory_space<vmem>>, vector<512x8xbf16>
      tpu.vector_store %arg9[%c0_22, %c0_23], %28 {strides = array<i32>} : memref<512x8xbf16, #tpu.memory_space<vmem>>, vector<512x8xbf16>,
    } else {
    }
    return
  }
  func.func @transform_0(%arg0: i32, %arg1: i32) -> (i32, i32) {
    %c0_i32 = arith.constant 0 : i32
    return %arg0, %arg1 : i32, i32
  }
  func.func @transform_1(%arg0: i32, %arg1: i32) -> (i32, i32) {
    %c0_i32 = arith.constant 0 : i32
    %c0_i32_0 = arith.constant 0 : i32
    return %arg1, %c0_i32 : i32, i32
  }
  func.func @transform_2(%arg0: i32, %arg1: i32) -> (i32, i32) {
    %c0_i32 = arith.constant 0 : i32
    %c0_i32_0 = arith.constant 0 : i32
    %c0_i32_1 = arith.constant 0 : i32
    return %c0_i32, %c0_i32_0 : i32, i32
  }
  func.func @transform_3(%arg0: i32, %arg1: i32) -> (i32, i32) {
    %c0_i32 = arith.constant 0 : i32
    %c0_i32_0 = arith.constant 0 : i32
    %c0_i32_1 = arith.constant 0 : i32
    return %c0_i32, %c0_i32_0 : i32, i32
  }
  func.func @transform_4(%arg0: i32, %arg1: i32) -> (i32, i32) {
    %c0_i32 = arith.constant 0 : i32
    %c0_i32_0 = arith.constant 0 : i32
    %c0_i32_1 = arith.constant 0 : i32
    return %c0_i32, %c0_i32_0 : i32, i32
  }
  func.func @transform_5(%arg0: i32, %arg1: i32) -> (i32, i32) {
    %c0_i32 = arith.constant 0 : i32
    %c0_i32_0 = arith.constant 0 : i32
    return %arg0, %c0_i32 : i32, i32
  }
  func.func @transform_6(%arg0: i32, %arg1: i32) -> (i32, i32) {
    %c0_i32 = arith.constant 0 : i32
    %c0_i32_0 = arith.constant 0 : i32
    return %arg0, %c0_i32 : i32, i32
  }
  func.func @transform_7(%arg0: i32, %arg1: i32) -> (i32, i32) {
    %c0_i32 = arith.constant 0 : i32
    %c0_i32_0 = arith.constant 0 : i32
    return %arg0, %c0_i32 : i32, i32
  }
}

</mosaic_0001>

<bundles_post_ra>
// kernel: _lambda_.6
= control target key start
LH: loop header
LB: loop body
LE: loop exit
PB: predicated region body
PF: predicated region fallthrough
CT: control target
= control target key end

     0   :  { %vm25_vm0 = vcmask 31744   ;;  %v541_v1 = vmov 0.0   ;;  %vm122_vm1 = vcmask 130048   ;;  %vm429_vm2 = vcmask 27648   ;;  %s766_s1 = inlined_call_operand.vmem [shape: bf16[16,4], index: 1, kind: input, shape index: {}]   ;;  %s767_s0 = inlined_call_operand.vmem [shape: bf16[128,16], index: 0, kind: input, shape index: {}]   ;;  %s768_s2 = inlined_call_operand.vmem [shape: f32[1,4], index: 2, kind: input, shape index: {}]   ;;  %s769_s3 = inlined_call_operand.vmem [shape: f32[1,4], index: 3, kind: input, shape index: {}]   ;;  %s770_s4 = inlined_call_operand.vmem [shape: f32[1,4], index: 4, kind: input, shape index: {}]   ;;  %s771_s5 = inlined_call_operand.vmem [shape: bf16[128,4], index: 5, kind: output, shape index: {}]  }
   0x1   :  { %v532_v0 = vld [vmem:[%s766_s1] sm:$0xff]   ;;  %28 = vst.msk [vmem:[#allocation2 + $0x10] sm:$0xff] %vm25_vm0, %v541_v1  ;;  %26 = vst.msk [vmem:[#allocation2] sm:$0xff] %vm25_vm0, %v541_v1  ;;  %v535_v4 = vld [vmem:[%s767_s0 + $0x8] sm:$0xff]  }
   0x2   :  { %27 = vst.msk [vmem:[#allocation2 + $0x8] sm:$0xff] %vm25_vm0, %v541_v1  ;;  %29 = vst.msk [vmem:[#allocation2 + $0x18] sm:$0xff] %vm25_vm0, %v541_v1  ;;  %v533_v2 = vld [vmem:[%s767_s0] sm:$0xff]   ;;  %511 = vmatprep.subr.bf16.mxu0 %v532_v0  ;;  %529 = vmatprep.subr.bf16.mxu1 %v532_v0  ;;  %v536_v5 = vld [vmem:[%s767_s0 + $0x28] sm:$0xff]  }
   0x3   :  { %30 = vst.msk [vmem:[#allocation2 + $0x20] sm:$0xff] %vm25_vm0, %v541_v1  ;;  %31 = vst.msk [vmem:[#allocation2 + $0x28] sm:$0xff] %vm25_vm0, %v541_v1  ;;  %v534_v3 = vld [vmem:[%s767_s0 + $0x20] sm:$0xff]   ;;  %512 = vmatpush3.bf16.msra.mxu0 %v532_v0  ;;  %530 = vmatpush3.bf16.msra.mxu1 %v532_v0  ;;  %v537_v6 = vld [vmem:[%s767_s0 + $0x10] sm:$0xff]  }
   0x4   :  { %32 = vst.msk [vmem:[#allocation2 + $0x30] sm:$0xff] %vm25_vm0, %v541_v1  ;;  %33 = vst.msk [vmem:[#allocation2 + $0x38] sm:$0xff] %vm25_vm0, %v541_v1  ;;  %513 = vmatprep.mubr.msk.bf16.mxu0 %vm122_vm1, %v533_v2  ;;  %521 = vmatprep.mubr.msk.bf16.mxu1 %vm122_vm1, %v534_v3  ;;  %v538_v7 = vld [vmem:[%s767_s0 + $0x30] sm:$0xff]   ;;  %v539_v8 = vld [vmem:[%s767_s0 + $0x18] sm:$0xff]  }
   0x5   :  { %34 = vst.msk [vmem:[#allocation2 + $0x40] sm:$0xff] %vm25_vm0, %v541_v1  ;;  %35 = vst.msk [vmem:[#allocation2 + $0x48] sm:$0xff] %vm25_vm0, %v541_v1  ;;  %v540_v9 = vld [vmem:[%s767_s0 + $0x38] sm:$0xff]   ;;  %v632_v36 = vld [vmem:[%s768_s2] ss:$0 sm:$0xff] }
   0x6   :  { %36 = vst.msk [vmem:[#allocation2 + $0x50] sm:$0xff] %vm25_vm0, %v541_v1  ;;  %37 = vst.msk [vmem:[#allocation2 + $0x58] sm:$0xff] %vm25_vm0, %v541_v1  ;;  %514 = vmatmul.mubr.msk.bf16.vlgmr.msra.gmra.mxu0 %vm122_vm1, %v535_v4  ;;  %522 = vmatmul.mubr.msk.bf16.vlgmr.msra.gmra.mxu1 %vm122_vm1, %v536_v5  ;;  %v639_v44 = vld [vmem:[%s769_s3] ss:$0 sm:$0xff] }
   0x7   :  { %38 = vst.msk [vmem:[#allocation2 + $0x60] sm:$0xff] %vm25_vm0, %v541_v1  ;;  %39 = vst.msk [vmem:[#allocation2 + $0x68] sm:$0xff] %vm25_vm0, %v541_v1  ;;  %517 = vmatprep.mubr.msk.bf16.mxu0 %vm122_vm1, %v537_v6  ;;  %525 = vmatprep.mubr.msk.bf16.mxu1 %vm122_vm1, %v538_v7  ;;  %v648_v54 = vld [vmem:[%s770_s4] ss:$0 sm:$0xff] }
   0x8   :  { %40 = vst.msk [vmem:[#allocation2 + $0x70] sm:$0xff] %vm25_vm0, %v541_v1  ;;  %41 = vst.msk [vmem:[#allocation2 + $0x78] sm:$0xff] %vm25_vm0, %v541_v1  ;;  %v44_v10 = vld [vmem:[#allocation2 + $0x10] sm:$0xff]  ;;  %v42_v14 = vld [vmem:[#allocation2] sm:$0xff] }
   0x9   :  { %v45_v20 = vld [vmem:[#allocation2 + $0x18] sm:$0xff]  ;;  %v43_v26 = vld [vmem:[#allocation2 + $0x8] sm:$0xff] }
   0xa   :  { %v46_v39 = vld [vmem:[#allocation2 + $0x20] sm:$0xff]  ;;  %v47_v63 = vld [vmem:[#allocation2 + $0x28] sm:$0xff] }
   0xb   :  { %v48_v32 = vld [vmem:[#allocation2 + $0x30] sm:$0xff]  ;;  %v49_v52 = vld [vmem:[#allocation2 + $0x38] sm:$0xff] }
   0xc   :  { %v50_v15 = vld [vmem:[#allocation2 + $0x40] sm:$0xff]  ;;  %v51_v27 = vld [vmem:[#allocation2 + $0x48] sm:$0xff] }
   0xd   :  { %v52_v11 = vld [vmem:[#allocation2 + $0x50] sm:$0xff]  ;;  %v53_v21 = vld [vmem:[#allocation2 + $0x58] sm:$0xff] }
   0xe   :  { %518 = vmatmul.mubr.msk.bf16.gmra.mxu0 %vm122_vm1, %v539_v8  ;;  %526 = vmatmul.mubr.msk.bf16.gmra.mxu1 %vm122_vm1, %v540_v9  ;;  %v54_v40 = vld [vmem:[#allocation2 + $0x60] sm:$0xff]  ;;  %v55_v0 = vld [vmem:[#allocation2 + $0x68] sm:$0xff] }
   0xf   :  { %v56_v33 = vld [vmem:[#allocation2 + $0x70] sm:$0xff]  ;;  %v57_v53 = vld [vmem:[#allocation2 + $0x78] sm:$0xff] }
  0xc6   :  { %v515_v12 = vpop.f32.mrf.mxu0  ;;  %v523_v13 = vpop.f32.mrf.mxu1 }
  0xc7   :  { %v246_v16 = vadd.f32 %v515_v12, %v44_v10  ;;  %v254_v17 = vadd.f32 %v523_v13, %v52_v11 }
  0xc8   :  { %v181_v18 = vpop.f32.mrf.mxu0  ;;  %v213_v19 = vpop.f32.mrf.mxu1 }
  0xc9   :  { %263 = vst.msk [vmem:[#allocation2 + $0x10] sm:$0xff] %vm25_vm0, %v246_v16  ;;  %271 = vst.msk [vmem:[#allocation2 + $0x50] sm:$0xff] %vm25_vm0, %v254_v17  ;;  %v244_v22 = vadd.f32 %v181_v18, %v42_v14  ;;  %v252_v23 = vadd.f32 %v213_v19, %v50_v15 }
  0xca   :  { %v516_v24 = vpop.f32.mrf.mxu0  ;;  %v524_v25 = vpop.f32.mrf.mxu1 }
  0xcb   :  { %261 = vst.msk [vmem:[#allocation2] sm:$0xff] %vm25_vm0, %v244_v22  ;;  %269 = vst.msk [vmem:[#allocation2 + $0x40] sm:$0xff] %vm25_vm0, %v252_v23  ;;  %v247_v28 = vadd.f32 %v516_v24, %v45_v20  ;;  %v255_v29 = vadd.f32 %v524_v25, %v53_v21 }
  0xcc   :  { %v184_v30 = vpop.f32.mrf.mxu0  ;;  %v216_v31 = vpop.f32.mrf.mxu1 }
  0xcd   :  { %264 = vst.msk [vmem:[#allocation2 + $0x18] sm:$0xff] %vm25_vm0, %v247_v28  ;;  %272 = vst.msk [vmem:[#allocation2 + $0x58] sm:$0xff] %vm25_vm0, %v255_v29  ;;  %v245_v34 = vadd.f32 %v184_v30, %v43_v26  ;;  %v253_v35 = vadd.f32 %v216_v31, %v51_v27 }
  0xce   :  { %v519_v37 = vpop.f32.mrf.mxu0  ;;  %v527_v38 = vpop.f32.mrf.mxu1 }
  0xcf   :  { %262 = vst.msk [vmem:[#allocation2 + $0x8] sm:$0xff] %vm25_vm0, %v245_v34  ;;  %270 = vst.msk [vmem:[#allocation2 + $0x48] sm:$0xff] %vm25_vm0, %v253_v35  ;;  %v250_v41 = vadd.f32 %v519_v37, %v48_v32  ;;  %v258_v42 = vadd.f32 %v527_v38, %v56_v33 }
  0xd0   :  { %v282_v43 = vld [vmem:[#allocation2 + $0x10] sm:$0xff]  ;;  %v197_v46 = vpop.f32.mrf.mxu0  ;;  %v229_v47 = vpop.f32.mrf.mxu1 }
  0xd1   :  { %v290_v45 = vld [vmem:[#allocation2 + $0x50] sm:$0xff]  ;;  %v305_v48 = vmul.f32 %v632_v36, %v282_v43  ;;  %267 = vst.msk [vmem:[#allocation2 + $0x30] sm:$0xff] %vm25_vm0, %v250_v41  ;;  %275 = vst.msk [vmem:[#allocation2 + $0x70] sm:$0xff] %vm25_vm0, %v258_v42  ;;  %v248_v50 = vadd.f32 %v197_v46, %v46_v39  ;;  %v256_v51 = vadd.f32 %v229_v47, %v54_v40 }
  0xd2   :  { %v313_v49 = vmul.f32 %v632_v36, %v290_v45  ;;  %v280_v55 = vld [vmem:[#allocation2] sm:$0xff]  ;;  %v520_v57 = vpop.f32.mrf.mxu0  ;;  %v528_v58 = vpop.f32.mrf.mxu1 }
  0xd3   :  { %v288_v56 = vld [vmem:[#allocation2 + $0x40] sm:$0xff]  ;;  %v328_v59 = vadd.f32 %v639_v44, %v305_v48  ;;  %v303_v61 = vmul.f32 %v632_v36, %v280_v55  ;;  %265 = vst.msk [vmem:[#allocation2 + $0x20] sm:$0xff] %vm25_vm0, %v248_v50  ;;  %273 = vst.msk [vmem:[#allocation2 + $0x60] sm:$0xff] %vm25_vm0, %v256_v51  ;;  %v251_v3 = vadd.f32 %v520_v57, %v49_v52 }
  0xd4   :  { %v336_v60 = vadd.f32 %v639_v44, %v313_v49  ;;  %v311_v62 = vmul.f32 %v632_v36, %v288_v56  ;;  %v283_v1 = vld [vmem:[#allocation2 + $0x18] sm:$0xff]  ;;  %v259_v4 = vadd.f32 %v528_v58, %v57_v53  ;;  %v200_v5 = vpop.f32.mrf.mxu0  ;;  %v232_v6 = vpop.f32.mrf.mxu1 }
  0xd5   :  { %v291_v2 = vld [vmem:[#allocation2 + $0x58] sm:$0xff]  ;;  %v351_v7 = vmax.f32 %v328_v59, %v648_v54  ;;  %v326_v9 = vadd.f32 %v639_v44, %v303_v61  ;;  %v306_v11 = vmul.f32 %v632_v36, %v283_v1  ;;  %268 = vst.msk [vmem:[#allocation2 + $0x38] sm:$0xff] %vm25_vm0, %v251_v3  ;;  %v249_v15 = vadd.f32 %v200_v5, %v47_v63 }
  0xd6   :  { %v359_v8 = vmax.f32 %v336_v60, %v648_v54  ;;  %v334_v10 = vadd.f32 %v639_v44, %v311_v62  ;;  %v314_v12 = vmul.f32 %v632_v36, %v291_v2  ;;  %v281_v13 = vld [vmem:[#allocation2 + $0x8] sm:$0xff]  ;;  %276 = vst.msk [vmem:[#allocation2 + $0x78] sm:$0xff] %vm25_vm0, %v259_v4  ;;  %v257_v16 = vadd.f32 %v232_v6, %v55_v0 }
  0xd7   :  { %v289_v14 = vld [vmem:[#allocation2 + $0x48] sm:$0xff]  ;;  %v488_v17 = vpack.c.bf16 %v351_v7, %v351_v7  ;;  %v349_v19 = vmax.f32 %v326_v9, %v648_v54  ;;  %v329_v21 = vadd.f32 %v639_v44, %v306_v11  ;;  %v304_v23 = vmul.f32 %v632_v36, %v281_v13  ;;  %266 = vst.msk [vmem:[#allocation2 + $0x28] sm:$0xff] %vm25_vm0, %v249_v15 }
  0xd8   :  { %v496_v18 = vpack.c.bf16 %v359_v8, %v359_v8  ;;  %v357_v20 = vmax.f32 %v334_v10, %v648_v54  ;;  %v337_v22 = vadd.f32 %v639_v44, %v314_v12  ;;  %v312_v24 = vmul.f32 %v632_v36, %v289_v14  ;;  %v286_v25 = vld [vmem:[#allocation2 + $0x30] sm:$0xff]  ;;  %274 = vst.msk [vmem:[#allocation2 + $0x68] sm:$0xff] %vm25_vm0, %v257_v16 }
  0xd9   :  { %v294_v26 = vld [vmem:[#allocation2 + $0x70] sm:$0xff]  ;;  %432 = vst.msk [vmem:[%s771_s5 + $0x8] sm:$0xf] %vm429_vm2, %v488_v17  ;;  %v486_v27 = vpack.c.bf16 %v349_v19, %v349_v19  ;;  %v309_v29 = vmul.f32 %v632_v36, %v286_v25  ;;  %v352_v31 = vmax.f32 %v329_v21, %v648_v54  ;;  %v327_v33 = vadd.f32 %v639_v44, %v304_v23 }
  0xda   :  { %440 = vst.msk [vmem:[%s771_s5 + $0x28] sm:$0xf] %vm429_vm2, %v496_v18  ;;  %v494_v28 = vpack.c.bf16 %v357_v20, %v357_v20  ;;  %v317_v30 = vmul.f32 %v632_v36, %v294_v26  ;;  %v360_v32 = vmax.f32 %v337_v22, %v648_v54  ;;  %v335_v34 = vadd.f32 %v639_v44, %v312_v24  ;;  %v284_v35 = vld [vmem:[#allocation2 + $0x20] sm:$0xff] }
  0xdb   :  { %v292_v37 = vld [vmem:[#allocation2 + $0x60] sm:$0xff]  ;;  %430 = vst.msk [vmem:[%s771_s5] sm:$0xf] %vm429_vm2, %v486_v27  ;;  %v332_v38 = vadd.f32 %v639_v44, %v309_v29  ;;  %v307_v40 = vmul.f32 %v632_v36, %v284_v35  ;;  %v489_v42 = vpack.c.bf16 %v352_v31, %v352_v31  ;;  %v350_v45 = vmax.f32 %v327_v33, %v648_v54 }
  0xdc   :  { %438 = vst.msk [vmem:[%s771_s5 + $0x20] sm:$0xf] %vm429_vm2, %v494_v28  ;;  %v340_v39 = vadd.f32 %v639_v44, %v317_v30  ;;  %v315_v41 = vmul.f32 %v632_v36, %v292_v37  ;;  %v497_v43 = vpack.c.bf16 %v360_v32, %v360_v32  ;;  %v358_v46 = vmax.f32 %v335_v34, %v648_v54  ;;  %v287_v51 = vld [vmem:[#allocation2 + $0x38] sm:$0xff] }
  0xdd   :  { %v355_v47 = vmax.f32 %v332_v38, %v648_v54  ;;  %v330_v49 = vadd.f32 %v639_v44, %v307_v40  ;;  %v295_v52 = vld [vmem:[#allocation2 + $0x78] sm:$0xff]  ;;  %433 = vst.msk [vmem:[%s771_s5 + $0xc] sm:$0xf] %vm429_vm2, %v489_v42  ;;  %v487_v53 = vpack.c.bf16 %v350_v45, %v350_v45  ;;  %v310_v56 = vmul.f32 %v632_v36, %v287_v51 }
  0xde   :  { %v363_v48 = vmax.f32 %v340_v39, %v648_v54  ;;  %v338_v50 = vadd.f32 %v639_v44, %v315_v41  ;;  %441 = vst.msk [vmem:[%s771_s5 + $0x2c] sm:$0xf] %vm429_vm2, %v497_v43  ;;  %v495_v55 = vpack.c.bf16 %v358_v46, %v358_v46  ;;  %v318_v57 = vmul.f32 %v632_v36, %v295_v52  ;;  %v285_v62 = vld [vmem:[#allocation2 + $0x28] sm:$0xff] }
  0xdf   :  { %v492_v58 = vpack.c.bf16 %v355_v47, %v355_v47  ;;  %v353_v60 = vmax.f32 %v330_v49, %v648_v54  ;;  %v293_v63 = vld [vmem:[#allocation2 + $0x68] sm:$0xff]  ;;  %431 = vst.msk [vmem:[%s771_s5 + $0x4] sm:$0xf] %vm429_vm2, %v487_v53  ;;  %v333_v0 = vadd.f32 %v639_v44, %v310_v56  ;;  %v308_v2 = vmul.f32 %v632_v36, %v285_v62 }
  0xe0   :  { %v500_v59 = vpack.c.bf16 %v363_v48, %v363_v48  ;;  %v361_v61 = vmax.f32 %v338_v50, %v648_v54  ;;  %439 = vst.msk [vmem:[%s771_s5 + $0x24] sm:$0xf] %vm429_vm2, %v495_v55  ;;  %v341_v1 = vadd.f32 %v639_v44, %v318_v57  ;;  %v316_v3 = vmul.f32 %v632_v36, %v293_v63 }
  0xe1   :  { %436 = vst.msk [vmem:[%s771_s5 + $0x18] sm:$0xf] %vm429_vm2, %v492_v58  ;;  %v490_v4 = vpack.c.bf16 %v353_v60, %v353_v60  ;;  %v356_v6 = vmax.f32 %v333_v0, %v648_v54  ;;  %v331_v8 = vadd.f32 %v639_v44, %v308_v2 }
  0xe2   :  { %444 = vst.msk [vmem:[%s771_s5 + $0x38] sm:$0xf] %vm429_vm2, %v500_v59  ;;  %v498_v5 = vpack.c.bf16 %v361_v61, %v361_v61  ;;  %v364_v7 = vmax.f32 %v341_v1, %v648_v54  ;;  %v339_v36 = vadd.f32 %v639_v44, %v316_v3 }
  0xe3   :  { %434 = vst.msk [vmem:[%s771_s5 + $0x10] sm:$0xf] %vm429_vm2, %v490_v4  ;;  %v493_v9 = vpack.c.bf16 %v356_v6, %v356_v6  ;;  %v354_v11 = vmax.f32 %v331_v8, %v648_v54 }
  0xe4   :  { %442 = vst.msk [vmem:[%s771_s5 + $0x30] sm:$0xf] %vm429_vm2, %v498_v5  ;;  %v501_v10 = vpack.c.bf16 %v364_v7, %v364_v7  ;;  %v362_v12 = vmax.f32 %v339_v36, %v648_v54 }
  0xe5   :  { %437 = vst.msk [vmem:[%s771_s5 + $0x1c] sm:$0xf] %vm429_vm2, %v493_v9  ;;  %v491_v44 = vpack.c.bf16 %v354_v11, %v354_v11 }
  0xe6   :  { %445 = vst.msk [vmem:[%s771_s5 + $0x3c] sm:$0xf] %vm429_vm2, %v501_v10  ;;  %v499_v13 = vpack.c.bf16 %v362_v12, %v362_v12 }
  0xe7   :  { %435 = vst.msk [vmem:[%s771_s5 + $0x14] sm:$0xf] %vm429_vm2, %v491_v44 }
  0xe8   :  { %443 = vst.msk [vmem:[%s771_s5 + $0x34] sm:$0xf] %vm429_vm2, %v499_v13 }

// kernel: _lambda_.7
= control target key start
LH: loop header
LB: loop body
LE: loop exit
PB: predicated region body
PF: predicated region fallthrough
CT: control target
= control target key end

     0   :  { %vm479_vm0 = vcmask 1043456   ;;  %vm382_vm1 = vcmask 64512   ;;  %vm28_vm2 = vcmask 15360   ;;  %v2191_v1 = vmov 0.0   ;;  %s3481_s1 = inlined_call_operand.vmem [shape: bf16[8,2], index: 1, kind: input, shape index: {}]   ;;  %s3482_s0 = inlined_call_operand.vmem [shape: bf16[512,8], index: 0, kind: input, shape index: {}]   ;;  %s3483_s5 = inlined_call_operand.vmem [shape: bf16[512,2], index: 5, kind: input, shape index: {}]   ;;  %s3484_s2 = inlined_call_operand.vmem [shape: f32[1,2], index: 2, kind: input, shape index: {}]   ;;  %s3485_s3 = inlined_call_operand.vmem [shape: f32[1,2], index: 3, kind: input, shape index: {}]   ;;  %s3486_s4 = inlined_call_operand.vmem [shape: f32[1,2], index: 4, kind: input, shape index: {}]   ;;  %s3487_s6 = inlined_call_operand.vmem [shape: bf16[512,2], index: 6, kind: output, shape index: {}]  }
   0x1   :  { %v2230_v0 = vld [vmem:[%s3481_s1] sm:$0xf]  ;;  %31 = vst.msk [vmem:[#allocation2 + $0x10] sm:$0xff] %vm28_vm2, %v2191_v1  ;;  %29 = vst.msk [vmem:[#allocation2] sm:$0xff] %vm28_vm2, %v2191_v1  ;;  %v2158_v5 = vld [vmem:[%s3482_s0 + $0x8] sm:$0xff]   ;;  %vm1629_vm3 = vcmask 11264  }
   0x2   :  { %30 = vst.msk [vmem:[#allocation2 + $0x8] sm:$0xff] %vm28_vm2, %v2191_v1  ;;  %32 = vst.msk [vmem:[#allocation2 + $0x18] sm:$0xff] %vm28_vm2, %v2191_v1  ;;  %2153 = vmatprep.subr.msk.bf16.mxu0 %vm479_vm0, %v2230_v0  ;;  %2154 = vmatprep.subr.msk.bf16.mxu1 %vm479_vm0, %v2230_v0  ;;  %v481_v2 = vsel %vm479_vm0, %v2230_v0, 0  ;;  %v2156_v3 = vld [vmem:[%s3482_s0] sm:$0xff]   ;;  %v2159_v6 = vld [vmem:[%s3482_s0 + $0x88] sm:$0xff]  }
   0x3   :  { %33 = vst.msk [vmem:[#allocation2 + $0x20] sm:$0xff] %vm28_vm2, %v2191_v1  ;;  %34 = vst.msk [vmem:[#allocation2 + $0x28] sm:$0xff] %vm28_vm2, %v2191_v1  ;;  %2086 = vmatpush3.bf16.msra.mxu0 %v481_v2  ;;  %2152 = vmatpush3.bf16.msra.mxu1 %v481_v2  ;;  %v2157_v4 = vld [vmem:[%s3482_s0 + $0x80] sm:$0xff]   ;;  %v2160_v7 = vld [vmem:[%s3482_s0 + $0x10] sm:$0xff]  }
   0x4   :  { %35 = vst.msk [vmem:[#allocation2 + $0x30] sm:$0xff] %vm28_vm2, %v2191_v1  ;;  %36 = vst.msk [vmem:[#allocation2 + $0x38] sm:$0xff] %vm28_vm2, %v2191_v1  ;;  %2087 = vmatprep.mubr.msk.bf16.mxu0 %vm382_vm1, %v2156_v3  ;;  %2119 = vmatprep.mubr.msk.bf16.mxu1 %vm382_vm1, %v2157_v4  ;;  %v2161_v8 = vld [vmem:[%s3482_s0 + $0x90] sm:$0xff]   ;;  %v2162_v9 = vld [vmem:[%s3482_s0 + $0x18] sm:$0xff]  }
   0x5   :  { %37 = vst.msk [vmem:[#allocation2 + $0x40] sm:$0xff] %vm28_vm2, %v2191_v1  ;;  %38 = vst.msk [vmem:[#allocation2 + $0x48] sm:$0xff] %vm28_vm2, %v2191_v1  ;;  %v2163_v10 = vld [vmem:[%s3482_s0 + $0x98] sm:$0xff]   ;;  %v2164_v11 = vld [vmem:[%s3482_s0 + $0x20] sm:$0xff]  }
   0x6   :  { %39 = vst.msk [vmem:[#allocation2 + $0x50] sm:$0xff] %vm28_vm2, %v2191_v1  ;;  %40 = vst.msk [vmem:[#allocation2 + $0x58] sm:$0xff] %vm28_vm2, %v2191_v1  ;;  %2088 = vmatmul.mubr.msk.bf16.vlgmr.msra.gmra.mxu0 %vm382_vm1, %v2158_v5  ;;  %2120 = vmatmul.mubr.msk.bf16.vlgmr.msra.gmra.mxu1 %vm382_vm1, %v2159_v6  ;;  %v2165_v12 = vld [vmem:[%s3482_s0 + $0xa0] sm:$0xff]   ;;  %v2166_v13 = vld [vmem:[%s3482_s0 + $0x28] sm:$0xff]  }
   0x7   :  { %41 = vst.msk [vmem:[#allocation2 + $0x60] sm:$0xff] %vm28_vm2, %v2191_v1  ;;  %42 = vst.msk [vmem:[#allocation2 + $0x68] sm:$0xff] %vm28_vm2, %v2191_v1  ;;  %2091 = vmatprep.mubr.msk.bf16.mxu0 %vm382_vm1, %v2160_v7  ;;  %2123 = vmatprep.mubr.msk.bf16.mxu1 %vm382_vm1, %v2161_v8  ;;  %v2167_v14 = vld [vmem:[%s3482_s0 + $0xa8] sm:$0xff]   ;;  %v2168_v15 = vld [vmem:[%s3482_s0 + $0x30] sm:$0xff]  }
   0x8   :  { %43 = vst.msk [vmem:[#allocation2 + $0x70] sm:$0xff] %vm28_vm2, %v2191_v1  ;;  %44 = vst.msk [vmem:[#allocation2 + $0x78] sm:$0xff] %vm28_vm2, %v2191_v1  ;;  %v2169_v16 = vld [vmem:[%s3482_s0 + $0xb0] sm:$0xff]   ;;  %v2170_v17 = vld [vmem:[%s3482_s0 + $0x38] sm:$0xff]  }
   0x9   :  { %45 = vst.msk [vmem:[#allocation2 + $0x80] sm:$0xff] %vm28_vm2, %v2191_v1  ;;  %46 = vst.msk [vmem:[#allocation2 + $0x88] sm:$0xff] %vm28_vm2, %v2191_v1  ;;  %v2171_v18 = vld [vmem:[%s3482_s0 + $0xb8] sm:$0xff]   ;;  %v2172_v19 = vld [vmem:[%s3482_s0 + $0x40] sm:$0xff]  }
   0xa   :  { %47 = vst.msk [vmem:[#allocation2 + $0x90] sm:$0xff] %vm28_vm2, %v2191_v1  ;;  %48 = vst.msk [vmem:[#allocation2 + $0x98] sm:$0xff] %vm28_vm2, %v2191_v1  ;;  %v2173_v20 = vld [vmem:[%s3482_s0 + $0xc0] sm:$0xff]   ;;  %v2174_v21 = vld [vmem:[%s3482_s0 + $0x48] sm:$0xff]  }
   0xb   :  { %49 = vst.msk [vmem:[#allocation2 + $0xa0] sm:$0xff] %vm28_vm2, %v2191_v1  ;;  %50 = vst.msk [vmem:[#allocation2 + $0xa8] sm:$0xff] %vm28_vm2, %v2191_v1  ;;  %v2175_v22 = vld [vmem:[%s3482_s0 + $0xc8] sm:$0xff]   ;;  %v2176_v23 = vld [vmem:[%s3482_s0 + $0x50] sm:$0xff]  }
   0xc   :  { %51 = vst.msk [vmem:[#allocation2 + $0xb0] sm:$0xff] %vm28_vm2, %v2191_v1  ;;  %52 = vst.msk [vmem:[#allocation2 + $0xb8] sm:$0xff] %vm28_vm2, %v2191_v1  ;;  %v2177_v24 = vld [vmem:[%s3482_s0 + $0xd0] sm:$0xff]   ;;  %v2178_v25 = vld [vmem:[%s3482_s0 + $0x58] sm:$0xff]  }
   0xd   :  { %53 = vst.msk [vmem:[#allocation2 + $0xc0] sm:$0xff] %vm28_vm2, %v2191_v1  ;;  %54 = vst.msk [vmem:[#allocation2 + $0xc8] sm:$0xff] %vm28_vm2, %v2191_v1  ;;  %v2179_v26 = vld [vmem:[%s3482_s0 + $0xd8] sm:$0xff]   ;;  %v2180_v27 = vld [vmem:[%s3482_s0 + $0x60] sm:$0xff]  }
   0xe   :  { %55 = vst.msk [vmem:[#allocation2 + $0xd0] sm:$0xff] %vm28_vm2, %v2191_v1  ;;  %56 = vst.msk [vmem:[#allocation2 + $0xd8] sm:$0xff] %vm28_vm2, %v2191_v1  ;;  %2092 = vmatmul.mubr.msk.bf16.gmra.mxu0 %vm382_vm1, %v2162_v9  ;;  %2124 = vmatmul.mubr.msk.bf16.gmra.mxu1 %vm382_vm1, %v2163_v10  ;;  %v2181_v28 = vld [vmem:[%s3482_s0 + $0xe0] sm:$0xff]   ;;  %v2182_v29 = vld [vmem:[%s3482_s0 + $0x68] sm:$0xff]  }
   0xf   :  { %57 = vst.msk [vmem:[#allocation2 + $0xe0] sm:$0xff] %vm28_vm2, %v2191_v1  ;;  %58 = vst.msk [vmem:[#allocation2 + $0xe8] sm:$0xff] %vm28_vm2, %v2191_v1  ;;  %2095 = vmatprep.mubr.msk.bf16.mxu0 %vm382_vm1, %v2164_v11  ;;  %2127 = vmatprep.mubr.msk.bf16.mxu1 %vm382_vm1, %v2165_v12  ;;  %v2183_v30 = vld [vmem:[%s3482_s0 + $0xe8] sm:$0xff]   ;;  %v2184_v31 = vld [vmem:[%s3482_s0 + $0x70] sm:$0xff]  }
  0x10   :  { %59 = vst.msk [vmem:[#allocation2 + $0xf0] sm:$0xff] %vm28_vm2, %v2191_v1  ;;  %60 = vst.msk [vmem:[#allocation2 + $0xf8] sm:$0xff] %vm28_vm2, %v2191_v1  ;;  %v2185_v32 = vld [vmem:[%s3482_s0 + $0xf0] sm:$0xff]   ;;  %v2186_v33 = vld [vmem:[%s3482_s0 + $0x78] sm:$0xff]  }
  0x11   :  { %61 = vst.msk [vmem:[#allocation2 + $0x100] sm:$0xff] %vm28_vm2, %v2191_v1  ;;  %62 = vst.msk [vmem:[#allocation2 + $0x108] sm:$0xff] %vm28_vm2, %v2191_v1  ;;  %v2187_v34 = vld [vmem:[%s3482_s0 + $0xf8] sm:$0xff]   ;;  %v2497_v35 = vld [vmem:[%s3483_s5 + $0x8] sm:$0xff]  }
  0x12   :  { %63 = vst.msk [vmem:[#allocation2 + $0x110] sm:$0xff] %vm28_vm2, %v2191_v1  ;;  %64 = vst.msk [vmem:[#allocation2 + $0x118] sm:$0xff] %vm28_vm2, %v2191_v1  ;;  %v2502_v36 = vld [vmem:[%s3483_s5 + $0x88] sm:$0xff]   ;;  %v2507_v37 = vld [vmem:[%s3483_s5] sm:$0xff]   ;;  %v1899_v42 = vunpack.c.l.bf16 %v2497_v35  ;;  %v1900_v50 = vunpack.c.h.bf16 %v2497_v35 }
  0x13   :  { %65 = vst.msk [vmem:[#allocation2 + $0x120] sm:$0xff] %vm28_vm2, %v2191_v1  ;;  %66 = vst.msk [vmem:[#allocation2 + $0x128] sm:$0xff] %vm28_vm2, %v2191_v1  ;;  %v2512_v38 = vld [vmem:[%s3483_s5 + $0x80] sm:$0xff]   ;;  %v2517_v39 = vld [vmem:[%s3483_s5 + $0x18] sm:$0xff]   ;;  %v1963_v43 = vunpack.c.l.bf16 %v2502_v36  ;;  %v1895_v48 = vunpack.c.l.bf16 %v2507_v37  ;;  %v1964_v51 = vunpack.c.h.bf16 %v2502_v36  ;;  %v1896_v53 = vunpack.c.h.bf16 %v2507_v37 }
  0x14   :  { %67 = vst.msk [vmem:[#allocation2 + $0x130] sm:$0xff] %vm28_vm2, %v2191_v1  ;;  %68 = vst.msk [vmem:[#allocation2 + $0x138] sm:$0xff] %vm28_vm2, %v2191_v1  ;;  %v2522_v40 = vld [vmem:[%s3483_s5 + $0x98] sm:$0xff]   ;;  %v95_v41 = vld [vmem:[#allocation2 + $0x10] sm:$0xff]  ;;  %v1959_v49 = vunpack.c.l.bf16 %v2512_v38  ;;  %v1960_v54 = vunpack.c.h.bf16 %v2512_v38  ;;  %v1907_v55 = vunpack.c.l.bf16 %v2517_v39 }
  0x15   :  { %69 = vst.msk [vmem:[#allocation2 + $0x140] sm:$0xff] %vm28_vm2, %v2191_v1  ;;  %70 = vst.msk [vmem:[#allocation2 + $0x148] sm:$0xff] %vm28_vm2, %v2191_v1  ;;  %v2529_v44 = vld [vmem:[%s3483_s5 + $0x10] sm:$0xff]   ;;  %v93_v47 = vld [vmem:[#allocation2] sm:$0xff]  ;;  %v1971_v56 = vunpack.c.l.bf16 %v2522_v40  ;;  %v1972_v7 = vunpack.c.h.bf16 %v2522_v40 }
  0x16   :  { %71 = vst.msk [vmem:[#allocation2 + $0x150] sm:$0xff] %vm28_vm2, %v2191_v1  ;;  %72 = vst.msk [vmem:[#allocation2 + $0x158] sm:$0xff] %vm28_vm2, %v2191_v1  ;;  %2096 = vmatmul.mubr.msk.bf16.gmra.mxu0 %vm382_vm1, %v2166_v13  ;;  %2128 = vmatmul.mubr.msk.bf16.gmra.mxu1 %vm382_vm1, %v2167_v14  ;;  %v2534_v45 = vld [vmem:[%s3483_s5 + $0x90] sm:$0xff]   ;;  %v2547_v57 = vld [vmem:[%s3483_s5 + $0x28] sm:$0xff]   ;;  %v1903_v63 = vunpack.c.l.bf16 %v2529_v44  ;;  %v1904_v8 = vunpack.c.h.bf16 %v2529_v44 }
  0x17   :  { %73 = vst.msk [vmem:[#allocation2 + $0x160] sm:$0xff] %vm28_vm2, %v2191_v1  ;;  %74 = vst.msk [vmem:[#allocation2 + $0x168] sm:$0xff] %vm28_vm2, %v2191_v1  ;;  %2099 = vmatprep.mubr.msk.bf16.mxu0 %vm382_vm1, %v2168_v15  ;;  %2131 = vmatprep.mubr.msk.bf16.mxu1 %vm382_vm1, %v2169_v16  ;;  %v2552_v58 = vld [vmem:[%s3483_s5 + $0xa8] sm:$0xff]   ;;  %v2557_v59 = vld [vmem:[%s3483_s5 + $0x20] sm:$0xff]   ;;  %v1967_v0 = vunpack.c.l.bf16 %v2534_v45  ;;  %v1968_v9 = vunpack.c.h.bf16 %v2534_v45  ;;  %v1915_v13 = vunpack.c.l.bf16 %v2547_v57 }
  0x18   :  { %75 = vst.msk [vmem:[#allocation2 + $0x170] sm:$0xff] %vm28_vm2, %v2191_v1  ;;  %76 = vst.msk [vmem:[#allocation2 + $0x178] sm:$0xff] %vm28_vm2, %v2191_v1  ;;  %v125_v62 = vld [vmem:[#allocation2 + $0x100] sm:$0xff]  ;;  %v96_v5 = vld [vmem:[#allocation2 + $0x18] sm:$0xff]  ;;  %v1979_v14 = vunpack.c.l.bf16 %v2552_v58  ;;  %v1911_v15 = vunpack.c.l.bf16 %v2557_v59 }
  0x19   :  { %77 = vst.msk [vmem:[#allocation2 + $0x180] sm:$0xff] %vm28_vm2, %v2191_v1  ;;  %78 = vst.msk [vmem:[#allocation2 + $0x188] sm:$0xff] %vm28_vm2, %v2191_v1  ;;  %v127_v46 = vld [vmem:[#allocation2 + $0x110] sm:$0xff]  ;;  %v2565_v2 = vld [vmem:[%s3483_s5 + $0xa0] sm:$0xff]  }
  0x1a   :  { %79 = vst.msk [vmem:[#allocation2 + $0x190] sm:$0xff] %vm28_vm2, %v2191_v1  ;;  %80 = vst.msk [vmem:[#allocation2 + $0x198] sm:$0xff] %vm28_vm2, %v2191_v1  ;;  %v128_v6 = vld [vmem:[#allocation2 + $0x118] sm:$0xff] }
  0x1b   :  { %81 = vst.msk [vmem:[#allocation2 + $0x1a0] sm:$0xff] %vm28_vm2, %v2191_v1  ;;  %82 = vst.msk [vmem:[#allocation2 + $0x1a8] sm:$0xff] %vm28_vm2, %v2191_v1  ;;  %v2573_v10 = vld [vmem:[%s3483_s5 + $0x38] sm:$0xff]  }
  0x1c   :  { %83 = vst.msk [vmem:[#allocation2 + $0x1b0] sm:$0xff] %vm28_vm2, %v2191_v1  ;;  %84 = vst.msk [vmem:[#allocation2 + $0x1b8] sm:$0xff] %vm28_vm2, %v2191_v1  ;;  %v2582_v16 = vld [vmem:[%s3483_s5 + $0xb8] sm:$0xff]  }
  0x1d   :  { %85 = vst.msk [vmem:[#allocation2 + $0x1c0] sm:$0xff] %vm28_vm2, %v2191_v1  ;;  %86 = vst.msk [vmem:[#allocation2 + $0x1c8] sm:$0xff] %vm28_vm2, %v2191_v1 }
  0x1e   :  { %87 = vst.msk [vmem:[#allocation2 + $0x1d0] sm:$0xff] %vm28_vm2, %v2191_v1  ;;  %88 = vst.msk [vmem:[#allocation2 + $0x1d8] sm:$0xff] %vm28_vm2, %v2191_v1  ;;  %2100 = vmatmul.mubr.msk.bf16.gmra.mxu0 %vm382_vm1, %v2170_v17  ;;  %2132 = vmatmul.mubr.msk.bf16.gmra.mxu1 %vm382_vm1, %v2171_v18  ;;  %v2587_v17 = vld [vmem:[%s3483_s5 + $0x30] sm:$0xff]  }
  0x1f   :  { %89 = vst.msk [vmem:[#allocation2 + $0x1e0] sm:$0xff] %vm28_vm2, %v2191_v1  ;;  %90 = vst.msk [vmem:[#allocation2 + $0x1e8] sm:$0xff] %vm28_vm2, %v2191_v1  ;;  %2103 = vmatprep.mubr.msk.bf16.mxu0 %vm382_vm1, %v2172_v19  ;;  %2135 = vmatprep.mubr.msk.bf16.mxu1 %vm382_vm1, %v2173_v20  ;;  %v2592_v18 = vld [vmem:[%s3483_s5 + $0xb0] sm:$0xff]  }
  0x20   :  { %91 = vst.msk [vmem:[#allocation2 + $0x1f0] sm:$0xff] %vm28_vm2, %v2191_v1  ;;  %92 = vst.msk [vmem:[#allocation2 + $0x1f8] sm:$0xff] %vm28_vm2, %v2191_v1  ;;  %v1908_v1 = vunpack.c.h.bf16 %v2517_v39 }
  0x26   :  { %2104 = vmatmul.mubr.msk.bf16.gmra.mxu0 %vm382_vm1, %v2174_v21  ;;  %2136 = vmatmul.mubr.msk.bf16.gmra.mxu1 %vm382_vm1, %v2175_v22  ;;  %v94_v21 = vld [vmem:[#allocation2 + $0x8] sm:$0xff] }
  0x27   :  { %2107 = vmatprep.mubr.msk.bf16.mxu0 %vm382_vm1, %v2176_v23  ;;  %2139 = vmatprep.mubr.msk.bf16.mxu1 %vm382_vm1, %v2177_v24  ;;  %v132_v24 = vld [vmem:[#allocation2 + $0x138] sm:$0xff] }
  0x2e   :  { %2108 = vmatmul.mubr.msk.bf16.gmra.mxu0 %vm382_vm1, %v2178_v25  ;;  %2140 = vmatmul.mubr.msk.bf16.gmra.mxu1 %vm382_vm1, %v2179_v26 }
  0x2f   :  { %2111 = vmatprep.mubr.msk.bf16.mxu0 %vm382_vm1, %v2180_v27  ;;  %2143 = vmatprep.mubr.msk.bf16.mxu1 %vm382_vm1, %v2181_v28  ;;  %v126_v27 = vld [vmem:[#allocation2 + $0x108] sm:$0xff] }
  0x36   :  { %2112 = vmatmul.mubr.msk.bf16.gmra.mxu0 %vm382_vm1, %v2182_v29  ;;  %2144 = vmatmul.mubr.msk.bf16.gmra.mxu1 %vm382_vm1, %v2183_v30 }
  0x37   :  { %2115 = vmatprep.mubr.msk.bf16.mxu0 %vm382_vm1, %v2184_v31  ;;  %2147 = vmatprep.mubr.msk.bf16.mxu1 %vm382_vm1, %v2185_v32  ;;  %v2605_v31 = vld [vmem:[%s3483_s5 + $0x48] sm:$0xff]  }
  0x38   :  { %v2610_v32 = vld [vmem:[%s3483_s5 + $0xc8] sm:$0xff]  }
  0x3e   :  { %2116 = vmatmul.mubr.msk.bf16.gmra.mxu0 %vm382_vm1, %v2186_v33  ;;  %2148 = vmatmul.mubr.msk.bf16.gmra.mxu1 %vm382_vm1, %v2187_v34 }
  0xc6   :  { %v2089_v52 = vpop.f32.mrf.mxu0  ;;  %v2121_v61 = vpop.f32.mrf.mxu1 }
  0xc7   :  { %v774_v60 = vadd.f32 %v2089_v52, %v95_v41  ;;  %v806_v3 = vadd.f32 %v2121_v61, %v127_v46  ;;  %v99_v41 = vld [vmem:[#allocation2 + $0x30] sm:$0xff]  ;;  %v2624_v61 = vld [vmem:[%s3483_s5 + $0xc0] sm:$0xff]   ;;  %v100_v52 = vld [vmem:[#allocation2 + $0x38] sm:$0xff] }
  0xc8   :  { %v517_v4 = vpop.f32.mrf.mxu0  ;;  %v645_v12 = vpop.f32.mrf.mxu1 }
  0xc9   :  { %839 = vst.msk [vmem:[#allocation2 + $0x10] sm:$0xff] %vm28_vm2, %v774_v60  ;;  %v772_v11 = vadd.f32 %v517_v4, %v93_v47  ;;  %871 = vst.msk [vmem:[#allocation2 + $0x110] sm:$0xff] %vm28_vm2, %v806_v3  ;;  %v804_v19 = vadd.f32 %v645_v12, %v125_v62  ;;  %v2619_v60 = vld [vmem:[%s3483_s5 + $0x40] sm:$0xff]   ;;  %v131_v4 = vld [vmem:[#allocation2 + $0x130] sm:$0xff] }
  0xca   :  { %v2090_v20 = vpop.f32.mrf.mxu0  ;;  %v2122_v26 = vpop.f32.mrf.mxu1 }
  0xcb   :  { %837 = vst.msk [vmem:[#allocation2] sm:$0xff] %vm28_vm2, %v772_v11  ;;  %v775_v25 = vadd.f32 %v2090_v20, %v96_v5  ;;  %869 = vst.msk [vmem:[#allocation2 + $0x100] sm:$0xff] %vm28_vm2, %v804_v19  ;;  %v807_v33 = vadd.f32 %v2122_v26, %v128_v6  ;;  %v97_v20 = vld [vmem:[#allocation2 + $0x20] sm:$0xff]  ;;  %v2651_v11 = vld [vmem:[%s3483_s5 + $0x50] sm:$0xff]  }
  0xcc   :  { %v520_v34 = vpop.f32.mrf.mxu0  ;;  %v648_v3 = vpop.f32.mrf.mxu1  ;;  %v2656_v6 = vld [vmem:[%s3483_s5 + $0xd0] sm:$0xff]  }
  0xcd   :  { %840 = vst.msk [vmem:[#allocation2 + $0x18] sm:$0xff] %vm28_vm2, %v775_v25  ;;  %v773_v62 = vadd.f32 %v520_v34, %v94_v21  ;;  %872 = vst.msk [vmem:[#allocation2 + $0x118] sm:$0xff] %vm28_vm2, %v807_v33  ;;  %v805_v12 = vadd.f32 %v648_v3, %v126_v27  ;;  %v2637_v21 = vld [vmem:[%s3483_s5 + $0x58] sm:$0xff]   ;;  %v129_v3 = vld [vmem:[#allocation2 + $0x120] sm:$0xff] }
  0xce   :  { %v2093_v19 = vpop.f32.mrf.mxu0  ;;  %v2642_v34 = vld [vmem:[%s3483_s5 + $0xd8] sm:$0xff]   ;;  %v2125_v33 = vpop.f32.mrf.mxu1 }
  0xcf   :  { %838 = vst.msk [vmem:[#allocation2 + $0x8] sm:$0xff] %vm28_vm2, %v773_v62  ;;  %v778_v27 = vadd.f32 %v2093_v19, %v99_v41  ;;  %v2661_v41 = vld [vmem:[%s3484_s2] ss:$0 sm:$0xff]  ;;  %870 = vst.msk [vmem:[#allocation2 + $0x108] sm:$0xff] %vm28_vm2, %v805_v12  ;;  %v810_v19 = vadd.f32 %v2125_v33, %v131_v4 }
  0xd0   :  { %v906_v62 = vld [vmem:[#allocation2 + $0x10] sm:$0xff]  ;;  %v533_v25 = vpop.f32.mrf.mxu0  ;;  %v661_v28 = vpop.f32.mrf.mxu1  ;;  %v2675_v33 = vld [vmem:[%s3485_s3] ss:$0 sm:$0xff] }
  0xd1   :  { %v1098_v46 = vadd.f32 %v1899_v42, %v906_v62  ;;  %v938_v30 = vld [vmem:[#allocation2 + $0x110] sm:$0xff]  ;;  %843 = vst.msk [vmem:[#allocation2 + $0x30] sm:$0xff] %vm28_vm2, %v778_v27  ;;  %v776_v29 = vadd.f32 %v533_v25, %v97_v20  ;;  %875 = vst.msk [vmem:[#allocation2 + $0x130] sm:$0xff] %vm28_vm2, %v810_v19  ;;  %v808_v42 = vadd.f32 %v661_v28, %v129_v3  ;;  %v98_v20 = vld [vmem:[#allocation2 + $0x28] sm:$0xff] }
  0xd2   :  { %v1130_v47 = vadd.f32 %v1963_v43, %v938_v30  ;;  %v904_v5 = vld [vmem:[#allocation2] sm:$0xff]  ;;  %v2094_v27 = vpop.f32.mrf.mxu0  ;;  %v2126_v43 = vpop.f32.mrf.mxu1  ;;  %v130_v30 = vld [vmem:[#allocation2 + $0x128] sm:$0xff] }
  0xd3   :  { %v1169_v4 = vmul.f32 %v2661_v41, %v1098_v46  ;;  %v1096_v12 = vadd.f32 %v1895_v48, %v904_v5  ;;  %v936_v26 = vld [vmem:[#allocation2 + $0x100] sm:$0xff]  ;;  %841 = vst.msk [vmem:[#allocation2 + $0x20] sm:$0xff] %vm28_vm2, %v776_v29  ;;  %v779_v23 = vadd.f32 %v2094_v27, %v100_v52  ;;  %873 = vst.msk [vmem:[#allocation2 + $0x120] sm:$0xff] %vm28_vm2, %v808_v42  ;;  %v2004_v52 = vunpack.c.h.bf16 %v2642_v34 }
  0xd4   :  { %v2690_v28 = vld [vmem:[%s3486_s4] ss:$0 sm:$0xff]  ;;  %v1201_v3 = vmul.f32 %v2661_v41, %v1130_v47  ;;  %v1128_v46 = vadd.f32 %v1959_v49, %v936_v26  ;;  %v907_v62 = vld [vmem:[#allocation2 + $0x18] sm:$0xff]  ;;  %v811_v48 = vadd.f32 %v2126_v43, %v132_v24  ;;  %v536_v29 = vpop.f32.mrf.mxu0  ;;  %v664_v22 = vpop.f32.mrf.mxu1 }
  0xd5   :  { %v1240_v5 = vadd.f32 %v2675_v33, %v1169_v4  ;;  %v1167_v27 = vmul.f32 %v2661_v41, %v1096_v12  ;;  %v1099_v19 = vadd.f32 %v1900_v50, %v907_v62  ;;  %v939_v25 = vld [vmem:[#allocation2 + $0x118] sm:$0xff]  ;;  %844 = vst.msk [vmem:[#allocation2 + $0x38] sm:$0xff] %vm28_vm2, %v779_v23  ;;  %v777_v47 = vadd.f32 %v536_v29, %v98_v20 }
  0xd6   :  { %v1272_v49 = vadd.f32 %v2675_v33, %v1201_v3  ;;  %v1199_v26 = vmul.f32 %v2661_v41, %v1128_v46  ;;  %v1131_v24 = vadd.f32 %v1964_v51, %v939_v25  ;;  %v905_v42 = vld [vmem:[#allocation2 + $0x8] sm:$0xff]  ;;  %876 = vst.msk [vmem:[#allocation2 + $0x138] sm:$0xff] %vm28_vm2, %v811_v48  ;;  %v809_v4 = vadd.f32 %v664_v22, %v130_v30  ;;  %v2707_v12 = vpop.f32.mrf.mxu0  ;;  %v2715_v36 = vpop.f32.mrf.mxu1 }
  0xd7   :  { %v1311_v35 = vmax.f32 %v1240_v5, %v2690_v28  ;;  %v1238_v50 = vadd.f32 %v2675_v33, %v1167_v27  ;;  %v1170_v23 = vmul.f32 %v2661_v41, %v1099_v19  ;;  %v1097_v20 = vadd.f32 %v1896_v53, %v905_v42  ;;  %v937_v62 = vld [vmem:[#allocation2 + $0x108] sm:$0xff]  ;;  %842 = vst.msk [vmem:[#allocation2 + $0x28] sm:$0xff] %vm28_vm2, %v777_v47 }
  0xd8   :  { %v1343_v51 = vmax.f32 %v1272_v49, %v2690_v28  ;;  %v1270_v22 = vadd.f32 %v2675_v33, %v1199_v26  ;;  %v1202_v25 = vmul.f32 %v2661_v41, %v1131_v24  ;;  %v1129_v43 = vadd.f32 %v1960_v54, %v937_v62  ;;  %v910_v30 = vld [vmem:[#allocation2 + $0x30] sm:$0xff]  ;;  %874 = vst.msk [vmem:[#allocation2 + $0x128] sm:$0xff] %vm28_vm2, %v809_v4  ;;  %v2723_v19 = vpop.f32.mrf.mxu0  ;;  %v2728_v29 = vpop.f32.mrf.mxu1 }
  0xd9   :  { %v1831_v37 = vpack.c.bf16 %v1311_v35, %v1311_v35  ;;  %v1309_v53 = vmax.f32 %v1238_v50, %v2690_v28  ;;  %v1241_v3 = vadd.f32 %v2675_v33, %v1170_v23  ;;  %v1168_v46 = vmul.f32 %v2661_v41, %v1097_v20  ;;  %v942_v48 = vld [vmem:[#allocation2 + $0x130] sm:$0xff] }
  0xda   :  { %v1863_v5 = vpack.c.bf16 %v1343_v51, %v1343_v51  ;;  %v1341_v27 = vmax.f32 %v1270_v22, %v2690_v28  ;;  %v1273_v38 = vadd.f32 %v2675_v33, %v1202_v25  ;;  %v1200_v54 = vmul.f32 %v2661_v41, %v1129_v43  ;;  %v908_v47 = vld [vmem:[#allocation2 + $0x20] sm:$0xff]  ;;  %v2733_v49 = vpop.f32.mrf.mxu0  ;;  %v2743_v50 = vpop.f32.mrf.mxu1 }
  0xdb   :  { %1632 = vst.msk [vmem:[%s3487_s6 + $0x8] sm:$0xf] %vm1629_vm3, %v1831_v37  ;;  %v1829_v26 = vpack.c.bf16 %v1309_v53, %v1309_v53  ;;  %v1312_v24 = vmax.f32 %v1241_v3, %v2690_v28  ;;  %v1239_v42 = vadd.f32 %v2675_v33, %v1168_v46  ;;  %v1102_v4 = vadd.f32 %v1907_v55, %v910_v30  ;;  %v940_v35 = vld [vmem:[#allocation2 + $0x120] sm:$0xff] }
  0xdc   :  { %1664 = vst.msk [vmem:[%s3487_s6 + $0x88] sm:$0xf] %vm1629_vm3, %v1863_v5  ;;  %v1861_v23 = vpack.c.bf16 %v1341_v27, %v1341_v27  ;;  %v1344_v20 = vmax.f32 %v1273_v38, %v2690_v28  ;;  %v1271_v62 = vadd.f32 %v2675_v33, %v1200_v54  ;;  %v1134_v51 = vadd.f32 %v1971_v56, %v942_v48  ;;  %v911_v22 = vld [vmem:[#allocation2 + $0x38] sm:$0xff]  ;;  %v2753_v25 = vpop.f32.mrf.mxu0  ;;  %v2763_v3 = vpop.f32.mrf.mxu1 }
  0xdd   :  { %1630 = vst.msk [vmem:[%s3487_s6] sm:$0xf] %vm1629_vm3, %v1829_v26  ;;  %v1832_v55 = vpack.c.bf16 %v1312_v24, %v1312_v24  ;;  %v1310_v43 = vmax.f32 %v1239_v42, %v2690_v28  ;;  %v1173_v30 = vmul.f32 %v2661_v41, %v1102_v4  ;;  %v1100_v37 = vadd.f32 %v1903_v63, %v908_v47  ;;  %v943_v53 = vld [vmem:[#allocation2 + $0x138] sm:$0xff] }
  0xde   :  { %1662 = vst.msk [vmem:[%s3487_s6 + $0x80] sm:$0xf] %vm1629_vm3, %v1861_v23  ;;  %v1864_v56 = vpack.c.bf16 %v1344_v20, %v1344_v20  ;;  %v1342_v46 = vmax.f32 %v1271_v62, %v2690_v28  ;;  %v1205_v48 = vmul.f32 %v2661_v41, %v1134_v51  ;;  %v1132_v5 = vadd.f32 %v1967_v0, %v940_v35  ;;  %v909_v27 = vld [vmem:[#allocation2 + $0x28] sm:$0xff]  ;;  %v2773_v38 = vpop.f32.mrf.mxu0  ;;  %v2783_v42 = vpop.f32.mrf.mxu1 }
  0xdf   :  { %1633 = vst.msk [vmem:[%s3487_s6 + $0xc] sm:$0xf] %vm1629_vm3, %v1832_v55  ;;  %v1830_v63 = vpack.c.bf16 %v1310_v43, %v1310_v43  ;;  %v1244_v54 = vadd.f32 %v2675_v33, %v1173_v30  ;;  %v1171_v47 = vmul.f32 %v2661_v41, %v1100_v37  ;;  %v1103_v26 = vadd.f32 %v1908_v1, %v911_v22  ;;  %v941_v24 = vld [vmem:[#allocation2 + $0x128] sm:$0xff]  ;;  %v103_v30 = vld [vmem:[#allocation2 + $0x50] sm:$0xff] }
  0xe0   :  { %1665 = vst.msk [vmem:[%s3487_s6 + $0x8c] sm:$0xf] %vm1629_vm3, %v1864_v56  ;;  %v1862_v0 = vpack.c.bf16 %v1342_v46, %v1342_v46  ;;  %v1276_v4 = vadd.f32 %v2675_v33, %v1205_v48  ;;  %v1203_v35 = vmul.f32 %v2661_v41, %v1132_v5  ;;  %v1135_v23 = vadd.f32 %v1972_v7, %v943_v53  ;;  %v2793_v20 = vpop.f32.mrf.mxu0  ;;  %v2804_v22 = vpop.f32.mrf.mxu1  ;;  %v135_v46 = vld [vmem:[#allocation2 + $0x150] sm:$0xff] }
  0xe1   :  { %1631 = vst.msk [vmem:[%s3487_s6 + $0x4] sm:$0xf] %vm1629_vm3, %v1830_v63  ;;  %v1315_v39 = vmax.f32 %v1244_v54, %v2690_v28  ;;  %v1242_v1 = vadd.f32 %v2675_v33, %v1171_v47  ;;  %v1174_v62 = vmul.f32 %v2661_v41, %v1103_v26  ;;  %v1101_v51 = vadd.f32 %v1904_v8, %v909_v27  ;;  %v133_v54 = vld [vmem:[#allocation2 + $0x140] sm:$0xff]  ;;  %v104_v47 = vld [vmem:[#allocation2 + $0x58] sm:$0xff] }
  0xe2   :  { %1663 = vst.msk [vmem:[%s3487_s6 + $0x84] sm:$0xf] %vm1629_vm3, %v1862_v0  ;;  %v1347_v40 = vmax.f32 %v1276_v4, %v2690_v28  ;;  %v1274_v7 = vadd.f32 %v2675_v33, %v1203_v35  ;;  %v1206_v55 = vmul.f32 %v2661_v41, %v1135_v23  ;;  %v1133_v43 = vadd.f32 %v1968_v9, %v941_v24  ;;  %v2815_v37 = vpop.f32.mrf.mxu0  ;;  %v2820_v48 = vpop.f32.mrf.mxu1  ;;  %v101_v9 = vld [vmem:[#allocation2 + $0x40] sm:$0xff]  ;;  %v136_v23 = vld [vmem:[#allocation2 + $0x158] sm:$0xff] }
  0xe3   :  { %v1835_v44 = vpack.c.bf16 %v1315_v39, %v1315_v39  ;;  %v1313_v8 = vmax.f32 %v1242_v1, %v2690_v28  ;;  %v1245_v53 = vadd.f32 %v2675_v33, %v1174_v62  ;;  %v1172_v56 = vmul.f32 %v2661_v41, %v1101_v51  ;;  %v102_v39 = vld [vmem:[#allocation2 + $0x48] sm:$0xff] }
  0xe4   :  { %v1867_v5 = vpack.c.bf16 %v1347_v40, %v1347_v40  ;;  %v1345_v27 = vmax.f32 %v1274_v7, %v2690_v28  ;;  %v1277_v63 = vadd.f32 %v2675_v33, %v1206_v55  ;;  %v1204_v45 = vmul.f32 %v2661_v41, %v1133_v43  ;;  %v2825_v26 = vpop.f32.mrf.mxu0  ;;  %v134_v1 = vld [vmem:[#allocation2 + $0x148] sm:$0xff]  ;;  %v696_v62 = vpop.f32.mrf.mxu1  ;;  %v107_v43 = vld [vmem:[#allocation2 + $0x70] sm:$0xff] }
  0xe5   :  { %1636 = vst.msk [vmem:[%s3487_s6 + $0x18] sm:$0xf] %vm1629_vm3, %v1835_v44  ;;  %v1833_v24 = vpack.c.bf16 %v1313_v8, %v1313_v8  ;;  %v1316_v0 = vmax.f32 %v1245_v53, %v2690_v28  ;;  %v1243_v4 = vadd.f32 %v2675_v33, %v1172_v56  ;;  %v782_v35 = vadd.f32 %v2707_v12, %v103_v30  ;;  %v139_v44 = vld [vmem:[#allocation2 + $0x170] sm:$0xff]  ;;  %v105_v8 = vld [vmem:[#allocation2 + $0x60] sm:$0xff] }
  0xe6   :  { %1668 = vst.msk [vmem:[%s3487_s6 + $0x98] sm:$0xf] %vm1629_vm3, %v1867_v5  ;;  %v1865_v51 = vpack.c.bf16 %v1345_v27, %v1345_v27  ;;  %v1348_v40 = vmax.f32 %v1277_v63, %v2690_v28  ;;  %v1275_v7 = vadd.f32 %v2675_v33, %v1204_v45  ;;  %v814_v55 = vadd.f32 %v2715_v36, %v135_v46  ;;  %v2105_v12 = vpop.f32.mrf.mxu0  ;;  %v137_v27 = vld [vmem:[#allocation2 + $0x160] sm:$0xff]  ;;  %v108_v36 = vld [vmem:[#allocation2 + $0x78] sm:$0xff]  ;;  %v2137_v63 = vpop.f32.mrf.mxu1 }
  0xe7   :  { %1634 = vst.msk [vmem:[%s3487_s6 + $0x10] sm:$0xf] %vm1629_vm3, %v1833_v24  ;;  %v1836_v30 = vpack.c.bf16 %v1316_v0, %v1316_v0  ;;  %v1314_v53 = vmax.f32 %v1243_v4, %v2690_v28  ;;  %v780_v56 = vadd.f32 %v2723_v19, %v101_v9  ;;  %v812_v5 = vadd.f32 %v2728_v29, %v133_v54  ;;  %v140_v46 = vld [vmem:[#allocation2 + $0x178] sm:$0xff]  ;;  %v106_v9 = vld [vmem:[#allocation2 + $0x68] sm:$0xff]  ;;  %v111_v54 = vld [vmem:[#allocation2 + $0x90] sm:$0xff] }
  0xe8   :  { %847 = vst.msk [vmem:[#allocation2 + $0x50] sm:$0xff] %vm28_vm2, %v782_v35  ;;  %v1868_v45 = vpack.c.bf16 %v1348_v40, %v1348_v40  ;;  %v1346_v24 = vmax.f32 %v1275_v7, %v2690_v28  ;;  %879 = vst.msk [vmem:[#allocation2 + $0x150] sm:$0xff] %vm28_vm2, %v814_v55  ;;  %v783_v0 = vadd.f32 %v2733_v49, %v104_v47  ;;  %v138_v29 = vld [vmem:[#allocation2 + $0x168] sm:$0xff]  ;;  %v581_v4 = vpop.f32.mrf.mxu0  ;;  %v143_v47 = vld [vmem:[#allocation2 + $0x190] sm:$0xff]  ;;  %v709_v7 = vpop.f32.mrf.mxu1 }
  0xe9   :  { %1666 = vst.msk [vmem:[%s3487_s6 + $0x90] sm:$0xf] %vm1629_vm3, %v1865_v51  ;;  %v815_v19 = vadd.f32 %v2743_v50, %v136_v23  ;;  %1637 = vst.msk [vmem:[%s3487_s6 + $0x1c] sm:$0xf] %vm1629_vm3, %v1836_v30  ;;  %v1834_v35 = vpack.c.bf16 %v1314_v53, %v1314_v53  ;;  %v781_v51 = vadd.f32 %v2753_v25, %v102_v39  ;;  %v109_v23 = vld [vmem:[#allocation2 + $0x80] sm:$0xff]  ;;  %v112_v39 = vld [vmem:[#allocation2 + $0x98] sm:$0xff] }
  0xea   :  { %845 = vst.msk [vmem:[#allocation2 + $0x40] sm:$0xff] %vm28_vm2, %v780_v56  ;;  %877 = vst.msk [vmem:[#allocation2 + $0x140] sm:$0xff] %vm28_vm2, %v812_v5  ;;  %v813_v49 = vadd.f32 %v2763_v3, %v134_v1  ;;  %v786_v50 = vadd.f32 %v2773_v38, %v107_v43  ;;  %v141_v40 = vld [vmem:[#allocation2 + $0x180] sm:$0xff]  ;;  %v1866_v55 = vpack.c.bf16 %v1346_v24, %v1346_v24  ;;  %v2106_v1 = vpop.f32.mrf.mxu0  ;;  %v144_v43 = vld [vmem:[#allocation2 + $0x198] sm:$0xff] }
  0xeb   :  { %1669 = vst.msk [vmem:[%s3487_s6 + $0x9c] sm:$0xf] %vm1629_vm3, %v1868_v45  ;;  %v818_v25 = vadd.f32 %v2783_v42, %v139_v44  ;;  %v784_v3 = vadd.f32 %v2793_v20, %v105_v8  ;;  %v816_v38 = vadd.f32 %v2804_v22, %v137_v27  ;;  %v110_v30 = vld [vmem:[#allocation2 + $0x88] sm:$0xff]  ;;  %1635 = vst.msk [vmem:[%s3487_s6 + $0x14] sm:$0xf] %vm1629_vm3, %v1834_v35  ;;  %v2138_v8 = vpop.f32.mrf.mxu1  ;;  %v2910_v45 = vld [vmem:[%s3483_s5 + $0xe0] sm:$0xff]  }
  0xec   :  { %848 = vst.msk [vmem:[#allocation2 + $0x58] sm:$0xff] %vm28_vm2, %v783_v0  ;;  %880 = vst.msk [vmem:[#allocation2 + $0x158] sm:$0xff] %vm28_vm2, %v815_v19  ;;  %v787_v42 = vadd.f32 %v2815_v37, %v108_v36  ;;  %v819_v20 = vadd.f32 %v2820_v48, %v140_v46  ;;  %v785_v22 = vadd.f32 %v2825_v26, %v106_v9  ;;  %v142_v53 = vld [vmem:[#allocation2 + $0x188] sm:$0xff]  ;;  %v584_v27 = vpop.f32.mrf.mxu0  ;;  %v115_v36 = vld [vmem:[#allocation2 + $0xb0] sm:$0xff]  ;;  %v1936_v9 = vunpack.c.h.bf16 %v2651_v11 }
  0xed   :  { %846 = vst.msk [vmem:[#allocation2 + $0x48] sm:$0xff] %vm28_vm2, %v781_v51  ;;  %878 = vst.msk [vmem:[#allocation2 + $0x148] sm:$0xff] %vm28_vm2, %v813_v49  ;;  %v817_v44 = vadd.f32 %v696_v62, %v138_v29  ;;  %v2888_v56 = vld [vmem:[%s3483_s5 + $0x68] sm:$0xff]   ;;  %v790_v37 = vadd.f32 %v2105_v12, %v111_v54  ;;  %v822_v48 = vadd.f32 %v2137_v63, %v143_v47  ;;  %v2905_v46 = vld [vmem:[%s3483_s5 + $0x60] sm:$0xff]   ;;  %v712_v0 = vpop.f32.mrf.mxu1  ;;  %v2000_v51 = vunpack.c.h.bf16 %v2656_v6 }
  0xee   :  { %851 = vst.msk [vmem:[#allocation2 + $0x70] sm:$0xff] %vm28_vm2, %v786_v50  ;;  %v2893_v5 = vld [vmem:[%s3483_s5 + $0xe8] sm:$0xff]   ;;  %883 = vst.msk [vmem:[#allocation2 + $0x170] sm:$0xff] %vm28_vm2, %v818_v25  ;;  %v788_v26 = vadd.f32 %v581_v4, %v109_v23  ;;  %v820_v62 = vadd.f32 %v709_v7, %v141_v40  ;;  %v791_v12 = vadd.f32 %v2106_v1, %v112_v39  ;;  %v147_v19 = vld [vmem:[#allocation2 + $0x1b0] sm:$0xff]  ;;  %v2109_v4 = vpop.f32.mrf.mxu0  ;;  %v1947_v49 = vunpack.c.l.bf16 %v2888_v56 }
  0xef   :  { %1667 = vst.msk [vmem:[%s3487_s6 + $0x94] sm:$0xf] %vm1629_vm3, %v1866_v55  ;;  %v823_v63 = vadd.f32 %v2138_v8, %v144_v43  ;;  %v789_v24 = vadd.f32 %v584_v27, %v110_v30  ;;  %v914_v29 = vld [vmem:[#allocation2 + $0x50] sm:$0xff]  ;;  %v821_v54 = vadd.f32 %v712_v0, %v142_v53  ;;  %v113_v35 = vld [vmem:[#allocation2 + $0xa0] sm:$0xff]  ;;  %v2011_v50 = vunpack.c.l.bf16 %v2893_v5  ;;  %v2141_v7 = vpop.f32.mrf.mxu1 }
  0xf0   :  { %849 = vst.msk [vmem:[#allocation2 + $0x60] sm:$0xff] %vm28_vm2, %v784_v3  ;;  %881 = vst.msk [vmem:[#allocation2 + $0x160] sm:$0xff] %vm28_vm2, %v816_v38  ;;  %v1106_v47 = vadd.f32 %v1915_v13, %v914_v29  ;;  %v946_v23 = vld [vmem:[#allocation2 + $0x150] sm:$0xff]  ;;  %v794_v40 = vadd.f32 %v2109_v4, %v115_v36  ;;  %v145_v55 = vld [vmem:[#allocation2 + $0x1a0] sm:$0xff]  ;;  %v1943_v25 = vunpack.c.l.bf16 %v2905_v46  ;;  %v2007_v3 = vunpack.c.l.bf16 %v2910_v45  ;;  %v597_v43 = vpop.f32.mrf.mxu0 }
  0xf1   :  { %852 = vst.msk [vmem:[#allocation2 + $0x78] sm:$0xff] %vm28_vm2, %v787_v42  ;;  %884 = vst.msk [vmem:[#allocation2 + $0x178] sm:$0xff] %vm28_vm2, %v819_v20  ;;  %v1138_v38 = vadd.f32 %v1979_v14, %v946_v23  ;;  %v912_v39 = vld [vmem:[#allocation2 + $0x40] sm:$0xff]  ;;  %v826_v13 = vadd.f32 %v2141_v7, %v147_v19  ;;  %v1948_v30 = vunpack.c.h.bf16 %v2888_v56  ;;  %v2012_v42 = vunpack.c.h.bf16 %v2893_v5 }
  0xf2   :  { %850 = vst.msk [vmem:[#allocation2 + $0x68] sm:$0xff] %vm28_vm2, %v785_v22  ;;  %882 = vst.msk [vmem:[#allocation2 + $0x168] sm:$0xff] %vm28_vm2, %v817_v44  ;;  %v944_v1 = vld [vmem:[#allocation2 + $0x140] sm:$0xff]  ;;  %v1177_v20 = vmul.f32 %v2661_v41, %v1106_v47  ;;  %v1104_v22 = vadd.f32 %v1911_v15, %v912_v39  ;;  %v3488_v44 = vunpack.c.l.bf16 %v2565_v2  ;;  %v3490_v36 = vunpack.c.h.bf16 %v2552_v58  ;;  %v2948_v0 = vpop.f32.mrf.mxu0 }
  0xf3   :  { %855 = vst.msk [vmem:[#allocation2 + $0x90] sm:$0xff] %vm28_vm2, %v790_v37  ;;  %887 = vst.msk [vmem:[#allocation2 + $0x190] sm:$0xff] %vm28_vm2, %v822_v48  ;;  %v915_v53 = vld [vmem:[#allocation2 + $0x58] sm:$0xff]  ;;  %v792_v37 = vadd.f32 %v597_v43, %v113_v35  ;;  %v725_v48 = vpop.f32.mrf.mxu1  ;;  %v3491_v4 = vunpack.c.h.bf16 %v2557_v59 }
  0xf4   :  { %853 = vst.msk [vmem:[#allocation2 + $0x80] sm:$0xff] %vm28_vm2, %v788_v26  ;;  %885 = vst.msk [vmem:[#allocation2 + $0x180] sm:$0xff] %vm28_vm2, %v820_v62  ;;  %v1136_v8 = vadd.f32 %v3488_v44, %v944_v1  ;;  %v947_v14 = vld [vmem:[#allocation2 + $0x158] sm:$0xff]  ;;  %v1209_v26 = vmul.f32 %v2661_v41, %v1138_v38  ;;  %v3489_v62 = vunpack.c.h.bf16 %v2547_v57  ;;  %v824_v15 = vadd.f32 %v725_v48, %v145_v55  ;;  %v2968_v1 = vpop.f32.mrf.mxu0 }
  0xf5   :  { %856 = vst.msk [vmem:[#allocation2 + $0x98] sm:$0xff] %vm28_vm2, %v791_v12  ;;  %888 = vst.msk [vmem:[#allocation2 + $0x198] sm:$0xff] %vm28_vm2, %v823_v63  ;;  %v1139_v12 = vadd.f32 %v3490_v36, %v947_v14  ;;  %v913_v63 = vld [vmem:[#allocation2 + $0x48] sm:$0xff]  ;;  %v1248_v19 = vadd.f32 %v2675_v33, %v1177_v20  ;;  %v1175_v29 = vmul.f32 %v2661_v41, %v1104_v22  ;;  %v2956_v58 = vpop.f32.mrf.mxu1  ;;  %v918_v44 = vld [vmem:[#allocation2 + $0x70] sm:$0xff] }
  0xf6   :  { %854 = vst.msk [vmem:[#allocation2 + $0x88] sm:$0xff] %vm28_vm2, %v789_v24  ;;  %886 = vst.msk [vmem:[#allocation2 + $0x188] sm:$0xff] %vm28_vm2, %v821_v54  ;;  %v1107_v27 = vadd.f32 %v3489_v62, %v915_v53  ;;  %v945_v24 = vld [vmem:[#allocation2 + $0x148] sm:$0xff]  ;;  %v1207_v54 = vmul.f32 %v2661_v41, %v1136_v8  ;;  %v1105_v57 = vadd.f32 %v3491_v4, %v913_v63  ;;  %v950_v48 = vld [vmem:[#allocation2 + $0x170] sm:$0xff] }
  0xf7   :  { %859 = vst.msk [vmem:[#allocation2 + $0xb0] sm:$0xff] %vm28_vm2, %v794_v40  ;;  %891 = vst.msk [vmem:[#allocation2 + $0x1b0] sm:$0xff] %vm28_vm2, %v826_v13  ;;  %v1280_v35 = vadd.f32 %v2675_v33, %v1209_v26  ;;  %v1210_v23 = vmul.f32 %v2661_v41, %v1139_v12  ;;  %v3492_v40 = vunpack.c.h.bf16 %v2565_v2  ;;  %v1319_v55 = vmax.f32 %v1248_v19, %v2690_v28  ;;  %v2970_v13 = vpop.f32.mrf.mxu1  ;;  %v916_v12 = vld [vmem:[#allocation2 + $0x60] sm:$0xff] }
  0xf8   :  { %857 = vst.msk [vmem:[#allocation2 + $0xa0] sm:$0xff] %vm28_vm2, %v792_v37  ;;  %v1178_v47 = vmul.f32 %v2661_v41, %v1107_v27  ;;  %889 = vst.msk [vmem:[#allocation2 + $0x1a0] sm:$0xff] %vm28_vm2, %v824_v15  ;;  %v1246_v59 = vadd.f32 %v2675_v33, %v1175_v29  ;;  %v1278_v38 = vadd.f32 %v2675_v33, %v1207_v54  ;;  %v948_v63 = vld [vmem:[#allocation2 + $0x160] sm:$0xff]  ;;  %v3493_v29 = vunpack.c.l.bf16 %v2573_v10  ;;  %v919_v4 = vld [vmem:[#allocation2 + $0x78] sm:$0xff] }
  0xf9   :  { %v1137_v7 = vadd.f32 %v3492_v40, %v945_v24  ;;  %v1176_v39 = vmul.f32 %v2661_v41, %v1105_v57  ;;  %v1351_v43 = vmax.f32 %v1280_v35, %v2690_v28  ;;  %v1281_v2 = vadd.f32 %v2675_v33, %v1210_v23  ;;  %v951_v57 = vld [vmem:[#allocation2 + $0x178] sm:$0xff]  ;;  %v2989_v35 = vpop.f32.mrf.mxu0 }
  0xfa   :  { %v1249_v20 = vadd.f32 %v2675_v33, %v1178_v47  ;;  %v1839_v8 = vpack.c.bf16 %v1319_v55, %v1319_v55  ;;  %v1317_v53 = vmax.f32 %v1246_v59, %v2690_v28  ;;  %v1349_v14 = vmax.f32 %v1278_v38, %v2690_v28  ;;  %v2991_v47 = vpop.f32.mrf.mxu1  ;;  %v917_v38 = vld [vmem:[#allocation2 + $0x68] sm:$0xff] }
  0xfb   :  { %v1208_v22 = vmul.f32 %v2661_v41, %v1137_v7  ;;  %v1247_v37 = vadd.f32 %v2675_v33, %v1176_v39  ;;  %v1871_v26 = vpack.c.bf16 %v1351_v43, %v1351_v43  ;;  %v1352_v27 = vmax.f32 %v1281_v2, %v2690_v28 }
  0xfc   :  { %v1320_v62 = vmax.f32 %v1249_v20, %v2690_v28  ;;  %1640 = vst.msk [vmem:[%s3487_s6 + $0x28] sm:$0xf] %vm1629_vm3, %v1839_v8  ;;  %v1837_v24 = vpack.c.bf16 %v1317_v53, %v1317_v53  ;;  %v1869_v15 = vpack.c.bf16 %v1349_v14, %v1349_v14  ;;  %v1110_v54 = vadd.f32 %v3493_v29, %v918_v44  ;;  %v949_v8 = vld [vmem:[#allocation2 + $0x168] sm:$0xff] }
  0xfd   :  { %v1279_v36 = vadd.f32 %v2675_v33, %v1208_v22  ;;  %v1318_v19 = vmax.f32 %v1247_v37, %v2690_v28  ;;  %1672 = vst.msk [vmem:[%s3487_s6 + $0xa8] sm:$0xf] %vm1629_vm3, %v1871_v26  ;;  %v1872_v40 = vpack.c.bf16 %v1352_v27, %v1352_v27  ;;  %v3494_v55 = vunpack.c.l.bf16 %v2582_v16 }
  0xfe   :  { %v1840_v23 = vpack.c.bf16 %v1320_v62, %v1320_v62  ;;  %1638 = vst.msk [vmem:[%s3487_s6 + $0x20] sm:$0xf] %vm1629_vm3, %v1837_v24  ;;  %1670 = vst.msk [vmem:[%s3487_s6 + $0xa0] sm:$0xf] %vm1629_vm3, %v1869_v15  ;;  %v1181_v43 = vmul.f32 %v2661_v41, %v1110_v54  ;;  %v3495_v20 = vunpack.c.l.bf16 %v2587_v17  ;;  %v3496_v22 = vunpack.c.l.bf16 %v2592_v18  ;;  %v3035_v15 = vpop.f32.mrf.mxu0 }
  0xff   :  { %v1350_v7 = vmax.f32 %v1279_v36, %v2690_v28  ;;  %v1142_v59 = vadd.f32 %v3494_v55, %v950_v48  ;;  %v1838_v39 = vpack.c.bf16 %v1318_v19, %v1318_v19  ;;  %1673 = vst.msk [vmem:[%s3487_s6 + $0xac] sm:$0xf] %vm1629_vm3, %v1872_v40  ;;  %v3497_v37 = vunpack.c.h.bf16 %v2573_v10  ;;  %v3037_v10 = vpop.f32.mrf.mxu1 }
 0x100   :  { %v1108_v2 = vadd.f32 %v3495_v20, %v916_v12  ;;  %v1140_v44 = vadd.f32 %v3496_v22, %v948_v63  ;;  %1641 = vst.msk [vmem:[%s3487_s6 + $0x2c] sm:$0xf] %vm1629_vm3, %v1840_v23  ;;  %v3498_v26 = vunpack.c.h.bf16 %v2582_v16  ;;  %v1252_v27 = vadd.f32 %v2675_v33, %v1181_v43  ;;  %v954_v22 = vld [vmem:[#allocation2 + $0x190] sm:$0xff] }
 0x101   :  { %v1870_v53 = vpack.c.bf16 %v1350_v7, %v1350_v7  ;;  %v1213_v14 = vmul.f32 %v2661_v41, %v1142_v59  ;;  %v1111_v48 = vadd.f32 %v3497_v37, %v919_v4  ;;  %1639 = vst.msk [vmem:[%s3487_s6 + $0x24] sm:$0xf] %vm1629_vm3, %v1838_v39  ;;  %v3499_v63 = vunpack.c.h.bf16 %v2587_v17  ;;  %v922_v39 = vld [vmem:[#allocation2 + $0x90] sm:$0xff] }
 0x102   :  { %v1143_v62 = vadd.f32 %v3498_v26, %v951_v57  ;;  %v1179_v36 = vmul.f32 %v2661_v41, %v1108_v2  ;;  %v1211_v12 = vmul.f32 %v2661_v41, %v1140_v44  ;;  %v3500_v54 = vunpack.c.h.bf16 %v2592_v18  ;;  %v3059_v44 = vpop.f32.mrf.mxu0  ;;  %v920_v26 = vld [vmem:[#allocation2 + $0x80] sm:$0xff] }
 0x103   :  { %v1109_v24 = vadd.f32 %v3499_v63, %v917_v38  ;;  %1671 = vst.msk [vmem:[%s3487_s6 + $0xa4] sm:$0xf] %vm1629_vm3, %v1870_v53  ;;  %v1284_v16 = vadd.f32 %v2675_v33, %v1213_v14  ;;  %v1182_v19 = vmul.f32 %v2661_v41, %v1111_v48  ;;  %v1323_v17 = vmax.f32 %v1252_v27, %v2690_v28 }
 0x104   :  { %v1214_v29 = vmul.f32 %v2661_v41, %v1143_v62  ;;  %v1141_v4 = vadd.f32 %v3500_v54, %v949_v8  ;;  %v1250_v57 = vadd.f32 %v2675_v33, %v1179_v36  ;;  %v1282_v23 = vadd.f32 %v2675_v33, %v1211_v12  ;;  %v3061_v8 = vpop.f32.mrf.mxu1  ;;  %v952_v62 = vld [vmem:[#allocation2 + $0x180] sm:$0xff] }
 0x105   :  { %v1180_v40 = vmul.f32 %v2661_v41, %v1109_v24  ;;  %v1355_v7 = vmax.f32 %v1284_v16, %v2690_v28  ;;  %v1253_v55 = vadd.f32 %v2675_v33, %v1182_v19  ;;  %v1843_v43 = vpack.c.bf16 %v1323_v17, %v1323_v17  ;;  %v923_v16 = vld [vmem:[#allocation2 + $0x98] sm:$0xff] }
 0x106   :  { %v1285_v59 = vadd.f32 %v2675_v33, %v1214_v29  ;;  %v1212_v38 = vmul.f32 %v2661_v41, %v1141_v4  ;;  %v1321_v18 = vmax.f32 %v1250_v57, %v2690_v28  ;;  %v1353_v20 = vmax.f32 %v1282_v23, %v2690_v28  ;;  %v955_v19 = vld [vmem:[#allocation2 + $0x198] sm:$0xff]  ;;  %v921_v23 = vld [vmem:[#allocation2 + $0x88] sm:$0xff] }
 0x107   :  { %v1251_v2 = vadd.f32 %v2675_v33, %v1180_v40  ;;  %v1875_v53 = vpack.c.bf16 %v1355_v7, %v1355_v7  ;;  %v1324_v14 = vmax.f32 %v1253_v55, %v2690_v28  ;;  %1644 = vst.msk [vmem:[%s3487_s6 + $0x38] sm:$0xf] %vm1629_vm3, %v1843_v43  ;;  %v3501_v63 = vunpack.c.l.bf16 %v2605_v31  ;;  %v953_v43 = vld [vmem:[#allocation2 + $0x188] sm:$0xff] }
 0x108   :  { %v1356_v37 = vmax.f32 %v1285_v59, %v2690_v28  ;;  %v1283_v48 = vadd.f32 %v2675_v33, %v1212_v38  ;;  %v1841_v27 = vpack.c.bf16 %v1321_v18, %v1321_v18  ;;  %v1873_v36 = vpack.c.bf16 %v1353_v20, %v1353_v20  ;;  %v3093_v18 = vpop.f32.mrf.mxu0  ;;  %v3095_v20 = vpop.f32.mrf.mxu1 }
 0x109   :  { %v1322_v12 = vmax.f32 %v1251_v2, %v2690_v28  ;;  %v1114_v24 = vadd.f32 %v3501_v63, %v922_v39  ;;  %1676 = vst.msk [vmem:[%s3487_s6 + $0xb8] sm:$0xf] %vm1629_vm3, %v1875_v53  ;;  %v1844_v29 = vpack.c.bf16 %v1324_v14, %v1324_v14  ;;  %v3502_v17 = vunpack.c.l.bf16 %v2610_v32 }
 0x10a   :  { %v1876_v54 = vpack.c.bf16 %v1356_v37, %v1356_v37  ;;  %v1354_v4 = vmax.f32 %v1283_v48, %v2690_v28  ;;  %1642 = vst.msk [vmem:[%s3487_s6 + $0x30] sm:$0xf] %vm1629_vm3, %v1841_v27  ;;  %1674 = vst.msk [vmem:[%s3487_s6 + $0xb0] sm:$0xf] %vm1629_vm3, %v1873_v36  ;;  %v3503_v55 = vunpack.c.l.bf16 %v2619_v60  ;;  %v3504_v38 = vunpack.c.l.bf16 %v2624_v61 }
 0x10b   :  { %v1146_v57 = vadd.f32 %v3502_v17, %v954_v22  ;;  %v1842_v40 = vpack.c.bf16 %v1322_v12, %v1322_v12  ;;  %v1185_v7 = vmul.f32 %v2661_v41, %v1114_v24  ;;  %1645 = vst.msk [vmem:[%s3487_s6 + $0x3c] sm:$0xf] %vm1629_vm3, %v1844_v29  ;;  %v3505_v53 = vunpack.c.h.bf16 %v2605_v31  ;;  %v3134_v17 = vpop.f32.mrf.mxu1 }
 0x10c   :  { %v1112_v59 = vadd.f32 %v3503_v55, %v920_v26  ;;  %v1144_v39 = vadd.f32 %v3504_v38, %v952_v62  ;;  %1677 = vst.msk [vmem:[%s3487_s6 + $0xbc] sm:$0xf] %vm1629_vm3, %v1876_v54  ;;  %v1874_v2 = vpack.c.bf16 %v1354_v4, %v1354_v4  ;;  %v3506_v37 = vunpack.c.h.bf16 %v2610_v32  ;;  %v3132_v4 = vpop.f32.mrf.mxu0 }
 0x10d   :  { %v1217_v22 = vmul.f32 %v2661_v41, %v1146_v57  ;;  %v1115_v14 = vadd.f32 %v3505_v53, %v923_v16  ;;  %1643 = vst.msk [vmem:[%s3487_s6 + $0x34] sm:$0xf] %vm1629_vm3, %v1842_v40  ;;  %v1256_v26 = vadd.f32 %v2675_v33, %v1185_v7  ;;  %v3507_v36 = vunpack.c.h.bf16 %v2619_v60  ;;  %v926_v7 = vld [vmem:[#allocation2 + $0xb0] sm:$0xff] }
 0x10e   :  { %v1147_v48 = vadd.f32 %v3506_v37, %v955_v19  ;;  %v1183_v62 = vmul.f32 %v2661_v41, %v1112_v59  ;;  %v1215_v27 = vmul.f32 %v2661_v41, %v1144_v39  ;;  %1675 = vst.msk [vmem:[%s3487_s6 + $0xb4] sm:$0xf] %vm1629_vm3, %v1874_v2  ;;  %v3508_v24 = vunpack.c.h.bf16 %v2624_v61  ;;  %v924_v37 = vld [vmem:[#allocation2 + $0xa0] sm:$0xff] }
 0x10f   :  { %v1113_v12 = vadd.f32 %v3507_v36, %v921_v23  ;;  %v1288_v31 = vadd.f32 %v2675_v33, %v1217_v22  ;;  %v1186_v32 = vmul.f32 %v2661_v41, %v1115_v14  ;;  %v1327_v19 = vmax.f32 %v1256_v26, %v2690_v28 }
 0x110   :  { %v1218_v63 = vmul.f32 %v2661_v41, %v1147_v48  ;;  %v1145_v16 = vadd.f32 %v3508_v24, %v953_v43  ;;  %v1254_v29 = vadd.f32 %v2675_v33, %v1183_v62  ;;  %v1286_v60 = vadd.f32 %v2675_v33, %v1215_v27  ;;  %v958_v43 = vld [vmem:[#allocation2 + $0x1b0] sm:$0xff]  ;;  %v956_v48 = vld [vmem:[#allocation2 + $0x1a0] sm:$0xff]  ;;  %v3155_v24 = vpop.f32.mrf.mxu1 }
 0x111   :  { %v1184_v54 = vmul.f32 %v2661_v41, %v1113_v12  ;;  %v1359_v57 = vmax.f32 %v1288_v31, %v2690_v28  ;;  %v1257_v23 = vadd.f32 %v2675_v33, %v1186_v32  ;;  %v1847_v55 = vpack.c.bf16 %v1327_v19, %v1327_v19  ;;  %v116_v31 = vld [vmem:[#allocation2 + $0xb8] sm:$0xff] }
 0x112   :  { %v1289_v40 = vadd.f32 %v2675_v33, %v1218_v63  ;;  %v1216_v61 = vmul.f32 %v2661_v41, %v1145_v16  ;;  %v1325_v59 = vmax.f32 %v1254_v29, %v2690_v28  ;;  %v1357_v38 = vmax.f32 %v1286_v60, %v2690_v28  ;;  %v148_v32 = vld [vmem:[#allocation2 + $0x1b8] sm:$0xff]  ;;  %v3153_v63 = vpop.f32.mrf.mxu0 }
 0x113   :  { %v1255_v39 = vadd.f32 %v2675_v33, %v1184_v54  ;;  %v1879_v2 = vpack.c.bf16 %v1359_v57, %v1359_v57  ;;  %v1328_v22 = vmax.f32 %v1257_v23, %v2690_v28  ;;  %1648 = vst.msk [vmem:[%s3487_s6 + $0x48] sm:$0xf] %vm1629_vm3, %v1847_v55  ;;  %v3509_v36 = vunpack.c.l.bf16 %v2637_v21  ;;  %v114_v57 = vld [vmem:[#allocation2 + $0xa8] sm:$0xff] }
 0x114   :  { %v1360_v53 = vmax.f32 %v1289_v40, %v2690_v28  ;;  %v1287_v14 = vadd.f32 %v2675_v33, %v1216_v61  ;;  %v1845_v26 = vpack.c.bf16 %v1325_v59, %v1325_v59  ;;  %v1877_v62 = vpack.c.bf16 %v1357_v38, %v1357_v38  ;;  %v146_v38 = vld [vmem:[#allocation2 + $0x1a8] sm:$0xff] }
 0x115   :  { %v1326_v27 = vmax.f32 %v1255_v39, %v2690_v28  ;;  %v1118_v12 = vadd.f32 %v3509_v36, %v926_v7  ;;  %1680 = vst.msk [vmem:[%s3487_s6 + $0xc8] sm:$0xf] %vm1629_vm3, %v1879_v2  ;;  %v1848_v16 = vpack.c.bf16 %v1328_v22, %v1328_v22  ;;  %v3510_v60 = vunpack.c.l.bf16 %v2642_v34  ;;  %v119_v39 = vld [vmem:[#allocation2 + $0xd0] sm:$0xff]  ;;  %v149_v36 = vld [vmem:[#allocation2 + $0x1c0] sm:$0xff] }
 0x116   :  { %v1880_v19 = vpack.c.bf16 %v1360_v53, %v1360_v53  ;;  %v1358_v29 = vmax.f32 %v1287_v14, %v2690_v28  ;;  %1646 = vst.msk [vmem:[%s3487_s6 + $0x40] sm:$0xf] %vm1629_vm3, %v1845_v26  ;;  %1678 = vst.msk [vmem:[%s3487_s6 + $0xc0] sm:$0xf] %vm1629_vm3, %v1877_v62  ;;  %v3511_v61 = vunpack.c.l.bf16 %v2651_v11  ;;  %v3512_v55 = vunpack.c.l.bf16 %v2656_v6  ;;  %v3311_v6 = vld [vmem:[%s3485_s3] ss:$0 sm:$0xff] }
 0x117   :  { %v1150_v54 = vadd.f32 %v3510_v60, %v958_v43  ;;  %v1846_v23 = vpack.c.bf16 %v1326_v27, %v1326_v27  ;;  %v1189_v40 = vmul.f32 %v2661_v41, %v1118_v12  ;;  %v151_v43 = vld [vmem:[#allocation2 + $0x1d0] sm:$0xff]  ;;  %1649 = vst.msk [vmem:[%s3487_s6 + $0x4c] sm:$0xf] %vm1629_vm3, %v1848_v16  ;;  %v795_v53 = vadd.f32 %v2948_v0, %v116_v31  ;;  %v120_v12 = vld [vmem:[#allocation2 + $0xd8] sm:$0xff]  ;;  %v2118_v0 = vpop.f32.mrf.mxu0  ;;  %v2150_v31 = vpop.f32.mrf.mxu1 }
 0x118   :  { %v1116_v7 = vadd.f32 %v3511_v61, %v924_v37  ;;  %v1148_v59 = vadd.f32 %v3512_v55, %v956_v48  ;;  %1681 = vst.msk [vmem:[%s3487_s6 + $0xcc] sm:$0xf] %vm1629_vm3, %v1880_v19  ;;  %v1878_v2 = vpack.c.bf16 %v1358_v29, %v1358_v29  ;;  %v827_v14 = vadd.f32 %v2956_v58, %v148_v32  ;;  %v117_v37 = vld [vmem:[#allocation2 + $0xc0] sm:$0xff]  ;;  %v152_v16 = vld [vmem:[#allocation2 + $0x1d8] sm:$0xff]  ;;  %v118_v19 = vld [vmem:[#allocation2 + $0xc8] sm:$0xff] }
 0x119   :  { %v1221_v22 = vmul.f32 %v2661_v41, %v1150_v54  ;;  %1647 = vst.msk [vmem:[%s3487_s6 + $0x44] sm:$0xf] %vm1629_vm3, %v1846_v23  ;;  %v1260_v48 = vadd.f32 %v2675_v33, %v1189_v40  ;;  %v793_v27 = vadd.f32 %v2968_v1, %v114_v57  ;;  %v798_v1 = vadd.f32 %v2989_v35, %v119_v39  ;;  %v150_v23 = vld [vmem:[#allocation2 + $0x1c8] sm:$0xff]  ;;  %v123_v40 = vld [vmem:[#allocation2 + $0xf0] sm:$0xff]  ;;  %v153_v55 = vld [vmem:[#allocation2 + $0x1e0] sm:$0xff] }
 0x11a   :  { %v1187_v26 = vmul.f32 %v2661_v41, %v1116_v7  ;;  %v1219_v62 = vmul.f32 %v2661_v41, %v1148_v59  ;;  %1679 = vst.msk [vmem:[%s3487_s6 + $0xc4] sm:$0xf] %vm1629_vm3, %v1878_v2  ;;  %v825_v41 = vadd.f32 %v2970_v13, %v146_v38  ;;  %v830_v32 = vadd.f32 %v2991_v47, %v151_v43  ;;  %v155_v61 = vld [vmem:[#allocation2 + $0x1f0] sm:$0xff]  ;;  %v121_v7 = vld [vmem:[#allocation2 + $0xe0] sm:$0xff]  ;;  %v156_v2 = vld [vmem:[#allocation2 + $0x1f8] sm:$0xff] }
 0x11b   :  { %v1292_v58 = vadd.f32 %v2675_v33, %v1221_v22  ;;  %860 = vst.msk [vmem:[#allocation2 + $0xb8] sm:$0xff] %vm28_vm2, %v795_v53  ;;  %892 = vst.msk [vmem:[#allocation2 + $0x1b8] sm:$0xff] %vm28_vm2, %v827_v14  ;;  %v1331_v29 = vmax.f32 %v1260_v48, %v2690_v28  ;;  %v796_v57 = vadd.f32 %v3035_v15, %v117_v37  ;;  %v124_v15 = vld [vmem:[#allocation2 + $0xf8] sm:$0xff]  ;;  %v122_v22 = vld [vmem:[#allocation2 + $0xe8] sm:$0xff]  ;;  %v632_v53 = vpop.f32.mrf.mxu0  ;;  %v760_v14 = vpop.f32.mrf.mxu1 }
 0x11c   :  { %v1258_v60 = vadd.f32 %v2675_v33, %v1187_v26  ;;  %v1290_v54 = vadd.f32 %v2675_v33, %v1219_v62  ;;  %858 = vst.msk [vmem:[#allocation2 + $0xa8] sm:$0xff] %vm28_vm2, %v793_v27  ;;  %890 = vst.msk [vmem:[#allocation2 + $0x1a8] sm:$0xff] %vm28_vm2, %v825_v41  ;;  %v828_v35 = vadd.f32 %v3037_v10, %v149_v36  ;;  %v154_v10 = vld [vmem:[#allocation2 + $0x1e8] sm:$0xff]  ;;  %v3236_v48 = vld [vmem:[%s3483_s5 + $0xf8] sm:$0xff]   ;;  %v1944_v41 = vunpack.c.h.bf16 %v2905_v46 }
 0x11d   :  { %v1363_v13 = vmax.f32 %v1292_v58, %v2690_v28  ;;  %863 = vst.msk [vmem:[#allocation2 + $0xd0] sm:$0xff] %vm28_vm2, %v798_v1  ;;  %895 = vst.msk [vmem:[#allocation2 + $0x1d0] sm:$0xff] %vm28_vm2, %v830_v32  ;;  %v799_v47 = vadd.f32 %v3059_v44, %v120_v12  ;;  %v831_v33 = vadd.f32 %v3061_v8, %v152_v16  ;;  %v3253_v27 = vld [vmem:[%s3483_s5 + $0xf0] sm:$0xff]   ;;  %v2008_v1 = vunpack.c.h.bf16 %v2910_v45 }
 0x11e   :  { %v1851_v59 = vpack.c.bf16 %v1331_v29, %v1331_v29  ;;  %v1329_v38 = vmax.f32 %v1258_v60, %v2690_v28  ;;  %v1361_v39 = vmax.f32 %v1290_v54, %v2690_v28  ;;  %861 = vst.msk [vmem:[#allocation2 + $0xc0] sm:$0xff] %vm28_vm2, %v796_v57  ;;  %v797_v43 = vadd.f32 %v3093_v18, %v118_v19  ;;  %v3230_v18 = vld [vmem:[%s3483_s5 + $0x78] sm:$0xff]  }
 0x11f   :  { %v1883_v44 = vpack.c.bf16 %v1363_v13, %v1363_v13  ;;  %893 = vst.msk [vmem:[#allocation2 + $0x1c0] sm:$0xff] %vm28_vm2, %v828_v35  ;;  %864 = vst.msk [vmem:[#allocation2 + $0xd8] sm:$0xff] %vm28_vm2, %v799_v47  ;;  %v829_v8 = vadd.f32 %v3095_v20, %v150_v23  ;;  %v802_v28 = vadd.f32 %v3132_v4, %v123_v40  ;;  %v3513_v32 = vunpack.c.h.bf16 %v2637_v21  ;;  %v3294_v35 = vld [vmem:[%s3484_s2] ss:$0 sm:$0xff] }
 0x120   :  { %896 = vst.msk [vmem:[#allocation2 + $0x1d8] sm:$0xff] %vm28_vm2, %v831_v33  ;;  %v834_v37 = vadd.f32 %v3134_v17, %v155_v61  ;;  %v1849_v20 = vpack.c.bf16 %v1329_v38, %v1329_v38  ;;  %v1881_v26 = vpack.c.bf16 %v1361_v39, %v1361_v39  ;;  %862 = vst.msk [vmem:[#allocation2 + $0xc8] sm:$0xff] %vm28_vm2, %v797_v43  ;;  %v3247_v17 = vld [vmem:[%s3483_s5 + $0x70] sm:$0xff]   ;;  %v2015_v57 = vunpack.c.l.bf16 %v3253_v27 }
 0x121   :  { %1652 = vst.msk [vmem:[%s3487_s6 + $0x58] sm:$0xf] %vm1629_vm3, %v1851_v59  ;;  %v800_v4 = vadd.f32 %v3153_v63, %v121_v7  ;;  %v832_v62 = vadd.f32 %v3155_v24, %v153_v55  ;;  %1684 = vst.msk [vmem:[%s3487_s6 + $0xd8] sm:$0xf] %vm1629_vm3, %v1883_v44  ;;  %v803_v63 = vadd.f32 %v2118_v0, %v124_v15  ;;  %v1955_v0 = vunpack.c.l.bf16 %v3230_v18 }
 0x122   :  { %894 = vst.msk [vmem:[#allocation2 + $0x1c8] sm:$0xff] %vm28_vm2, %v829_v8  ;;  %867 = vst.msk [vmem:[#allocation2 + $0xf0] sm:$0xff] %vm28_vm2, %v802_v28  ;;  %v835_v36 = vadd.f32 %v2150_v31, %v156_v2  ;;  %v801_v12 = vadd.f32 %v632_v53, %v122_v22  ;;  %v833_v24 = vadd.f32 %v760_v14, %v154_v10  ;;  %v927_v16 = vld [vmem:[#allocation2 + $0xb8] sm:$0xff]  ;;  %v2019_v31 = vunpack.c.l.bf16 %v3236_v48  ;;  %v3325_v10 = vld [vmem:[%s3486_s4] ss:$0 sm:$0xff] }
 0x123   :  { %899 = vst.msk [vmem:[#allocation2 + $0x1f0] sm:$0xff] %vm28_vm2, %v834_v37  ;;  %v959_v58 = vld [vmem:[#allocation2 + $0x1b8] sm:$0xff]  ;;  %865 = vst.msk [vmem:[#allocation2 + $0xe0] sm:$0xff] %vm28_vm2, %v800_v4  ;;  %v1119_v19 = vadd.f32 %v3513_v32, %v927_v16  ;;  %v925_v60 = vld [vmem:[#allocation2 + $0xa8] sm:$0xff]  ;;  %v1951_v54 = vunpack.c.l.bf16 %v3247_v17  ;;  %v2020_v61 = vunpack.c.h.bf16 %v3236_v48  ;;  %v1952_v13 = vunpack.c.h.bf16 %v3247_v17 }
 0x124   :  { %1650 = vst.msk [vmem:[%s3487_s6 + $0x50] sm:$0xf] %vm1629_vm3, %v1849_v20  ;;  %1682 = vst.msk [vmem:[%s3487_s6 + $0xd0] sm:$0xf] %vm1629_vm3, %v1881_v26  ;;  %v1151_v29 = vadd.f32 %v2004_v52, %v959_v58  ;;  %v1117_v21 = vadd.f32 %v1936_v9, %v925_v60  ;;  %v957_v23 = vld [vmem:[#allocation2 + $0x1a8] sm:$0xff]  ;;  %v930_v40 = vld [vmem:[#allocation2 + $0xd0] sm:$0xff]  ;;  %v1956_v52 = vunpack.c.h.bf16 %v3230_v18  ;;  %v2016_v39 = vunpack.c.h.bf16 %v3253_v27 }
 0x125   :  { %897 = vst.msk [vmem:[#allocation2 + $0x1e0] sm:$0xff] %vm28_vm2, %v832_v62  ;;  %868 = vst.msk [vmem:[#allocation2 + $0xf8] sm:$0xff] %vm28_vm2, %v803_v63  ;;  %v962_v34 = vld [vmem:[#allocation2 + $0x1d0] sm:$0xff]  ;;  %v1190_v47 = vmul.f32 %v3294_v35, %v1119_v19  ;;  %v1149_v11 = vadd.f32 %v2000_v51, %v957_v23  ;;  %v1122_v9 = vadd.f32 %v1947_v49, %v930_v40  ;;  %v928_v7 = vld [vmem:[#allocation2 + $0xc0] sm:$0xff] }
 0x126   :  { %900 = vst.msk [vmem:[#allocation2 + $0x1f8] sm:$0xff] %vm28_vm2, %v835_v36  ;;  %866 = vst.msk [vmem:[#allocation2 + $0xe8] sm:$0xff] %vm28_vm2, %v801_v12  ;;  %v1222_v33 = vmul.f32 %v3294_v35, %v1151_v29  ;;  %v1188_v55 = vmul.f32 %v3294_v35, %v1117_v21  ;;  %v1154_v15 = vadd.f32 %v2011_v50, %v962_v34  ;;  %v960_v38 = vld [vmem:[#allocation2 + $0x1c0] sm:$0xff]  ;;  %v931_v4 = vld [vmem:[#allocation2 + $0xd8] sm:$0xff] }
 0x127   :  { %898 = vst.msk [vmem:[#allocation2 + $0x1e8] sm:$0xff] %vm28_vm2, %v833_v24  ;;  %v1120_v59 = vadd.f32 %v1943_v25, %v928_v7  ;;  %v1261_v51 = vadd.f32 %v3311_v6, %v1190_v47  ;;  %v1220_v43 = vmul.f32 %v3294_v35, %v1149_v11  ;;  %v1193_v2 = vmul.f32 %v3294_v35, %v1122_v9  ;;  %v963_v62 = vld [vmem:[#allocation2 + $0x1d8] sm:$0xff]  ;;  %v929_v16 = vld [vmem:[#allocation2 + $0xc8] sm:$0xff] }
 0x128   :  { %v1293_v49 = vadd.f32 %v3311_v6, %v1222_v33  ;;  %v1259_v50 = vadd.f32 %v3311_v6, %v1188_v55  ;;  %v1225_v25 = vmul.f32 %v3294_v35, %v1154_v15  ;;  %v1152_v53 = vadd.f32 %v2007_v3, %v960_v38 }
 0x129   :  { %v1191_v22 = vmul.f32 %v3294_v35, %v1120_v59  ;;  %v1332_v14 = vmax.f32 %v1261_v51, %v3325_v10  ;;  %v1291_v8 = vadd.f32 %v3311_v6, %v1220_v43  ;;  %v1264_v28 = vadd.f32 %v3311_v6, %v1193_v2  ;;  %v961_v60 = vld [vmem:[#allocation2 + $0x1c8] sm:$0xff]  ;;  %v934_v21 = vld [vmem:[#allocation2 + $0xf0] sm:$0xff] }
 0x12a   :  { %v1364_v44 = vmax.f32 %v1293_v49, %v3325_v10  ;;  %v1330_v37 = vmax.f32 %v1259_v50, %v3325_v10  ;;  %v1296_v20 = vadd.f32 %v3311_v6, %v1225_v25  ;;  %v1223_v3 = vmul.f32 %v3294_v35, %v1152_v53  ;;  %v966_v33 = vld [vmem:[#allocation2 + $0x1f0] sm:$0xff]  ;;  %v932_v11 = vld [vmem:[#allocation2 + $0xe0] sm:$0xff] }
 0x12b   :  { %v1262_v26 = vadd.f32 %v3311_v6, %v1191_v22  ;;  %v1852_v63 = vpack.c.bf16 %v1332_v14, %v1332_v14  ;;  %v1362_v12 = vmax.f32 %v1291_v8, %v3325_v10  ;;  %v1335_v24 = vmax.f32 %v1264_v28, %v3325_v10 }
 0x12c   :  { %v1884_v36 = vpack.c.bf16 %v1364_v44, %v1364_v44  ;;  %v1850_v58 = vpack.c.bf16 %v1330_v37, %v1330_v37  ;;  %v1367_v32 = vmax.f32 %v1296_v20, %v3325_v10  ;;  %v1294_v29 = vadd.f32 %v3311_v6, %v1223_v3  ;;  %v935_v37 = vld [vmem:[#allocation2 + $0xf8] sm:$0xff] }
 0x12d   :  { %v1333_v19 = vmax.f32 %v1262_v26, %v3325_v10  ;;  %1653 = vst.msk [vmem:[%s3487_s6 + $0x5c] sm:$0xf] %vm1629_vm3, %v1852_v63  ;;  %v1882_v23 = vpack.c.bf16 %v1362_v12, %v1362_v12  ;;  %v1855_v40 = vpack.c.bf16 %v1335_v24, %v1335_v24  ;;  %v1123_v34 = vadd.f32 %v1948_v30, %v931_v4  ;;  %v967_v20 = vld [vmem:[#allocation2 + $0x1f8] sm:$0xff] }
 0x12e   :  { %1685 = vst.msk [vmem:[%s3487_s6 + $0xdc] sm:$0xf] %vm1629_vm3, %v1884_v36  ;;  %v1155_v47 = vadd.f32 %v2012_v42, %v963_v62  ;;  %1651 = vst.msk [vmem:[%s3487_s6 + $0x54] sm:$0xf] %vm1629_vm3, %v1850_v58  ;;  %v1887_v9 = vpack.c.bf16 %v1367_v32, %v1367_v32  ;;  %v1365_v55 = vmax.f32 %v1294_v29, %v3325_v10  ;;  %v964_v42 = vld [vmem:[#allocation2 + $0x1e0] sm:$0xff]  ;;  %v933_v62 = vld [vmem:[#allocation2 + $0xe8] sm:$0xff] }
 0x12f   :  { %v1853_v7 = vpack.c.bf16 %v1333_v19, %v1333_v19  ;;  %v1121_v15 = vadd.f32 %v1944_v41, %v929_v16  ;;  %1683 = vst.msk [vmem:[%s3487_s6 + $0xd4] sm:$0xf] %vm1629_vm3, %v1882_v23  ;;  %1656 = vst.msk [vmem:[%s3487_s6 + $0x68] sm:$0xf] %vm1629_vm3, %v1855_v40  ;;  %v1194_v56 = vmul.f32 %v3294_v35, %v1123_v34  ;;  %v965_v16 = vld [vmem:[#allocation2 + $0x1e8] sm:$0xff] }
 0x130   :  { %v1226_v5 = vmul.f32 %v3294_v35, %v1155_v47  ;;  %v1153_v30 = vadd.f32 %v2008_v1, %v961_v60  ;;  %v1126_v46 = vadd.f32 %v1955_v0, %v934_v21  ;;  %1688 = vst.msk [vmem:[%s3487_s6 + $0xe8] sm:$0xf] %vm1629_vm3, %v1887_v9  ;;  %v1885_v41 = vpack.c.bf16 %v1365_v55, %v1365_v55 }
 0x131   :  { %1654 = vst.msk [vmem:[%s3487_s6 + $0x60] sm:$0xf] %vm1629_vm3, %v1853_v7  ;;  %v1192_v59 = vmul.f32 %v3294_v35, %v1121_v15  ;;  %v1158_v45 = vadd.f32 %v2019_v31, %v966_v33  ;;  %v1124_v1 = vadd.f32 %v1951_v54, %v932_v11  ;;  %v1265_v0 = vadd.f32 %v3311_v6, %v1194_v56 }
 0x132   :  { %v1297_v38 = vadd.f32 %v3311_v6, %v1226_v5  ;;  %v1224_v51 = vmul.f32 %v3294_v35, %v1153_v30  ;;  %v1197_v49 = vmul.f32 %v3294_v35, %v1126_v46  ;;  %1686 = vst.msk [vmem:[%s3487_s6 + $0xe0] sm:$0xf] %vm1629_vm3, %v1885_v41  ;;  %v1156_v54 = vadd.f32 %v2015_v57, %v964_v42 }
 0x133   :  { %v1263_v43 = vadd.f32 %v3311_v6, %v1192_v59  ;;  %v1229_v31 = vmul.f32 %v3294_v35, %v1158_v45  ;;  %v1195_v2 = vmul.f32 %v3294_v35, %v1124_v1  ;;  %v1336_v50 = vmax.f32 %v1265_v0, %v3325_v10 }
 0x134   :  { %v1368_v25 = vmax.f32 %v1297_v38, %v3325_v10  ;;  %v1295_v22 = vadd.f32 %v3311_v6, %v1224_v51  ;;  %v1268_v53 = vadd.f32 %v3311_v6, %v1197_v49  ;;  %v1227_v28 = vmul.f32 %v3294_v35, %v1156_v54 }
 0x135   :  { %v1334_v14 = vmax.f32 %v1263_v43, %v3325_v10  ;;  %v1300_v44 = vadd.f32 %v3311_v6, %v1229_v31  ;;  %v1266_v8 = vadd.f32 %v3311_v6, %v1195_v2  ;;  %v1856_v26 = vpack.c.bf16 %v1336_v50, %v1336_v50 }
 0x136   :  { %v1888_v57 = vpack.c.bf16 %v1368_v25, %v1368_v25  ;;  %v1366_v3 = vmax.f32 %v1295_v22, %v3325_v10  ;;  %v1339_v4 = vmax.f32 %v1268_v53, %v3325_v10  ;;  %v1298_v24 = vadd.f32 %v3311_v6, %v1227_v28 }
 0x137   :  { %v1854_v63 = vpack.c.bf16 %v1334_v14, %v1334_v14  ;;  %v1371_v36 = vmax.f32 %v1300_v44, %v3325_v10  ;;  %v1337_v12 = vmax.f32 %v1266_v8, %v3325_v10  ;;  %1657 = vst.msk [vmem:[%s3487_s6 + $0x6c] sm:$0xf] %vm1629_vm3, %v1856_v26  ;;  %v1127_v19 = vadd.f32 %v1956_v52, %v935_v37 }
 0x138   :  { %1689 = vst.msk [vmem:[%s3487_s6 + $0xec] sm:$0xf] %vm1629_vm3, %v1888_v57  ;;  %v1886_v58 = vpack.c.bf16 %v1366_v3, %v1366_v3  ;;  %v1859_v32 = vpack.c.bf16 %v1339_v4, %v1339_v4  ;;  %v1159_v29 = vadd.f32 %v2020_v61, %v967_v20  ;;  %v1369_v23 = vmax.f32 %v1298_v24, %v3325_v10 }
 0x139   :  { %1655 = vst.msk [vmem:[%s3487_s6 + $0x64] sm:$0xf] %vm1629_vm3, %v1854_v63  ;;  %v1891_v60 = vpack.c.bf16 %v1371_v36, %v1371_v36  ;;  %v1857_v21 = vpack.c.bf16 %v1337_v12, %v1337_v12  ;;  %v1125_v40 = vadd.f32 %v1952_v13, %v933_v62  ;;  %v1198_v18 = vmul.f32 %v3294_v35, %v1127_v19 }
 0x13a   :  { %1687 = vst.msk [vmem:[%s3487_s6 + $0xe4] sm:$0xf] %vm1629_vm3, %v1886_v58  ;;  %1660 = vst.msk [vmem:[%s3487_s6 + $0x78] sm:$0xf] %vm1629_vm3, %v1859_v32  ;;  %v1230_v48 = vmul.f32 %v3294_v35, %v1159_v29  ;;  %v1157_v52 = vadd.f32 %v2016_v39, %v965_v16  ;;  %v1889_v17 = vpack.c.bf16 %v1369_v23, %v1369_v23 }
 0x13b   :  { %1692 = vst.msk [vmem:[%s3487_s6 + $0xf8] sm:$0xf] %vm1629_vm3, %v1891_v60  ;;  %1658 = vst.msk [vmem:[%s3487_s6 + $0x70] sm:$0xf] %vm1629_vm3, %v1857_v21  ;;  %v1196_v61 = vmul.f32 %v3294_v35, %v1125_v40  ;;  %v1269_v13 = vadd.f32 %v3311_v6, %v1198_v18 }
 0x13c   :  { %v1301_v34 = vadd.f32 %v3311_v6, %v1230_v48  ;;  %v1228_v27 = vmul.f32 %v3294_v35, %v1157_v52  ;;  %1690 = vst.msk [vmem:[%s3487_s6 + $0xf0] sm:$0xf] %vm1629_vm3, %v1889_v17 }
 0x13d   :  { %v1267_v39 = vadd.f32 %v3311_v6, %v1196_v61  ;;  %v1340_v47 = vmax.f32 %v1269_v13, %v3325_v10 }
 0x13e   :  { %v1372_v33 = vmax.f32 %v1301_v34, %v3325_v10  ;;  %v1299_v11 = vadd.f32 %v3311_v6, %v1228_v27 }
 0x13f   :  { %v1338_v9 = vmax.f32 %v1267_v39, %v3325_v10  ;;  %v1860_v7 = vpack.c.bf16 %v1340_v47, %v1340_v47 }
 0x140   :  { %v1892_v55 = vpack.c.bf16 %v1372_v33, %v1372_v33  ;;  %v1370_v15 = vmax.f32 %v1299_v11, %v3325_v10 }
 0x141   :  { %v1858_v35 = vpack.c.bf16 %v1338_v9, %v1338_v9  ;;  %1661 = vst.msk [vmem:[%s3487_s6 + $0x7c] sm:$0xf] %vm1629_vm3, %v1860_v7 }
 0x142   :  { %1693 = vst.msk [vmem:[%s3487_s6 + $0xfc] sm:$0xf] %vm1629_vm3, %v1892_v55  ;;  %v1890_v56 = vpack.c.bf16 %v1370_v15, %v1370_v15 }
 0x143   :  { %1659 = vst.msk [vmem:[%s3487_s6 + $0x74] sm:$0xf] %vm1629_vm3, %v1858_v35 }
 0x144   :  { %1691 = vst.msk [vmem:[%s3487_s6 + $0xf4] sm:$0xf] %vm1629_vm3, %v1890_v56 }

// kernel: _lambda_.8
= control target key start
LH: loop header
LB: loop body
LE: loop exit
PB: predicated region body
PF: predicated region fallthrough
CT: control target
= control target key end

     0   :  { %vm159_vm0 = vcmask 1041408   ;;  %vm134_vm1 = vcmask 293888   ;;  %vm25_vm2 = vcmask 31744   ;;  %v573_v2 = vmov 0.0   ;;  %s807_s1 = inlined_call_operand.vmem [shape: bf16[36,4], index: 1, kind: input, shape index: {}]   ;;  %s808_s0 = inlined_call_operand.vmem [shape: bf16[128,36], index: 0, kind: input, shape index: {}]   ;;  %s809_s2 = inlined_call_operand.vmem [shape: f32[1,4], index: 2, kind: input, shape index: {}]   ;;  %s810_s3 = inlined_call_operand.vmem [shape: f32[1,4], index: 3, kind: input, shape index: {}]   ;;  %s811_s4 = inlined_call_operand.vmem [shape: f32[1,4], index: 4, kind: input, shape index: {}]   ;;  %s812_s5 = inlined_call_operand.vmem [shape: bf16[128,4], index: 5, kind: output, shape index: {}]  }
   0x1   :  { %v562_v0 = vld [vmem:[%s807_s1 + $0x10] ss:$0 sps:$4 sm:$0x33]   ;;  %v563_v1 = vld [vmem:[%s807_s1 + $0x8] sm:$0xff]   ;;  %28 = vst.msk [vmem:[#allocation2 + $0x10] sm:$0xff] %vm25_vm2, %v573_v2  ;;  %26 = vst.msk [vmem:[#allocation2] sm:$0xff] %vm25_vm2, %v573_v2 }
   0x2   :  { %27 = vst.msk [vmem:[#allocation2 + $0x8] sm:$0xff] %vm25_vm2, %v573_v2  ;;  %29 = vst.msk [vmem:[#allocation2 + $0x18] sm:$0xff] %vm25_vm2, %v573_v2  ;;  %559 = vmatprep.subr.msk.bf16.mxu0 %vm159_vm0, %v562_v0  ;;  %560 = vmatprep.subr.msk.bf16.mxu1 %vm159_vm0, %v562_v0  ;;  %v161_v3 = vsel %vm159_vm0, %v562_v0, 0  ;;  %v564_v4 = vld [vmem:[%s807_s1] sm:$0xff]   ;;  %v567_v7 = vld [vmem:[%s808_s0 + $0x8] sm:$0xff]   ;;  %vm445_vm3 = vcmask 27648  }
   0x3   :  { %30 = vst.msk [vmem:[#allocation2 + $0x20] sm:$0xff] %vm25_vm2, %v573_v2  ;;  %31 = vst.msk [vmem:[#allocation2 + $0x28] sm:$0xff] %vm25_vm2, %v573_v2  ;;  %532 = vmatpush3.bf16.msra.mxu0 %v161_v3  ;;  %556 = vmatpush3.bf16.msra.mxu1 %v161_v3  ;;  %v565_v5 = vld [vmem:[%s808_s0] sm:$0xff]   ;;  %v568_v8 = vld [vmem:[%s808_s0 + $0x28] sm:$0xff]  }
   0x4   :  { %32 = vst.msk [vmem:[#allocation2 + $0x30] sm:$0xff] %vm25_vm2, %v573_v2  ;;  %33 = vst.msk [vmem:[#allocation2 + $0x38] sm:$0xff] %vm25_vm2, %v573_v2  ;;  %533 = vmatprep.subr.bf16.mxu0 %v563_v1  ;;  %554 = vmatprep.subr.bf16.mxu1 %v563_v1  ;;  %v566_v6 = vld [vmem:[%s808_s0 + $0x20] sm:$0xff]   ;;  %v569_v9 = vld [vmem:[%s808_s0 + $0x10] sm:$0xff]  }
   0x5   :  { %34 = vst.msk [vmem:[#allocation2 + $0x40] sm:$0xff] %vm25_vm2, %v573_v2  ;;  %35 = vst.msk [vmem:[#allocation2 + $0x48] sm:$0xff] %vm25_vm2, %v573_v2  ;;  %537 = vmatprep.mubr.msk.bf16.mxu0 %vm134_vm1, %v565_v5  ;;  %545 = vmatprep.mubr.msk.bf16.mxu1 %vm134_vm1, %v566_v6  ;;  %v570_v10 = vld [vmem:[%s808_s0 + $0x30] sm:$0xff]   ;;  %v571_v11 = vld [vmem:[%s808_s0 + $0x18] sm:$0xff]  }
   0x6   :  { %36 = vst.msk [vmem:[#allocation2 + $0x50] sm:$0xff] %vm25_vm2, %v573_v2  ;;  %37 = vst.msk [vmem:[#allocation2 + $0x58] sm:$0xff] %vm25_vm2, %v573_v2  ;;  %v572_v12 = vld [vmem:[%s808_s0 + $0x38] sm:$0xff]   ;;  %v673_v39 = vld [vmem:[%s809_s2] ss:$0 sm:$0xff] }
   0x7   :  { %38 = vst.msk [vmem:[#allocation2 + $0x60] sm:$0xff] %vm25_vm2, %v573_v2  ;;  %39 = vst.msk [vmem:[#allocation2 + $0x68] sm:$0xff] %vm25_vm2, %v573_v2  ;;  %534 = vmatpush3.bf16.msra.mxu0 %v563_v1  ;;  %557 = vmatpush3.bf16.msra.mxu1 %v563_v1  ;;  %v680_v47 = vld [vmem:[%s810_s3] ss:$0 sm:$0xff] }
   0x8   :  { %40 = vst.msk [vmem:[#allocation2 + $0x70] sm:$0xff] %vm25_vm2, %v573_v2  ;;  %41 = vst.msk [vmem:[#allocation2 + $0x78] sm:$0xff] %vm25_vm2, %v573_v2  ;;  %535 = vmatprep.subr.bf16.mxu0 %v564_v4  ;;  %555 = vmatprep.subr.bf16.mxu1 %v564_v4  ;;  %v44_v13 = vld [vmem:[#allocation2 + $0x10] sm:$0xff]  ;;  %v42_v17 = vld [vmem:[#allocation2] sm:$0xff] }
   0x9   :  { %v45_v23 = vld [vmem:[#allocation2 + $0x18] sm:$0xff]  ;;  %v43_v29 = vld [vmem:[#allocation2 + $0x8] sm:$0xff]  ;;  %v689_v57 = vld [vmem:[%s811_s4] ss:$0 sm:$0xff] }
   0xa   :  { %v46_v42 = vld [vmem:[#allocation2 + $0x20] sm:$0xff]  ;;  %v47_v2 = vld [vmem:[#allocation2 + $0x28] sm:$0xff] }
   0xb   :  { %536 = vmatpush3.bf16.msra.mxu0 %v564_v4  ;;  %558 = vmatpush3.bf16.msra.mxu1 %v564_v4  ;;  %v48_v35 = vld [vmem:[#allocation2 + $0x30] sm:$0xff]  ;;  %v49_v55 = vld [vmem:[#allocation2 + $0x38] sm:$0xff] }
   0xc   :  { %v50_v18 = vld [vmem:[#allocation2 + $0x40] sm:$0xff]  ;;  %v51_v30 = vld [vmem:[#allocation2 + $0x48] sm:$0xff] }
   0xd   :  { %v52_v14 = vld [vmem:[#allocation2 + $0x50] sm:$0xff]  ;;  %v53_v24 = vld [vmem:[#allocation2 + $0x58] sm:$0xff] }
   0xe   :  { %538 = vmatmul.mubr.msk.bf16.vlgmr.msra.gmra.mxu0 %vm134_vm1, %v567_v7  ;;  %546 = vmatmul.mubr.msk.bf16.vlgmr.msra.gmra.mxu1 %vm134_vm1, %v568_v8  ;;  %v54_v43 = vld [vmem:[#allocation2 + $0x60] sm:$0xff]  ;;  %v55_v3 = vld [vmem:[#allocation2 + $0x68] sm:$0xff] }
   0xf   :  { %541 = vmatprep.mubr.msk.bf16.mxu0 %vm134_vm1, %v569_v9  ;;  %549 = vmatprep.mubr.msk.bf16.mxu1 %vm134_vm1, %v570_v10  ;;  %v56_v36 = vld [vmem:[#allocation2 + $0x70] sm:$0xff]  ;;  %v57_v56 = vld [vmem:[#allocation2 + $0x78] sm:$0xff] }
  0x16   :  { %542 = vmatmul.mubr.msk.bf16.gmra.mxu0 %vm134_vm1, %v571_v11  ;;  %550 = vmatmul.mubr.msk.bf16.gmra.mxu1 %vm134_vm1, %v572_v12 }
  0xce   :  { %v539_v15 = vpop.f32.mrf.mxu0  ;;  %v547_v16 = vpop.f32.mrf.mxu1 }
  0xcf   :  { %v262_v19 = vadd.f32 %v539_v15, %v44_v13  ;;  %v270_v20 = vadd.f32 %v547_v16, %v52_v14 }
  0xd0   :  { %v197_v21 = vpop.f32.mrf.mxu0  ;;  %v229_v22 = vpop.f32.mrf.mxu1 }
  0xd1   :  { %279 = vst.msk [vmem:[#allocation2 + $0x10] sm:$0xff] %vm25_vm2, %v262_v19  ;;  %287 = vst.msk [vmem:[#allocation2 + $0x50] sm:$0xff] %vm25_vm2, %v270_v20  ;;  %v260_v25 = vadd.f32 %v197_v21, %v42_v17  ;;  %v268_v26 = vadd.f32 %v229_v22, %v50_v18 }
  0xd2   :  { %v540_v27 = vpop.f32.mrf.mxu0  ;;  %v548_v28 = vpop.f32.mrf.mxu1 }
  0xd3   :  { %277 = vst.msk [vmem:[#allocation2] sm:$0xff] %vm25_vm2, %v260_v25  ;;  %285 = vst.msk [vmem:[#allocation2 + $0x40] sm:$0xff] %vm25_vm2, %v268_v26  ;;  %v263_v31 = vadd.f32 %v540_v27, %v45_v23  ;;  %v271_v32 = vadd.f32 %v548_v28, %v53_v24 }
  0xd4   :  { %v200_v33 = vpop.f32.mrf.mxu0  ;;  %v232_v34 = vpop.f32.mrf.mxu1 }
  0xd5   :  { %280 = vst.msk [vmem:[#allocation2 + $0x18] sm:$0xff] %vm25_vm2, %v263_v31  ;;  %288 = vst.msk [vmem:[#allocation2 + $0x58] sm:$0xff] %vm25_vm2, %v271_v32  ;;  %v261_v37 = vadd.f32 %v200_v33, %v43_v29  ;;  %v269_v38 = vadd.f32 %v232_v34, %v51_v30 }
  0xd6   :  { %v543_v40 = vpop.f32.mrf.mxu0  ;;  %v551_v41 = vpop.f32.mrf.mxu1 }
  0xd7   :  { %278 = vst.msk [vmem:[#allocation2 + $0x8] sm:$0xff] %vm25_vm2, %v261_v37  ;;  %286 = vst.msk [vmem:[#allocation2 + $0x48] sm:$0xff] %vm25_vm2, %v269_v38  ;;  %v266_v44 = vadd.f32 %v543_v40, %v48_v35  ;;  %v274_v45 = vadd.f32 %v551_v41, %v56_v36 }
  0xd8   :  { %v298_v46 = vld [vmem:[#allocation2 + $0x10] sm:$0xff]  ;;  %v213_v49 = vpop.f32.mrf.mxu0  ;;  %v245_v50 = vpop.f32.mrf.mxu1 }
  0xd9   :  { %v306_v48 = vld [vmem:[#allocation2 + $0x50] sm:$0xff]  ;;  %v321_v51 = vmul.f32 %v673_v39, %v298_v46  ;;  %283 = vst.msk [vmem:[#allocation2 + $0x30] sm:$0xff] %vm25_vm2, %v266_v44  ;;  %291 = vst.msk [vmem:[#allocation2 + $0x70] sm:$0xff] %vm25_vm2, %v274_v45  ;;  %v264_v53 = vadd.f32 %v213_v49, %v46_v42  ;;  %v272_v54 = vadd.f32 %v245_v50, %v54_v43 }
  0xda   :  { %v329_v52 = vmul.f32 %v673_v39, %v306_v48  ;;  %v296_v58 = vld [vmem:[#allocation2] sm:$0xff]  ;;  %v544_v60 = vpop.f32.mrf.mxu0  ;;  %v552_v61 = vpop.f32.mrf.mxu1 }
  0xdb   :  { %v304_v59 = vld [vmem:[#allocation2 + $0x40] sm:$0xff]  ;;  %v344_v62 = vadd.f32 %v680_v47, %v321_v51  ;;  %v319_v0 = vmul.f32 %v673_v39, %v296_v58  ;;  %281 = vst.msk [vmem:[#allocation2 + $0x20] sm:$0xff] %vm25_vm2, %v264_v53  ;;  %289 = vst.msk [vmem:[#allocation2 + $0x60] sm:$0xff] %vm25_vm2, %v272_v54  ;;  %v267_v6 = vadd.f32 %v544_v60, %v49_v55 }
  0xdc   :  { %v352_v63 = vadd.f32 %v680_v47, %v329_v52  ;;  %v327_v1 = vmul.f32 %v673_v39, %v304_v59  ;;  %v299_v4 = vld [vmem:[#allocation2 + $0x18] sm:$0xff]  ;;  %v275_v7 = vadd.f32 %v552_v61, %v57_v56  ;;  %v216_v8 = vpop.f32.mrf.mxu0  ;;  %v248_v9 = vpop.f32.mrf.mxu1 }
  0xdd   :  { %v307_v5 = vld [vmem:[#allocation2 + $0x58] sm:$0xff]  ;;  %v367_v10 = vmax.f32 %v344_v62, %v689_v57  ;;  %v342_v12 = vadd.f32 %v680_v47, %v319_v0  ;;  %v322_v14 = vmul.f32 %v673_v39, %v299_v4  ;;  %284 = vst.msk [vmem:[#allocation2 + $0x38] sm:$0xff] %vm25_vm2, %v267_v6  ;;  %v265_v18 = vadd.f32 %v216_v8, %v47_v2 }
  0xde   :  { %v375_v11 = vmax.f32 %v352_v63, %v689_v57  ;;  %v350_v13 = vadd.f32 %v680_v47, %v327_v1  ;;  %v330_v15 = vmul.f32 %v673_v39, %v307_v5  ;;  %v297_v16 = vld [vmem:[#allocation2 + $0x8] sm:$0xff]  ;;  %292 = vst.msk [vmem:[#allocation2 + $0x78] sm:$0xff] %vm25_vm2, %v275_v7  ;;  %v273_v19 = vadd.f32 %v248_v9, %v55_v3 }
  0xdf   :  { %v305_v17 = vld [vmem:[#allocation2 + $0x48] sm:$0xff]  ;;  %v506_v20 = vpack.c.bf16 %v367_v10, %v367_v10  ;;  %v365_v22 = vmax.f32 %v342_v12, %v689_v57  ;;  %v345_v24 = vadd.f32 %v680_v47, %v322_v14  ;;  %v320_v26 = vmul.f32 %v673_v39, %v297_v16  ;;  %282 = vst.msk [vmem:[#allocation2 + $0x28] sm:$0xff] %vm25_vm2, %v265_v18 }
  0xe0   :  { %v514_v21 = vpack.c.bf16 %v375_v11, %v375_v11  ;;  %v373_v23 = vmax.f32 %v350_v13, %v689_v57  ;;  %v353_v25 = vadd.f32 %v680_v47, %v330_v15  ;;  %v328_v27 = vmul.f32 %v673_v39, %v305_v17  ;;  %v302_v28 = vld [vmem:[#allocation2 + $0x30] sm:$0xff]  ;;  %290 = vst.msk [vmem:[#allocation2 + $0x68] sm:$0xff] %vm25_vm2, %v273_v19 }
  0xe1   :  { %v310_v29 = vld [vmem:[#allocation2 + $0x70] sm:$0xff]  ;;  %448 = vst.msk [vmem:[%s812_s5 + $0x8] sm:$0xf] %vm445_vm3, %v506_v20  ;;  %v504_v30 = vpack.c.bf16 %v365_v22, %v365_v22  ;;  %v325_v32 = vmul.f32 %v673_v39, %v302_v28  ;;  %v368_v34 = vmax.f32 %v345_v24, %v689_v57  ;;  %v343_v36 = vadd.f32 %v680_v47, %v320_v26 }
  0xe2   :  { %456 = vst.msk [vmem:[%s812_s5 + $0x28] sm:$0xf] %vm445_vm3, %v514_v21  ;;  %v512_v31 = vpack.c.bf16 %v373_v23, %v373_v23  ;;  %v333_v33 = vmul.f32 %v673_v39, %v310_v29  ;;  %v376_v35 = vmax.f32 %v353_v25, %v689_v57  ;;  %v351_v37 = vadd.f32 %v680_v47, %v328_v27  ;;  %v300_v38 = vld [vmem:[#allocation2 + $0x20] sm:$0xff] }
  0xe3   :  { %v308_v40 = vld [vmem:[#allocation2 + $0x60] sm:$0xff]  ;;  %446 = vst.msk [vmem:[%s812_s5] sm:$0xf] %vm445_vm3, %v504_v30  ;;  %v348_v41 = vadd.f32 %v680_v47, %v325_v32  ;;  %v323_v43 = vmul.f32 %v673_v39, %v300_v38  ;;  %v507_v45 = vpack.c.bf16 %v368_v34, %v368_v34  ;;  %v366_v48 = vmax.f32 %v343_v36, %v689_v57 }
  0xe4   :  { %454 = vst.msk [vmem:[%s812_s5 + $0x20] sm:$0xf] %vm445_vm3, %v512_v31  ;;  %v356_v42 = vadd.f32 %v680_v47, %v333_v33  ;;  %v331_v44 = vmul.f32 %v673_v39, %v308_v40  ;;  %v515_v46 = vpack.c.bf16 %v376_v35, %v376_v35  ;;  %v374_v49 = vmax.f32 %v351_v37, %v689_v57  ;;  %v303_v54 = vld [vmem:[#allocation2 + $0x38] sm:$0xff] }
  0xe5   :  { %v371_v50 = vmax.f32 %v348_v41, %v689_v57  ;;  %v346_v52 = vadd.f32 %v680_v47, %v323_v43  ;;  %v311_v55 = vld [vmem:[#allocation2 + $0x78] sm:$0xff]  ;;  %449 = vst.msk [vmem:[%s812_s5 + $0xc] sm:$0xf] %vm445_vm3, %v507_v45  ;;  %v505_v56 = vpack.c.bf16 %v366_v48, %v366_v48  ;;  %v326_v59 = vmul.f32 %v673_v39, %v303_v54 }
  0xe6   :  { %v379_v51 = vmax.f32 %v356_v42, %v689_v57  ;;  %v354_v53 = vadd.f32 %v680_v47, %v331_v44  ;;  %457 = vst.msk [vmem:[%s812_s5 + $0x2c] sm:$0xf] %vm445_vm3, %v515_v46  ;;  %v513_v58 = vpack.c.bf16 %v374_v49, %v374_v49  ;;  %v334_v60 = vmul.f32 %v673_v39, %v311_v55  ;;  %v301_v1 = vld [vmem:[#allocation2 + $0x28] sm:$0xff] }
  0xe7   :  { %v510_v61 = vpack.c.bf16 %v371_v50, %v371_v50  ;;  %v369_v63 = vmax.f32 %v346_v52, %v689_v57  ;;  %v309_v2 = vld [vmem:[#allocation2 + $0x68] sm:$0xff]  ;;  %447 = vst.msk [vmem:[%s812_s5 + $0x4] sm:$0xf] %vm445_vm3, %v505_v56  ;;  %v349_v3 = vadd.f32 %v680_v47, %v326_v59  ;;  %v324_v5 = vmul.f32 %v673_v39, %v301_v1 }
  0xe8   :  { %v518_v62 = vpack.c.bf16 %v379_v51, %v379_v51  ;;  %v377_v0 = vmax.f32 %v354_v53, %v689_v57  ;;  %455 = vst.msk [vmem:[%s812_s5 + $0x24] sm:$0xf] %vm445_vm3, %v513_v58  ;;  %v357_v4 = vadd.f32 %v680_v47, %v334_v60  ;;  %v332_v6 = vmul.f32 %v673_v39, %v309_v2 }
  0xe9   :  { %452 = vst.msk [vmem:[%s812_s5 + $0x18] sm:$0xf] %vm445_vm3, %v510_v61  ;;  %v508_v7 = vpack.c.bf16 %v369_v63, %v369_v63  ;;  %v372_v9 = vmax.f32 %v349_v3, %v689_v57  ;;  %v347_v11 = vadd.f32 %v680_v47, %v324_v5 }
  0xea   :  { %460 = vst.msk [vmem:[%s812_s5 + $0x38] sm:$0xf] %vm445_vm3, %v518_v62  ;;  %v516_v8 = vpack.c.bf16 %v377_v0, %v377_v0  ;;  %v380_v10 = vmax.f32 %v357_v4, %v689_v57  ;;  %v355_v39 = vadd.f32 %v680_v47, %v332_v6 }
  0xeb   :  { %450 = vst.msk [vmem:[%s812_s5 + $0x10] sm:$0xf] %vm445_vm3, %v508_v7  ;;  %v511_v12 = vpack.c.bf16 %v372_v9, %v372_v9  ;;  %v370_v14 = vmax.f32 %v347_v11, %v689_v57 }
  0xec   :  { %458 = vst.msk [vmem:[%s812_s5 + $0x30] sm:$0xf] %vm445_vm3, %v516_v8  ;;  %v519_v13 = vpack.c.bf16 %v380_v10, %v380_v10  ;;  %v378_v15 = vmax.f32 %v355_v39, %v689_v57 }
  0xed   :  { %453 = vst.msk [vmem:[%s812_s5 + $0x1c] sm:$0xf] %vm445_vm3, %v511_v12  ;;  %v509_v47 = vpack.c.bf16 %v370_v14, %v370_v14 }
  0xee   :  { %461 = vst.msk [vmem:[%s812_s5 + $0x3c] sm:$0xf] %vm445_vm3, %v519_v13  ;;  %v517_v16 = vpack.c.bf16 %v378_v15, %v378_v15 }
  0xef   :  { %451 = vst.msk [vmem:[%s812_s5 + $0x14] sm:$0xf] %vm445_vm3, %v509_v47 }
  0xf0   :  { %459 = vst.msk [vmem:[%s812_s5 + $0x34] sm:$0xf] %vm445_vm3, %v517_v16 }

// kernel: _lambda_.10
= control target key start
LH: loop header
LB: loop body
LE: loop exit
PB: predicated region body
PF: predicated region fallthrough
CT: control target
= control target key end

     0   :  { %vm143_vm0 = vcmask 1041408   ;;  %vm118_vm1 = vcmask 31744   ;;  %vm28_vm2 = vcmask 130048   ;;  %v628_v1 = vmov 0.0   ;;  %s949_s1 = inlined_call_operand.vmem [shape: bf16[4,16], index: 1, kind: input, shape index: {}]   ;;  %s950_s0 = inlined_call_operand.vmem [shape: bf16[128,4], index: 0, kind: input, shape index: {}]   ;;  %s951_s5 = inlined_call_operand.vmem [shape: bf16[128,16], index: 5, kind: input, shape index: {}]   ;;  %s952_s2 = inlined_call_operand.vmem [shape: f32[1,16], index: 2, kind: input, shape index: {}]   ;;  %s953_s3 = inlined_call_operand.vmem [shape: f32[1,16], index: 3, kind: input, shape index: {}]   ;;  %s954_s4 = inlined_call_operand.vmem [shape: f32[1,16], index: 4, kind: input, shape index: {}]   ;;  %s955_s6 = inlined_call_operand.vmem [shape: bf16[128,16], index: 6, kind: output, shape index: {}]  }
   0x1   :  { %v77_v0 = vld [vmem:[%s949_s1] sm:$0x3]  ;;  %31 = vst.msk [vmem:[#allocation2 + $0x10] sm:$0xff] %vm28_vm2, %v628_v1  ;;  %29 = vst.msk [vmem:[#allocation2] sm:$0xff] %vm28_vm2, %v628_v1  ;;  %v622_v5 = vld [vmem:[%s950_s0 + $0x8] sm:$0xff]   ;;  %vm477_vm3 = vcmask 125952  }
   0x2   :  { %30 = vst.msk [vmem:[#allocation2 + $0x8] sm:$0xff] %vm28_vm2, %v628_v1  ;;  %32 = vst.msk [vmem:[#allocation2 + $0x18] sm:$0xff] %vm28_vm2, %v628_v1  ;;  %617 = vmatprep.subr.msk.bf16.mxu0 %vm143_vm0, %v77_v0  ;;  %618 = vmatprep.subr.msk.bf16.mxu1 %vm143_vm0, %v77_v0  ;;  %v145_v2 = vsel %vm143_vm0, %v77_v0, 0  ;;  %v620_v3 = vld [vmem:[%s950_s0] sm:$0xff]   ;;  %v623_v6 = vld [vmem:[%s950_s0 + $0x28] sm:$0xff]  }
   0x3   :  { %33 = vst.msk [vmem:[#allocation2 + $0x20] sm:$0xff] %vm28_vm2, %v628_v1  ;;  %34 = vst.msk [vmem:[#allocation2 + $0x28] sm:$0xff] %vm28_vm2, %v628_v1  ;;  %598 = vmatpush3.bf16.msra.mxu0 %v145_v2  ;;  %616 = vmatpush3.bf16.msra.mxu1 %v145_v2  ;;  %v621_v4 = vld [vmem:[%s950_s0 + $0x20] sm:$0xff]   ;;  %v624_v7 = vld [vmem:[%s950_s0 + $0x10] sm:$0xff]  }
   0x4   :  { %35 = vst.msk [vmem:[#allocation2 + $0x30] sm:$0xff] %vm28_vm2, %v628_v1  ;;  %36 = vst.msk [vmem:[#allocation2 + $0x38] sm:$0xff] %vm28_vm2, %v628_v1  ;;  %599 = vmatprep.mubr.msk.bf16.mxu0 %vm118_vm1, %v620_v3  ;;  %607 = vmatprep.mubr.msk.bf16.mxu1 %vm118_vm1, %v621_v4  ;;  %v625_v8 = vld [vmem:[%s950_s0 + $0x30] sm:$0xff]   ;;  %v626_v9 = vld [vmem:[%s950_s0 + $0x18] sm:$0xff]  }
   0x5   :  { %37 = vst.msk [vmem:[#allocation2 + $0x40] sm:$0xff] %vm28_vm2, %v628_v1  ;;  %38 = vst.msk [vmem:[#allocation2 + $0x48] sm:$0xff] %vm28_vm2, %v628_v1  ;;  %v627_v10 = vld [vmem:[%s950_s0 + $0x38] sm:$0xff]   ;;  %v722_v24 = vld [vmem:[%s951_s5 + $0x8] sm:$0xff]  }
   0x6   :  { %39 = vst.msk [vmem:[#allocation2 + $0x50] sm:$0xff] %vm28_vm2, %v628_v1  ;;  %40 = vst.msk [vmem:[#allocation2 + $0x58] sm:$0xff] %vm28_vm2, %v628_v1  ;;  %600 = vmatmul.mubr.msk.bf16.vlgmr.msra.gmra.mxu0 %vm118_vm1, %v622_v5  ;;  %608 = vmatmul.mubr.msk.bf16.vlgmr.msra.gmra.mxu1 %vm118_vm1, %v623_v6  ;;  %v728_v29 = vld [vmem:[%s951_s5 + $0x28] sm:$0xff]   ;;  %v734_v30 = vld [vmem:[%s951_s5] sm:$0xff]   ;;  %v555_v38 = vunpack.c.l.bf16 %v722_v24  ;;  %v556_v52 = vunpack.c.h.bf16 %v722_v24 }
   0x7   :  { %41 = vst.msk [vmem:[#allocation2 + $0x60] sm:$0xff] %vm28_vm2, %v628_v1  ;;  %42 = vst.msk [vmem:[#allocation2 + $0x68] sm:$0xff] %vm28_vm2, %v628_v1  ;;  %603 = vmatprep.mubr.msk.bf16.mxu0 %vm118_vm1, %v624_v7  ;;  %611 = vmatprep.mubr.msk.bf16.mxu1 %vm118_vm1, %v625_v8  ;;  %v739_v31 = vld [vmem:[%s951_s5 + $0x20] sm:$0xff]   ;;  %v752_v41 = vld [vmem:[%s951_s5 + $0x18] sm:$0xff]   ;;  %v571_v44 = vunpack.c.l.bf16 %v728_v29  ;;  %v551_v45 = vunpack.c.l.bf16 %v734_v30  ;;  %v572_v53 = vunpack.c.h.bf16 %v728_v29  ;;  %v552_v54 = vunpack.c.h.bf16 %v734_v30 }
   0x8   :  { %43 = vst.msk [vmem:[#allocation2 + $0x70] sm:$0xff] %vm28_vm2, %v628_v1  ;;  %44 = vst.msk [vmem:[#allocation2 + $0x78] sm:$0xff] %vm28_vm2, %v628_v1  ;;  %v47_v11 = vld [vmem:[#allocation2 + $0x10] sm:$0xff]  ;;  %v45_v14 = vld [vmem:[#allocation2] sm:$0xff]  ;;  %v567_v46 = vunpack.c.l.bf16 %v739_v31  ;;  %v568_v60 = vunpack.c.h.bf16 %v739_v31  ;;  %v563_v61 = vunpack.c.l.bf16 %v752_v41 }
   0x9   :  { %v48_v20 = vld [vmem:[#allocation2 + $0x18] sm:$0xff]  ;;  %v46_v27 = vld [vmem:[#allocation2 + $0x8] sm:$0xff]  ;;  %v744_v34 = vld [vmem:[%s952_s2] ss:$0 sm:$0xff] }
   0xa   :  { %v757_v43 = vld [vmem:[%s951_s5 + $0x38] sm:$0xff]   ;;  %v49_v49 = vld [vmem:[#allocation2 + $0x20] sm:$0xff]  ;;  %v766_v50 = vld [vmem:[%s951_s5 + $0x10] sm:$0xff]  }
   0xb   :  { %v51_v37 = vld [vmem:[#allocation2 + $0x30] sm:$0xff]  ;;  %v780_v59 = vld [vmem:[%s953_s3] ss:$0 sm:$0xff]  ;;  %v579_v63 = vunpack.c.l.bf16 %v757_v43  ;;  %v52_v1 = vld [vmem:[#allocation2 + $0x38] sm:$0xff]  ;;  %v559_v5 = vunpack.c.l.bf16 %v766_v50 }
   0xc   :  { %v53_v17 = vld [vmem:[#allocation2 + $0x40] sm:$0xff]  ;;  %v54_v28 = vld [vmem:[#allocation2 + $0x48] sm:$0xff]  ;;  %v771_v51 = vld [vmem:[%s951_s5 + $0x30] sm:$0xff]  }
   0xd   :  { %v55_v12 = vld [vmem:[#allocation2 + $0x50] sm:$0xff]  ;;  %v56_v23 = vld [vmem:[#allocation2 + $0x58] sm:$0xff]  ;;  %v575_v7 = vunpack.c.l.bf16 %v771_v51 }
   0xe   :  { %604 = vmatmul.mubr.msk.bf16.gmra.mxu0 %vm118_vm1, %v626_v9  ;;  %612 = vmatmul.mubr.msk.bf16.gmra.mxu1 %vm118_vm1, %v627_v10  ;;  %v57_v57 = vld [vmem:[#allocation2 + $0x60] sm:$0xff] }
   0xf   :  { %v59_v42 = vld [vmem:[#allocation2 + $0x70] sm:$0xff]  ;;  %v60_v8 = vld [vmem:[#allocation2 + $0x78] sm:$0xff] }
  0xc6   :  { %v601_v13 = vpop.f32.mrf.mxu0  ;;  %v609_v16 = vpop.f32.mrf.mxu1 }
  0xc7   :  { %v246_v15 = vadd.f32 %v601_v13, %v47_v11  ;;  %v254_v18 = vadd.f32 %v609_v16, %v55_v12  ;;  %v564_v13 = vunpack.c.h.bf16 %v752_v41 }
  0xc8   :  { %v181_v19 = vpop.f32.mrf.mxu0  ;;  %v213_v22 = vpop.f32.mrf.mxu1 }
  0xc9   :  { %263 = vst.msk [vmem:[#allocation2 + $0x10] sm:$0xff] %vm28_vm2, %v246_v15  ;;  %v244_v21 = vadd.f32 %v181_v19, %v45_v14  ;;  %271 = vst.msk [vmem:[#allocation2 + $0x50] sm:$0xff] %vm28_vm2, %v254_v18  ;;  %v252_v25 = vadd.f32 %v213_v22, %v53_v17  ;;  %v580_v14 = vunpack.c.h.bf16 %v757_v43  ;;  %v50_v15 = vld [vmem:[#allocation2 + $0x28] sm:$0xff] }
  0xca   :  { %v602_v26 = vpop.f32.mrf.mxu0  ;;  %v610_v33 = vpop.f32.mrf.mxu1  ;;  %v58_v22 = vld [vmem:[#allocation2 + $0x68] sm:$0xff] }
  0xcb   :  { %261 = vst.msk [vmem:[#allocation2] sm:$0xff] %vm28_vm2, %v244_v21  ;;  %v247_v32 = vadd.f32 %v602_v26, %v48_v20  ;;  %269 = vst.msk [vmem:[#allocation2 + $0x40] sm:$0xff] %vm28_vm2, %v252_v25  ;;  %v255_v35 = vadd.f32 %v610_v33, %v56_v23  ;;  %v560_v21 = vunpack.c.h.bf16 %v766_v50  ;;  %v801_v23 = vld [vmem:[%s954_s4] ss:$0 sm:$0xff]  ;;  %v576_v33 = vunpack.c.h.bf16 %v771_v51 }
  0xcc   :  { %v184_v36 = vpop.f32.mrf.mxu0  ;;  %v216_v40 = vpop.f32.mrf.mxu1 }
  0xcd   :  { %264 = vst.msk [vmem:[#allocation2 + $0x18] sm:$0xff] %vm28_vm2, %v247_v32  ;;  %v245_v39 = vadd.f32 %v184_v36, %v46_v27  ;;  %272 = vst.msk [vmem:[#allocation2 + $0x58] sm:$0xff] %vm28_vm2, %v255_v35  ;;  %v253_v47 = vadd.f32 %v216_v40, %v54_v28 }
  0xce   :  { %v605_v48 = vpop.f32.mrf.mxu0  ;;  %v613_v56 = vpop.f32.mrf.mxu1 }
  0xcf   :  { %262 = vst.msk [vmem:[#allocation2 + $0x8] sm:$0xff] %vm28_vm2, %v245_v39  ;;  %v250_v55 = vadd.f32 %v605_v48, %v51_v37  ;;  %270 = vst.msk [vmem:[#allocation2 + $0x48] sm:$0xff] %vm28_vm2, %v253_v47  ;;  %v258_v62 = vadd.f32 %v613_v56, %v59_v42 }
  0xd0   :  { %v282_v58 = vld [vmem:[#allocation2 + $0x10] sm:$0xff]  ;;  %v197_v0 = vpop.f32.mrf.mxu0  ;;  %v229_v6 = vpop.f32.mrf.mxu1 }
  0xd1   :  { %v305_v2 = vmul.f32 %v744_v34, %v282_v58  ;;  %v290_v3 = vld [vmem:[#allocation2 + $0x50] sm:$0xff]  ;;  %267 = vst.msk [vmem:[#allocation2 + $0x30] sm:$0xff] %vm28_vm2, %v250_v55  ;;  %v248_v4 = vadd.f32 %v197_v0, %v49_v49  ;;  %275 = vst.msk [vmem:[#allocation2 + $0x70] sm:$0xff] %vm28_vm2, %v258_v62  ;;  %v256_v11 = vadd.f32 %v229_v6, %v57_v57 }
  0xd2   :  { %v313_v9 = vmul.f32 %v744_v34, %v290_v3  ;;  %v280_v10 = vld [vmem:[#allocation2] sm:$0xff]  ;;  %v606_v12 = vpop.f32.mrf.mxu0  ;;  %v614_v20 = vpop.f32.mrf.mxu1 }
  0xd3   :  { %v328_v16 = vadd.f32 %v780_v59, %v305_v2  ;;  %v303_v17 = vmul.f32 %v744_v34, %v280_v10  ;;  %v288_v18 = vld [vmem:[#allocation2 + $0x40] sm:$0xff]  ;;  %265 = vst.msk [vmem:[#allocation2 + $0x20] sm:$0xff] %vm28_vm2, %v248_v4  ;;  %v251_v19 = vadd.f32 %v606_v12, %v52_v1  ;;  %273 = vst.msk [vmem:[#allocation2 + $0x60] sm:$0xff] %vm28_vm2, %v256_v11 }
  0xd4   :  { %v336_v25 = vadd.f32 %v780_v59, %v313_v9  ;;  %v311_v26 = vmul.f32 %v744_v34, %v288_v18  ;;  %v283_v27 = vld [vmem:[#allocation2 + $0x18] sm:$0xff]  ;;  %v259_v28 = vadd.f32 %v614_v20, %v60_v8  ;;  %v200_v32 = vpop.f32.mrf.mxu0  ;;  %v232_v42 = vpop.f32.mrf.mxu1 }
  0xd5   :  { %v376_v35 = vadd.f32 %v555_v38, %v328_v16  ;;  %v326_v36 = vadd.f32 %v780_v59, %v303_v17  ;;  %v306_v37 = vmul.f32 %v744_v34, %v283_v27  ;;  %v291_v39 = vld [vmem:[#allocation2 + $0x58] sm:$0xff]  ;;  %268 = vst.msk [vmem:[#allocation2 + $0x38] sm:$0xff] %vm28_vm2, %v251_v19  ;;  %v249_v40 = vadd.f32 %v200_v32, %v50_v15 }
  0xd6   :  { %v384_v47 = vadd.f32 %v571_v44, %v336_v25  ;;  %v334_v48 = vadd.f32 %v780_v59, %v311_v26  ;;  %v314_v49 = vmul.f32 %v744_v34, %v291_v39  ;;  %v281_v55 = vld [vmem:[#allocation2 + $0x8] sm:$0xff]  ;;  %276 = vst.msk [vmem:[#allocation2 + $0x78] sm:$0xff] %vm28_vm2, %v259_v28  ;;  %v257_v38 = vadd.f32 %v232_v42, %v58_v22 }
  0xd7   :  { %v399_v56 = vmax.f32 %v376_v35, %v801_v23  ;;  %v374_v57 = vadd.f32 %v551_v45, %v326_v36  ;;  %v329_v58 = vadd.f32 %v780_v59, %v306_v37  ;;  %v304_v62 = vmul.f32 %v744_v34, %v281_v55  ;;  %v289_v0 = vld [vmem:[#allocation2 + $0x48] sm:$0xff]  ;;  %266 = vst.msk [vmem:[#allocation2 + $0x28] sm:$0xff] %vm28_vm2, %v249_v40 }
  0xd8   :  { %v407_v44 = vmax.f32 %v384_v47, %v801_v23  ;;  %v382_v1 = vadd.f32 %v567_v46, %v334_v48  ;;  %v337_v2 = vadd.f32 %v780_v59, %v314_v49  ;;  %v312_v3 = vmul.f32 %v744_v34, %v289_v0  ;;  %v286_v4 = vld [vmem:[#allocation2 + $0x30] sm:$0xff]  ;;  %274 = vst.msk [vmem:[#allocation2 + $0x68] sm:$0xff] %vm28_vm2, %v257_v38 }
  0xd9   :  { %v535_v45 = vpack.c.bf16 %v399_v56, %v399_v56  ;;  %v397_v6 = vmax.f32 %v374_v57, %v801_v23  ;;  %v377_v8 = vadd.f32 %v556_v52, %v329_v58  ;;  %v327_v9 = vadd.f32 %v780_v59, %v304_v62  ;;  %v294_v10 = vld [vmem:[#allocation2 + $0x70] sm:$0xff] }
  0xda   :  { %v543_v11 = vpack.c.bf16 %v407_v44, %v407_v44  ;;  %v405_v12 = vmax.f32 %v382_v1, %v801_v23  ;;  %v385_v46 = vadd.f32 %v572_v53, %v337_v2  ;;  %v335_v15 = vadd.f32 %v780_v59, %v312_v3  ;;  %v284_v16 = vld [vmem:[#allocation2 + $0x20] sm:$0xff] }
  0xdb   :  { %480 = vst.msk [vmem:[%s955_s6 + $0x8] sm:$0xf] %vm477_vm3, %v535_v45  ;;  %v533_v17 = vpack.c.bf16 %v397_v6, %v397_v6  ;;  %v400_v24 = vmax.f32 %v377_v8, %v801_v23  ;;  %v375_v52 = vadd.f32 %v552_v54, %v327_v9  ;;  %v309_v18 = vmul.f32 %v744_v34, %v286_v4  ;;  %v292_v19 = vld [vmem:[#allocation2 + $0x60] sm:$0xff] }
  0xdc   :  { %488 = vst.msk [vmem:[%s955_s6 + $0x28] sm:$0xf] %vm477_vm3, %v543_v11  ;;  %v541_v29 = vpack.c.bf16 %v405_v12, %v405_v12  ;;  %v408_v53 = vmax.f32 %v385_v46, %v801_v23  ;;  %v383_v20 = vadd.f32 %v568_v60, %v335_v15  ;;  %v317_v22 = vmul.f32 %v744_v34, %v294_v10  ;;  %v287_v25 = vld [vmem:[#allocation2 + $0x38] sm:$0xff] }
  0xdd   :  { %478 = vst.msk [vmem:[%s955_s6] sm:$0xf] %vm477_vm3, %v533_v17  ;;  %v536_v30 = vpack.c.bf16 %v400_v24, %v400_v24  ;;  %v398_v54 = vmax.f32 %v375_v52, %v801_v23  ;;  %v332_v26 = vadd.f32 %v780_v59, %v309_v18  ;;  %v307_v27 = vmul.f32 %v744_v34, %v284_v16  ;;  %v295_v28 = vld [vmem:[#allocation2 + $0x78] sm:$0xff] }
  0xde   :  { %486 = vst.msk [vmem:[%s955_s6 + $0x20] sm:$0xf] %vm477_vm3, %v541_v29  ;;  %v544_v31 = vpack.c.bf16 %v408_v53, %v408_v53  ;;  %v406_v60 = vmax.f32 %v383_v20, %v801_v23  ;;  %v340_v32 = vadd.f32 %v780_v59, %v317_v22  ;;  %v315_v35 = vmul.f32 %v744_v34, %v292_v19  ;;  %v285_v36 = vld [vmem:[#allocation2 + $0x28] sm:$0xff] }
  0xdf   :  { %481 = vst.msk [vmem:[%s955_s6 + $0xc] sm:$0xf] %vm477_vm3, %v536_v30  ;;  %v534_v37 = vpack.c.bf16 %v398_v54, %v398_v54  ;;  %v380_v39 = vadd.f32 %v563_v61, %v332_v26  ;;  %v330_v40 = vadd.f32 %v780_v59, %v307_v27  ;;  %v310_v42 = vmul.f32 %v744_v34, %v287_v25  ;;  %v293_v47 = vld [vmem:[#allocation2 + $0x68] sm:$0xff] }
  0xe0   :  { %489 = vst.msk [vmem:[%s955_s6 + $0x2c] sm:$0xf] %vm477_vm3, %v544_v31  ;;  %v542_v48 = vpack.c.bf16 %v406_v60, %v406_v60  ;;  %v388_v49 = vadd.f32 %v579_v63, %v340_v32  ;;  %v338_v55 = vadd.f32 %v780_v59, %v315_v35  ;;  %v318_v38 = vmul.f32 %v744_v34, %v295_v28 }
  0xe1   :  { %479 = vst.msk [vmem:[%s955_s6 + $0x4] sm:$0xf] %vm477_vm3, %v534_v37  ;;  %v403_v61 = vmax.f32 %v380_v39, %v801_v23  ;;  %v378_v56 = vadd.f32 %v559_v5, %v330_v40  ;;  %v333_v57 = vadd.f32 %v780_v59, %v310_v42  ;;  %v308_v58 = vmul.f32 %v744_v34, %v285_v36 }
  0xe2   :  { %487 = vst.msk [vmem:[%s955_s6 + $0x24] sm:$0xf] %vm477_vm3, %v542_v48  ;;  %v411_v63 = vmax.f32 %v388_v49, %v801_v23  ;;  %v386_v62 = vadd.f32 %v575_v7, %v338_v55  ;;  %v341_v0 = vadd.f32 %v780_v59, %v318_v38  ;;  %v316_v44 = vmul.f32 %v744_v34, %v293_v47 }
  0xe3   :  { %v539_v1 = vpack.c.bf16 %v403_v61, %v403_v61  ;;  %v401_v5 = vmax.f32 %v378_v56, %v801_v23  ;;  %v381_v2 = vadd.f32 %v564_v13, %v333_v57  ;;  %v331_v3 = vadd.f32 %v780_v59, %v308_v58 }
  0xe4   :  { %v547_v4 = vpack.c.bf16 %v411_v63, %v411_v63  ;;  %v409_v45 = vmax.f32 %v386_v62, %v801_v23  ;;  %v389_v6 = vadd.f32 %v580_v14, %v341_v0  ;;  %v339_v7 = vadd.f32 %v780_v59, %v316_v44 }
  0xe5   :  { %484 = vst.msk [vmem:[%s955_s6 + $0x18] sm:$0xf] %vm477_vm3, %v539_v1  ;;  %v537_v34 = vpack.c.bf16 %v401_v5, %v401_v5  ;;  %v404_v8 = vmax.f32 %v381_v2, %v801_v23  ;;  %v379_v41 = vadd.f32 %v560_v21, %v331_v3 }
  0xe6   :  { %492 = vst.msk [vmem:[%s955_s6 + $0x38] sm:$0xf] %vm477_vm3, %v547_v4  ;;  %v545_v43 = vpack.c.bf16 %v409_v45, %v409_v45  ;;  %v412_v13 = vmax.f32 %v389_v6, %v801_v23  ;;  %v387_v59 = vadd.f32 %v576_v33, %v339_v7 }
  0xe7   :  { %482 = vst.msk [vmem:[%s955_s6 + $0x10] sm:$0xf] %vm477_vm3, %v537_v34  ;;  %v540_v14 = vpack.c.bf16 %v404_v8, %v404_v8  ;;  %v402_v50 = vmax.f32 %v379_v41, %v801_v23 }
  0xe8   :  { %490 = vst.msk [vmem:[%s955_s6 + $0x30] sm:$0xf] %vm477_vm3, %v545_v43  ;;  %v548_v21 = vpack.c.bf16 %v412_v13, %v412_v13  ;;  %v410_v9 = vmax.f32 %v387_v59, %v801_v23 }
  0xe9   :  { %485 = vst.msk [vmem:[%s955_s6 + $0x1c] sm:$0xf] %vm477_vm3, %v540_v14  ;;  %v538_v51 = vpack.c.bf16 %v402_v50, %v402_v50 }
  0xea   :  { %493 = vst.msk [vmem:[%s955_s6 + $0x3c] sm:$0xf] %vm477_vm3, %v548_v21  ;;  %v546_v33 = vpack.c.bf16 %v410_v9, %v410_v9 }
  0xeb   :  { %483 = vst.msk [vmem:[%s955_s6 + $0x14] sm:$0xf] %vm477_vm3, %v538_v51 }
  0xec   :  { %491 = vst.msk [vmem:[%s955_s6 + $0x34] sm:$0xf] %vm477_vm3, %v546_v33 }

// kernel: _lambda_.9
= control target key start
LH: loop header
LB: loop body
LE: loop exit
PB: predicated region body
PF: predicated region fallthrough
CT: control target
= control target key end

     0   :  { %vm490_vm0 = vcmask 1040384   ;;  %vm393_vm1 = vcmask 146432   ;;  %vm28_vm2 = vcmask 15360   ;;  %v2211_v2 = vmov 0.0   ;;  %s3513_s1 = inlined_call_operand.vmem [shape: bf16[18,2], index: 1, kind: input, shape index: {}]   ;;  %s3514_s0 = inlined_call_operand.vmem [shape: bf16[512,18], index: 0, kind: input, shape index: {}]   ;;  %s3515_s5 = inlined_call_operand.vmem [shape: bf16[512,2], index: 5, kind: input, shape index: {}]   ;;  %s3516_s2 = inlined_call_operand.vmem [shape: f32[1,2], index: 2, kind: input, shape index: {}]   ;;  %s3517_s3 = inlined_call_operand.vmem [shape: f32[1,2], index: 3, kind: input, shape index: {}]   ;;  %s3518_s4 = inlined_call_operand.vmem [shape: f32[1,2], index: 4, kind: input, shape index: {}]   ;;  %s3519_s6 = inlined_call_operand.vmem [shape: bf16[512,2], index: 6, kind: output, shape index: {}]  }
   0x1   :  { %v2250_v0 = vld [vmem:[%s3513_s1 + $0x8] ss:$0 sps:$4 sm:$0x11]   ;;  %v2255_v1 = vld [vmem:[%s3513_s1] sm:$0xff]   ;;  %31 = vst.msk [vmem:[#allocation2 + $0x10] sm:$0xff] %vm28_vm2, %v2211_v2  ;;  %29 = vst.msk [vmem:[#allocation2] sm:$0xff] %vm28_vm2, %v2211_v2 }
   0x2   :  { %30 = vst.msk [vmem:[#allocation2 + $0x8] sm:$0xff] %vm28_vm2, %v2211_v2  ;;  %32 = vst.msk [vmem:[#allocation2 + $0x18] sm:$0xff] %vm28_vm2, %v2211_v2  ;;  %2171 = vmatprep.subr.msk.bf16.mxu0 %vm490_vm0, %v2250_v0  ;;  %2172 = vmatprep.subr.msk.bf16.mxu1 %vm490_vm0, %v2250_v0  ;;  %v492_v3 = vsel %vm490_vm0, %v2250_v0, 0  ;;  %v2176_v4 = vld [vmem:[%s3514_s0] sm:$0xff]   ;;  %v2178_v6 = vld [vmem:[%s3514_s0 + $0x8] sm:$0xff]   ;;  %vm1640_vm3 = vcmask 11264  }
   0x3   :  { %33 = vst.msk [vmem:[#allocation2 + $0x20] sm:$0xff] %vm28_vm2, %v2211_v2  ;;  %34 = vst.msk [vmem:[#allocation2 + $0x28] sm:$0xff] %vm28_vm2, %v2211_v2  ;;  %2100 = vmatpush3.bf16.msra.mxu0 %v492_v3  ;;  %2169 = vmatpush3.bf16.msra.mxu1 %v492_v3  ;;  %v2177_v5 = vld [vmem:[%s3514_s0 + $0x80] sm:$0xff]   ;;  %v2179_v7 = vld [vmem:[%s3514_s0 + $0x88] sm:$0xff]  }
   0x4   :  { %35 = vst.msk [vmem:[#allocation2 + $0x30] sm:$0xff] %vm28_vm2, %v2211_v2  ;;  %36 = vst.msk [vmem:[#allocation2 + $0x38] sm:$0xff] %vm28_vm2, %v2211_v2  ;;  %2101 = vmatprep.subr.bf16.mxu0 %v2255_v1  ;;  %2168 = vmatprep.subr.bf16.mxu1 %v2255_v1  ;;  %v2180_v8 = vld [vmem:[%s3514_s0 + $0x10] sm:$0xff]   ;;  %v2182_v10 = vld [vmem:[%s3514_s0 + $0x18] sm:$0xff]  }
   0x5   :  { %37 = vst.msk [vmem:[#allocation2 + $0x40] sm:$0xff] %vm28_vm2, %v2211_v2  ;;  %38 = vst.msk [vmem:[#allocation2 + $0x48] sm:$0xff] %vm28_vm2, %v2211_v2  ;;  %2103 = vmatprep.mubr.msk.bf16.mxu0 %vm393_vm1, %v2176_v4  ;;  %2135 = vmatprep.mubr.msk.bf16.mxu1 %vm393_vm1, %v2177_v5  ;;  %v2181_v9 = vld [vmem:[%s3514_s0 + $0x90] sm:$0xff]   ;;  %v2183_v11 = vld [vmem:[%s3514_s0 + $0x98] sm:$0xff]  }
   0x6   :  { %39 = vst.msk [vmem:[#allocation2 + $0x50] sm:$0xff] %vm28_vm2, %v2211_v2  ;;  %40 = vst.msk [vmem:[#allocation2 + $0x58] sm:$0xff] %vm28_vm2, %v2211_v2  ;;  %v2184_v12 = vld [vmem:[%s3514_s0 + $0x20] sm:$0xff]   ;;  %v2186_v14 = vld [vmem:[%s3514_s0 + $0x28] sm:$0xff]  }
   0x7   :  { %41 = vst.msk [vmem:[#allocation2 + $0x60] sm:$0xff] %vm28_vm2, %v2211_v2  ;;  %42 = vst.msk [vmem:[#allocation2 + $0x68] sm:$0xff] %vm28_vm2, %v2211_v2  ;;  %2102 = vmatpush3.bf16.msra.mxu0 %v2255_v1  ;;  %2170 = vmatpush3.bf16.msra.mxu1 %v2255_v1  ;;  %v2185_v13 = vld [vmem:[%s3514_s0 + $0xa0] sm:$0xff]   ;;  %v2187_v15 = vld [vmem:[%s3514_s0 + $0xa8] sm:$0xff]  }
   0x8   :  { %43 = vst.msk [vmem:[#allocation2 + $0x70] sm:$0xff] %vm28_vm2, %v2211_v2  ;;  %44 = vst.msk [vmem:[#allocation2 + $0x78] sm:$0xff] %vm28_vm2, %v2211_v2  ;;  %v2188_v16 = vld [vmem:[%s3514_s0 + $0x30] sm:$0xff]   ;;  %v2190_v18 = vld [vmem:[%s3514_s0 + $0x38] sm:$0xff]  }
   0x9   :  { %45 = vst.msk [vmem:[#allocation2 + $0x80] sm:$0xff] %vm28_vm2, %v2211_v2  ;;  %46 = vst.msk [vmem:[#allocation2 + $0x88] sm:$0xff] %vm28_vm2, %v2211_v2  ;;  %v2189_v17 = vld [vmem:[%s3514_s0 + $0xb0] sm:$0xff]   ;;  %v2191_v19 = vld [vmem:[%s3514_s0 + $0xb8] sm:$0xff]  }
   0xa   :  { %47 = vst.msk [vmem:[#allocation2 + $0x90] sm:$0xff] %vm28_vm2, %v2211_v2  ;;  %48 = vst.msk [vmem:[#allocation2 + $0x98] sm:$0xff] %vm28_vm2, %v2211_v2  ;;  %2104 = vmatmul.mubr.msk.bf16.vlgmr.msra.gmra.mxu0 %vm393_vm1, %v2178_v6  ;;  %2136 = vmatmul.mubr.msk.bf16.vlgmr.msra.gmra.mxu1 %vm393_vm1, %v2179_v7  ;;  %v2192_v20 = vld [vmem:[%s3514_s0 + $0x40] sm:$0xff]   ;;  %v2194_v22 = vld [vmem:[%s3514_s0 + $0x48] sm:$0xff]  }
   0xb   :  { %49 = vst.msk [vmem:[#allocation2 + $0xa0] sm:$0xff] %vm28_vm2, %v2211_v2  ;;  %50 = vst.msk [vmem:[#allocation2 + $0xa8] sm:$0xff] %vm28_vm2, %v2211_v2  ;;  %2107 = vmatprep.mubr.msk.bf16.mxu0 %vm393_vm1, %v2180_v8  ;;  %2139 = vmatprep.mubr.msk.bf16.mxu1 %vm393_vm1, %v2181_v9  ;;  %v2193_v21 = vld [vmem:[%s3514_s0 + $0xc0] sm:$0xff]   ;;  %v2195_v23 = vld [vmem:[%s3514_s0 + $0xc8] sm:$0xff]  }
   0xc   :  { %51 = vst.msk [vmem:[#allocation2 + $0xb0] sm:$0xff] %vm28_vm2, %v2211_v2  ;;  %52 = vst.msk [vmem:[#allocation2 + $0xb8] sm:$0xff] %vm28_vm2, %v2211_v2  ;;  %v2196_v24 = vld [vmem:[%s3514_s0 + $0x50] sm:$0xff]   ;;  %v2198_v26 = vld [vmem:[%s3514_s0 + $0x58] sm:$0xff]  }
   0xd   :  { %53 = vst.msk [vmem:[#allocation2 + $0xc0] sm:$0xff] %vm28_vm2, %v2211_v2  ;;  %54 = vst.msk [vmem:[#allocation2 + $0xc8] sm:$0xff] %vm28_vm2, %v2211_v2  ;;  %v2197_v25 = vld [vmem:[%s3514_s0 + $0xd0] sm:$0xff]   ;;  %v2199_v27 = vld [vmem:[%s3514_s0 + $0xd8] sm:$0xff]  }
   0xe   :  { %55 = vst.msk [vmem:[#allocation2 + $0xd0] sm:$0xff] %vm28_vm2, %v2211_v2  ;;  %56 = vst.msk [vmem:[#allocation2 + $0xd8] sm:$0xff] %vm28_vm2, %v2211_v2  ;;  %v2200_v28 = vld [vmem:[%s3514_s0 + $0x60] sm:$0xff]   ;;  %v2202_v30 = vld [vmem:[%s3514_s0 + $0x68] sm:$0xff]  }
   0xf   :  { %57 = vst.msk [vmem:[#allocation2 + $0xe0] sm:$0xff] %vm28_vm2, %v2211_v2  ;;  %58 = vst.msk [vmem:[#allocation2 + $0xe8] sm:$0xff] %vm28_vm2, %v2211_v2  ;;  %v2201_v29 = vld [vmem:[%s3514_s0 + $0xe0] sm:$0xff]   ;;  %v2203_v31 = vld [vmem:[%s3514_s0 + $0xe8] sm:$0xff]  }
  0x10   :  { %59 = vst.msk [vmem:[#allocation2 + $0xf0] sm:$0xff] %vm28_vm2, %v2211_v2  ;;  %60 = vst.msk [vmem:[#allocation2 + $0xf8] sm:$0xff] %vm28_vm2, %v2211_v2  ;;  %v2204_v32 = vld [vmem:[%s3514_s0 + $0x70] sm:$0xff]   ;;  %v2206_v34 = vld [vmem:[%s3514_s0 + $0x78] sm:$0xff]  }
  0x11   :  { %61 = vst.msk [vmem:[#allocation2 + $0x100] sm:$0xff] %vm28_vm2, %v2211_v2  ;;  %62 = vst.msk [vmem:[#allocation2 + $0x108] sm:$0xff] %vm28_vm2, %v2211_v2  ;;  %v2205_v33 = vld [vmem:[%s3514_s0 + $0xf0] sm:$0xff]   ;;  %v2207_v35 = vld [vmem:[%s3514_s0 + $0xf8] sm:$0xff]  }
  0x12   :  { %63 = vst.msk [vmem:[#allocation2 + $0x110] sm:$0xff] %vm28_vm2, %v2211_v2  ;;  %64 = vst.msk [vmem:[#allocation2 + $0x118] sm:$0xff] %vm28_vm2, %v2211_v2  ;;  %2108 = vmatmul.mubr.msk.bf16.gmra.mxu0 %vm393_vm1, %v2182_v10  ;;  %2140 = vmatmul.mubr.msk.bf16.gmra.mxu1 %vm393_vm1, %v2183_v11  ;;  %v2526_v36 = vld [vmem:[%s3515_s5 + $0x8] sm:$0xff]   ;;  %v2536_v38 = vld [vmem:[%s3515_s5] sm:$0xff]  }
  0x13   :  { %65 = vst.msk [vmem:[#allocation2 + $0x120] sm:$0xff] %vm28_vm2, %v2211_v2  ;;  %66 = vst.msk [vmem:[#allocation2 + $0x128] sm:$0xff] %vm28_vm2, %v2211_v2  ;;  %2111 = vmatprep.mubr.msk.bf16.mxu0 %vm393_vm1, %v2184_v12  ;;  %2143 = vmatprep.mubr.msk.bf16.mxu1 %vm393_vm1, %v2185_v13  ;;  %v2531_v37 = vld [vmem:[%s3515_s5 + $0x88] sm:$0xff]   ;;  %v2541_v39 = vld [vmem:[%s3515_s5 + $0x80] sm:$0xff]   ;;  %v1912_v44 = vunpack.c.l.bf16 %v2526_v36  ;;  %v1908_v46 = vunpack.c.l.bf16 %v2536_v38  ;;  %v1913_v54 = vunpack.c.h.bf16 %v2526_v36  ;;  %v1909_v56 = vunpack.c.h.bf16 %v2536_v38 }
  0x14   :  { %67 = vst.msk [vmem:[#allocation2 + $0x130] sm:$0xff] %vm28_vm2, %v2211_v2  ;;  %68 = vst.msk [vmem:[#allocation2 + $0x138] sm:$0xff] %vm28_vm2, %v2211_v2  ;;  %v95_v40 = vld [vmem:[#allocation2 + $0x10] sm:$0xff]  ;;  %v2546_v42 = vld [vmem:[%s3515_s5 + $0x18] sm:$0xff]   ;;  %v1976_v45 = vunpack.c.l.bf16 %v2531_v37  ;;  %v1972_v47 = vunpack.c.l.bf16 %v2541_v39  ;;  %v1977_v55 = vunpack.c.h.bf16 %v2531_v37  ;;  %v1973_v57 = vunpack.c.h.bf16 %v2541_v39 }
  0x15   :  { %69 = vst.msk [vmem:[#allocation2 + $0x140] sm:$0xff] %vm28_vm2, %v2211_v2  ;;  %70 = vst.msk [vmem:[#allocation2 + $0x148] sm:$0xff] %vm28_vm2, %v2211_v2  ;;  %v2551_v43 = vld [vmem:[%s3515_s5 + $0x98] sm:$0xff]   ;;  %v2560_v48 = vld [vmem:[%s3515_s5 + $0x10] sm:$0xff]   ;;  %v1920_v61 = vunpack.c.l.bf16 %v2546_v42  ;;  %v1921_v8 = vunpack.c.h.bf16 %v2546_v42 }
  0x16   :  { %71 = vst.msk [vmem:[#allocation2 + $0x150] sm:$0xff] %vm28_vm2, %v2211_v2  ;;  %72 = vst.msk [vmem:[#allocation2 + $0x158] sm:$0xff] %vm28_vm2, %v2211_v2  ;;  %v2565_v49 = vld [vmem:[%s3515_s5 + $0x90] sm:$0xff]   ;;  %v93_v52 = vld [vmem:[#allocation2] sm:$0xff]  ;;  %v1984_v62 = vunpack.c.l.bf16 %v2551_v43  ;;  %v1916_v6 = vunpack.c.l.bf16 %v2560_v48  ;;  %v1985_v9 = vunpack.c.h.bf16 %v2551_v43  ;;  %v1917_v13 = vunpack.c.h.bf16 %v2560_v48 }
  0x17   :  { %73 = vst.msk [vmem:[#allocation2 + $0x160] sm:$0xff] %vm28_vm2, %v2211_v2  ;;  %74 = vst.msk [vmem:[#allocation2 + $0x168] sm:$0xff] %vm28_vm2, %v2211_v2  ;;  %v2574_v58 = vld [vmem:[%s3515_s5 + $0x28] sm:$0xff]   ;;  %v2586_v0 = vld [vmem:[%s3515_s5 + $0x20] sm:$0xff]   ;;  %v1980_v7 = vunpack.c.l.bf16 %v2565_v49 }
  0x18   :  { %75 = vst.msk [vmem:[#allocation2 + $0x170] sm:$0xff] %vm28_vm2, %v2211_v2  ;;  %76 = vst.msk [vmem:[#allocation2 + $0x178] sm:$0xff] %vm28_vm2, %v2211_v2  ;;  %v125_v53 = vld [vmem:[#allocation2 + $0x100] sm:$0xff]  ;;  %v2581_v63 = vld [vmem:[%s3515_s5 + $0xa8] sm:$0xff]  }
  0x19   :  { %77 = vst.msk [vmem:[#allocation2 + $0x180] sm:$0xff] %vm28_vm2, %v2211_v2  ;;  %78 = vst.msk [vmem:[#allocation2 + $0x188] sm:$0xff] %vm28_vm2, %v2211_v2  ;;  %v127_v41 = vld [vmem:[#allocation2 + $0x110] sm:$0xff]  ;;  %v2591_v1 = vld [vmem:[%s3515_s5 + $0xa0] sm:$0xff]  }
  0x1a   :  { %79 = vst.msk [vmem:[#allocation2 + $0x190] sm:$0xff] %vm28_vm2, %v2211_v2  ;;  %80 = vst.msk [vmem:[#allocation2 + $0x198] sm:$0xff] %vm28_vm2, %v2211_v2  ;;  %2112 = vmatmul.mubr.msk.bf16.gmra.mxu0 %vm393_vm1, %v2186_v14  ;;  %2144 = vmatmul.mubr.msk.bf16.gmra.mxu1 %vm393_vm1, %v2187_v15  ;;  %v96_v4 = vld [vmem:[#allocation2 + $0x18] sm:$0xff]  ;;  %v94_v12 = vld [vmem:[#allocation2 + $0x8] sm:$0xff]  ;;  %v1981_v14 = vunpack.c.h.bf16 %v2565_v49 }
  0x1b   :  { %81 = vst.msk [vmem:[#allocation2 + $0x1a0] sm:$0xff] %vm28_vm2, %v2211_v2  ;;  %82 = vst.msk [vmem:[#allocation2 + $0x1a8] sm:$0xff] %vm28_vm2, %v2211_v2  ;;  %2115 = vmatprep.mubr.msk.bf16.mxu0 %vm393_vm1, %v2188_v16  ;;  %2147 = vmatprep.mubr.msk.bf16.mxu1 %vm393_vm1, %v2189_v17  ;;  %v128_v5 = vld [vmem:[#allocation2 + $0x118] sm:$0xff] }
  0x1c   :  { %83 = vst.msk [vmem:[#allocation2 + $0x1b0] sm:$0xff] %vm28_vm2, %v2211_v2  ;;  %84 = vst.msk [vmem:[#allocation2 + $0x1b8] sm:$0xff] %vm28_vm2, %v2211_v2  ;;  %v2604_v15 = vld [vmem:[%s3515_s5 + $0x38] sm:$0xff]  }
  0x1d   :  { %85 = vst.msk [vmem:[#allocation2 + $0x1c0] sm:$0xff] %vm28_vm2, %v2211_v2  ;;  %86 = vst.msk [vmem:[#allocation2 + $0x1c8] sm:$0xff] %vm28_vm2, %v2211_v2  ;;  %v2609_v16 = vld [vmem:[%s3515_s5 + $0xb8] sm:$0xff]  }
  0x1e   :  { %87 = vst.msk [vmem:[#allocation2 + $0x1d0] sm:$0xff] %vm28_vm2, %v2211_v2  ;;  %88 = vst.msk [vmem:[#allocation2 + $0x1d8] sm:$0xff] %vm28_vm2, %v2211_v2 }
  0x1f   :  { %89 = vst.msk [vmem:[#allocation2 + $0x1e0] sm:$0xff] %vm28_vm2, %v2211_v2  ;;  %90 = vst.msk [vmem:[#allocation2 + $0x1e8] sm:$0xff] %vm28_vm2, %v2211_v2 }
  0x20   :  { %91 = vst.msk [vmem:[#allocation2 + $0x1f0] sm:$0xff] %vm28_vm2, %v2211_v2  ;;  %92 = vst.msk [vmem:[#allocation2 + $0x1f8] sm:$0xff] %vm28_vm2, %v2211_v2 }
  0x22   :  { %2116 = vmatmul.mubr.msk.bf16.gmra.mxu0 %vm393_vm1, %v2190_v18  ;;  %2148 = vmatmul.mubr.msk.bf16.gmra.mxu1 %vm393_vm1, %v2191_v19  ;;  %v126_v19 = vld [vmem:[#allocation2 + $0x108] sm:$0xff] }
  0x23   :  { %2119 = vmatprep.mubr.msk.bf16.mxu0 %vm393_vm1, %v2192_v20  ;;  %2151 = vmatprep.mubr.msk.bf16.mxu1 %vm393_vm1, %v2193_v21  ;;  %v111_v21 = vld [vmem:[#allocation2 + $0x90] sm:$0xff] }
  0x2a   :  { %2120 = vmatmul.mubr.msk.bf16.gmra.mxu0 %vm393_vm1, %v2194_v22  ;;  %2152 = vmatmul.mubr.msk.bf16.gmra.mxu1 %vm393_vm1, %v2195_v23 }
  0x2b   :  { %2123 = vmatprep.mubr.msk.bf16.mxu0 %vm393_vm1, %v2196_v24  ;;  %2155 = vmatprep.mubr.msk.bf16.mxu1 %vm393_vm1, %v2197_v25  ;;  %v2618_v24 = vld [vmem:[%s3515_s5 + $0x30] sm:$0xff]  }
  0x2c   :  { %v2623_v25 = vld [vmem:[%s3515_s5 + $0xb0] sm:$0xff]  }
  0x32   :  { %2124 = vmatmul.mubr.msk.bf16.gmra.mxu0 %vm393_vm1, %v2198_v26  ;;  %2156 = vmatmul.mubr.msk.bf16.gmra.mxu1 %vm393_vm1, %v2199_v27 }
  0x33   :  { %2127 = vmatprep.mubr.msk.bf16.mxu0 %vm393_vm1, %v2200_v28  ;;  %2159 = vmatprep.mubr.msk.bf16.mxu1 %vm393_vm1, %v2201_v29  ;;  %v99_v28 = vld [vmem:[#allocation2 + $0x30] sm:$0xff] }
  0x3a   :  { %2128 = vmatmul.mubr.msk.bf16.gmra.mxu0 %vm393_vm1, %v2202_v30  ;;  %2160 = vmatmul.mubr.msk.bf16.gmra.mxu1 %vm393_vm1, %v2203_v31 }
  0x3b   :  { %2131 = vmatprep.mubr.msk.bf16.mxu0 %vm393_vm1, %v2204_v32  ;;  %2163 = vmatprep.mubr.msk.bf16.mxu1 %vm393_vm1, %v2205_v33  ;;  %v131_v33 = vld [vmem:[#allocation2 + $0x130] sm:$0xff] }
  0x42   :  { %2132 = vmatmul.mubr.msk.bf16.gmra.mxu0 %vm393_vm1, %v2206_v34  ;;  %2164 = vmatmul.mubr.msk.bf16.gmra.mxu1 %vm393_vm1, %v2207_v35  ;;  %v132_v35 = vld [vmem:[#allocation2 + $0x138] sm:$0xff] }
  0xca   :  { %v2105_v50 = vpop.f32.mrf.mxu0  ;;  %v2137_v51 = vpop.f32.mrf.mxu1 }
  0xcb   :  { %v785_v59 = vadd.f32 %v2105_v50, %v95_v40  ;;  %v817_v60 = vadd.f32 %v2137_v51, %v127_v41  ;;  %v2636_v50 = vld [vmem:[%s3515_s5 + $0x48] sm:$0xff]  }
  0xcc   :  { %v528_v2 = vpop.f32.mrf.mxu0  ;;  %v656_v3 = vpop.f32.mrf.mxu1  ;;  %v2641_v51 = vld [vmem:[%s3515_s5 + $0xc8] sm:$0xff]  }
  0xcd   :  { %850 = vst.msk [vmem:[#allocation2 + $0x10] sm:$0xff] %vm28_vm2, %v785_v59  ;;  %882 = vst.msk [vmem:[#allocation2 + $0x110] sm:$0xff] %vm28_vm2, %v817_v60  ;;  %v783_v10 = vadd.f32 %v528_v2, %v93_v52  ;;  %v815_v11 = vadd.f32 %v656_v3, %v125_v53  ;;  %v2650_v2 = vld [vmem:[%s3515_s5 + $0x40] sm:$0xff]  }
  0xce   :  { %v2106_v17 = vpop.f32.mrf.mxu0  ;;  %v2138_v18 = vpop.f32.mrf.mxu1  ;;  %v2655_v3 = vld [vmem:[%s3515_s5 + $0xc0] sm:$0xff]  }
  0xcf   :  { %848 = vst.msk [vmem:[#allocation2] sm:$0xff] %vm28_vm2, %v783_v10  ;;  %880 = vst.msk [vmem:[#allocation2 + $0x100] sm:$0xff] %vm28_vm2, %v815_v11  ;;  %v786_v26 = vadd.f32 %v2106_v17, %v96_v4  ;;  %v818_v27 = vadd.f32 %v2138_v18, %v128_v5  ;;  %v97_v10 = vld [vmem:[#allocation2 + $0x20] sm:$0xff]  ;;  %v2673_v18 = vld [vmem:[%s3515_s5 + $0x58] sm:$0xff]  }
  0xd0   :  { %v531_v31 = vpop.f32.mrf.mxu0  ;;  %v659_v32 = vpop.f32.mrf.mxu1  ;;  %v129_v11 = vld [vmem:[#allocation2 + $0x120] sm:$0xff] }
  0xd1   :  { %851 = vst.msk [vmem:[#allocation2 + $0x18] sm:$0xff] %vm28_vm2, %v786_v26  ;;  %883 = vst.msk [vmem:[#allocation2 + $0x118] sm:$0xff] %vm28_vm2, %v818_v27  ;;  %v784_v52 = vadd.f32 %v531_v31, %v94_v12  ;;  %v816_v53 = vadd.f32 %v659_v32, %v126_v19  ;;  %v2664_v26 = vld [vmem:[%s3516_s2] ss:$0 sm:$0xff]  ;;  %v2678_v19 = vld [vmem:[%s3515_s5 + $0xd8] sm:$0xff]  }
  0xd2   :  { %v2109_v4 = vpop.f32.mrf.mxu0  ;;  %v2141_v5 = vpop.f32.mrf.mxu1  ;;  %v2698_v32 = vld [vmem:[%s3515_s5 + $0xd0] sm:$0xff]  }
  0xd3   :  { %849 = vst.msk [vmem:[#allocation2 + $0x8] sm:$0xff] %vm28_vm2, %v784_v52  ;;  %881 = vst.msk [vmem:[#allocation2 + $0x108] sm:$0xff] %vm28_vm2, %v816_v53  ;;  %v789_v27 = vadd.f32 %v2109_v4, %v99_v28  ;;  %v821_v31 = vadd.f32 %v2141_v5, %v131_v33  ;;  %v100_v33 = vld [vmem:[#allocation2 + $0x38] sm:$0xff]  ;;  %v2693_v5 = vld [vmem:[%s3515_s5 + $0x50] sm:$0xff]  }
  0xd4   :  { %v917_v17 = vld [vmem:[#allocation2 + $0x10] sm:$0xff]  ;;  %v544_v53 = vpop.f32.mrf.mxu0  ;;  %v672_v28 = vpop.f32.mrf.mxu1 }
  0xd5   :  { %v949_v52 = vld [vmem:[#allocation2 + $0x110] sm:$0xff]  ;;  %v1109_v60 = vadd.f32 %v1912_v44, %v917_v17  ;;  %854 = vst.msk [vmem:[#allocation2 + $0x30] sm:$0xff] %vm28_vm2, %v789_v27  ;;  %886 = vst.msk [vmem:[#allocation2 + $0x130] sm:$0xff] %vm28_vm2, %v821_v31  ;;  %v787_v41 = vadd.f32 %v544_v53, %v97_v10  ;;  %v819_v40 = vadd.f32 %v672_v28, %v129_v11  ;;  %v2703_v44 = vld [vmem:[%s3517_s3] ss:$0 sm:$0xff] }
  0xd6   :  { %v1141_v59 = vadd.f32 %v1976_v45, %v949_v52  ;;  %v915_v45 = vld [vmem:[#allocation2] sm:$0xff]  ;;  %v2110_v10 = vpop.f32.mrf.mxu0  ;;  %v2142_v11 = vpop.f32.mrf.mxu1  ;;  %v98_v27 = vld [vmem:[#allocation2 + $0x28] sm:$0xff] }
  0xd7   :  { %v947_v17 = vld [vmem:[#allocation2 + $0x100] sm:$0xff]  ;;  %v1180_v28 = vmul.f32 %v2664_v26, %v1109_v60  ;;  %v1107_v4 = vadd.f32 %v1908_v46, %v915_v45  ;;  %852 = vst.msk [vmem:[#allocation2 + $0x20] sm:$0xff] %vm28_vm2, %v787_v41  ;;  %884 = vst.msk [vmem:[#allocation2 + $0x120] sm:$0xff] %vm28_vm2, %v819_v40  ;;  %v130_v31 = vld [vmem:[#allocation2 + $0x128] sm:$0xff]  ;;  %v822_v30 = vadd.f32 %v2142_v11, %v132_v35 }
  0xd8   :  { %v1212_v12 = vmul.f32 %v2664_v26, %v1141_v59  ;;  %v1139_v34 = vadd.f32 %v1972_v47, %v947_v17  ;;  %v2720_v53 = vld [vmem:[%s3518_s4] ss:$0 sm:$0xff]  ;;  %v918_v60 = vld [vmem:[#allocation2 + $0x18] sm:$0xff]  ;;  %v790_v59 = vadd.f32 %v2110_v10, %v100_v33  ;;  %v547_v29 = vpop.f32.mrf.mxu0  ;;  %v675_v46 = vpop.f32.mrf.mxu1 }
  0xd9   :  { %v950_v52 = vld [vmem:[#allocation2 + $0x118] sm:$0xff]  ;;  %v1251_v41 = vadd.f32 %v2703_v44, %v1180_v28  ;;  %v1178_v17 = vmul.f32 %v2664_v26, %v1107_v4  ;;  %v1110_v22 = vadd.f32 %v1913_v54, %v918_v60  ;;  %887 = vst.msk [vmem:[#allocation2 + $0x138] sm:$0xff] %vm28_vm2, %v822_v30  ;;  %v788_v11 = vadd.f32 %v547_v29, %v98_v27 }
  0xda   :  { %v1283_v40 = vadd.f32 %v2703_v44, %v1212_v12  ;;  %v1210_v23 = vmul.f32 %v2664_v26, %v1139_v34  ;;  %v1142_v35 = vadd.f32 %v1977_v55, %v950_v52  ;;  %v916_v33 = vld [vmem:[#allocation2 + $0x8] sm:$0xff]  ;;  %855 = vst.msk [vmem:[#allocation2 + $0x38] sm:$0xff] %vm28_vm2, %v790_v59  ;;  %v820_v28 = vadd.f32 %v675_v46, %v130_v31  ;;  %v2734_v47 = vpop.f32.mrf.mxu0  ;;  %v2736_v12 = vpop.f32.mrf.mxu1 }
  0xdb   :  { %v948_v10 = vld [vmem:[#allocation2 + $0x108] sm:$0xff]  ;;  %v1322_v34 = vmax.f32 %v1251_v41, %v2720_v53  ;;  %v1249_v54 = vadd.f32 %v2703_v44, %v1178_v17  ;;  %v1181_v55 = vmul.f32 %v2664_v26, %v1110_v22  ;;  %v1108_v29 = vadd.f32 %v1909_v56, %v916_v33  ;;  %853 = vst.msk [vmem:[#allocation2 + $0x28] sm:$0xff] %vm28_vm2, %v788_v11 }
  0xdc   :  { %v1354_v36 = vmax.f32 %v1283_v40, %v2720_v53  ;;  %v1281_v37 = vadd.f32 %v2703_v44, %v1210_v23  ;;  %v1213_v4 = vmul.f32 %v2664_v26, %v1142_v35  ;;  %v1140_v30 = vadd.f32 %v1973_v57, %v948_v10  ;;  %v921_v27 = vld [vmem:[#allocation2 + $0x30] sm:$0xff]  ;;  %885 = vst.msk [vmem:[#allocation2 + $0x128] sm:$0xff] %vm28_vm2, %v820_v28  ;;  %v2750_v52 = vpop.f32.mrf.mxu0  ;;  %v2752_v60 = vpop.f32.mrf.mxu1 }
  0xdd   :  { %v953_v31 = vld [vmem:[#allocation2 + $0x130] sm:$0xff]  ;;  %v1844_v23 = vpack.c.bf16 %v1322_v34, %v1322_v34  ;;  %v1320_v59 = vmax.f32 %v1249_v54, %v2720_v53  ;;  %v1252_v56 = vadd.f32 %v2703_v44, %v1181_v55  ;;  %v1179_v57 = vmul.f32 %v2664_v26, %v1108_v29 }
  0xde   :  { %v1876_v22 = vpack.c.bf16 %v1354_v36, %v1354_v36  ;;  %v1352_v38 = vmax.f32 %v1281_v37, %v2720_v53  ;;  %v1284_v39 = vadd.f32 %v2703_v44, %v1213_v4  ;;  %v1211_v46 = vmul.f32 %v2664_v26, %v1140_v30  ;;  %v919_v41 = vld [vmem:[#allocation2 + $0x20] sm:$0xff]  ;;  %v2760_v17 = vpop.f32.mrf.mxu0  ;;  %v2762_v35 = vpop.f32.mrf.mxu1 }
  0xdf   :  { %v951_v40 = vld [vmem:[#allocation2 + $0x120] sm:$0xff]  ;;  %1643 = vst.msk [vmem:[%s3519_s6 + $0x8] sm:$0xf] %vm1640_vm3, %v1844_v23  ;;  %v1842_v33 = vpack.c.bf16 %v1320_v59, %v1320_v59  ;;  %v1113_v11 = vadd.f32 %v1920_v61, %v921_v27  ;;  %v1145_v28 = vadd.f32 %v1984_v62, %v953_v31  ;;  %v1323_v34 = vmax.f32 %v1252_v56, %v2720_v53 }
  0xe0   :  { %1675 = vst.msk [vmem:[%s3519_s6 + $0x88] sm:$0xf] %vm1640_vm3, %v1876_v22  ;;  %v1874_v10 = vpack.c.bf16 %v1352_v38, %v1352_v38  ;;  %v1355_v36 = vmax.f32 %v1284_v39, %v2720_v53  ;;  %v1250_v54 = vadd.f32 %v2703_v44, %v1179_v57  ;;  %v1282_v37 = vadd.f32 %v2703_v44, %v1211_v46  ;;  %v2780_v55 = vpop.f32.mrf.mxu0  ;;  %v2782_v4 = vpop.f32.mrf.mxu1  ;;  %v954_v31 = vld [vmem:[#allocation2 + $0x138] sm:$0xff] }
  0xe1   :  { %1641 = vst.msk [vmem:[%s3519_s6] sm:$0xf] %vm1640_vm3, %v1842_v33  ;;  %v1184_v61 = vmul.f32 %v2664_v26, %v1113_v11  ;;  %v1216_v62 = vmul.f32 %v2664_v26, %v1145_v28  ;;  %v1111_v29 = vadd.f32 %v1916_v6, %v919_v41  ;;  %v1143_v30 = vadd.f32 %v1980_v7, %v951_v40  ;;  %v922_v27 = vld [vmem:[#allocation2 + $0x38] sm:$0xff] }
  0xe2   :  { %1673 = vst.msk [vmem:[%s3519_s6 + $0x80] sm:$0xf] %vm1640_vm3, %v1874_v10  ;;  %v1845_v23 = vpack.c.bf16 %v1323_v34, %v1323_v34  ;;  %v1877_v22 = vpack.c.bf16 %v1355_v36, %v1355_v36  ;;  %v1321_v59 = vmax.f32 %v1250_v54, %v2720_v53  ;;  %v1353_v38 = vmax.f32 %v1282_v37, %v2720_v53  ;;  %v2800_v56 = vpop.f32.mrf.mxu0  ;;  %v2802_v39 = vpop.f32.mrf.mxu1  ;;  %v920_v41 = vld [vmem:[#allocation2 + $0x28] sm:$0xff] }
  0xe3   :  { %v1255_v57 = vadd.f32 %v2703_v44, %v1184_v61  ;;  %v1287_v46 = vadd.f32 %v2703_v44, %v1216_v62  ;;  %v1182_v6 = vmul.f32 %v2664_v26, %v1111_v29  ;;  %v1214_v7 = vmul.f32 %v2664_v26, %v1143_v30  ;;  %v952_v40 = vld [vmem:[#allocation2 + $0x128] sm:$0xff]  ;;  %v103_v29 = vld [vmem:[#allocation2 + $0x50] sm:$0xff] }
  0xe4   :  { %1644 = vst.msk [vmem:[%s3519_s6 + $0xc] sm:$0xf] %vm1640_vm3, %v1845_v23  ;;  %1676 = vst.msk [vmem:[%s3519_s6 + $0x8c] sm:$0xf] %vm1640_vm3, %v1877_v22  ;;  %v1843_v33 = vpack.c.bf16 %v1321_v59, %v1321_v59  ;;  %v1875_v10 = vpack.c.bf16 %v1353_v38, %v1353_v38  ;;  %v1114_v11 = vadd.f32 %v1921_v8, %v922_v27  ;;  %v2820_v34 = vpop.f32.mrf.mxu0  ;;  %v2822_v36 = vpop.f32.mrf.mxu1  ;;  %v135_v30 = vld [vmem:[#allocation2 + $0x150] sm:$0xff] }
  0xe5   :  { %v1146_v28 = vadd.f32 %v1985_v9, %v954_v31  ;;  %v1326_v54 = vmax.f32 %v1255_v57, %v2720_v53  ;;  %v1358_v37 = vmax.f32 %v1287_v46, %v2720_v53  ;;  %v1253_v61 = vadd.f32 %v2703_v44, %v1182_v6  ;;  %v101_v57 = vld [vmem:[#allocation2 + $0x40] sm:$0xff]  ;;  %v104_v6 = vld [vmem:[#allocation2 + $0x58] sm:$0xff] }
  0xe6   :  { %v1285_v62 = vadd.f32 %v2703_v44, %v1214_v7  ;;  %1642 = vst.msk [vmem:[%s3519_s6 + $0x4] sm:$0xf] %vm1640_vm3, %v1843_v33  ;;  %1674 = vst.msk [vmem:[%s3519_s6 + $0x84] sm:$0xf] %vm1640_vm3, %v1875_v10  ;;  %v1185_v42 = vmul.f32 %v2664_v26, %v1114_v11  ;;  %v1112_v8 = vadd.f32 %v1917_v13, %v920_v41  ;;  %v2842_v27 = vpop.f32.mrf.mxu0  ;;  %v2844_v31 = vpop.f32.mrf.mxu1  ;;  %v136_v7 = vld [vmem:[#allocation2 + $0x158] sm:$0xff] }
  0xe7   :  { %v1217_v43 = vmul.f32 %v2664_v26, %v1146_v28  ;;  %v1144_v9 = vadd.f32 %v1981_v14, %v952_v40  ;;  %v1848_v23 = vpack.c.bf16 %v1326_v54, %v1326_v54  ;;  %v1880_v22 = vpack.c.bf16 %v1358_v37, %v1358_v37  ;;  %v133_v14 = vld [vmem:[#allocation2 + $0x140] sm:$0xff]  ;;  %v102_v54 = vld [vmem:[#allocation2 + $0x48] sm:$0xff] }
  0xe8   :  { %v1324_v59 = vmax.f32 %v1253_v61, %v2720_v53  ;;  %v1356_v38 = vmax.f32 %v1285_v62, %v2720_v53  ;;  %v1256_v46 = vadd.f32 %v2703_v44, %v1185_v42  ;;  %v1183_v49 = vmul.f32 %v2664_v26, %v1112_v8  ;;  %v2852_v41 = vpop.f32.mrf.mxu0  ;;  %v2854_v40 = vpop.f32.mrf.mxu1  ;;  %v134_v37 = vld [vmem:[#allocation2 + $0x148] sm:$0xff]  ;;  %v107_v61 = vld [vmem:[#allocation2 + $0x70] sm:$0xff] }
  0xe9   :  { %v1288_v48 = vadd.f32 %v2703_v44, %v1217_v43  ;;  %v1215_v13 = vmul.f32 %v2664_v26, %v1144_v9  ;;  %1647 = vst.msk [vmem:[%s3519_s6 + $0x18] sm:$0xf] %vm1640_vm3, %v1848_v23  ;;  %1679 = vst.msk [vmem:[%s3519_s6 + $0x98] sm:$0xf] %vm1640_vm3, %v1880_v22  ;;  %v793_v11 = vadd.f32 %v2734_v47, %v103_v29  ;;  %v139_v9 = vld [vmem:[#allocation2 + $0x170] sm:$0xff]  ;;  %v105_v23 = vld [vmem:[#allocation2 + $0x60] sm:$0xff] }
  0xea   :  { %v1846_v33 = vpack.c.bf16 %v1324_v59, %v1324_v59  ;;  %v1878_v10 = vpack.c.bf16 %v1356_v38, %v1356_v38  ;;  %v825_v28 = vadd.f32 %v2736_v12, %v135_v30  ;;  %v1327_v62 = vmax.f32 %v1256_v46, %v2720_v53  ;;  %v137_v22 = vld [vmem:[#allocation2 + $0x160] sm:$0xff]  ;;  %v2121_v59 = vpop.f32.mrf.mxu0  ;;  %v2153_v38 = vpop.f32.mrf.mxu1  ;;  %v108_v46 = vld [vmem:[#allocation2 + $0x78] sm:$0xff] }
  0xeb   :  { %v1359_v42 = vmax.f32 %v1288_v48, %v2720_v53  ;;  %v1254_v43 = vadd.f32 %v2703_v44, %v1183_v49  ;;  %v1286_v8 = vadd.f32 %v2703_v44, %v1215_v13  ;;  %858 = vst.msk [vmem:[#allocation2 + $0x50] sm:$0xff] %vm28_vm2, %v793_v11  ;;  %v791_v47 = vadd.f32 %v2750_v52, %v101_v57  ;;  %v140_v48 = vld [vmem:[#allocation2 + $0x178] sm:$0xff]  ;;  %v106_v49 = vld [vmem:[#allocation2 + $0x68] sm:$0xff] }
  0xec   :  { %1645 = vst.msk [vmem:[%s3519_s6 + $0x10] sm:$0xf] %vm1640_vm3, %v1846_v33  ;;  %1677 = vst.msk [vmem:[%s3519_s6 + $0x90] sm:$0xf] %vm1640_vm3, %v1878_v10  ;;  %v823_v12 = vadd.f32 %v2752_v60, %v133_v14  ;;  %v794_v29 = vadd.f32 %v2760_v17, %v104_v6  ;;  %v826_v30 = vadd.f32 %v2762_v35, %v136_v7  ;;  %v138_v11 = vld [vmem:[#allocation2 + $0x168] sm:$0xff]  ;;  %v592_v20 = vpop.f32.mrf.mxu0  ;;  %v720_v52 = vpop.f32.mrf.mxu1  ;;  %v109_v14 = vld [vmem:[#allocation2 + $0x80] sm:$0xff] }
  0xed   :  { %890 = vst.msk [vmem:[#allocation2 + $0x150] sm:$0xff] %vm28_vm2, %v825_v28  ;;  %v1849_v13 = vpack.c.bf16 %v1327_v62, %v1327_v62  ;;  %v1881_v33 = vpack.c.bf16 %v1359_v42, %v1359_v42  ;;  %v1325_v45 = vmax.f32 %v1254_v43, %v2720_v53  ;;  %v1357_v10 = vmax.f32 %v1286_v8, %v2720_v53  ;;  %v143_v28 = vld [vmem:[#allocation2 + $0x190] sm:$0xff]  ;;  %v141_v6 = vld [vmem:[#allocation2 + $0x180] sm:$0xff]  ;;  %v112_v7 = vld [vmem:[#allocation2 + $0x98] sm:$0xff] }
  0xee   :  { %856 = vst.msk [vmem:[#allocation2 + $0x40] sm:$0xff] %vm28_vm2, %v791_v47  ;;  %888 = vst.msk [vmem:[#allocation2 + $0x140] sm:$0xff] %vm28_vm2, %v823_v12  ;;  %v792_v60 = vadd.f32 %v2780_v55, %v102_v54  ;;  %v824_v17 = vadd.f32 %v2782_v4, %v134_v37  ;;  %v797_v35 = vadd.f32 %v2800_v56, %v107_v61  ;;  %v144_v37 = vld [vmem:[#allocation2 + $0x198] sm:$0xff]  ;;  %v2154_v61 = vpop.f32.mrf.mxu1  ;;  %v110_v62 = vld [vmem:[#allocation2 + $0x88] sm:$0xff] }
  0xef   :  { %859 = vst.msk [vmem:[#allocation2 + $0x58] sm:$0xff] %vm28_vm2, %v794_v29  ;;  %891 = vst.msk [vmem:[#allocation2 + $0x158] sm:$0xff] %vm28_vm2, %v826_v30  ;;  %v829_v57 = vadd.f32 %v2802_v39, %v139_v9  ;;  %v1847_v55 = vpack.c.bf16 %v1325_v45, %v1325_v45  ;;  %v1879_v54 = vpack.c.bf16 %v1357_v10, %v1357_v10  ;;  %v2122_v39 = vpop.f32.mrf.mxu0  ;;  %v142_v42 = vld [vmem:[#allocation2 + $0x188] sm:$0xff]  ;;  %v2939_v29 = vld [vmem:[%s3515_s5 + $0x60] sm:$0xff]   ;;  %v2017_v10 = vunpack.c.h.bf16 %v2678_v19 }
  0xf0   :  { %1648 = vst.msk [vmem:[%s3519_s6 + $0x1c] sm:$0xf] %vm1640_vm3, %v1849_v13  ;;  %1680 = vst.msk [vmem:[%s3519_s6 + $0x9c] sm:$0xf] %vm1640_vm3, %v1881_v33  ;;  %v795_v4 = vadd.f32 %v2820_v34, %v105_v23  ;;  %v827_v56 = vadd.f32 %v2822_v36, %v137_v22  ;;  %v798_v45 = vadd.f32 %v2842_v27, %v108_v46  ;;  %v115_v23 = vld [vmem:[#allocation2 + $0xb0] sm:$0xff]  ;;  %v2925_v47 = vld [vmem:[%s3515_s5 + $0x68] sm:$0xff]   ;;  %v1953_v33 = vunpack.c.h.bf16 %v2673_v18 }
  0xf1   :  { %857 = vst.msk [vmem:[#allocation2 + $0x48] sm:$0xff] %vm28_vm2, %v792_v60  ;;  %889 = vst.msk [vmem:[#allocation2 + $0x148] sm:$0xff] %vm28_vm2, %v824_v17  ;;  %v830_v43 = vadd.f32 %v2844_v31, %v140_v48  ;;  %v796_v34 = vadd.f32 %v2852_v41, %v106_v49  ;;  %v828_v36 = vadd.f32 %v2854_v40, %v138_v11  ;;  %v595_v9 = vpop.f32.mrf.mxu0  ;;  %v723_v40 = vpop.f32.mrf.mxu1  ;;  %v147_v22 = vld [vmem:[#allocation2 + $0x1b0] sm:$0xff]  ;;  %v2934_v12 = vld [vmem:[%s3515_s5 + $0xe8] sm:$0xff]   ;;  %v1949_v11 = vunpack.c.h.bf16 %v2693_v5 }
  0xf2   :  { %862 = vst.msk [vmem:[#allocation2 + $0x70] sm:$0xff] %vm28_vm2, %v797_v35  ;;  %894 = vst.msk [vmem:[#allocation2 + $0x170] sm:$0xff] %vm28_vm2, %v829_v57  ;;  %v801_v27 = vadd.f32 %v2121_v59, %v111_v21  ;;  %v833_v31 = vadd.f32 %v2153_v38, %v143_v28  ;;  %v799_v8 = vadd.f32 %v592_v20, %v109_v14  ;;  %v2944_v30 = vld [vmem:[%s3515_s5 + $0xe0] sm:$0xff]   ;;  %v925_v46 = vld [vmem:[#allocation2 + $0x50] sm:$0xff]  ;;  %v2013_v28 = vunpack.c.h.bf16 %v2698_v32 }
  0xf3   :  { %1646 = vst.msk [vmem:[%s3519_s6 + $0x14] sm:$0xf] %vm1640_vm3, %v1847_v55  ;;  %1678 = vst.msk [vmem:[%s3519_s6 + $0x94] sm:$0xf] %vm1640_vm3, %v1879_v54  ;;  %v831_v41 = vadd.f32 %v720_v52, %v141_v6  ;;  %v802_v21 = vadd.f32 %v2122_v39, %v112_v7  ;;  %v834_v20 = vadd.f32 %v2154_v61, %v144_v37  ;;  %v2125_v49 = vpop.f32.mrf.mxu0  ;;  %v2157_v13 = vpop.f32.mrf.mxu1  ;;  %v3520_v52 = vunpack.c.l.bf16 %v2574_v58  ;;  %v113_v6 = vld [vmem:[#allocation2 + $0xa0] sm:$0xff] }
  0xf4   :  { %860 = vst.msk [vmem:[#allocation2 + $0x60] sm:$0xff] %vm28_vm2, %v795_v4  ;;  %892 = vst.msk [vmem:[#allocation2 + $0x160] sm:$0xff] %vm28_vm2, %v827_v56  ;;  %v800_v59 = vadd.f32 %v595_v9, %v110_v62  ;;  %v832_v38 = vadd.f32 %v723_v40, %v142_v42  ;;  %v957_v48 = vld [vmem:[#allocation2 + $0x150] sm:$0xff]  ;;  %v3521_v17 = vunpack.c.l.bf16 %v2581_v63  ;;  %v805_v57 = vadd.f32 %v2125_v49, %v115_v23  ;;  %v145_v7 = vld [vmem:[#allocation2 + $0x1a0] sm:$0xff] }
  0xf5   :  { %863 = vst.msk [vmem:[#allocation2 + $0x78] sm:$0xff] %vm28_vm2, %v798_v45  ;;  %895 = vst.msk [vmem:[#allocation2 + $0x178] sm:$0xff] %vm28_vm2, %v830_v43  ;;  %v1117_v60 = vadd.f32 %v3520_v52, %v925_v46  ;;  %v837_v14 = vadd.f32 %v2157_v13, %v147_v22  ;;  %v923_v55 = vld [vmem:[#allocation2 + $0x40] sm:$0xff]  ;;  %v608_v56 = vpop.f32.mrf.mxu0  ;;  %v736_v39 = vpop.f32.mrf.mxu1  ;;  %v1960_v37 = vunpack.c.l.bf16 %v2925_v47  ;;  %v2024_v61 = vunpack.c.l.bf16 %v2934_v12 }
  0xf6   :  { %861 = vst.msk [vmem:[#allocation2 + $0x68] sm:$0xff] %vm28_vm2, %v796_v34  ;;  %893 = vst.msk [vmem:[#allocation2 + $0x168] sm:$0xff] %vm28_vm2, %v828_v36  ;;  %v1149_v35 = vadd.f32 %v3521_v17, %v957_v48  ;;  %v955_v54 = vld [vmem:[#allocation2 + $0x140] sm:$0xff]  ;;  %v926_v4 = vld [vmem:[#allocation2 + $0x58] sm:$0xff]  ;;  %v1956_v62 = vunpack.c.l.bf16 %v2939_v29  ;;  %v2020_v42 = vunpack.c.l.bf16 %v2944_v30  ;;  %v3522_v34 = vunpack.c.l.bf16 %v2586_v0 }
  0xf7   :  { %866 = vst.msk [vmem:[#allocation2 + $0x90] sm:$0xff] %vm28_vm2, %v801_v27  ;;  %898 = vst.msk [vmem:[#allocation2 + $0x190] sm:$0xff] %vm28_vm2, %v833_v31  ;;  %v1188_v45 = vmul.f32 %v2664_v26, %v1117_v60  ;;  %v3523_v27 = vunpack.c.l.bf16 %v2591_v1  ;;  %v3525_v40 = vunpack.c.h.bf16 %v2581_v63  ;;  %v2980_v46 = vpop.f32.mrf.mxu1  ;;  %v3526_v60 = vunpack.c.h.bf16 %v2586_v0 }
  0xf8   :  { %864 = vst.msk [vmem:[#allocation2 + $0x80] sm:$0xff] %vm28_vm2, %v799_v8  ;;  %896 = vst.msk [vmem:[#allocation2 + $0x180] sm:$0xff] %vm28_vm2, %v831_v41  ;;  %v1220_v43 = vmul.f32 %v2664_v26, %v1149_v35  ;;  %v1115_v36 = vadd.f32 %v3522_v34, %v923_v55  ;;  %v958_v8 = vld [vmem:[#allocation2 + $0x158] sm:$0xff]  ;;  %v3524_v41 = vunpack.c.h.bf16 %v2574_v58  ;;  %v924_v22 = vld [vmem:[#allocation2 + $0x48] sm:$0xff]  ;;  %v3527_v35 = vunpack.c.h.bf16 %v2591_v1 }
  0xf9   :  { %867 = vst.msk [vmem:[#allocation2 + $0x98] sm:$0xff] %vm28_vm2, %v802_v21  ;;  %899 = vst.msk [vmem:[#allocation2 + $0x198] sm:$0xff] %vm28_vm2, %v834_v20  ;;  %v1147_v31 = vadd.f32 %v3523_v27, %v955_v54  ;;  %v1150_v23 = vadd.f32 %v3525_v40, %v958_v8  ;;  %v956_v21 = vld [vmem:[#allocation2 + $0x148] sm:$0xff]  ;;  %v803_v20 = vadd.f32 %v608_v56, %v113_v6 }
  0xfa   :  { %865 = vst.msk [vmem:[#allocation2 + $0x88] sm:$0xff] %vm28_vm2, %v800_v59  ;;  %897 = vst.msk [vmem:[#allocation2 + $0x188] sm:$0xff] %vm28_vm2, %v832_v38  ;;  %v1118_v9 = vadd.f32 %v3524_v41, %v926_v4  ;;  %v835_v59 = vadd.f32 %v736_v39, %v145_v7  ;;  %v2978_v38 = vpop.f32.mrf.mxu0  ;;  %v1259_v48 = vadd.f32 %v2703_v44, %v1188_v45  ;;  %v3000_v4 = vpop.f32.mrf.mxu1  ;;  %v929_v45 = vld [vmem:[#allocation2 + $0x70] sm:$0xff] }
  0xfb   :  { %870 = vst.msk [vmem:[#allocation2 + $0xb0] sm:$0xff] %vm28_vm2, %v805_v57  ;;  %902 = vst.msk [vmem:[#allocation2 + $0x1b0] sm:$0xff] %vm28_vm2, %v837_v14  ;;  %v1291_v49 = vadd.f32 %v2703_v44, %v1220_v43  ;;  %v1186_v13 = vmul.f32 %v2664_v26, %v1115_v36  ;;  %v1218_v58 = vmul.f32 %v2664_v26, %v1147_v31  ;;  %v961_v43 = vld [vmem:[#allocation2 + $0x170] sm:$0xff] }
  0xfc   :  { %v1189_v52 = vmul.f32 %v2664_v26, %v1118_v9  ;;  %v1221_v63 = vmul.f32 %v2664_v26, %v1150_v23  ;;  %v1116_v17 = vadd.f32 %v3526_v60, %v924_v22  ;;  %v1148_v57 = vadd.f32 %v3527_v35, %v956_v21  ;;  %868 = vst.msk [vmem:[#allocation2 + $0xa0] sm:$0xff] %vm28_vm2, %v803_v20  ;;  %v2998_v54 = vpop.f32.mrf.mxu0  ;;  %v927_v23 = vld [vmem:[#allocation2 + $0x60] sm:$0xff]  ;;  %v3026_v60 = vpop.f32.mrf.mxu1 }
  0xfd   :  { %900 = vst.msk [vmem:[#allocation2 + $0x1a0] sm:$0xff] %vm28_vm2, %v835_v59  ;;  %v1330_v14 = vmax.f32 %v1259_v48, %v2720_v53  ;;  %v1362_v6 = vmax.f32 %v1291_v49, %v2720_v53  ;;  %v1257_v7 = vadd.f32 %v2703_v44, %v1186_v13  ;;  %v1289_v55 = vadd.f32 %v2703_v44, %v1218_v58  ;;  %v959_v22 = vld [vmem:[#allocation2 + $0x160] sm:$0xff]  ;;  %v930_v58 = vld [vmem:[#allocation2 + $0x78] sm:$0xff] }
  0xfe   :  { %v1260_v0 = vadd.f32 %v2703_v44, %v1189_v52  ;;  %v1292_v1 = vadd.f32 %v2703_v44, %v1221_v63  ;;  %v1187_v56 = vmul.f32 %v2664_v26, %v1116_v17  ;;  %v1219_v39 = vmul.f32 %v2664_v26, %v1148_v57  ;;  %v962_v52 = vld [vmem:[#allocation2 + $0x178] sm:$0xff]  ;;  %v3024_v63 = vpop.f32.mrf.mxu0 }
  0xff   :  { %v1852_v34 = vpack.c.bf16 %v1330_v14, %v1330_v14  ;;  %v1884_v36 = vpack.c.bf16 %v1362_v6, %v1362_v6  ;;  %v1328_v27 = vmax.f32 %v1257_v7, %v2720_v53  ;;  %v1360_v31 = vmax.f32 %v1289_v55, %v2720_v53 }
 0x100   :  { %v1331_v8 = vmax.f32 %v1260_v0, %v2720_v53  ;;  %v1363_v41 = vmax.f32 %v1292_v1, %v2720_v53  ;;  %v1258_v9 = vadd.f32 %v2703_v44, %v1187_v56  ;;  %v1290_v40 = vadd.f32 %v2703_v44, %v1219_v39  ;;  %v928_v39 = vld [vmem:[#allocation2 + $0x68] sm:$0xff] }
 0x101   :  { %1651 = vst.msk [vmem:[%s3519_s6 + $0x28] sm:$0xf] %vm1640_vm3, %v1852_v34  ;;  %1683 = vst.msk [vmem:[%s3519_s6 + $0xa8] sm:$0xf] %vm1640_vm3, %v1884_v36  ;;  %v1850_v21 = vpack.c.bf16 %v1328_v27, %v1328_v27  ;;  %v1882_v20 = vpack.c.bf16 %v1360_v31, %v1360_v31  ;;  %v3528_v59 = vunpack.c.l.bf16 %v2604_v15  ;;  %v3529_v49 = vunpack.c.l.bf16 %v2609_v16 }
 0x102   :  { %v1853_v17 = vpack.c.bf16 %v1331_v8, %v1331_v8  ;;  %v1885_v35 = vpack.c.bf16 %v1363_v41, %v1363_v41  ;;  %v1329_v57 = vmax.f32 %v1258_v9, %v2720_v53  ;;  %v1361_v14 = vmax.f32 %v1290_v40, %v2720_v53 }
 0x103   :  { %v1121_v48 = vadd.f32 %v3528_v59, %v929_v45  ;;  %v1153_v13 = vadd.f32 %v3529_v49, %v961_v43  ;;  %1649 = vst.msk [vmem:[%s3519_s6 + $0x20] sm:$0xf] %vm1640_vm3, %v1850_v21  ;;  %1681 = vst.msk [vmem:[%s3519_s6 + $0xa0] sm:$0xf] %vm1640_vm3, %v1882_v20  ;;  %v3530_v55 = vunpack.c.l.bf16 %v2618_v24  ;;  %v3531_v1 = vunpack.c.l.bf16 %v2623_v25  ;;  %v960_v45 = vld [vmem:[#allocation2 + $0x168] sm:$0xff]  ;;  %v3062_v21 = vpop.f32.mrf.mxu1 }
 0x104   :  { %1652 = vst.msk [vmem:[%s3519_s6 + $0x2c] sm:$0xf] %vm1640_vm3, %v1853_v17  ;;  %1684 = vst.msk [vmem:[%s3519_s6 + $0xac] sm:$0xf] %vm1640_vm3, %v1885_v35  ;;  %v1851_v43 = vpack.c.bf16 %v1329_v57, %v1329_v57  ;;  %v1883_v34 = vpack.c.bf16 %v1361_v14, %v1361_v14  ;;  %v3532_v36 = vunpack.c.h.bf16 %v2604_v15  ;;  %v3533_v31 = vunpack.c.h.bf16 %v2609_v16 }
 0x105   :  { %v1192_v6 = vmul.f32 %v2664_v26, %v1121_v48  ;;  %v1224_v7 = vmul.f32 %v2664_v26, %v1153_v13  ;;  %v1119_v0 = vadd.f32 %v3530_v55, %v927_v23  ;;  %v1151_v56 = vadd.f32 %v3531_v1, %v959_v22  ;;  %v3060_v22 = vpop.f32.mrf.mxu0 }
 0x106   :  { %v1122_v27 = vadd.f32 %v3532_v36, %v930_v58  ;;  %v1154_v8 = vadd.f32 %v3533_v31, %v962_v52  ;;  %1650 = vst.msk [vmem:[%s3519_s6 + $0x24] sm:$0xf] %vm1640_vm3, %v1851_v43  ;;  %1682 = vst.msk [vmem:[%s3519_s6 + $0xa4] sm:$0xf] %vm1640_vm3, %v1883_v34  ;;  %v3534_v20 = vunpack.c.h.bf16 %v2618_v24  ;;  %v3535_v48 = vunpack.c.h.bf16 %v2623_v25  ;;  %v963_v31 = vld [vmem:[#allocation2 + $0x180] sm:$0xff] }
 0x107   :  { %v1263_v41 = vadd.f32 %v2703_v44, %v1192_v6  ;;  %v1295_v9 = vadd.f32 %v2703_v44, %v1224_v7  ;;  %v1190_v40 = vmul.f32 %v2664_v26, %v1119_v0  ;;  %v1222_v23 = vmul.f32 %v2664_v26, %v1151_v56  ;;  %v933_v6 = vld [vmem:[#allocation2 + $0x90] sm:$0xff]  ;;  %v3088_v56 = vpop.f32.mrf.mxu0 }
 0x108   :  { %v1193_v15 = vmul.f32 %v2664_v26, %v1122_v27  ;;  %v1225_v16 = vmul.f32 %v2664_v26, %v1154_v8  ;;  %v1120_v59 = vadd.f32 %v3534_v20, %v928_v39  ;;  %v1152_v49 = vadd.f32 %v3535_v48, %v960_v45  ;;  %v965_v7 = vld [vmem:[#allocation2 + $0x190] sm:$0xff]  ;;  %v3090_v39 = vpop.f32.mrf.mxu1  ;;  %v931_v27 = vld [vmem:[#allocation2 + $0x80] sm:$0xff]  ;;  %v966_v20 = vld [vmem:[#allocation2 + $0x198] sm:$0xff] }
 0x109   :  { %v1334_v13 = vmax.f32 %v1263_v41, %v2720_v53  ;;  %v1366_v58 = vmax.f32 %v1295_v9, %v2720_v53  ;;  %v1261_v52 = vadd.f32 %v2703_v44, %v1190_v40  ;;  %v1293_v17 = vadd.f32 %v2703_v44, %v1222_v23 }
 0x10a   :  { %v1264_v35 = vadd.f32 %v2703_v44, %v1193_v15  ;;  %v1296_v57 = vadd.f32 %v2703_v44, %v1225_v16  ;;  %v1191_v14 = vmul.f32 %v2664_v26, %v1120_v59  ;;  %v1223_v24 = vmul.f32 %v2664_v26, %v1152_v49  ;;  %v934_v16 = vld [vmem:[#allocation2 + $0x98] sm:$0xff] }
 0x10b   :  { %v1856_v25 = vpack.c.bf16 %v1334_v13, %v1334_v13  ;;  %v1888_v55 = vpack.c.bf16 %v1366_v58, %v1366_v58  ;;  %v1332_v0 = vmax.f32 %v1261_v52, %v2720_v53  ;;  %v1364_v1 = vmax.f32 %v1293_v17, %v2720_v53 }
 0x10c   :  { %v1335_v45 = vmax.f32 %v1264_v35, %v2720_v53  ;;  %v1367_v43 = vmax.f32 %v1296_v57, %v2720_v53  ;;  %v1262_v34 = vadd.f32 %v2703_v44, %v1191_v14  ;;  %v1294_v36 = vadd.f32 %v2703_v44, %v1223_v24  ;;  %v932_v24 = vld [vmem:[#allocation2 + $0x88] sm:$0xff] }
 0x10d   :  { %1655 = vst.msk [vmem:[%s3519_s6 + $0x38] sm:$0xf] %vm1640_vm3, %v1856_v25  ;;  %1687 = vst.msk [vmem:[%s3519_s6 + $0xb8] sm:$0xf] %vm1640_vm3, %v1888_v55  ;;  %v1854_v8 = vpack.c.bf16 %v1332_v0, %v1332_v0  ;;  %v1886_v41 = vpack.c.bf16 %v1364_v1, %v1364_v1  ;;  %v3536_v9 = vunpack.c.l.bf16 %v2636_v50  ;;  %v3537_v23 = vunpack.c.l.bf16 %v2641_v51  ;;  %v3126_v25 = vpop.f32.mrf.mxu1 }
 0x10e   :  { %v1857_v59 = vpack.c.bf16 %v1335_v45, %v1335_v45  ;;  %v1889_v48 = vpack.c.bf16 %v1367_v43, %v1367_v43  ;;  %v1333_v49 = vmax.f32 %v1262_v34, %v2720_v53  ;;  %v1365_v13 = vmax.f32 %v1294_v36, %v2720_v53 }
 0x10f   :  { %v1125_v40 = vadd.f32 %v3536_v9, %v933_v6  ;;  %v1157_v15 = vadd.f32 %v3537_v23, %v965_v7  ;;  %1653 = vst.msk [vmem:[%s3519_s6 + $0x30] sm:$0xf] %vm1640_vm3, %v1854_v8  ;;  %1685 = vst.msk [vmem:[%s3519_s6 + $0xb0] sm:$0xf] %vm1640_vm3, %v1886_v41  ;;  %v3538_v17 = vunpack.c.l.bf16 %v2650_v2  ;;  %v3539_v57 = vunpack.c.l.bf16 %v2655_v3  ;;  %v964_v6 = vld [vmem:[#allocation2 + $0x188] sm:$0xff]  ;;  %v3124_v7 = vpop.f32.mrf.mxu0 }
 0x110   :  { %1656 = vst.msk [vmem:[%s3519_s6 + $0x3c] sm:$0xf] %vm1640_vm3, %v1857_v59  ;;  %1688 = vst.msk [vmem:[%s3519_s6 + $0xbc] sm:$0xf] %vm1640_vm3, %v1889_v48  ;;  %v1855_v55 = vpack.c.bf16 %v1333_v49, %v1333_v49  ;;  %v1887_v0 = vpack.c.bf16 %v1365_v13, %v1365_v13  ;;  %v3540_v1 = vunpack.c.h.bf16 %v2636_v50  ;;  %v3541_v43 = vunpack.c.h.bf16 %v2641_v51  ;;  %v3164_v49 = vpop.f32.mrf.mxu1 }
 0x111   :  { %v1196_v58 = vmul.f32 %v2664_v26, %v1125_v40  ;;  %v1228_v52 = vmul.f32 %v2664_v26, %v1157_v15  ;;  %v1123_v35 = vadd.f32 %v3538_v17, %v931_v27  ;;  %v1155_v14 = vadd.f32 %v3539_v57, %v963_v31  ;;  %v3162_v48 = vpop.f32.mrf.mxu0  ;;  %v969_v17 = vld [vmem:[#allocation2 + $0x1b0] sm:$0xff] }
 0x112   :  { %v1126_v45 = vadd.f32 %v3540_v1, %v934_v16  ;;  %v1158_v34 = vadd.f32 %v3541_v43, %v966_v20  ;;  %1654 = vst.msk [vmem:[%s3519_s6 + $0x34] sm:$0xf] %vm1640_vm3, %v1855_v55  ;;  %1686 = vst.msk [vmem:[%s3519_s6 + $0xb4] sm:$0xf] %vm1640_vm3, %v1887_v0  ;;  %v3542_v41 = vunpack.c.h.bf16 %v2650_v2  ;;  %v3543_v40 = vunpack.c.h.bf16 %v2655_v3  ;;  %v967_v43 = vld [vmem:[#allocation2 + $0x1a0] sm:$0xff] }
 0x113   :  { %v1267_v36 = vadd.f32 %v2703_v44, %v1196_v58  ;;  %v1299_v27 = vadd.f32 %v2703_v44, %v1228_v52  ;;  %v1194_v31 = vmul.f32 %v2664_v26, %v1123_v35  ;;  %v1226_v8 = vmul.f32 %v2664_v26, %v1155_v14  ;;  %v937_v52 = vld [vmem:[#allocation2 + $0xb0] sm:$0xff] }
 0x114   :  { %v1197_v50 = vmul.f32 %v2664_v26, %v1126_v45  ;;  %v1229_v51 = vmul.f32 %v2664_v26, %v1158_v34  ;;  %v1124_v9 = vadd.f32 %v3542_v41, %v932_v24  ;;  %v1156_v23 = vadd.f32 %v3543_v40, %v964_v6  ;;  %v935_v45 = vld [vmem:[#allocation2 + $0xa0] sm:$0xff]  ;;  %v148_v41 = vld [vmem:[#allocation2 + $0x1b8] sm:$0xff]  ;;  %v3190_v40 = vpop.f32.mrf.mxu1 }
 0x115   :  { %v1338_v15 = vmax.f32 %v1267_v36, %v2720_v53  ;;  %v1370_v16 = vmax.f32 %v1299_v27, %v2720_v53  ;;  %v1265_v20 = vadd.f32 %v2703_v44, %v1194_v31  ;;  %v1297_v59 = vadd.f32 %v2703_v44, %v1226_v8 }
 0x116   :  { %v1268_v13 = vadd.f32 %v2703_v44, %v1197_v50  ;;  %v1300_v2 = vadd.f32 %v2703_v44, %v1229_v51  ;;  %v1195_v58 = vmul.f32 %v2664_v26, %v1124_v9  ;;  %v1227_v3 = vmul.f32 %v2664_v26, %v1156_v23  ;;  %v116_v51 = vld [vmem:[#allocation2 + $0xb8] sm:$0xff]  ;;  %v3188_v9 = vpop.f32.mrf.mxu0 }
 0x117   :  { %v1860_v35 = vpack.c.bf16 %v1338_v15, %v1338_v15  ;;  %v1892_v57 = vpack.c.bf16 %v1370_v16, %v1370_v16  ;;  %v1336_v14 = vmax.f32 %v1265_v20, %v2720_v53  ;;  %v1368_v24 = vmax.f32 %v1297_v59, %v2720_v53  ;;  %v114_v59 = vld [vmem:[#allocation2 + $0xa8] sm:$0xff] }
 0x118   :  { %v1339_v6 = vmax.f32 %v1268_v13, %v2720_v53  ;;  %v1371_v55 = vmax.f32 %v1300_v2, %v2720_v53  ;;  %v1266_v0 = vadd.f32 %v2703_v44, %v1195_v58  ;;  %v1298_v1 = vadd.f32 %v2703_v44, %v1227_v3 }
 0x119   :  { %1659 = vst.msk [vmem:[%s3519_s6 + $0x48] sm:$0xf] %vm1640_vm3, %v1860_v35  ;;  %1691 = vst.msk [vmem:[%s3519_s6 + $0xc8] sm:$0xf] %vm1640_vm3, %v1892_v57  ;;  %v1858_v34 = vpack.c.bf16 %v1336_v14, %v1336_v14  ;;  %v1890_v36 = vpack.c.bf16 %v1368_v24, %v1368_v24  ;;  %v3544_v27 = vunpack.c.l.bf16 %v2673_v18  ;;  %v3545_v8 = vunpack.c.l.bf16 %v2678_v19  ;;  %v146_v35 = vld [vmem:[#allocation2 + $0x1a8] sm:$0xff]  ;;  %v119_v57 = vld [vmem:[#allocation2 + $0xd0] sm:$0xff] }
 0x11a   :  { %v1861_v23 = vpack.c.bf16 %v1339_v6, %v1339_v6  ;;  %v1893_v15 = vpack.c.bf16 %v1371_v55, %v1371_v55  ;;  %v1337_v16 = vmax.f32 %v1266_v0, %v2720_v53  ;;  %v1369_v20 = vmax.f32 %v1298_v1, %v2720_v53  ;;  %v151_v14 = vld [vmem:[#allocation2 + $0x1d0] sm:$0xff]  ;;  %v117_v1 = vld [vmem:[#allocation2 + $0xc0] sm:$0xff] }
 0x11b   :  { %v1129_v31 = vadd.f32 %v3544_v27, %v937_v52  ;;  %v1161_v50 = vadd.f32 %v3545_v8, %v969_v17  ;;  %1657 = vst.msk [vmem:[%s3519_s6 + $0x40] sm:$0xf] %vm1640_vm3, %v1858_v34  ;;  %1689 = vst.msk [vmem:[%s3519_s6 + $0xc0] sm:$0xf] %vm1640_vm3, %v1890_v36  ;;  %v3546_v58 = vunpack.c.l.bf16 %v2693_v5  ;;  %v3547_v52 = vunpack.c.l.bf16 %v2698_v32  ;;  %v149_v27 = vld [vmem:[#allocation2 + $0x1c0] sm:$0xff]  ;;  %v152_v8 = vld [vmem:[#allocation2 + $0x1d8] sm:$0xff] }
 0x11c   :  { %1660 = vst.msk [vmem:[%s3519_s6 + $0x4c] sm:$0xf] %vm1640_vm3, %v1861_v23  ;;  %1692 = vst.msk [vmem:[%s3519_s6 + $0xcc] sm:$0xf] %vm1640_vm3, %v1893_v15  ;;  %v1859_v24 = vpack.c.bf16 %v1337_v16, %v1337_v16  ;;  %v1891_v6 = vpack.c.bf16 %v1369_v20, %v1369_v20  ;;  %v806_v55 = vadd.f32 %v2978_v38, %v116_v51  ;;  %v2166_v23 = vpop.f32.mrf.mxu1  ;;  %v3340_v5 = vld [vmem:[%s3517_s3] ss:$0 sm:$0xff] }
 0x11d   :  { %v1200_v13 = vmul.f32 %v2664_v26, %v1129_v31  ;;  %v1232_v2 = vmul.f32 %v2664_v26, %v1161_v50  ;;  %v1127_v3 = vadd.f32 %v3546_v58, %v935_v45  ;;  %v1159_v17 = vadd.f32 %v3547_v52, %v967_v43  ;;  %v120_v31 = vld [vmem:[#allocation2 + $0xd8] sm:$0xff]  ;;  %v2134_v50 = vpop.f32.mrf.mxu0  ;;  %v123_v58 = vld [vmem:[#allocation2 + $0xf0] sm:$0xff] }
 0x11e   :  { %v838_v0 = vadd.f32 %v2980_v46, %v148_v41  ;;  %1658 = vst.msk [vmem:[%s3519_s6 + $0x44] sm:$0xf] %vm1640_vm3, %v1859_v24  ;;  %1690 = vst.msk [vmem:[%s3519_s6 + $0xc4] sm:$0xf] %vm1640_vm3, %v1891_v6  ;;  %v836_v38 = vadd.f32 %v3000_v4, %v146_v35  ;;  %v809_v46 = vadd.f32 %v3024_v63, %v119_v57  ;;  %v118_v41 = vld [vmem:[#allocation2 + $0xc8] sm:$0xff]  ;;  %v124_v52 = vld [vmem:[#allocation2 + $0xf8] sm:$0xff] }
 0x11f   :  { %v1271_v45 = vadd.f32 %v2703_v44, %v1200_v13  ;;  %v1303_v43 = vadd.f32 %v2703_v44, %v1232_v2  ;;  %v1198_v34 = vmul.f32 %v2664_v26, %v1127_v3  ;;  %v1230_v36 = vmul.f32 %v2664_v26, %v1159_v17  ;;  %871 = vst.msk [vmem:[#allocation2 + $0xb8] sm:$0xff] %vm28_vm2, %v806_v55  ;;  %v150_v2 = vld [vmem:[#allocation2 + $0x1c8] sm:$0xff]  ;;  %v155_v3 = vld [vmem:[#allocation2 + $0x1f0] sm:$0xff]  ;;  %v156_v24 = vld [vmem:[#allocation2 + $0x1f8] sm:$0xff]  ;;  %v643_v55 = vpop.f32.mrf.mxu0 }
 0x120   :  { %903 = vst.msk [vmem:[#allocation2 + $0x1b8] sm:$0xff] %vm28_vm2, %v838_v0  ;;  %v804_v26 = vadd.f32 %v2998_v54, %v114_v59  ;;  %v841_v51 = vadd.f32 %v3026_v60, %v151_v14  ;;  %901 = vst.msk [vmem:[#allocation2 + $0x1a8] sm:$0xff] %vm28_vm2, %v836_v38  ;;  %v807_v54 = vadd.f32 %v3060_v22, %v117_v1  ;;  %v153_v59 = vld [vmem:[#allocation2 + $0x1e0] sm:$0xff]  ;;  %v122_v6 = vld [vmem:[#allocation2 + $0xe8] sm:$0xff]  ;;  %v771_v22 = vpop.f32.mrf.mxu1  ;;  %v2025_v38 = vunpack.c.h.bf16 %v2934_v12 }
 0x121   :  { %v1342_v15 = vmax.f32 %v1271_v45, %v2720_v53  ;;  %v1374_v16 = vmax.f32 %v1303_v43, %v2720_v53  ;;  %v1269_v20 = vadd.f32 %v2703_v44, %v1198_v34  ;;  %v1301_v13 = vadd.f32 %v2703_v44, %v1230_v36  ;;  %874 = vst.msk [vmem:[#allocation2 + $0xd0] sm:$0xff] %vm28_vm2, %v809_v46  ;;  %v121_v44 = vld [vmem:[#allocation2 + $0xe0] sm:$0xff]  ;;  %v154_v0 = vld [vmem:[#allocation2 + $0x1e8] sm:$0xff]  ;;  %v3285_v43 = vld [vmem:[%s3515_s5 + $0x70] sm:$0xff]  }
 0x122   :  { %869 = vst.msk [vmem:[#allocation2 + $0xa8] sm:$0xff] %vm28_vm2, %v804_v26  ;;  %906 = vst.msk [vmem:[#allocation2 + $0x1d0] sm:$0xff] %vm28_vm2, %v841_v51  ;;  %v839_v4 = vadd.f32 %v3062_v21, %v149_v27  ;;  %v810_v63 = vadd.f32 %v3088_v56, %v120_v31  ;;  %v842_v60 = vadd.f32 %v3090_v39, %v152_v8  ;;  %v3290_v34 = vld [vmem:[%s3515_s5 + $0xf0] sm:$0xff]   ;;  %v1961_v26 = vunpack.c.h.bf16 %v2925_v47 }
 0x123   :  { %v1864_v17 = vpack.c.bf16 %v1342_v15, %v1342_v15  ;;  %v1896_v35 = vpack.c.bf16 %v1374_v16, %v1374_v16  ;;  %v1340_v57 = vmax.f32 %v1269_v20, %v2720_v53  ;;  %v1372_v14 = vmax.f32 %v1301_v13, %v2720_v53  ;;  %872 = vst.msk [vmem:[#allocation2 + $0xc0] sm:$0xff] %vm28_vm2, %v807_v54 }
 0x124   :  { %904 = vst.msk [vmem:[#allocation2 + $0x1c0] sm:$0xff] %vm28_vm2, %v839_v4  ;;  %875 = vst.msk [vmem:[#allocation2 + $0xd8] sm:$0xff] %vm28_vm2, %v810_v63  ;;  %v808_v21 = vadd.f32 %v3124_v7, %v118_v41  ;;  %v840_v56 = vadd.f32 %v3126_v25, %v150_v2  ;;  %v813_v39 = vadd.f32 %v3162_v48, %v123_v58  ;;  %v3269_v7 = vld [vmem:[%s3515_s5 + $0x78] sm:$0xff]   ;;  %v1964_v18 = vunpack.c.l.bf16 %v3285_v43  ;;  %v3323_v2 = vld [vmem:[%s3516_s2] ss:$0 sm:$0xff] }
 0x125   :  { %907 = vst.msk [vmem:[#allocation2 + $0x1d8] sm:$0xff] %vm28_vm2, %v842_v60  ;;  %v845_v53 = vadd.f32 %v3164_v49, %v155_v3  ;;  %v1862_v1 = vpack.c.bf16 %v1340_v57, %v1340_v57  ;;  %v1894_v45 = vpack.c.bf16 %v1372_v14, %v1372_v14  ;;  %v3274_v25 = vld [vmem:[%s3515_s5 + $0xf8] sm:$0xff]   ;;  %v811_v48 = vadd.f32 %v3188_v9, %v121_v44 }
 0x126   :  { %1663 = vst.msk [vmem:[%s3519_s6 + $0x58] sm:$0xf] %vm1640_vm3, %v1864_v17  ;;  %1695 = vst.msk [vmem:[%s3519_s6 + $0xd8] sm:$0xf] %vm1640_vm3, %v1896_v35  ;;  %v843_v49 = vadd.f32 %v3190_v40, %v153_v59  ;;  %v814_v9 = vadd.f32 %v2134_v50, %v124_v52  ;;  %v846_v40 = vadd.f32 %v2166_v23, %v156_v24  ;;  %v938_v31 = vld [vmem:[#allocation2 + $0xb8] sm:$0xff]  ;;  %v1957_v50 = vunpack.c.h.bf16 %v2939_v29 }
 0x127   :  { %873 = vst.msk [vmem:[#allocation2 + $0xc8] sm:$0xff] %vm28_vm2, %v808_v21  ;;  %905 = vst.msk [vmem:[#allocation2 + $0x1c8] sm:$0xff] %vm28_vm2, %v840_v56  ;;  %v812_v36 = vadd.f32 %v643_v55, %v122_v6  ;;  %v844_v27 = vadd.f32 %v771_v22, %v154_v0  ;;  %v970_v8 = vld [vmem:[#allocation2 + $0x1b8] sm:$0xff]  ;;  %v2021_v23 = vunpack.c.h.bf16 %v2944_v30  ;;  %v1130_v46 = vadd.f32 %v1953_v33, %v938_v31  ;;  %v968_v20 = vld [vmem:[#allocation2 + $0x1a8] sm:$0xff] }
 0x128   :  { %878 = vst.msk [vmem:[#allocation2 + $0xf0] sm:$0xff] %vm28_vm2, %v813_v39  ;;  %910 = vst.msk [vmem:[#allocation2 + $0x1f0] sm:$0xff] %vm28_vm2, %v845_v53  ;;  %v1162_v51 = vadd.f32 %v2017_v10, %v970_v8  ;;  %v1968_v41 = vunpack.c.l.bf16 %v3269_v7  ;;  %v2032_v15 = vunpack.c.l.bf16 %v3274_v25  ;;  %v941_v13 = vld [vmem:[#allocation2 + $0xd0] sm:$0xff]  ;;  %v2028_v19 = vunpack.c.l.bf16 %v3290_v34  ;;  %v3355_v6 = vld [vmem:[%s3518_s4] ss:$0 sm:$0xff] }
 0x129   :  { %1661 = vst.msk [vmem:[%s3519_s6 + $0x50] sm:$0xf] %vm1640_vm3, %v1862_v1  ;;  %1693 = vst.msk [vmem:[%s3519_s6 + $0xd0] sm:$0xf] %vm1640_vm3, %v1894_v45  ;;  %v936_v16 = vld [vmem:[#allocation2 + $0xa8] sm:$0xff]  ;;  %v1969_v33 = vunpack.c.h.bf16 %v3269_v7  ;;  %v2033_v10 = vunpack.c.h.bf16 %v3274_v25  ;;  %v1201_v58 = vmul.f32 %v3323_v2, %v1130_v46  ;;  %v1160_v4 = vadd.f32 %v2013_v28, %v968_v20  ;;  %v973_v63 = vld [vmem:[#allocation2 + $0x1d0] sm:$0xff] }
 0x12a   :  { %876 = vst.msk [vmem:[#allocation2 + $0xe0] sm:$0xff] %vm28_vm2, %v811_v48  ;;  %908 = vst.msk [vmem:[#allocation2 + $0x1e0] sm:$0xff] %vm28_vm2, %v843_v49  ;;  %v1233_v3 = vmul.f32 %v3323_v2, %v1162_v51  ;;  %v1128_v54 = vadd.f32 %v1949_v11, %v936_v16  ;;  %v1133_v60 = vadd.f32 %v1960_v37, %v941_v13  ;;  %v939_v59 = vld [vmem:[#allocation2 + $0xc0] sm:$0xff]  ;;  %v1965_v17 = vunpack.c.h.bf16 %v3285_v43 }
 0x12b   :  { %879 = vst.msk [vmem:[#allocation2 + $0xf8] sm:$0xff] %vm28_vm2, %v814_v9  ;;  %911 = vst.msk [vmem:[#allocation2 + $0x1f8] sm:$0xff] %vm28_vm2, %v846_v40  ;;  %v1165_v44 = vadd.f32 %v2024_v61, %v973_v63  ;;  %v971_v52 = vld [vmem:[#allocation2 + $0x1c0] sm:$0xff]  ;;  %v2029_v35 = vunpack.c.h.bf16 %v3290_v34  ;;  %v1272_v32 = vadd.f32 %v3340_v5, %v1201_v58  ;;  %v1231_v37 = vmul.f32 %v3323_v2, %v1160_v4  ;;  %v942_v53 = vld [vmem:[#allocation2 + $0xd8] sm:$0xff] }
 0x12c   :  { %877 = vst.msk [vmem:[#allocation2 + $0xe8] sm:$0xff] %vm28_vm2, %v812_v36  ;;  %909 = vst.msk [vmem:[#allocation2 + $0x1e8] sm:$0xff] %vm28_vm2, %v844_v27  ;;  %v1304_v11 = vadd.f32 %v3340_v5, %v1233_v3  ;;  %v1199_v28 = vmul.f32 %v3323_v2, %v1128_v54  ;;  %v1204_v61 = vmul.f32 %v3323_v2, %v1133_v60  ;;  %v974_v1 = vld [vmem:[#allocation2 + $0x1d8] sm:$0xff] }
 0x12d   :  { %v1236_v57 = vmul.f32 %v3323_v2, %v1165_v44  ;;  %v1131_v14 = vadd.f32 %v1956_v62, %v939_v59  ;;  %v1163_v24 = vadd.f32 %v2020_v42, %v971_v52  ;;  %v1343_v55 = vmax.f32 %v1272_v32, %v3355_v6 }
 0x12e   :  { %v1375_v0 = vmax.f32 %v1304_v11, %v3355_v6  ;;  %v1270_v22 = vadd.f32 %v3340_v5, %v1199_v28  ;;  %v1302_v21 = vadd.f32 %v3340_v5, %v1231_v37  ;;  %v1275_v56 = vadd.f32 %v3340_v5, %v1204_v61  ;;  %v940_v8 = vld [vmem:[#allocation2 + $0xc8] sm:$0xff] }
 0x12f   :  { %v1307_v62 = vadd.f32 %v3340_v5, %v1236_v57  ;;  %v1202_v39 = vmul.f32 %v3323_v2, %v1131_v14  ;;  %v1234_v42 = vmul.f32 %v3323_v2, %v1163_v24  ;;  %v1865_v45 = vpack.c.bf16 %v1343_v55, %v1343_v55  ;;  %v972_v46 = vld [vmem:[#allocation2 + $0x1c8] sm:$0xff]  ;;  %v945_v58 = vld [vmem:[#allocation2 + $0xf0] sm:$0xff] }
 0x130   :  { %v1897_v48 = vpack.c.bf16 %v1375_v0, %v1375_v0  ;;  %v1341_v49 = vmax.f32 %v1270_v22, %v3355_v6  ;;  %v1373_v9 = vmax.f32 %v1302_v21, %v3355_v6  ;;  %v1346_v40 = vmax.f32 %v1275_v56, %v3355_v6  ;;  %v977_v3 = vld [vmem:[#allocation2 + $0x1f0] sm:$0xff] }
 0x131   :  { %v1378_v36 = vmax.f32 %v1307_v62, %v3355_v6  ;;  %v1273_v27 = vadd.f32 %v3340_v5, %v1202_v39  ;;  %v1305_v31 = vadd.f32 %v3340_v5, %v1234_v42  ;;  %1664 = vst.msk [vmem:[%s3519_s6 + $0x5c] sm:$0xf] %vm1640_vm3, %v1865_v45  ;;  %v1134_v20 = vadd.f32 %v1961_v26, %v942_v53  ;;  %v943_v44 = vld [vmem:[#allocation2 + $0xe0] sm:$0xff] }
 0x132   :  { %1696 = vst.msk [vmem:[%s3519_s6 + $0xdc] sm:$0xf] %vm1640_vm3, %v1897_v48  ;;  %v1863_v51 = vpack.c.bf16 %v1341_v49, %v1341_v49  ;;  %v1895_v16 = vpack.c.bf16 %v1373_v9, %v1373_v9  ;;  %v1166_v13 = vadd.f32 %v2025_v38, %v974_v1  ;;  %v1868_v54 = vpack.c.bf16 %v1346_v40, %v1346_v40  ;;  %v975_v59 = vld [vmem:[#allocation2 + $0x1e0] sm:$0xff]  ;;  %v978_v62 = vld [vmem:[#allocation2 + $0x1f8] sm:$0xff] }
 0x133   :  { %v1900_v4 = vpack.c.bf16 %v1378_v36, %v1378_v36  ;;  %v1344_v63 = vmax.f32 %v1273_v27, %v3355_v6  ;;  %v1376_v60 = vmax.f32 %v1305_v31, %v3355_v6  ;;  %v1205_v47 = vmul.f32 %v3323_v2, %v1134_v20  ;;  %v944_v9 = vld [vmem:[#allocation2 + $0xe8] sm:$0xff] }
 0x134   :  { %1662 = vst.msk [vmem:[%s3519_s6 + $0x54] sm:$0xf] %vm1640_vm3, %v1863_v51  ;;  %1694 = vst.msk [vmem:[%s3519_s6 + $0xd4] sm:$0xf] %vm1640_vm3, %v1895_v16  ;;  %v1237_v12 = vmul.f32 %v3323_v2, %v1166_v13  ;;  %v1132_v26 = vadd.f32 %v1957_v50, %v940_v8  ;;  %v1164_v38 = vadd.f32 %v2021_v23, %v972_v46  ;;  %v976_v40 = vld [vmem:[#allocation2 + $0x1e8] sm:$0xff] }
 0x135   :  { %1667 = vst.msk [vmem:[%s3519_s6 + $0x68] sm:$0xf] %vm1640_vm3, %v1868_v54  ;;  %1699 = vst.msk [vmem:[%s3519_s6 + $0xe8] sm:$0xf] %vm1640_vm3, %v1900_v4  ;;  %v1866_v52 = vpack.c.bf16 %v1344_v63, %v1344_v63  ;;  %v1898_v32 = vpack.c.bf16 %v1376_v60, %v1376_v60  ;;  %v1137_v29 = vadd.f32 %v1968_v41, %v945_v58 }
 0x136   :  { %v1169_v30 = vadd.f32 %v2032_v15, %v977_v3  ;;  %v1276_v50 = vadd.f32 %v3340_v5, %v1205_v47  ;;  %v1308_v23 = vadd.f32 %v3340_v5, %v1237_v12  ;;  %v1203_v11 = vmul.f32 %v3323_v2, %v1132_v26 }
 0x137   :  { %v1235_v28 = vmul.f32 %v3323_v2, %v1164_v38  ;;  %1665 = vst.msk [vmem:[%s3519_s6 + $0x60] sm:$0xf] %vm1640_vm3, %v1866_v52  ;;  %1697 = vst.msk [vmem:[%s3519_s6 + $0xe0] sm:$0xf] %vm1640_vm3, %v1898_v32  ;;  %v1208_v41 = vmul.f32 %v3323_v2, %v1137_v29  ;;  %v1135_v37 = vadd.f32 %v1964_v18, %v943_v44  ;;  %v946_v18 = vld [vmem:[#allocation2 + $0xf8] sm:$0xff] }
 0x138   :  { %v1240_v15 = vmul.f32 %v3323_v2, %v1169_v30  ;;  %v1167_v61 = vadd.f32 %v2028_v19, %v975_v59  ;;  %v1347_v57 = vmax.f32 %v1276_v50, %v3355_v6  ;;  %v1379_v14 = vmax.f32 %v1308_v23, %v3355_v6 }
 0x139   :  { %v1274_v24 = vadd.f32 %v3340_v5, %v1203_v11  ;;  %v1306_v55 = vadd.f32 %v3340_v5, %v1235_v28  ;;  %v1279_v0 = vadd.f32 %v3340_v5, %v1208_v41  ;;  %v1206_v21 = vmul.f32 %v3323_v2, %v1135_v37 }
 0x13a   :  { %v1311_v22 = vadd.f32 %v3340_v5, %v1240_v15  ;;  %v1238_v56 = vmul.f32 %v3323_v2, %v1167_v61  ;;  %v1869_v39 = vpack.c.bf16 %v1347_v57, %v1347_v57  ;;  %v1901_v19 = vpack.c.bf16 %v1379_v14, %v1379_v14 }
 0x13b   :  { %v1345_v42 = vmax.f32 %v1274_v24, %v3355_v6  ;;  %v1377_v53 = vmax.f32 %v1306_v55, %v3355_v6  ;;  %v1350_v1 = vmax.f32 %v1279_v0, %v3355_v6  ;;  %v1277_v48 = vadd.f32 %v3340_v5, %v1206_v21 }
 0x13c   :  { %v1382_v45 = vmax.f32 %v1311_v22, %v3355_v6  ;;  %v1309_v49 = vadd.f32 %v3340_v5, %v1238_v56  ;;  %1668 = vst.msk [vmem:[%s3519_s6 + $0x6c] sm:$0xf] %vm1640_vm3, %v1869_v39  ;;  %1700 = vst.msk [vmem:[%s3519_s6 + $0xec] sm:$0xf] %vm1640_vm3, %v1901_v19  ;;  %v1138_v31 = vadd.f32 %v1969_v33, %v946_v18 }
 0x13d   :  { %v1867_v36 = vpack.c.bf16 %v1345_v42, %v1345_v42  ;;  %v1899_v27 = vpack.c.bf16 %v1377_v53, %v1377_v53  ;;  %v1170_v8 = vadd.f32 %v2033_v10, %v978_v62  ;;  %v1872_v46 = vpack.c.bf16 %v1350_v1, %v1350_v1 }
 0x13e   :  { %v1904_v51 = vpack.c.bf16 %v1382_v45, %v1382_v45  ;;  %v1348_v16 = vmax.f32 %v1277_v48, %v3355_v6  ;;  %v1380_v20 = vmax.f32 %v1309_v49, %v3355_v6  ;;  %v1209_v7 = vmul.f32 %v3323_v2, %v1138_v31 }
 0x13f   :  { %1666 = vst.msk [vmem:[%s3519_s6 + $0x64] sm:$0xf] %vm1640_vm3, %v1867_v36  ;;  %1698 = vst.msk [vmem:[%s3519_s6 + $0xe4] sm:$0xf] %vm1640_vm3, %v1899_v27  ;;  %v1241_v25 = vmul.f32 %v3323_v2, %v1170_v8  ;;  %v1136_v33 = vadd.f32 %v1965_v17, %v944_v9  ;;  %v1168_v10 = vadd.f32 %v2029_v35, %v976_v40 }
 0x140   :  { %1671 = vst.msk [vmem:[%s3519_s6 + $0x78] sm:$0xf] %vm1640_vm3, %v1872_v46  ;;  %1703 = vst.msk [vmem:[%s3519_s6 + $0xf8] sm:$0xf] %vm1640_vm3, %v1904_v51  ;;  %v1870_v13 = vpack.c.bf16 %v1348_v16, %v1348_v16  ;;  %v1902_v58 = vpack.c.bf16 %v1380_v20, %v1380_v20  ;;  %v1280_v3 = vadd.f32 %v3340_v5, %v1209_v7 }
 0x141   :  { %v1312_v43 = vadd.f32 %v3340_v5, %v1241_v25  ;;  %v1207_v17 = vmul.f32 %v3323_v2, %v1136_v33  ;;  %v1239_v34 = vmul.f32 %v3323_v2, %v1168_v10 }
 0x142   :  { %1669 = vst.msk [vmem:[%s3519_s6 + $0x70] sm:$0xf] %vm1640_vm3, %v1870_v13  ;;  %1701 = vst.msk [vmem:[%s3519_s6 + $0xf0] sm:$0xf] %vm1640_vm3, %v1902_v58  ;;  %v1351_v35 = vmax.f32 %v1280_v3, %v3355_v6 }
 0x143   :  { %v1383_v54 = vmax.f32 %v1312_v43, %v3355_v6  ;;  %v1278_v4 = vadd.f32 %v3340_v5, %v1207_v17  ;;  %v1310_v63 = vadd.f32 %v3340_v5, %v1239_v34 }
 0x144   :  { %v1873_v60 = vpack.c.bf16 %v1351_v35, %v1351_v35 }
 0x145   :  { %v1905_v2 = vpack.c.bf16 %v1383_v54, %v1383_v54  ;;  %v1349_v47 = vmax.f32 %v1278_v4, %v3355_v6  ;;  %v1381_v12 = vmax.f32 %v1310_v63, %v3355_v6 }
 0x146   :  { %1672 = vst.msk [vmem:[%s3519_s6 + $0x7c] sm:$0xf] %vm1640_vm3, %v1873_v60 }
 0x147   :  { %1704 = vst.msk [vmem:[%s3519_s6 + $0xfc] sm:$0xf] %vm1640_vm3, %v1905_v2  ;;  %v1871_v26 = vpack.c.bf16 %v1349_v47, %v1349_v47  ;;  %v1903_v38 = vpack.c.bf16 %v1381_v12, %v1381_v12 }
 0x149   :  { %1670 = vst.msk [vmem:[%s3519_s6 + $0x74] sm:$0xf] %vm1640_vm3, %v1871_v26  ;;  %1702 = vst.msk [vmem:[%s3519_s6 + $0xf4] sm:$0xf] %vm1640_vm3, %v1903_v38 }

// kernel: _lambda_.11
= control target key start
LH: loop header
LB: loop body
LE: loop exit
PB: predicated region body
PF: predicated region fallthrough
CT: control target
= control target key end

     0   :  { %vm482_vm0 = vcmask 1040384   ;;  %vm385_vm1 = vcmask 15360   ;;  %vm31_vm2 = vcmask 64512   ;;  %v2545_v1 = vmov 0.0   ;;  %s4204_s1 = inlined_call_operand.vmem [shape: bf16[2,8], index: 1, kind: input, shape index: {}]   ;;  %s4205_s0 = inlined_call_operand.vmem [shape: bf16[512,2], index: 0, kind: input, shape index: {}]   ;;  %s4206_s5 = inlined_call_operand.vmem [shape: bf16[512,8], index: 5, kind: input, shape index: {}]   ;;  %s4207_s6 = inlined_call_operand.vmem [shape: bf16[512,8], index: 6, kind: input, shape index: {}]   ;;  %s4208_s2 = inlined_call_operand.vmem [shape: f32[1,8], index: 2, kind: input, shape index: {}]   ;;  %s4209_s3 = inlined_call_operand.vmem [shape: f32[1,8], index: 3, kind: input, shape index: {}]   ;;  %s4210_s4 = inlined_call_operand.vmem [shape: f32[1,8], index: 4, kind: input, shape index: {}]   ;;  %s4211_s7 = inlined_call_operand.vmem [shape: bf16[512,8], index: 7, kind: output, shape index: {}]  }
   0x1   :  { %v2589_v0 = vld [vmem:[%s4204_s1] sm:$0x1]  ;;  %34 = vst.msk [vmem:[#allocation2 + $0x10] sm:$0xff] %vm31_vm2, %v2545_v1  ;;  %32 = vst.msk [vmem:[#allocation2] sm:$0xff] %vm31_vm2, %v2545_v1  ;;  %v2512_v5 = vld [vmem:[%s4205_s0 + $0x8] sm:$0xff]   ;;  %vm1824_vm3 = vcmask 60416  }
   0x2   :  { %33 = vst.msk [vmem:[#allocation2 + $0x8] sm:$0xff] %vm31_vm2, %v2545_v1  ;;  %35 = vst.msk [vmem:[#allocation2 + $0x18] sm:$0xff] %vm31_vm2, %v2545_v1  ;;  %2507 = vmatprep.subr.msk.bf16.mxu0 %vm482_vm0, %v2589_v0  ;;  %2508 = vmatprep.subr.msk.bf16.mxu1 %vm482_vm0, %v2589_v0  ;;  %v484_v2 = vsel %vm482_vm0, %v2589_v0, 0  ;;  %v2510_v3 = vld [vmem:[%s4205_s0] sm:$0xff]   ;;  %v2513_v6 = vld [vmem:[%s4205_s0 + $0x88] sm:$0xff]  }
   0x3   :  { %36 = vst.msk [vmem:[#allocation2 + $0x20] sm:$0xff] %vm31_vm2, %v2545_v1  ;;  %37 = vst.msk [vmem:[#allocation2 + $0x28] sm:$0xff] %vm31_vm2, %v2545_v1  ;;  %2440 = vmatpush3.bf16.msra.mxu0 %v484_v2  ;;  %2506 = vmatpush3.bf16.msra.mxu1 %v484_v2  ;;  %v2511_v4 = vld [vmem:[%s4205_s0 + $0x80] sm:$0xff]   ;;  %v2514_v7 = vld [vmem:[%s4205_s0 + $0x10] sm:$0xff]  }
   0x4   :  { %38 = vst.msk [vmem:[#allocation2 + $0x30] sm:$0xff] %vm31_vm2, %v2545_v1  ;;  %39 = vst.msk [vmem:[#allocation2 + $0x38] sm:$0xff] %vm31_vm2, %v2545_v1  ;;  %2441 = vmatprep.mubr.msk.bf16.mxu0 %vm385_vm1, %v2510_v3  ;;  %2473 = vmatprep.mubr.msk.bf16.mxu1 %vm385_vm1, %v2511_v4  ;;  %v2515_v8 = vld [vmem:[%s4205_s0 + $0x90] sm:$0xff]   ;;  %v2516_v9 = vld [vmem:[%s4205_s0 + $0x18] sm:$0xff]  }
   0x5   :  { %40 = vst.msk [vmem:[#allocation2 + $0x40] sm:$0xff] %vm31_vm2, %v2545_v1  ;;  %41 = vst.msk [vmem:[#allocation2 + $0x48] sm:$0xff] %vm31_vm2, %v2545_v1  ;;  %v2517_v10 = vld [vmem:[%s4205_s0 + $0x98] sm:$0xff]   ;;  %v2518_v11 = vld [vmem:[%s4205_s0 + $0x20] sm:$0xff]  }
   0x6   :  { %42 = vst.msk [vmem:[#allocation2 + $0x50] sm:$0xff] %vm31_vm2, %v2545_v1  ;;  %43 = vst.msk [vmem:[#allocation2 + $0x58] sm:$0xff] %vm31_vm2, %v2545_v1  ;;  %2442 = vmatmul.mubr.msk.bf16.vlgmr.msra.gmra.mxu0 %vm385_vm1, %v2512_v5  ;;  %2474 = vmatmul.mubr.msk.bf16.vlgmr.msra.gmra.mxu1 %vm385_vm1, %v2513_v6  ;;  %v2519_v12 = vld [vmem:[%s4205_s0 + $0xa0] sm:$0xff]   ;;  %v2520_v13 = vld [vmem:[%s4205_s0 + $0x28] sm:$0xff]  }
   0x7   :  { %44 = vst.msk [vmem:[#allocation2 + $0x60] sm:$0xff] %vm31_vm2, %v2545_v1  ;;  %45 = vst.msk [vmem:[#allocation2 + $0x68] sm:$0xff] %vm31_vm2, %v2545_v1  ;;  %2445 = vmatprep.mubr.msk.bf16.mxu0 %vm385_vm1, %v2514_v7  ;;  %2477 = vmatprep.mubr.msk.bf16.mxu1 %vm385_vm1, %v2515_v8  ;;  %v2521_v14 = vld [vmem:[%s4205_s0 + $0xa8] sm:$0xff]   ;;  %v2522_v15 = vld [vmem:[%s4205_s0 + $0x30] sm:$0xff]  }
   0x8   :  { %46 = vst.msk [vmem:[#allocation2 + $0x70] sm:$0xff] %vm31_vm2, %v2545_v1  ;;  %47 = vst.msk [vmem:[#allocation2 + $0x78] sm:$0xff] %vm31_vm2, %v2545_v1  ;;  %v2523_v16 = vld [vmem:[%s4205_s0 + $0xb0] sm:$0xff]   ;;  %v2524_v17 = vld [vmem:[%s4205_s0 + $0x38] sm:$0xff]  }
   0x9   :  { %48 = vst.msk [vmem:[#allocation2 + $0x80] sm:$0xff] %vm31_vm2, %v2545_v1  ;;  %49 = vst.msk [vmem:[#allocation2 + $0x88] sm:$0xff] %vm31_vm2, %v2545_v1  ;;  %v2525_v18 = vld [vmem:[%s4205_s0 + $0xb8] sm:$0xff]   ;;  %v2526_v19 = vld [vmem:[%s4205_s0 + $0x40] sm:$0xff]  }
   0xa   :  { %50 = vst.msk [vmem:[#allocation2 + $0x90] sm:$0xff] %vm31_vm2, %v2545_v1  ;;  %51 = vst.msk [vmem:[#allocation2 + $0x98] sm:$0xff] %vm31_vm2, %v2545_v1  ;;  %v2527_v20 = vld [vmem:[%s4205_s0 + $0xc0] sm:$0xff]   ;;  %v2528_v21 = vld [vmem:[%s4205_s0 + $0x48] sm:$0xff]  }
   0xb   :  { %52 = vst.msk [vmem:[#allocation2 + $0xa0] sm:$0xff] %vm31_vm2, %v2545_v1  ;;  %53 = vst.msk [vmem:[#allocation2 + $0xa8] sm:$0xff] %vm31_vm2, %v2545_v1  ;;  %v2529_v22 = vld [vmem:[%s4205_s0 + $0xc8] sm:$0xff]   ;;  %v2530_v23 = vld [vmem:[%s4205_s0 + $0x50] sm:$0xff]  }
   0xc   :  { %54 = vst.msk [vmem:[#allocation2 + $0xb0] sm:$0xff] %vm31_vm2, %v2545_v1  ;;  %55 = vst.msk [vmem:[#allocation2 + $0xb8] sm:$0xff] %vm31_vm2, %v2545_v1  ;;  %v2531_v24 = vld [vmem:[%s4205_s0 + $0xd0] sm:$0xff]   ;;  %v2532_v25 = vld [vmem:[%s4205_s0 + $0x58] sm:$0xff]  }
   0xd   :  { %56 = vst.msk [vmem:[#allocation2 + $0xc0] sm:$0xff] %vm31_vm2, %v2545_v1  ;;  %57 = vst.msk [vmem:[#allocation2 + $0xc8] sm:$0xff] %vm31_vm2, %v2545_v1  ;;  %v2533_v26 = vld [vmem:[%s4205_s0 + $0xd8] sm:$0xff]   ;;  %v2534_v27 = vld [vmem:[%s4205_s0 + $0x60] sm:$0xff]  }
   0xe   :  { %58 = vst.msk [vmem:[#allocation2 + $0xd0] sm:$0xff] %vm31_vm2, %v2545_v1  ;;  %59 = vst.msk [vmem:[#allocation2 + $0xd8] sm:$0xff] %vm31_vm2, %v2545_v1  ;;  %2446 = vmatmul.mubr.msk.bf16.gmra.mxu0 %vm385_vm1, %v2516_v9  ;;  %2478 = vmatmul.mubr.msk.bf16.gmra.mxu1 %vm385_vm1, %v2517_v10  ;;  %v2535_v28 = vld [vmem:[%s4205_s0 + $0xe0] sm:$0xff]   ;;  %v2536_v29 = vld [vmem:[%s4205_s0 + $0x68] sm:$0xff]  }
   0xf   :  { %60 = vst.msk [vmem:[#allocation2 + $0xe0] sm:$0xff] %vm31_vm2, %v2545_v1  ;;  %61 = vst.msk [vmem:[#allocation2 + $0xe8] sm:$0xff] %vm31_vm2, %v2545_v1  ;;  %2449 = vmatprep.mubr.msk.bf16.mxu0 %vm385_vm1, %v2518_v11  ;;  %2481 = vmatprep.mubr.msk.bf16.mxu1 %vm385_vm1, %v2519_v12  ;;  %v2537_v30 = vld [vmem:[%s4205_s0 + $0xe8] sm:$0xff]   ;;  %v2538_v31 = vld [vmem:[%s4205_s0 + $0x70] sm:$0xff]  }
  0x10   :  { %62 = vst.msk [vmem:[#allocation2 + $0xf0] sm:$0xff] %vm31_vm2, %v2545_v1  ;;  %63 = vst.msk [vmem:[#allocation2 + $0xf8] sm:$0xff] %vm31_vm2, %v2545_v1  ;;  %v2539_v32 = vld [vmem:[%s4205_s0 + $0xf0] sm:$0xff]   ;;  %v2540_v33 = vld [vmem:[%s4205_s0 + $0x78] sm:$0xff]  }
  0x11   :  { %64 = vst.msk [vmem:[#allocation2 + $0x100] sm:$0xff] %vm31_vm2, %v2545_v1  ;;  %65 = vst.msk [vmem:[#allocation2 + $0x108] sm:$0xff] %vm31_vm2, %v2545_v1  ;;  %v2541_v34 = vld [vmem:[%s4205_s0 + $0xf8] sm:$0xff]   ;;  %v2856_v35 = vld [vmem:[%s4206_s5 + $0x8] sm:$0xff]  }
  0x12   :  { %66 = vst.msk [vmem:[#allocation2 + $0x110] sm:$0xff] %vm31_vm2, %v2545_v1  ;;  %67 = vst.msk [vmem:[#allocation2 + $0x118] sm:$0xff] %vm31_vm2, %v2545_v1  ;;  %v2861_v36 = vld [vmem:[%s4206_s5 + $0x88] sm:$0xff]   ;;  %v2866_v37 = vld [vmem:[%s4206_s5] sm:$0xff]  }
  0x13   :  { %68 = vst.msk [vmem:[#allocation2 + $0x120] sm:$0xff] %vm31_vm2, %v2545_v1  ;;  %69 = vst.msk [vmem:[#allocation2 + $0x128] sm:$0xff] %vm31_vm2, %v2545_v1  ;;  %v2871_v38 = vld [vmem:[%s4206_s5 + $0x80] sm:$0xff]   ;;  %v2876_v39 = vld [vmem:[%s4207_s6 + $0x8] sm:$0xff]   ;;  %v4280_v41 = vunpack.c.l.bf16 %v2866_v37 }
  0x14   :  { %70 = vst.msk [vmem:[#allocation2 + $0x130] sm:$0xff] %vm31_vm2, %v2545_v1  ;;  %71 = vst.msk [vmem:[#allocation2 + $0x138] sm:$0xff] %vm31_vm2, %v2545_v1  ;;  %v2881_v40 = vld [vmem:[%s4207_s6 + $0x88] sm:$0xff]   ;;  %v2888_v43 = vld [vmem:[%s4207_s6] sm:$0xff]  }
  0x15   :  { %72 = vst.msk [vmem:[#allocation2 + $0x140] sm:$0xff] %vm31_vm2, %v2545_v1  ;;  %73 = vst.msk [vmem:[#allocation2 + $0x148] sm:$0xff] %vm31_vm2, %v2545_v1  ;;  %v2893_v44 = vld [vmem:[%s4207_s6 + $0x80] sm:$0xff]   ;;  %v2898_v45 = vld [vmem:[%s4206_s5 + $0x18] sm:$0xff]  }
  0x16   :  { %74 = vst.msk [vmem:[#allocation2 + $0x150] sm:$0xff] %vm31_vm2, %v2545_v1  ;;  %75 = vst.msk [vmem:[#allocation2 + $0x158] sm:$0xff] %vm31_vm2, %v2545_v1  ;;  %2450 = vmatmul.mubr.msk.bf16.gmra.mxu0 %vm385_vm1, %v2520_v13  ;;  %2482 = vmatmul.mubr.msk.bf16.gmra.mxu1 %vm385_vm1, %v2521_v14  ;;  %v2907_v50 = vld [vmem:[%s4206_s5 + $0x98] sm:$0xff]   ;;  %v2916_v55 = vld [vmem:[%s4206_s5 + $0x10] sm:$0xff]  }
  0x17   :  { %76 = vst.msk [vmem:[#allocation2 + $0x160] sm:$0xff] %vm31_vm2, %v2545_v1  ;;  %77 = vst.msk [vmem:[#allocation2 + $0x168] sm:$0xff] %vm31_vm2, %v2545_v1  ;;  %2453 = vmatprep.mubr.msk.bf16.mxu0 %vm385_vm1, %v2522_v15  ;;  %2485 = vmatprep.mubr.msk.bf16.mxu1 %vm385_vm1, %v2523_v16  ;;  %v2921_v56 = vld [vmem:[%s4206_s5 + $0x90] sm:$0xff]   ;;  %v2930_v61 = vld [vmem:[%s4207_s6 + $0x18] sm:$0xff]  }
  0x18   :  { %78 = vst.msk [vmem:[#allocation2 + $0x170] sm:$0xff] %vm31_vm2, %v2545_v1  ;;  %79 = vst.msk [vmem:[#allocation2 + $0x178] sm:$0xff] %vm31_vm2, %v2545_v1  ;;  %v2935_v62 = vld [vmem:[%s4207_s6 + $0x98] sm:$0xff]   ;;  %v2944_v3 = vld [vmem:[%s4207_s6 + $0x10] sm:$0xff]  }
  0x19   :  { %80 = vst.msk [vmem:[#allocation2 + $0x180] sm:$0xff] %vm31_vm2, %v2545_v1  ;;  %81 = vst.msk [vmem:[#allocation2 + $0x188] sm:$0xff] %vm31_vm2, %v2545_v1  ;;  %v2949_v4 = vld [vmem:[%s4207_s6 + $0x90] sm:$0xff]   ;;  %v2958_v9 = vld [vmem:[%s4206_s5 + $0x28] sm:$0xff]  }
  0x1a   :  { %82 = vst.msk [vmem:[#allocation2 + $0x190] sm:$0xff] %vm31_vm2, %v2545_v1  ;;  %83 = vst.msk [vmem:[#allocation2 + $0x198] sm:$0xff] %vm31_vm2, %v2545_v1  ;;  %v2963_v10 = vld [vmem:[%s4206_s5 + $0xa8] sm:$0xff]   ;;  %v2972_v15 = vld [vmem:[%s4206_s5 + $0x20] sm:$0xff]  }
  0x1b   :  { %84 = vst.msk [vmem:[#allocation2 + $0x1a0] sm:$0xff] %vm31_vm2, %v2545_v1  ;;  %85 = vst.msk [vmem:[#allocation2 + $0x1a8] sm:$0xff] %vm31_vm2, %v2545_v1  ;;  %v2977_v16 = vld [vmem:[%s4206_s5 + $0xa0] sm:$0xff]   ;;  %v98_v14 = vld [vmem:[#allocation2 + $0x10] sm:$0xff] }
  0x1c   :  { %86 = vst.msk [vmem:[#allocation2 + $0x1b0] sm:$0xff] %vm31_vm2, %v2545_v1  ;;  %87 = vst.msk [vmem:[#allocation2 + $0x1b8] sm:$0xff] %vm31_vm2, %v2545_v1  ;;  %v3103_v7 = vld [vmem:[%s4207_s6 + $0xc8] sm:$0xff]   ;;  %v96_v5 = vld [vmem:[#allocation2] sm:$0xff] }
  0x1d   :  { %88 = vst.msk [vmem:[#allocation2 + $0x1c0] sm:$0xff] %vm31_vm2, %v2545_v1  ;;  %89 = vst.msk [vmem:[#allocation2 + $0x1c8] sm:$0xff] %vm31_vm2, %v2545_v1  ;;  %v3112_v2 = vld [vmem:[%s4207_s6 + $0x40] sm:$0xff]   ;;  %v3125_v11 = vld [vmem:[%s4206_s5 + $0x58] sm:$0xff]  }
  0x1e   :  { %90 = vst.msk [vmem:[#allocation2 + $0x1d0] sm:$0xff] %vm31_vm2, %v2545_v1  ;;  %91 = vst.msk [vmem:[#allocation2 + $0x1d8] sm:$0xff] %vm31_vm2, %v2545_v1  ;;  %2454 = vmatmul.mubr.msk.bf16.gmra.mxu0 %vm385_vm1, %v2524_v17  ;;  %2486 = vmatmul.mubr.msk.bf16.gmra.mxu1 %vm385_vm1, %v2525_v18  ;;  %v3075_v17 = vld [vmem:[%s4206_s5 + $0xc8] sm:$0xff]   ;;  %v3089_v18 = vld [vmem:[%s4206_s5 + $0xc0] sm:$0xff]  }
  0x1f   :  { %92 = vst.msk [vmem:[#allocation2 + $0x1e0] sm:$0xff] %vm31_vm2, %v2545_v1  ;;  %93 = vst.msk [vmem:[#allocation2 + $0x1e8] sm:$0xff] %vm31_vm2, %v2545_v1  ;;  %2457 = vmatprep.mubr.msk.bf16.mxu0 %vm385_vm1, %v2526_v19  ;;  %2489 = vmatprep.mubr.msk.bf16.mxu1 %vm385_vm1, %v2527_v20  ;;  %v3061_v19 = vld [vmem:[%s4207_s6 + $0xb0] sm:$0xff]   ;;  %v3066_v20 = vld [vmem:[%s4206_s5 + $0x48] sm:$0xff]  }
  0x20   :  { %94 = vst.msk [vmem:[#allocation2 + $0x1f0] sm:$0xff] %vm31_vm2, %v2545_v1  ;;  %95 = vst.msk [vmem:[#allocation2 + $0x1f8] sm:$0xff] %vm31_vm2, %v2545_v1  ;;  %v128_v0 = vld [vmem:[#allocation2 + $0x100] sm:$0xff]  ;;  %v3133_v57 = vld [vmem:[%s4206_s5 + $0xd8] sm:$0xff]  }
  0x21   :  { %4259 = vst [vmem:[#allocation6_spill] sm:$0xff] %v3061_v19  ;;  %4260 = vst [vmem:[#allocation7_spill] sm:$0xff] %v3066_v20  ;;  %v3119_v12 = vld [vmem:[%s4207_s6 + $0xc0] sm:$0xff]   ;;  %v131_v52 = vld [vmem:[#allocation2 + $0x118] sm:$0xff] }
  0x22   :  { %4261 = vst [vmem:[#allocation8_spill] sm:$0xff] %v3075_v17  ;;  %4263 = vst [vmem:[#allocation10_spill] sm:$0xff] %v3089_v18  ;;  %v3142_v63 = vld [vmem:[%s4206_s5 + $0x50] sm:$0xff]   ;;  %v3156_v53 = vld [vmem:[%s4207_s6 + $0x58] sm:$0xff]  }
  0x23   :  { %4265 = vst [vmem:[#allocation12_spill] sm:$0xff] %v3103_v7  ;;  %4266 = vst [vmem:[#allocation13_spill] sm:$0xff] %v3112_v2  ;;  %v3147_v59 = vld [vmem:[%s4206_s5 + $0xd0] sm:$0xff]   ;;  %v129_v48 = vld [vmem:[#allocation2 + $0x108] sm:$0xff] }
  0x24   :  { %4267 = vst [vmem:[#allocation14_spill] sm:$0xff] %v3119_v12  ;;  %4268 = vst [vmem:[#allocation15_spill] sm:$0xff] %v3125_v11  ;;  %v3165_v58 = vld [vmem:[%s4207_s6 + $0xd8] sm:$0xff]   ;;  %v102_v47 = vld [vmem:[#allocation2 + $0x30] sm:$0xff] }
  0x25   :  { %4269 = vst [vmem:[#allocation16_spill] sm:$0xff] %v3133_v57  ;;  %4270 = vst [vmem:[#allocation17_spill] sm:$0xff] %v3142_v63  ;;  %v100_v42 = vld [vmem:[#allocation2 + $0x20] sm:$0xff]  ;;  %v135_v7 = vld [vmem:[#allocation2 + $0x138] sm:$0xff] }
  0x26   :  { %2458 = vmatmul.mubr.msk.bf16.gmra.mxu0 %vm385_vm1, %v2528_v21  ;;  %2490 = vmatmul.mubr.msk.bf16.gmra.mxu1 %vm385_vm1, %v2529_v22  ;;  %v2986_v21 = vld [vmem:[%s4207_s6 + $0x28] sm:$0xff]   ;;  %4271 = vst [vmem:[#allocation18_spill] sm:$0xff] %v3147_v59  ;;  %4272 = vst [vmem:[#allocation19_spill] sm:$0xff] %v3156_v53  ;;  %v3206_v12 = vld [vmem:[%s4206_s5 + $0x60] sm:$0xff]   ;;  %v4278_v59 = vunpack.c.l.bf16 %v2856_v35  ;;  %v4279_v53 = vunpack.c.l.bf16 %v2861_v36 }
  0x27   :  { %2461 = vmatprep.mubr.msk.bf16.mxu0 %vm385_vm1, %v2530_v23  ;;  %2493 = vmatprep.mubr.msk.bf16.mxu1 %vm385_vm1, %v2531_v24  ;;  %v2991_v22 = vld [vmem:[%s4207_s6 + $0xa8] sm:$0xff]   ;;  %v3042_v23 = vld [vmem:[%s4207_s6 + $0x38] sm:$0xff]   ;;  %v3056_v24 = vld [vmem:[%s4207_s6 + $0x30] sm:$0xff]   ;;  %4273 = vst [vmem:[#allocation20_spill] sm:$0xff] %v3165_v58 }
  0x28   :  { %4256 = vst [vmem:[#allocation3_spill] sm:$0xff] %v3042_v23  ;;  %4258 = vst [vmem:[#allocation5_spill] sm:$0xff] %v3056_v24  ;;  %v136_v17 = vld [vmem:[#allocation2 + $0x140] sm:$0xff]  ;;  %v107_v19 = vld [vmem:[#allocation2 + $0x58] sm:$0xff] }
  0x29   :  { %v105_v24 = vld [vmem:[#allocation2 + $0x48] sm:$0xff] }
  0x2e   :  { %2462 = vmatmul.mubr.msk.bf16.gmra.mxu0 %vm385_vm1, %v2532_v25  ;;  %2494 = vmatmul.mubr.msk.bf16.gmra.mxu1 %vm385_vm1, %v2533_v26  ;;  %v3084_v25 = vld [vmem:[%s4206_s5 + $0x40] sm:$0xff]   ;;  %v130_v26 = vld [vmem:[#allocation2 + $0x110] sm:$0xff] }
  0x2f   :  { %2465 = vmatprep.mubr.msk.bf16.mxu0 %vm385_vm1, %v2534_v27  ;;  %2497 = vmatprep.mubr.msk.bf16.mxu1 %vm385_vm1, %v2535_v28  ;;  %v3000_v27 = vld [vmem:[%s4207_s6 + $0x20] sm:$0xff]   ;;  %4262 = vst [vmem:[#allocation9_spill] sm:$0xff] %v3084_v25  ;;  %v138_v25 = vld [vmem:[#allocation2 + $0x150] sm:$0xff] }
  0x30   :  { %v3005_v28 = vld [vmem:[%s4207_s6 + $0xa0] sm:$0xff]  }
  0x36   :  { %2466 = vmatmul.mubr.msk.bf16.gmra.mxu0 %vm385_vm1, %v2536_v29  ;;  %2498 = vmatmul.mubr.msk.bf16.gmra.mxu1 %vm385_vm1, %v2537_v30  ;;  %v3010_v29 = vld [vmem:[%s4206_s5 + $0x38] sm:$0xff]  }
  0x37   :  { %2469 = vmatprep.mubr.msk.bf16.mxu0 %vm385_vm1, %v2538_v31  ;;  %2501 = vmatprep.mubr.msk.bf16.mxu1 %vm385_vm1, %v2539_v32  ;;  %v3028_v31 = vld [vmem:[%s4206_s5 + $0x30] sm:$0xff]   ;;  %v3047_v30 = vld [vmem:[%s4207_s6 + $0xb8] sm:$0xff]   ;;  %v3098_v32 = vld [vmem:[%s4207_s6 + $0x48] sm:$0xff]  }
  0x38   :  { %4257 = vst [vmem:[#allocation4_spill] sm:$0xff] %v3047_v30  ;;  %4264 = vst [vmem:[#allocation11_spill] sm:$0xff] %v3098_v32 }
  0x3e   :  { %2470 = vmatmul.mubr.msk.bf16.gmra.mxu0 %vm385_vm1, %v2540_v33  ;;  %2502 = vmatmul.mubr.msk.bf16.gmra.mxu1 %vm385_vm1, %v2541_v34  ;;  %v3019_v34 = vld [vmem:[%s4206_s5 + $0xb8] sm:$0xff]   ;;  %v3033_v33 = vld [vmem:[%s4206_s5 + $0xb0] sm:$0xff]  }
  0xc6   :  { %v2443_v6 = vpop.f32.mrf.mxu0  ;;  %v2475_v60 = vpop.f32.mrf.mxu1 }
  0xc7   :  { %v777_v1 = vadd.f32 %v2443_v6, %v98_v14  ;;  %v809_v8 = vadd.f32 %v2475_v60, %v130_v26  ;;  %v99_v14 = vld [vmem:[#allocation2 + $0x18] sm:$0xff] }
  0xc8   :  { %v520_v6 = vpop.f32.mrf.mxu0  ;;  %v648_v54 = vpop.f32.mrf.mxu1 }
  0xc9   :  { %842 = vst.msk [vmem:[#allocation2 + $0x10] sm:$0xff] %vm31_vm2, %v777_v1  ;;  %v775_v13 = vadd.f32 %v520_v6, %v96_v5  ;;  %874 = vst.msk [vmem:[#allocation2 + $0x110] sm:$0xff] %vm31_vm2, %v809_v8  ;;  %v807_v1 = vadd.f32 %v648_v54, %v128_v0  ;;  %v97_v6 = vld [vmem:[#allocation2 + $0x8] sm:$0xff]  ;;  %v3179_v0 = vld [vmem:[%s4207_s6 + $0xd0] sm:$0xff]  }
  0xca   :  { %v2444_v5 = vpop.f32.mrf.mxu0  ;;  %v2476_v49 = vpop.f32.mrf.mxu1  ;;  %4275 = vst [vmem:[#allocation22_spill] sm:$0xff] %v3179_v0  ;;  %v3211_v54 = vld [vmem:[%s4206_s5 + $0xe0] sm:$0xff]  }
  0xcb   :  { %840 = vst.msk [vmem:[#allocation2] sm:$0xff] %vm31_vm2, %v775_v13  ;;  %v778_v51 = vadd.f32 %v2444_v5, %v99_v14  ;;  %872 = vst.msk [vmem:[#allocation2 + $0x100] sm:$0xff] %vm31_vm2, %v807_v1  ;;  %v810_v26 = vadd.f32 %v2476_v49, %v131_v52  ;;  %v3173_v5 = vld [vmem:[%s4207_s6 + $0x50] sm:$0xff]   ;;  %v103_v13 = vld [vmem:[#allocation2 + $0x38] sm:$0xff] }
  0xcc   :  { %v523_v60 = vpop.f32.mrf.mxu0  ;;  %4274 = vst [vmem:[#allocation21_spill] sm:$0xff] %v3173_v5  ;;  %v651_v52 = vpop.f32.mrf.mxu1  ;;  %v134_v1 = vld [vmem:[#allocation2 + $0x130] sm:$0xff] }
  0xcd   :  { %843 = vst.msk [vmem:[#allocation2 + $0x18] sm:$0xff] %vm31_vm2, %v778_v51  ;;  %v776_v49 = vadd.f32 %v523_v60, %v97_v6  ;;  %875 = vst.msk [vmem:[#allocation2 + $0x118] sm:$0xff] %vm31_vm2, %v810_v26  ;;  %v808_v46 = vadd.f32 %v651_v52, %v129_v48  ;;  %v3192_v60 = vld [vmem:[%s4206_s5 + $0x68] sm:$0xff]   ;;  %v132_v52 = vld [vmem:[#allocation2 + $0x120] sm:$0xff] }
  0xce   :  { %v2447_v8 = vpop.f32.mrf.mxu0  ;;  %4276 = vst [vmem:[#allocation23_spill] sm:$0xff] %v3192_v60  ;;  %v3197_v6 = vld [vmem:[%s4206_s5 + $0xe8] sm:$0xff]   ;;  %v2479_v26 = vpop.f32.mrf.mxu1 }
  0xcf   :  { %4277 = vst [vmem:[#allocation24_spill] sm:$0xff] %v3197_v6  ;;  %841 = vst.msk [vmem:[#allocation2 + $0x8] sm:$0xff] %vm31_vm2, %v776_v49  ;;  %v781_v48 = vadd.f32 %v2447_v8, %v102_v47  ;;  %v3216_v47 = vld [vmem:[%s4208_s2] ss:$0 sm:$0xff]  ;;  %v813_v8 = vadd.f32 %v2479_v26, %v134_v1 }
  0xd0   :  { %v909_v49 = vld [vmem:[#allocation2 + $0x10] sm:$0xff]  ;;  %873 = vst.msk [vmem:[#allocation2 + $0x108] sm:$0xff] %vm31_vm2, %v808_v46  ;;  %v536_v51 = vpop.f32.mrf.mxu0  ;;  %v664_v2 = vpop.f32.mrf.mxu1  ;;  %v3230_v26 = vld [vmem:[%s4209_s3] ss:$0 sm:$0xff] }
  0xd1   :  { %v1101_v63 = vadd.f32 %v4278_v59, %v909_v49  ;;  %v941_v57 = vld [vmem:[#allocation2 + $0x110] sm:$0xff]  ;;  %846 = vst.msk [vmem:[#allocation2 + $0x30] sm:$0xff] %vm31_vm2, %v781_v48  ;;  %v779_v11 = vadd.f32 %v536_v51, %v100_v42  ;;  %878 = vst.msk [vmem:[#allocation2 + $0x130] sm:$0xff] %vm31_vm2, %v813_v8  ;;  %v811_v48 = vadd.f32 %v664_v2, %v132_v52  ;;  %v101_v51 = vld [vmem:[#allocation2 + $0x28] sm:$0xff]  ;;  %v4281_v52 = vunpack.c.l.bf16 %v2871_v38 }
  0xd2   :  { %v1133_v14 = vadd.f32 %v4279_v53, %v941_v57  ;;  %v907_v59 = vld [vmem:[#allocation2] sm:$0xff]  ;;  %v2448_v42 = vpop.f32.mrf.mxu0  ;;  %v2480_v53 = vpop.f32.mrf.mxu1  ;;  %v133_v57 = vld [vmem:[#allocation2 + $0x128] sm:$0xff] }
  0xd3   :  { %v1172_v1 = vmul.f32 %v3216_v47, %v1101_v63  ;;  %v1099_v0 = vadd.f32 %v4280_v41, %v907_v59  ;;  %v939_v5 = vld [vmem:[#allocation2 + $0x100] sm:$0xff]  ;;  %844 = vst.msk [vmem:[#allocation2 + $0x20] sm:$0xff] %vm31_vm2, %v779_v11  ;;  %v782_v58 = vadd.f32 %v2448_v42, %v103_v13  ;;  %876 = vst.msk [vmem:[#allocation2 + $0x120] sm:$0xff] %vm31_vm2, %v811_v48  ;;  %v4282_v13 = vunpack.c.h.bf16 %v2856_v35 }
  0xd4   :  { %v1204_v2 = vmul.f32 %v3216_v47, %v1133_v14  ;;  %v1131_v49 = vadd.f32 %v4281_v52, %v939_v5  ;;  %v910_v32 = vld [vmem:[#allocation2 + $0x18] sm:$0xff]  ;;  %v814_v63 = vadd.f32 %v2480_v53, %v135_v7  ;;  %v539_v46 = vpop.f32.mrf.mxu0  ;;  %v667_v60 = vpop.f32.mrf.mxu1  ;;  %v3255_v5 = vld [vmem:[%s4210_s4] ss:$0 sm:$0xff] }
  0xd5   :  { %v1243_v59 = vadd.f32 %v3230_v26, %v1172_v1  ;;  %v1170_v11 = vmul.f32 %v3216_v47, %v1099_v0  ;;  %v1102_v42 = vadd.f32 %v4282_v13, %v910_v32  ;;  %v942_v8 = vld [vmem:[#allocation2 + $0x118] sm:$0xff]  ;;  %847 = vst.msk [vmem:[#allocation2 + $0x38] sm:$0xff] %vm31_vm2, %v782_v58  ;;  %v780_v14 = vadd.f32 %v539_v46, %v101_v51 }
  0xd6   :  { %v1275_v7 = vadd.f32 %v3230_v26, %v1204_v2  ;;  %v1202_v48 = vmul.f32 %v3216_v47, %v1131_v49  ;;  %v4283_v1 = vunpack.c.h.bf16 %v2861_v36  ;;  %v908_v53 = vld [vmem:[#allocation2 + $0x8] sm:$0xff]  ;;  %879 = vst.msk [vmem:[#allocation2 + $0x138] sm:$0xff] %vm31_vm2, %v814_v63  ;;  %v812_v35 = vadd.f32 %v667_v60, %v133_v57  ;;  %v3262_v32 = vpop.f32.mrf.mxu0  ;;  %v3271_v36 = vpop.f32.mrf.mxu1 }
  0xd7   :  { %v4284_v58 = vunpack.c.l.bf16 %v2876_v39  ;;  %v1241_v51 = vadd.f32 %v3230_v26, %v1170_v11  ;;  %v1173_v52 = vmul.f32 %v3216_v47, %v1102_v42  ;;  %v4285_v2 = vunpack.c.h.bf16 %v2866_v37  ;;  %v940_v49 = vld [vmem:[#allocation2 + $0x108] sm:$0xff]  ;;  %845 = vst.msk [vmem:[#allocation2 + $0x28] sm:$0xff] %vm31_vm2, %v780_v14 }
  0xd8   :  { %v1134_v0 = vadd.f32 %v4283_v1, %v942_v8  ;;  %v4286_v8 = vunpack.c.l.bf16 %v2881_v40  ;;  %v1273_v57 = vadd.f32 %v3230_v26, %v1202_v48  ;;  %877 = vst.msk [vmem:[#allocation2 + $0x128] sm:$0xff] %vm31_vm2, %v812_v35  ;;  %v3280_v42 = vpop.f32.mrf.mxu0  ;;  %v4288_v14 = vunpack.c.l.bf16 %v2888_v43 }
  0xd9   :  { %v1435_v46 = vadd.f32 %v4284_v58, %v1243_v59  ;;  %v1100_v13 = vadd.f32 %v4285_v2, %v908_v53  ;;  %v4287_v59 = vunpack.c.h.bf16 %v2871_v38  ;;  %v1244_v53 = vadd.f32 %v3230_v26, %v1173_v52  ;;  %v3287_v58 = vpop.f32.mrf.mxu1 }
  0xda   :  { %v1467_v60 = vadd.f32 %v4286_v8, %v1275_v7  ;;  %v1205_v63 = vmul.f32 %v3216_v47, %v1134_v0  ;;  %v1433_v1 = vadd.f32 %v4288_v14, %v1241_v51  ;;  %v4289_v38 = vunpack.c.l.bf16 %v2893_v44  ;;  %v945_v14 = vld [vmem:[#allocation2 + $0x130] sm:$0xff]  ;;  %v911_v6 = vld [vmem:[#allocation2 + $0x20] sm:$0xff] }
  0xdb   :  { %v1132_v11 = vadd.f32 %v4287_v59, %v940_v49  ;;  %v1506_v37 = vmax.f32 %v1435_v46, %v3255_v5  ;;  %v1171_v7 = vmul.f32 %v3216_v47, %v1100_v13  ;;  %v913_v49 = vld [vmem:[#allocation2 + $0x30] sm:$0xff]  ;;  %v3294_v46 = vpop.f32.mrf.mxu0  ;;  %v4290_v52 = vunpack.c.h.bf16 %v2876_v39 }
  0xdc   :  { %v1538_v48 = vmax.f32 %v1467_v60, %v3255_v5  ;;  %v1465_v0 = vadd.f32 %v4289_v38, %v1273_v57  ;;  %v1276_v35 = vadd.f32 %v3230_v26, %v1205_v63  ;;  %v1504_v51 = vmax.f32 %v1433_v1, %v3255_v5  ;;  %v3300_v60 = vpop.f32.mrf.mxu1 }
  0xdd   :  { %v1203_v2 = vmul.f32 %v3216_v47, %v1132_v11  ;;  %v2026_v8 = vpack.c.bf16 %v1506_v37, %v1506_v37  ;;  %v1436_v13 = vadd.f32 %v4290_v52, %v1244_v53  ;;  %v1242_v59 = vadd.f32 %v3230_v26, %v1171_v7  ;;  %v3306_v37 = vpop.f32.mrf.mxu0 }
  0xde   :  { %v2058_v41 = vpack.c.bf16 %v1538_v48, %v1538_v48  ;;  %v1536_v57 = vmax.f32 %v1465_v0, %v3255_v5  ;;  %v4291_v63 = vunpack.c.h.bf16 %v2881_v40  ;;  %v2024_v39 = vpack.c.bf16 %v1504_v51, %v1504_v51  ;;  %v943_v0 = vld [vmem:[#allocation2 + $0x120] sm:$0xff] }
  0xdf   :  { %v1274_v38 = vadd.f32 %v3230_v26, %v1203_v2  ;;  %1827 = vst.msk [vmem:[%s4211_s7 + $0x8] sm:$0xf] %vm1824_vm3, %v2026_v8  ;;  %v1507_v1 = vmax.f32 %v1436_v13, %v3255_v5  ;;  %v4292_v53 = vunpack.c.h.bf16 %v2888_v43  ;;  %v4293_v48 = vunpack.c.l.bf16 %v2898_v45 }
  0xe0   :  { %v1468_v11 = vadd.f32 %v4291_v63, %v1276_v35  ;;  %v3317_v35 = vpop.f32.mrf.mxu1  ;;  %1859 = vst.msk [vmem:[%s4211_s7 + $0x88] sm:$0xf] %vm1824_vm3, %v2058_v41  ;;  %v2056_v2 = vpack.c.bf16 %v1536_v57, %v1536_v57  ;;  %v4294_v51 = vunpack.c.h.bf16 %v2893_v44  ;;  %v4295_v43 = vunpack.c.l.bf16 %v2907_v50  ;;  %v3328_v63 = vpop.f32.mrf.mxu0  ;;  %1825 = vst.msk [vmem:[%s4211_s7] sm:$0xf] %vm1824_vm3, %v2024_v39 }
  0xe1   :  { %v1434_v7 = vadd.f32 %v4292_v53, %v1242_v59  ;;  %v1105_v40 = vadd.f32 %v4293_v48, %v913_v49  ;;  %v914_v59 = vld [vmem:[#allocation2 + $0x38] sm:$0xff]  ;;  %v2027_v49 = vpack.c.bf16 %v1507_v1, %v1507_v1  ;;  %v4297_v1 = vunpack.c.l.bf16 %v2921_v56 }
  0xe2   :  { %v1539_v8 = vmax.f32 %v1468_v11, %v3255_v5  ;;  %v1466_v52 = vadd.f32 %v4294_v51, %v1274_v38  ;;  %v1137_v13 = vadd.f32 %v4295_v43, %v945_v14  ;;  %v4296_v11 = vunpack.c.l.bf16 %v2916_v55  ;;  %v946_v38 = vld [vmem:[#allocation2 + $0x138] sm:$0xff]  ;;  %v3338_v53 = vpop.f32.mrf.mxu1  ;;  %1857 = vst.msk [vmem:[%s4211_s7 + $0x80] sm:$0xf] %vm1824_vm3, %v2056_v2  ;;  %v3348_v51 = vpop.f32.mrf.mxu0 }
  0xe3   :  { %v1505_v41 = vmax.f32 %v1434_v7, %v3255_v5  ;;  %v1176_v57 = vmul.f32 %v3216_v47, %v1105_v40  ;;  %v1135_v7 = vadd.f32 %v4297_v1, %v943_v0  ;;  %v912_v40 = vld [vmem:[#allocation2 + $0x28] sm:$0xff]  ;;  %1828 = vst.msk [vmem:[%s4211_s7 + $0xc] sm:$0xf] %vm1824_vm3, %v2027_v49 }
  0xe4   :  { %v1103_v44 = vadd.f32 %v4296_v11, %v911_v6  ;;  %v2059_v14 = vpack.c.bf16 %v1539_v8, %v1539_v8  ;;  %v1537_v48 = vmax.f32 %v1466_v52, %v3255_v5  ;;  %v1208_v39 = vmul.f32 %v3216_v47, %v1137_v13  ;;  %v944_v13 = vld [vmem:[#allocation2 + $0x128] sm:$0xff]  ;;  %v3358_v11 = vpop.f32.mrf.mxu1 }
  0xe5   :  { %v2025_v6 = vpack.c.bf16 %v1505_v41, %v1505_v41  ;;  %v1247_v43 = vadd.f32 %v3230_v26, %v1176_v57  ;;  %v4298_v8 = vunpack.c.h.bf16 %v2898_v45  ;;  %v1206_v49 = vmul.f32 %v3216_v47, %v1135_v7 }
  0xe6   :  { %v1174_v2 = vmul.f32 %v3216_v47, %v1103_v44  ;;  %1860 = vst.msk [vmem:[%s4211_s7 + $0x8c] sm:$0xf] %vm1824_vm3, %v2059_v14  ;;  %v2057_v0 = vpack.c.bf16 %v1537_v48, %v1537_v48  ;;  %v1279_v1 = vadd.f32 %v3230_v26, %v1208_v39  ;;  %v4299_v41 = vunpack.c.h.bf16 %v2907_v50  ;;  %v3368_v44 = vpop.f32.mrf.mxu0 }
  0xe7   :  { %v1106_v52 = vadd.f32 %v4298_v8, %v914_v59  ;;  %1826 = vst.msk [vmem:[%s4211_s7 + $0x4] sm:$0xf] %vm1824_vm3, %v2025_v6  ;;  %v4300_v45 = vunpack.c.l.bf16 %v2930_v61  ;;  %v4301_v39 = vunpack.c.h.bf16 %v2916_v55  ;;  %v3380_v8 = vpop.f32.mrf.mxu1  ;;  %v4302_v50 = vunpack.c.l.bf16 %v2935_v62 }
  0xe8   :  { %v1138_v57 = vadd.f32 %v4299_v41, %v946_v38  ;;  %v1245_v14 = vadd.f32 %v3230_v26, %v1174_v2  ;;  %1858 = vst.msk [vmem:[%s4211_s7 + $0x84] sm:$0xf] %vm1824_vm3, %v2057_v0  ;;  %v1277_v6 = vadd.f32 %v3230_v26, %v1206_v49  ;;  %v4303_v2 = vunpack.c.h.bf16 %v2921_v56  ;;  %v3392_v41 = vpop.f32.mrf.mxu0 }
  0xe9   :  { %v1439_v59 = vadd.f32 %v4300_v45, %v1247_v43  ;;  %v1177_v48 = vmul.f32 %v3216_v47, %v1106_v52  ;;  %v1104_v7 = vadd.f32 %v4301_v39, %v912_v40  ;;  %v1471_v38 = vadd.f32 %v4302_v50, %v1279_v1  ;;  %v3399_v18 = vpop.f32.mrf.mxu1  ;;  %v106_v50 = vld [vmem:[#allocation2 + $0x50] sm:$0xff] }
  0xea   :  { %v1209_v43 = vmul.f32 %v3216_v47, %v1138_v57  ;;  %v1136_v52 = vadd.f32 %v4303_v2, %v944_v13  ;;  %v4304_v40 = vunpack.c.l.bf16 %v2944_v3  ;;  %v4305_v49 = vunpack.c.l.bf16 %v2949_v4 }
  0xeb   :  { %v1510_v55 = vmax.f32 %v1439_v59, %v3255_v5  ;;  %v1248_v39 = vadd.f32 %v3230_v26, %v1177_v48  ;;  %v1175_v0 = vmul.f32 %v3216_v47, %v1104_v7  ;;  %v1542_v1 = vmax.f32 %v1471_v38, %v3255_v5  ;;  %v3406_v59 = vpop.f32.mrf.mxu0  ;;  %v104_v38 = vld [vmem:[#allocation2 + $0x40] sm:$0xff]  ;;  %v3412_v20 = vpop.f32.mrf.mxu1 }
  0xec   :  { %v1437_v45 = vadd.f32 %v4304_v40, %v1245_v14  ;;  %v1469_v57 = vadd.f32 %v4305_v49, %v1277_v6  ;;  %v1280_v56 = vadd.f32 %v3230_v26, %v1209_v43  ;;  %v1207_v13 = vmul.f32 %v3216_v47, %v1136_v52 }
  0xed   :  { %v2030_v2 = vpack.c.bf16 %v1510_v55, %v1510_v55  ;;  %v4306_v48 = vunpack.c.h.bf16 %v2930_v61  ;;  %v1246_v40 = vadd.f32 %v3230_v26, %v1175_v0  ;;  %v2062_v6 = vpack.c.bf16 %v1542_v1, %v1542_v1  ;;  %v3418_v61 = vpop.f32.mrf.mxu0 }
  0xee   :  { %v1508_v14 = vmax.f32 %v1437_v45, %v3255_v5  ;;  %v1540_v43 = vmax.f32 %v1469_v57, %v3255_v5  ;;  %v4307_v52 = vunpack.c.h.bf16 %v2935_v62  ;;  %v1278_v55 = vadd.f32 %v3230_v26, %v1207_v13  ;;  %v139_v45 = vld [vmem:[#allocation2 + $0x158] sm:$0xff]  ;;  %v110_v13 = vld [vmem:[#allocation2 + $0x70] sm:$0xff] }
  0xef   :  { %v1440_v7 = vadd.f32 %v4306_v48, %v1248_v39  ;;  %1831 = vst.msk [vmem:[%s4211_s7 + $0x18] sm:$0xf] %vm1824_vm3, %v2030_v2  ;;  %v4308_v1 = vunpack.c.h.bf16 %v2944_v3  ;;  %v785_v62 = vadd.f32 %v3262_v32, %v106_v50  ;;  %v142_v48 = vld [vmem:[#allocation2 + $0x170] sm:$0xff]  ;;  %1863 = vst.msk [vmem:[%s4211_s7 + $0x98] sm:$0xf] %vm1824_vm3, %v2062_v6  ;;  %v817_v3 = vadd.f32 %v3271_v36, %v138_v25  ;;  %v140_v32 = vld [vmem:[#allocation2 + $0x160] sm:$0xff] }
  0xf0   :  { %v1472_v49 = vadd.f32 %v4307_v52, %v1280_v56  ;;  %v2028_v39 = vpack.c.bf16 %v1508_v14, %v1508_v14  ;;  %v137_v56 = vld [vmem:[#allocation2 + $0x148] sm:$0xff]  ;;  %v3428_v52 = vpop.f32.mrf.mxu1  ;;  %v2060_v30 = vpack.c.bf16 %v1540_v43, %v1540_v43  ;;  %v4309_v14 = vunpack.c.h.bf16 %v2949_v4  ;;  %v111_v50 = vld [vmem:[#allocation2 + $0x78] sm:$0xff] }
  0xf1   :  { %v1511_v0 = vmax.f32 %v1440_v7, %v3255_v5  ;;  %v1438_v57 = vadd.f32 %v4308_v1, %v1246_v40  ;;  %v108_v40 = vld [vmem:[#allocation2 + $0x60] sm:$0xff]  ;;  %v3438_v1 = vpop.f32.mrf.mxu0  ;;  %850 = vst.msk [vmem:[#allocation2 + $0x50] sm:$0xff] %vm31_vm2, %v785_v62  ;;  %v783_v4 = vadd.f32 %v3280_v42, %v104_v38  ;;  %v815_v43 = vadd.f32 %v3287_v58, %v136_v17  ;;  %v143_v25 = vld [vmem:[#allocation2 + $0x178] sm:$0xff]  ;;  %v109_v36 = vld [vmem:[#allocation2 + $0x68] sm:$0xff] }
  0xf2   :  { %v1543_v2 = vmax.f32 %v1472_v49, %v3255_v5  ;;  %v1470_v7 = vadd.f32 %v4309_v14, %v1278_v55  ;;  %1829 = vst.msk [vmem:[%s4211_s7 + $0x10] sm:$0xf] %vm1824_vm3, %v2028_v39  ;;  %v141_v49 = vld [vmem:[#allocation2 + $0x168] sm:$0xff]  ;;  %v2492_v55 = vpop.f32.mrf.mxu1  ;;  %1861 = vst.msk [vmem:[%s4211_s7 + $0x90] sm:$0xf] %vm1824_vm3, %v2060_v30  ;;  %v818_v42 = vadd.f32 %v3300_v60, %v139_v45  ;;  %v114_v38 = vld [vmem:[#allocation2 + $0x90] sm:$0xff] }
  0xf3   :  { %v2031_v23 = vpack.c.bf16 %v1511_v0, %v1511_v0  ;;  %v1509_v6 = vmax.f32 %v1438_v57, %v3255_v5  ;;  %882 = vst.msk [vmem:[#allocation2 + $0x150] sm:$0xff] %vm31_vm2, %v817_v3  ;;  %v786_v0 = vadd.f32 %v3294_v46, %v107_v19  ;;  %v146_v17 = vld [vmem:[#allocation2 + $0x190] sm:$0xff]  ;;  %v112_v58 = vld [vmem:[#allocation2 + $0x80] sm:$0xff]  ;;  %v587_v57 = vpop.f32.mrf.mxu0  ;;  %848 = vst.msk [vmem:[#allocation2 + $0x40] sm:$0xff] %vm31_vm2, %v783_v4 }
  0xf4   :  { %v2063_v14 = vpack.c.bf16 %v1543_v2, %v1543_v2  ;;  %v1541_v39 = vmax.f32 %v1470_v7, %v3255_v5  ;;  %880 = vst.msk [vmem:[#allocation2 + $0x140] sm:$0xff] %vm31_vm2, %v815_v43  ;;  %v784_v30 = vadd.f32 %v3306_v37, %v105_v24  ;;  %v816_v19 = vadd.f32 %v3317_v35, %v137_v56  ;;  %v144_v60 = vld [vmem:[#allocation2 + $0x180] sm:$0xff]  ;;  %v115_v45 = vld [vmem:[#allocation2 + $0x98] sm:$0xff]  ;;  %v715_v7 = vpop.f32.mrf.mxu1  ;;  %v145_v56 = vld [vmem:[#allocation2 + $0x188] sm:$0xff] }
  0xf5   :  { %1832 = vst.msk [vmem:[%s4211_s7 + $0x1c] sm:$0xf] %vm1824_vm3, %v2031_v23  ;;  %v2029_v62 = vpack.c.bf16 %v1509_v6, %v1509_v6  ;;  %v789_v46 = vadd.f32 %v3328_v63, %v110_v13  ;;  %v147_v2 = vld [vmem:[#allocation2 + $0x198] sm:$0xff]  ;;  %v821_v24 = vadd.f32 %v3338_v53, %v142_v48  ;;  %v787_v37 = vadd.f32 %v3348_v51, %v108_v40  ;;  %v113_v63 = vld [vmem:[#allocation2 + $0x88] sm:$0xff]  ;;  %v118_v13 = vld [vmem:[#allocation2 + $0xb0] sm:$0xff]  ;;  %v2463_v3 = vpop.f32.mrf.mxu0 }
  0xf6   :  { %1864 = vst.msk [vmem:[%s4211_s7 + $0x9c] sm:$0xf] %vm1824_vm3, %v2063_v14  ;;  %v2061_v23 = vpack.c.bf16 %v1541_v39, %v1541_v39  ;;  %v819_v35 = vadd.f32 %v3358_v11, %v140_v32  ;;  %v790_v53 = vadd.f32 %v3368_v44, %v111_v50  ;;  %v822_v51 = vadd.f32 %v3380_v8, %v143_v25  ;;  %v150_v40 = vld [vmem:[#allocation2 + $0x1b0] sm:$0xff]  ;;  %v2495_v32 = vpop.f32.mrf.mxu1  ;;  %v116_v6 = vld [vmem:[#allocation2 + $0xa0] sm:$0xff]  ;;  %v119_v43 = vld [vmem:[#allocation2 + $0xb8] sm:$0xff] }
  0xf7   :  { %851 = vst.msk [vmem:[#allocation2 + $0x58] sm:$0xff] %vm31_vm2, %v786_v0  ;;  %883 = vst.msk [vmem:[#allocation2 + $0x158] sm:$0xff] %vm31_vm2, %v818_v42  ;;  %v788_v11 = vadd.f32 %v3392_v41, %v109_v36  ;;  %v820_v48 = vadd.f32 %v3399_v18, %v141_v49  ;;  %v148_v4 = vld [vmem:[#allocation2 + $0x1a0] sm:$0xff]  ;;  %v793_v44 = vadd.f32 %v3406_v59, %v114_v38  ;;  %v600_v50 = vpop.f32.mrf.mxu0  ;;  %v3499_v25 = vld [vmem:[%s4207_s6 + $0x68] sm:$0xff]  }
  0xf8   :  { %1830 = vst.msk [vmem:[%s4211_s7 + $0x14] sm:$0xf] %vm1824_vm3, %v2029_v62  ;;  %1862 = vst.msk [vmem:[%s4211_s7 + $0x94] sm:$0xf] %vm1824_vm3, %v2061_v23  ;;  %v825_v8 = vadd.f32 %v3412_v20, %v146_v17  ;;  %v791_v18 = vadd.f32 %v3418_v61, %v112_v58  ;;  %v823_v41 = vadd.f32 %v3428_v52, %v144_v60  ;;  %v3504_v36 = vld [vmem:[%s4207_s6 + $0xe8] sm:$0xff]   ;;  %v728_v49 = vpop.f32.mrf.mxu1  ;;  %v151_v14 = vld [vmem:[#allocation2 + $0x1b8] sm:$0xff]  ;;  %v2270_v60 = vunpack.c.l.bf16 %v3499_v25 }
  0xf9   :  { %849 = vst.msk [vmem:[#allocation2 + $0x48] sm:$0xff] %vm31_vm2, %v784_v30  ;;  %881 = vst.msk [vmem:[#allocation2 + $0x148] sm:$0xff] %vm31_vm2, %v816_v19  ;;  %v794_v20 = vadd.f32 %v3438_v1, %v115_v45  ;;  %v826_v59 = vadd.f32 %v2492_v55, %v147_v2  ;;  %v792_v61 = vadd.f32 %v587_v57, %v113_v63  ;;  %v917_v39 = vld [vmem:[#allocation2 + $0x50] sm:$0xff]  ;;  %v2464_v58 = vpop.f32.mrf.mxu0  ;;  %v117_v1 = vld [vmem:[#allocation2 + $0xa8] sm:$0xff]  ;;  %v4310_v55 = vunpack.c.l.bf16 %v2958_v9 }
  0xfa   :  { %854 = vst.msk [vmem:[#allocation2 + $0x70] sm:$0xff] %vm31_vm2, %v789_v46  ;;  %886 = vst.msk [vmem:[#allocation2 + $0x170] sm:$0xff] %vm31_vm2, %v821_v24  ;;  %v824_v52 = vadd.f32 %v715_v7, %v145_v56  ;;  %v797_v0 = vadd.f32 %v2463_v3, %v118_v13  ;;  %v829_v42 = vadd.f32 %v2495_v32, %v150_v40  ;;  %v949_v62 = vld [vmem:[#allocation2 + $0x150] sm:$0xff]  ;;  %v2496_v19 = vpop.f32.mrf.mxu1  ;;  %v149_v46 = vld [vmem:[#allocation2 + $0x1a8] sm:$0xff]  ;;  %v2334_v45 = vunpack.c.l.bf16 %v3504_v36 }
  0xfb   :  { %852 = vst.msk [vmem:[#allocation2 + $0x60] sm:$0xff] %vm31_vm2, %v787_v37  ;;  %884 = vst.msk [vmem:[#allocation2 + $0x160] sm:$0xff] %vm31_vm2, %v819_v35  ;;  %v795_v38 = vadd.f32 %v600_v50, %v116_v6  ;;  %v827_v17 = vadd.f32 %v728_v49, %v148_v4  ;;  %v1109_v57 = vadd.f32 %v4310_v55, %v917_v39  ;;  %v4311_v2 = vunpack.c.l.bf16 %v2963_v10  ;;  %v915_v23 = vld [vmem:[#allocation2 + $0x40] sm:$0xff]  ;;  %v603_v35 = vpop.f32.mrf.mxu0 }
  0xfc   :  { %855 = vst.msk [vmem:[#allocation2 + $0x78] sm:$0xff] %vm31_vm2, %v790_v53  ;;  %887 = vst.msk [vmem:[#allocation2 + $0x178] sm:$0xff] %vm31_vm2, %v822_v51  ;;  %v798_v30 = vadd.f32 %v2464_v58, %v119_v43  ;;  %v947_v24 = vld [vmem:[#allocation2 + $0x140] sm:$0xff]  ;;  %v830_v37 = vadd.f32 %v2496_v19, %v151_v14  ;;  %v2139_v63 = vunpack.c.h.bf16 %v3206_v12  ;;  %v2203_v56 = vunpack.c.h.bf16 %v3211_v54  ;;  %v731_v6 = vpop.f32.mrf.mxu1 }
  0xfd   :  { %853 = vst.msk [vmem:[#allocation2 + $0x68] sm:$0xff] %vm31_vm2, %v788_v11  ;;  %885 = vst.msk [vmem:[#allocation2 + $0x168] sm:$0xff] %vm31_vm2, %v820_v48  ;;  %v1141_v7 = vadd.f32 %v4311_v2, %v949_v62  ;;  %v1180_v13 = vmul.f32 %v3216_v47, %v1109_v57  ;;  %v4312_v3 = vunpack.c.l.bf16 %v2972_v15  ;;  %v4313_v51 = vunpack.c.l.bf16 %v2977_v16 }
  0xfe   :  { %858 = vst.msk [vmem:[#allocation2 + $0x90] sm:$0xff] %vm31_vm2, %v793_v44  ;;  %890 = vst.msk [vmem:[#allocation2 + $0x190] sm:$0xff] %vm31_vm2, %v825_v8  ;;  %v918_v48 = vld [vmem:[#allocation2 + $0x58] sm:$0xff]  ;;  %v796_v32 = vadd.f32 %v603_v35, %v117_v1  ;;  %v4314_v44 = vunpack.c.h.bf16 %v2958_v9  ;;  %v4316_v49 = vunpack.c.h.bf16 %v2972_v15  ;;  %v4319_v55 = vunpack.c.l.bf16 %v2991_v22 }
  0xff   :  { %856 = vst.msk [vmem:[#allocation2 + $0x80] sm:$0xff] %vm31_vm2, %v791_v18  ;;  %888 = vst.msk [vmem:[#allocation2 + $0x180] sm:$0xff] %vm31_vm2, %v823_v41  ;;  %v1107_v53 = vadd.f32 %v4312_v3, %v915_v23  ;;  %v1139_v11 = vadd.f32 %v4313_v51, %v947_v24  ;;  %v950_v40 = vld [vmem:[#allocation2 + $0x158] sm:$0xff]  ;;  %v1212_v4 = vmul.f32 %v3216_v47, %v1141_v7  ;;  %v4315_v18 = vunpack.c.h.bf16 %v2963_v10 }
 0x100   :  { %859 = vst.msk [vmem:[#allocation2 + $0x98] sm:$0xff] %vm31_vm2, %v794_v20  ;;  %891 = vst.msk [vmem:[#allocation2 + $0x198] sm:$0xff] %vm31_vm2, %v826_v59  ;;  %v1110_v8 = vadd.f32 %v4314_v44, %v918_v48  ;;  %v916_v50 = vld [vmem:[#allocation2 + $0x48] sm:$0xff]  ;;  %v828_v20 = vadd.f32 %v731_v6, %v149_v46  ;;  %v1251_v59 = vadd.f32 %v3230_v26, %v1180_v13  ;;  %v4320_v46 = vunpack.c.l.bf16 %v3000_v27 }
 0x101   :  { %857 = vst.msk [vmem:[#allocation2 + $0x88] sm:$0xff] %vm31_vm2, %v792_v61  ;;  %889 = vst.msk [vmem:[#allocation2 + $0x188] sm:$0xff] %vm31_vm2, %v824_v52  ;;  %v1142_v41 = vadd.f32 %v4315_v18, %v950_v40  ;;  %v948_v43 = vld [vmem:[#allocation2 + $0x148] sm:$0xff]  ;;  %v1178_v61 = vmul.f32 %v3216_v47, %v1107_v53  ;;  %v1210_v52 = vmul.f32 %v3216_v47, %v1139_v11  ;;  %v4321_v7 = vunpack.c.l.bf16 %v3005_v28  ;;  %v921_v11 = vld [vmem:[#allocation2 + $0x70] sm:$0xff] }
 0x102   :  { %862 = vst.msk [vmem:[#allocation2 + $0xb0] sm:$0xff] %vm31_vm2, %v797_v0  ;;  %894 = vst.msk [vmem:[#allocation2 + $0x1b0] sm:$0xff] %vm31_vm2, %v829_v42  ;;  %v1108_v14 = vadd.f32 %v4316_v49, %v916_v50  ;;  %v1283_v9 = vadd.f32 %v3230_v26, %v1212_v4  ;;  %v1181_v10 = vmul.f32 %v3216_v47, %v1110_v8  ;;  %v4317_v0 = vunpack.c.h.bf16 %v2977_v16  ;;  %v953_v44 = vld [vmem:[#allocation2 + $0x170] sm:$0xff]  ;;  %v919_v50 = vld [vmem:[#allocation2 + $0x60] sm:$0xff] }
 0x103   :  { %860 = vst.msk [vmem:[#allocation2 + $0xa0] sm:$0xff] %vm31_vm2, %v795_v38  ;;  %892 = vst.msk [vmem:[#allocation2 + $0x1a0] sm:$0xff] %vm31_vm2, %v827_v17  ;;  %v1213_v39 = vmul.f32 %v3216_v47, %v1142_v41  ;;  %v4318_v38 = vunpack.c.l.bf16 %v2986_v21  ;;  %v1249_v58 = vadd.f32 %v3230_v26, %v1178_v61  ;;  %v1281_v15 = vadd.f32 %v3230_v26, %v1210_v52  ;;  %v922_v49 = vld [vmem:[#allocation2 + $0x78] sm:$0xff] }
 0x104   :  { %863 = vst.msk [vmem:[#allocation2 + $0xb8] sm:$0xff] %vm31_vm2, %v798_v30  ;;  %895 = vst.msk [vmem:[#allocation2 + $0x1b8] sm:$0xff] %vm31_vm2, %v830_v37  ;;  %v1140_v42 = vadd.f32 %v4317_v0, %v948_v43  ;;  %v1179_v1 = vmul.f32 %v3216_v47, %v1108_v14  ;;  %v1475_v57 = vadd.f32 %v4319_v55, %v1283_v9  ;;  %v4322_v35 = vunpack.c.h.bf16 %v2986_v21  ;;  %v951_v43 = vld [vmem:[#allocation2 + $0x160] sm:$0xff]  ;;  %v954_v14 = vld [vmem:[#allocation2 + $0x178] sm:$0xff] }
 0x105   :  { %861 = vst.msk [vmem:[#allocation2 + $0xa8] sm:$0xff] %vm31_vm2, %v796_v32  ;;  %893 = vst.msk [vmem:[#allocation2 + $0x1a8] sm:$0xff] %vm31_vm2, %v828_v20  ;;  %v1443_v17 = vadd.f32 %v4318_v38, %v1251_v59  ;;  %v1252_v62 = vadd.f32 %v3230_v26, %v1181_v10  ;;  %v1284_v30 = vadd.f32 %v3230_v26, %v1213_v39  ;;  %v4323_v3 = vunpack.c.h.bf16 %v2991_v22 }
 0x106   :  { %v1211_v16 = vmul.f32 %v3216_v47, %v1140_v42  ;;  %v1441_v2 = vadd.f32 %v4320_v46, %v1249_v58  ;;  %v1473_v23 = vadd.f32 %v4321_v7, %v1281_v15  ;;  %v1250_v24 = vadd.f32 %v3230_v26, %v1179_v1  ;;  %v920_v42 = vld [vmem:[#allocation2 + $0x68] sm:$0xff] }
 0x107   :  { %v1514_v19 = vmax.f32 %v1443_v17, %v3255_v5  ;;  %v1546_v37 = vmax.f32 %v1475_v57, %v3255_v5  ;;  %v1444_v13 = vadd.f32 %v4322_v35, %v1252_v62  ;;  %v1476_v53 = vadd.f32 %v4323_v3, %v1284_v30  ;;  %v952_v57 = vld [vmem:[#allocation2 + $0x168] sm:$0xff] }
 0x108   :  { %v1282_v51 = vadd.f32 %v3230_v26, %v1211_v16  ;;  %v1512_v40 = vmax.f32 %v1441_v2, %v3255_v5  ;;  %v1544_v32 = vmax.f32 %v1473_v23, %v3255_v5  ;;  %v4324_v6 = vunpack.c.h.bf16 %v3000_v27 }
 0x109   :  { %v2034_v48 = vpack.c.bf16 %v1514_v19, %v1514_v19  ;;  %v2066_v8 = vpack.c.bf16 %v1546_v37, %v1546_v37  ;;  %v1515_v18 = vmax.f32 %v1444_v13, %v3255_v5  ;;  %v1547_v21 = vmax.f32 %v1476_v53, %v3255_v5 }
 0x10a   :  { %v1442_v4 = vadd.f32 %v4324_v6, %v1250_v24  ;;  %v4325_v22 = vunpack.c.h.bf16 %v3005_v28  ;;  %v2032_v20 = vpack.c.bf16 %v1512_v40, %v1512_v40  ;;  %v2064_v59 = vpack.c.bf16 %v1544_v32, %v1544_v32  ;;  %v4336_v6 = vld [vmem:[#allocation4_spill] sm:$0xff] }
 0x10b   :  { %1835 = vst.msk [vmem:[%s4211_s7 + $0x28] sm:$0xf] %vm1824_vm3, %v2034_v48  ;;  %v4326_v61 = vunpack.c.l.bf16 %v3010_v29  ;;  %1867 = vst.msk [vmem:[%s4211_s7 + $0xa8] sm:$0xf] %vm1824_vm3, %v2066_v8  ;;  %v2035_v28 = vpack.c.bf16 %v1515_v18, %v1515_v18  ;;  %v2067_v9 = vpack.c.bf16 %v1547_v21, %v1547_v21  ;;  %v4327_v39 = vunpack.c.l.bf16 %v3019_v34 }
 0x10c   :  { %v1474_v41 = vadd.f32 %v4325_v22, %v1282_v51  ;;  %v1513_v27 = vmax.f32 %v1442_v4, %v3255_v5  ;;  %1833 = vst.msk [vmem:[%s4211_s7 + $0x20] sm:$0xf] %vm1824_vm3, %v2032_v20  ;;  %1865 = vst.msk [vmem:[%s4211_s7 + $0xa0] sm:$0xf] %vm1824_vm3, %v2064_v59  ;;  %v4328_v58 = vunpack.c.l.bf16 %v3028_v31  ;;  %v4329_v1 = vunpack.c.l.bf16 %v3033_v33  ;;  %v4334_v51 = vld [vmem:[#allocation3_spill] sm:$0xff]  ;;  %v4338_v22 = vld [vmem:[#allocation5_spill] sm:$0xff] }
 0x10d   :  { %v1113_v52 = vadd.f32 %v4326_v61, %v921_v11  ;;  %v1145_v0 = vadd.f32 %v4327_v39, %v953_v44  ;;  %1836 = vst.msk [vmem:[%s4211_s7 + $0x2c] sm:$0xf] %vm1824_vm3, %v2035_v28  ;;  %1868 = vst.msk [vmem:[%s4211_s7 + $0xac] sm:$0xf] %vm1824_vm3, %v2067_v9  ;;  %v4330_v16 = vunpack.c.h.bf16 %v3010_v29  ;;  %v4331_v46 = vunpack.c.h.bf16 %v3019_v34 }
 0x10e   :  { %v1545_v10 = vmax.f32 %v1474_v41, %v3255_v5  ;;  %v2033_v38 = vpack.c.bf16 %v1513_v27, %v1513_v27  ;;  %v1111_v15 = vadd.f32 %v4328_v58, %v919_v50  ;;  %v1143_v55 = vadd.f32 %v4329_v1, %v951_v43  ;;  %v4340_v43 = vld [vmem:[#allocation6_spill] sm:$0xff]  ;;  %v957_v58 = vld [vmem:[#allocation2 + $0x190] sm:$0xff]  ;;  %v3671_v1 = vpop.f32.mrf.mxu1 }
 0x10f   :  { %v1184_v17 = vmul.f32 %v3216_v47, %v1113_v52  ;;  %v1216_v30 = vmul.f32 %v3216_v47, %v1145_v0  ;;  %v1114_v19 = vadd.f32 %v4330_v16, %v922_v49  ;;  %v1146_v2 = vadd.f32 %v4331_v46, %v954_v14  ;;  %v955_v46 = vld [vmem:[#allocation2 + $0x180] sm:$0xff] }
 0x110   :  { %v2065_v62 = vpack.c.bf16 %v1545_v10, %v1545_v10  ;;  %1834 = vst.msk [vmem:[%s4211_s7 + $0x24] sm:$0xf] %vm1824_vm3, %v2033_v38  ;;  %v1182_v23 = vmul.f32 %v3216_v47, %v1111_v15  ;;  %v1214_v24 = vmul.f32 %v3216_v47, %v1143_v55  ;;  %v4332_v37 = vunpack.c.h.bf16 %v3028_v31  ;;  %v925_v10 = vld [vmem:[#allocation2 + $0x90] sm:$0xff]  ;;  %v3669_v15 = vpop.f32.mrf.mxu0 }
 0x111   :  { %v1255_v7 = vadd.f32 %v3230_v26, %v1184_v17  ;;  %v1287_v29 = vadd.f32 %v3230_v26, %v1216_v30  ;;  %v1185_v34 = vmul.f32 %v3216_v47, %v1114_v19  ;;  %v1217_v13 = vmul.f32 %v3216_v47, %v1146_v2  ;;  %v923_v19 = vld [vmem:[#allocation2 + $0x80] sm:$0xff] }
 0x112   :  { %v1112_v35 = vadd.f32 %v4332_v37, %v920_v42  ;;  %1866 = vst.msk [vmem:[%s4211_s7 + $0xa4] sm:$0xf] %vm1824_vm3, %v2065_v62  ;;  %v4333_v3 = vunpack.c.h.bf16 %v3033_v33  ;;  %v4335_v11 = vunpack.c.l.bf16 %v4334_v51  ;;  %v1253_v31 = vadd.f32 %v3230_v26, %v1182_v23 }
 0x113   :  { %v1285_v40 = vadd.f32 %v3230_v26, %v1214_v24  ;;  %v4337_v4 = vunpack.c.l.bf16 %v4336_v6  ;;  %v1256_v8 = vadd.f32 %v3230_v26, %v1185_v34  ;;  %v1288_v18 = vadd.f32 %v3230_v26, %v1217_v13  ;;  %v4346_v24 = vld [vmem:[#allocation7_spill] sm:$0xff]  ;;  %v958_v34 = vld [vmem:[#allocation2 + $0x198] sm:$0xff] }
 0x114   :  { %v1144_v53 = vadd.f32 %v4333_v3, %v952_v57  ;;  %v1447_v48 = vadd.f32 %v4335_v11, %v1255_v7  ;;  %v1183_v32 = vmul.f32 %v3216_v47, %v1112_v35  ;;  %v4339_v41 = vunpack.c.l.bf16 %v4338_v22 }
 0x115   :  { %v1479_v44 = vadd.f32 %v4337_v4, %v1287_v29  ;;  %v4341_v20 = vunpack.c.l.bf16 %v4340_v43  ;;  %v4342_v52 = vunpack.c.h.bf16 %v4334_v51  ;;  %v4343_v14 = vunpack.c.h.bf16 %v4336_v6  ;;  %v926_v29 = vld [vmem:[#allocation2 + $0x98] sm:$0xff]  ;;  %v4348_v51 = vld [vmem:[#allocation8_spill] sm:$0xff]  ;;  %v4350_v6 = vld [vmem:[#allocation9_spill] sm:$0xff] }
 0x116   :  { %v1215_v21 = vmul.f32 %v3216_v47, %v1144_v53  ;;  %v1518_v33 = vmax.f32 %v1447_v48, %v3255_v5  ;;  %v1445_v50 = vadd.f32 %v4339_v41, %v1253_v31  ;;  %v1254_v27 = vadd.f32 %v3230_v26, %v1183_v32  ;;  %v924_v31 = vld [vmem:[#allocation2 + $0x88] sm:$0xff]  ;;  %v3706_v41 = vpop.f32.mrf.mxu1 }
 0x117   :  { %v1477_v59 = vadd.f32 %v4341_v20, %v1285_v40  ;;  %v1550_v61 = vmax.f32 %v1479_v44, %v3255_v5  ;;  %v1448_v49 = vadd.f32 %v4342_v52, %v1256_v8  ;;  %v1480_v28 = vadd.f32 %v4343_v14, %v1288_v18  ;;  %v4352_v8 = vld [vmem:[#allocation10_spill] sm:$0xff] }
 0x118   :  { %v1286_v9 = vadd.f32 %v3230_v26, %v1215_v21  ;;  %v2038_v39 = vpack.c.bf16 %v1518_v33, %v1518_v33  ;;  %v1516_v0 = vmax.f32 %v1445_v50, %v3255_v5  ;;  %v4344_v38 = vunpack.c.h.bf16 %v4338_v22  ;;  %v956_v33 = vld [vmem:[#allocation2 + $0x188] sm:$0xff]  ;;  %v3704_v22 = vpop.f32.mrf.mxu0 }
 0x119   :  { %v1548_v42 = vmax.f32 %v1477_v59, %v3255_v5  ;;  %v2070_v55 = vpack.c.bf16 %v1550_v61, %v1550_v61  ;;  %v1519_v57 = vmax.f32 %v1448_v49, %v3255_v5  ;;  %v1551_v62 = vmax.f32 %v1480_v28, %v3255_v5 }
 0x11a   :  { %v1446_v17 = vadd.f32 %v4344_v38, %v1254_v27  ;;  %v4345_v30 = vunpack.c.h.bf16 %v4340_v43  ;;  %1839 = vst.msk [vmem:[%s4211_s7 + $0x38] sm:$0xf] %vm1824_vm3, %v2038_v39  ;;  %v2036_v2 = vpack.c.bf16 %v1516_v0, %v1516_v0  ;;  %v4347_v37 = vunpack.c.l.bf16 %v4346_v24 }
 0x11b   :  { %v2068_v7 = vpack.c.bf16 %v1548_v42, %v1548_v42  ;;  %1871 = vst.msk [vmem:[%s4211_s7 + $0xb8] sm:$0xf] %vm1824_vm3, %v2070_v55  ;;  %v2039_v13 = vpack.c.bf16 %v1519_v57, %v1519_v57  ;;  %v2071_v3 = vpack.c.bf16 %v1551_v62, %v1551_v62  ;;  %v4349_v11 = vunpack.c.l.bf16 %v4348_v51 }
 0x11c   :  { %v1478_v16 = vadd.f32 %v4345_v30, %v1286_v9  ;;  %v1517_v23 = vmax.f32 %v1446_v17, %v3255_v5  ;;  %v1117_v35 = vadd.f32 %v4347_v37, %v925_v10  ;;  %1837 = vst.msk [vmem:[%s4211_s7 + $0x30] sm:$0xf] %vm1824_vm3, %v2036_v2  ;;  %v4351_v4 = vunpack.c.l.bf16 %v4350_v6  ;;  %v4358_v17 = vld [vmem:[#allocation11_spill] sm:$0xff] }
 0x11d   :  { %v1149_v48 = vadd.f32 %v4349_v11, %v957_v58  ;;  %1869 = vst.msk [vmem:[%s4211_s7 + $0xb0] sm:$0xf] %vm1824_vm3, %v2068_v7  ;;  %v4353_v18 = vunpack.c.l.bf16 %v4352_v8  ;;  %1840 = vst.msk [vmem:[%s4211_s7 + $0x3c] sm:$0xf] %vm1824_vm3, %v2039_v13  ;;  %v4354_v20 = vunpack.c.h.bf16 %v4346_v24  ;;  %v4355_v27 = vunpack.c.h.bf16 %v4348_v51 }
 0x11e   :  { %v1549_v53 = vmax.f32 %v1478_v16, %v3255_v5  ;;  %v2037_v40 = vpack.c.bf16 %v1517_v23, %v1517_v23  ;;  %v1188_v32 = vmul.f32 %v3216_v47, %v1117_v35  ;;  %v1115_v44 = vadd.f32 %v4351_v4, %v923_v19  ;;  %1872 = vst.msk [vmem:[%s4211_s7 + $0xbc] sm:$0xf] %vm1824_vm3, %v2071_v3  ;;  %v3744_v16 = vpop.f32.mrf.mxu0  ;;  %v3746_v19 = vpop.f32.mrf.mxu1  ;;  %v4364_v3 = vld [vmem:[#allocation14_spill] sm:$0xff] }
 0x11f   :  { %v1147_v21 = vadd.f32 %v4353_v18, %v955_v46  ;;  %v1220_v43 = vmul.f32 %v3216_v47, %v1149_v48  ;;  %v1118_v59 = vadd.f32 %v4354_v20, %v926_v29  ;;  %v1150_v61 = vadd.f32 %v4355_v27, %v958_v34  ;;  %v4360_v46 = vld [vmem:[#allocation12_spill] sm:$0xff]  ;;  %v4362_v29 = vld [vmem:[#allocation13_spill] sm:$0xff] }
 0x120   :  { %v2069_v50 = vpack.c.bf16 %v1549_v53, %v1549_v53  ;;  %1838 = vst.msk [vmem:[%s4211_s7 + $0x34] sm:$0xf] %vm1824_vm3, %v2037_v40  ;;  %v1259_v52 = vadd.f32 %v3230_v26, %v1188_v32  ;;  %v1186_v49 = vmul.f32 %v3216_v47, %v1115_v44  ;;  %v4356_v28 = vunpack.c.h.bf16 %v4350_v6  ;;  %v929_v44 = vld [vmem:[#allocation2 + $0xb0] sm:$0xff]  ;;  %v3769_v20 = vpop.f32.mrf.mxu0 }
 0x121   :  { %v1218_v14 = vmul.f32 %v3216_v47, %v1147_v21  ;;  %v1291_v10 = vadd.f32 %v3230_v26, %v1220_v43  ;;  %v1189_v39 = vmul.f32 %v3216_v47, %v1118_v59  ;;  %v1221_v0 = vmul.f32 %v3216_v47, %v1150_v61  ;;  %v961_v43 = vld [vmem:[#allocation2 + $0x1b0] sm:$0xff]  ;;  %v3771_v59 = vpop.f32.mrf.mxu1 }
 0x122   :  { %v1116_v9 = vadd.f32 %v4356_v28, %v924_v31  ;;  %1870 = vst.msk [vmem:[%s4211_s7 + $0xb4] sm:$0xf] %vm1824_vm3, %v2069_v50  ;;  %v4357_v42 = vunpack.c.h.bf16 %v4352_v8  ;;  %v4359_v58 = vunpack.c.l.bf16 %v4358_v17  ;;  %v1257_v57 = vadd.f32 %v3230_v26, %v1186_v49  ;;  %v927_v28 = vld [vmem:[#allocation2 + $0xa0] sm:$0xff] }
 0x123   :  { %v1289_v62 = vadd.f32 %v3230_v26, %v1218_v14  ;;  %v4361_v2 = vunpack.c.l.bf16 %v4360_v46  ;;  %v1260_v23 = vadd.f32 %v3230_v26, %v1189_v39  ;;  %v1292_v24 = vadd.f32 %v3230_v26, %v1221_v0 }
 0x124   :  { %v1148_v38 = vadd.f32 %v4357_v42, %v956_v33  ;;  %v1451_v55 = vadd.f32 %v4359_v58, %v1259_v52  ;;  %v1187_v30 = vmul.f32 %v3216_v47, %v1116_v9  ;;  %v4363_v34 = vunpack.c.l.bf16 %v4362_v29  ;;  %v959_v9 = vld [vmem:[#allocation2 + $0x1a0] sm:$0xff]  ;;  %v930_v58 = vld [vmem:[#allocation2 + $0xb8] sm:$0xff] }
 0x125   :  { %v1483_v7 = vadd.f32 %v4361_v2, %v1291_v10  ;;  %v4365_v53 = vunpack.c.l.bf16 %v4364_v3  ;;  %v4366_v31 = vunpack.c.h.bf16 %v4358_v17  ;;  %v4367_v32 = vunpack.c.h.bf16 %v4360_v46  ;;  %v4370_v42 = vld [vmem:[#allocation15_spill] sm:$0xff]  ;;  %v4372_v46 = vld [vmem:[#allocation16_spill] sm:$0xff] }
 0x126   :  { %v1219_v37 = vmul.f32 %v3216_v47, %v1148_v38  ;;  %v1522_v35 = vmax.f32 %v1451_v55, %v3255_v5  ;;  %v1449_v13 = vadd.f32 %v4363_v34, %v1257_v57  ;;  %v1258_v11 = vadd.f32 %v3230_v26, %v1187_v30  ;;  %v962_v55 = vld [vmem:[#allocation2 + $0x1b8] sm:$0xff] }
 0x127   :  { %v1481_v51 = vadd.f32 %v4365_v53, %v1289_v62  ;;  %v1554_v48 = vmax.f32 %v1483_v7, %v3255_v5  ;;  %v1452_v40 = vadd.f32 %v4366_v31, %v1260_v23  ;;  %v1484_v6 = vadd.f32 %v4367_v32, %v1292_v24  ;;  %v928_v23 = vld [vmem:[#allocation2 + $0xa8] sm:$0xff]  ;;  %v3819_v31 = vld [vmem:[%s4208_s2] ss:$0 sm:$0xff] }
 0x128   :  { %v1290_v4 = vadd.f32 %v3230_v26, %v1219_v37  ;;  %v2042_v8 = vpack.c.bf16 %v1522_v35, %v1522_v35  ;;  %v1520_v18 = vmax.f32 %v1449_v13, %v3255_v5  ;;  %v4368_v33 = vunpack.c.h.bf16 %v4362_v29  ;;  %v4374_v35 = vld [vmem:[#allocation17_spill] sm:$0xff]  ;;  %v4376_v13 = vld [vmem:[#allocation18_spill] sm:$0xff] }
 0x129   :  { %v1552_v21 = vmax.f32 %v1481_v51, %v3255_v5  ;;  %v2074_v27 = vpack.c.bf16 %v1554_v48, %v1554_v48  ;;  %v1523_v61 = vmax.f32 %v1452_v40, %v3255_v5  ;;  %v1555_v52 = vmax.f32 %v1484_v6, %v3255_v5  ;;  %v960_v51 = vld [vmem:[#allocation2 + $0x1a8] sm:$0xff]  ;;  %v3806_v48 = vpop.f32.mrf.mxu1 }
 0x12a   :  { %v1450_v50 = vadd.f32 %v4368_v33, %v1258_v11  ;;  %v4369_v49 = vunpack.c.h.bf16 %v4364_v3  ;;  %1843 = vst.msk [vmem:[%s4211_s7 + $0x48] sm:$0xf] %vm1824_vm3, %v2042_v8  ;;  %v2040_v10 = vpack.c.bf16 %v1520_v18, %v1520_v18  ;;  %v4371_v38 = vunpack.c.l.bf16 %v4370_v42  ;;  %v3804_v11 = vpop.f32.mrf.mxu0 }
 0x12b   :  { %v2072_v39 = vpack.c.bf16 %v1552_v21, %v1552_v21  ;;  %1875 = vst.msk [vmem:[%s4211_s7 + $0xc8] sm:$0xf] %vm1824_vm3, %v2074_v27  ;;  %v2043_v57 = vpack.c.bf16 %v1523_v61, %v1523_v61  ;;  %v2075_v62 = vpack.c.bf16 %v1555_v52, %v1555_v52  ;;  %v4373_v2 = vunpack.c.l.bf16 %v4372_v46 }
 0x12c   :  { %v1482_v14 = vadd.f32 %v4369_v49, %v1290_v4  ;;  %v1521_v0 = vmax.f32 %v1450_v50, %v3255_v5  ;;  %v1121_v17 = vadd.f32 %v4371_v38, %v929_v44  ;;  %1841 = vst.msk [vmem:[%s4211_s7 + $0x40] sm:$0xf] %vm1824_vm3, %v2040_v10  ;;  %v4375_v29 = vunpack.c.l.bf16 %v4374_v35  ;;  %v3849_v10 = vld [vmem:[%s4209_s3] ss:$0 sm:$0xff]  ;;  %v3856_v38 = vpop.f32.mrf.mxu1 }
 0x12d   :  { %v1153_v7 = vadd.f32 %v4373_v2, %v961_v43  ;;  %1873 = vst.msk [vmem:[%s4211_s7 + $0xc0] sm:$0xf] %vm1824_vm3, %v2072_v39  ;;  %v4377_v3 = vunpack.c.l.bf16 %v4376_v13  ;;  %1844 = vst.msk [vmem:[%s4211_s7 + $0x4c] sm:$0xf] %vm1824_vm3, %v2043_v57  ;;  %v4378_v32 = vunpack.c.h.bf16 %v4370_v42  ;;  %v4379_v4 = vunpack.c.h.bf16 %v4372_v46  ;;  %v3854_v42 = vpop.f32.mrf.mxu0  ;;  %v4386_v2 = vld [vmem:[#allocation21_spill] sm:$0xff] }
 0x12e   :  { %v1553_v30 = vmax.f32 %v1482_v14, %v3255_v5  ;;  %v2041_v24 = vpack.c.bf16 %v1521_v0, %v1521_v0  ;;  %v1192_v37 = vmul.f32 %v3216_v47, %v1121_v17  ;;  %v1119_v34 = vadd.f32 %v4375_v29, %v927_v28  ;;  %1876 = vst.msk [vmem:[%s4211_s7 + $0xcc] sm:$0xf] %vm1824_vm3, %v2075_v62  ;;  %v4382_v14 = vld [vmem:[#allocation19_spill] sm:$0xff]  ;;  %v4384_v17 = vld [vmem:[#allocation20_spill] sm:$0xff] }
 0x12f   :  { %v1151_v53 = vadd.f32 %v4377_v3, %v959_v9  ;;  %v1224_v40 = vmul.f32 %v3819_v31, %v1153_v7  ;;  %v1122_v6 = vadd.f32 %v4378_v32, %v930_v58  ;;  %v1154_v44 = vadd.f32 %v4379_v4, %v962_v55 }
 0x130   :  { %v2073_v47 = vpack.c.bf16 %v1553_v30, %v1553_v30  ;;  %1842 = vst.msk [vmem:[%s4211_s7 + $0x44] sm:$0xf] %vm1824_vm3, %v2041_v24  ;;  %v1263_v8 = vadd.f32 %v3230_v26, %v1192_v37  ;;  %v1190_v18 = vmul.f32 %v3819_v31, %v1119_v34  ;;  %v4380_v33 = vunpack.c.h.bf16 %v4374_v35  ;;  %v4388_v24 = vld [vmem:[#allocation22_spill] sm:$0xff] }
 0x131   :  { %v1222_v21 = vmul.f32 %v3819_v31, %v1151_v53  ;;  %v1295_v43 = vadd.f32 %v3230_v26, %v1224_v40  ;;  %v1193_v27 = vmul.f32 %v3819_v31, %v1122_v6  ;;  %v1225_v61 = vmul.f32 %v3819_v31, %v1154_v44  ;;  %v122_v40 = vld [vmem:[#allocation2 + $0xd0] sm:$0xff] }
 0x132   :  { %v1120_v50 = vadd.f32 %v4380_v33, %v928_v23  ;;  %1874 = vst.msk [vmem:[%s4211_s7 + $0xc4] sm:$0xf] %vm1824_vm3, %v2073_v47  ;;  %v4381_v52 = vunpack.c.h.bf16 %v4376_v13  ;;  %v4383_v28 = vunpack.c.l.bf16 %v4382_v14  ;;  %v1261_v39 = vadd.f32 %v3849_v10, %v1190_v18  ;;  %v154_v18 = vld [vmem:[#allocation2 + $0x1d0] sm:$0xff]  ;;  %v152_v33 = vld [vmem:[#allocation2 + $0x1c0] sm:$0xff] }
 0x133   :  { %v1293_v0 = vadd.f32 %v3849_v10, %v1222_v21  ;;  %v4385_v58 = vunpack.c.l.bf16 %v4384_v17  ;;  %v1264_v57 = vadd.f32 %v3849_v10, %v1193_v27  ;;  %v1296_v62 = vadd.f32 %v3849_v10, %v1225_v61  ;;  %v120_v21 = vld [vmem:[#allocation2 + $0xc0] sm:$0xff] }
 0x134   :  { %v1152_v49 = vadd.f32 %v4381_v52, %v960_v51  ;;  %v1455_v9 = vadd.f32 %v4383_v28, %v1263_v8  ;;  %v1191_v26 = vmul.f32 %v3819_v31, %v1120_v50  ;;  %v4387_v7 = vunpack.c.l.bf16 %v4386_v2  ;;  %v3879_v50 = vpop.f32.mrf.mxu0  ;;  %v123_v28 = vld [vmem:[#allocation2 + $0xd8] sm:$0xff] }
 0x135   :  { %v1487_v55 = vadd.f32 %v4385_v58, %v1295_v43  ;;  %v4389_v37 = vunpack.c.l.bf16 %v4388_v24  ;;  %v4390_v13 = vunpack.c.h.bf16 %v4382_v14  ;;  %v4391_v53 = vunpack.c.h.bf16 %v4384_v17  ;;  %v3881_v43 = vpop.f32.mrf.mxu1  ;;  %v3894_v17 = vld [vmem:[%s4210_s4] ss:$0 sm:$0xff] }
 0x136   :  { %v1223_v30 = vmul.f32 %v3819_v31, %v1152_v49  ;;  %v1526_v46 = vmax.f32 %v1455_v9, %v3255_v5  ;;  %v1453_v23 = vadd.f32 %v4387_v7, %v1261_v39  ;;  %v1262_v29 = vadd.f32 %v3849_v10, %v1191_v26  ;;  %v155_v9 = vld [vmem:[#allocation2 + $0x1d8] sm:$0xff]  ;;  %v121_v39 = vld [vmem:[#allocation2 + $0xc8] sm:$0xff] }
 0x137   :  { %v1485_v35 = vadd.f32 %v4389_v37, %v1293_v0  ;;  %v1558_v34 = vmax.f32 %v1487_v55, %v3255_v5  ;;  %v1456_v3 = vadd.f32 %v4390_v13, %v1264_v57  ;;  %v1488_v51 = vadd.f32 %v4391_v53, %v1296_v62  ;;  %v153_v55 = vld [vmem:[#allocation2 + $0x1c8] sm:$0xff]  ;;  %v126_v57 = vld [vmem:[#allocation2 + $0xf0] sm:$0xff]  ;;  %v127_v37 = vld [vmem:[#allocation2 + $0xf8] sm:$0xff] }
 0x138   :  { %v1294_v47 = vadd.f32 %v3849_v10, %v1223_v30  ;;  %v2046_v32 = vpack.c.bf16 %v1526_v46, %v1526_v46  ;;  %v1524_v6 = vmax.f32 %v1453_v23, %v3255_v5  ;;  %v4392_v44 = vunpack.c.h.bf16 %v4386_v2  ;;  %v158_v62 = vld [vmem:[#allocation2 + $0x1f0] sm:$0xff]  ;;  %v124_v23 = vld [vmem:[#allocation2 + $0xe0] sm:$0xff]  ;;  %v125_v13 = vld [vmem:[#allocation2 + $0xe8] sm:$0xff] }
 0x139   :  { %v1556_v4 = vmax.f32 %v1485_v35, %v3255_v5  ;;  %v2078_v27 = vpack.c.bf16 %v1558_v34, %v1558_v34  ;;  %v1527_v61 = vmax.f32 %v1456_v3, %v3255_v5  ;;  %v1559_v52 = vmax.f32 %v1488_v51, %v3255_v5  ;;  %v159_v34 = vld [vmem:[#allocation2 + $0x1f8] sm:$0xff]  ;;  %v635_v3 = vpop.f32.mrf.mxu0  ;;  %v157_v53 = vld [vmem:[#allocation2 + $0x1e8] sm:$0xff]  ;;  %v763_v51 = vpop.f32.mrf.mxu1 }
 0x13a   :  { %v1454_v8 = vadd.f32 %v4392_v44, %v1262_v29  ;;  %v4393_v49 = vunpack.c.h.bf16 %v4388_v24  ;;  %1847 = vst.msk [vmem:[%s4211_s7 + $0x58] sm:$0xf] %vm1824_vm3, %v2046_v32  ;;  %v2044_v0 = vpack.c.bf16 %v1524_v6, %v1524_v6  ;;  %v801_v58 = vadd.f32 %v3669_v15, %v122_v40  ;;  %v156_v24 = vld [vmem:[#allocation2 + $0x1e0] sm:$0xff]  ;;  %v3941_v6 = vld [vmem:[%s4206_s5 + $0x78] sm:$0xff]  }
 0x13b   :  { %v2076_v26 = vpack.c.bf16 %v1556_v4, %v1556_v4  ;;  %1879 = vst.msk [vmem:[%s4211_s7 + $0xd8] sm:$0xf] %vm1824_vm3, %v2078_v27  ;;  %v2047_v30 = vpack.c.bf16 %v1527_v61, %v1527_v61  ;;  %v2079_v46 = vpack.c.bf16 %v1559_v52, %v1559_v52  ;;  %v833_v7 = vadd.f32 %v3671_v1, %v154_v18  ;;  %v3986_v52 = vld [vmem:[%s4207_s6 + $0x78] sm:$0xff]  }
 0x13c   :  { %v1486_v14 = vadd.f32 %v4393_v49, %v1294_v47  ;;  %v1525_v5 = vmax.f32 %v1454_v8, %v3894_v17  ;;  %1845 = vst.msk [vmem:[%s4211_s7 + $0x50] sm:$0xf] %vm1824_vm3, %v2044_v0  ;;  %v799_v35 = vadd.f32 %v3704_v22, %v120_v21  ;;  %v831_v1 = vadd.f32 %v3706_v41, %v152_v33  ;;  %v3928_v41 = vld [vmem:[%s4207_s6 + $0x60] sm:$0xff]  }
 0x13d   :  { %1877 = vst.msk [vmem:[%s4211_s7 + $0xd0] sm:$0xf] %vm1824_vm3, %v2076_v26  ;;  %v802_v29 = vadd.f32 %v3744_v16, %v123_v28  ;;  %1848 = vst.msk [vmem:[%s4211_s7 + $0x5c] sm:$0xf] %vm1824_vm3, %v2047_v30  ;;  %v3933_v16 = vld [vmem:[%s4207_s6 + $0xe0] sm:$0xff]   ;;  %v834_v47 = vadd.f32 %v3746_v19, %v155_v9  ;;  %v800_v40 = vadd.f32 %v3769_v20, %v121_v39  ;;  %v2266_v21 = vunpack.c.l.bf16 %v3928_v41  ;;  %v4003_v9 = vld [vmem:[%s4207_s6 + $0x70] sm:$0xff]  }
 0x13e   :  { %v1557_v2 = vmax.f32 %v1486_v14, %v3894_v17  ;;  %v2045_v15 = vpack.c.bf16 %v1525_v5, %v1525_v5  ;;  %866 = vst.msk [vmem:[#allocation2 + $0xd0] sm:$0xff] %vm31_vm2, %v801_v58  ;;  %898 = vst.msk [vmem:[#allocation2 + $0x1d0] sm:$0xff] %vm31_vm2, %v833_v7  ;;  %v832_v32 = vadd.f32 %v3771_v59, %v153_v55  ;;  %v3955_v59 = vld [vmem:[%s4206_s5 + $0xf8] sm:$0xff]   ;;  %v2330_v33 = vunpack.c.l.bf16 %v3933_v16  ;;  %v4008_v39 = vld [vmem:[%s4207_s6 + $0xf0] sm:$0xff]  }
 0x13f   :  { %1880 = vst.msk [vmem:[%s4211_s7 + $0xdc] sm:$0xf] %vm1824_vm3, %v2079_v46  ;;  %v805_v19 = vadd.f32 %v3804_v11, %v126_v57  ;;  %v837_v20 = vadd.f32 %v3806_v48, %v158_v62  ;;  %v803_v4 = vadd.f32 %v3854_v42, %v124_v23  ;;  %v835_v44 = vadd.f32 %v3856_v38, %v156_v24  ;;  %v3969_v11 = vld [vmem:[%s4206_s5 + $0x70] sm:$0xff]  }
 0x140   :  { %v2077_v22 = vpack.c.bf16 %v1557_v2, %v1557_v2  ;;  %1846 = vst.msk [vmem:[%s4211_s7 + $0x54] sm:$0xf] %vm1824_vm3, %v2045_v15  ;;  %v3974_v48 = vld [vmem:[%s4206_s5 + $0xf0] sm:$0xff]   ;;  %v806_v42 = vadd.f32 %v3879_v50, %v127_v37  ;;  %v838_v38 = vadd.f32 %v3881_v43, %v159_v34  ;;  %v804_v8 = vadd.f32 %v635_v3, %v125_v13  ;;  %v3992_v50 = vld [vmem:[%s4207_s6 + $0xf8] sm:$0xff]   ;;  %v4394_v2 = vld [vmem:[#allocation23_spill] sm:$0xff] }
 0x141   :  { %864 = vst.msk [vmem:[#allocation2 + $0xc0] sm:$0xff] %vm31_vm2, %v799_v35  ;;  %896 = vst.msk [vmem:[#allocation2 + $0x1c0] sm:$0xff] %vm31_vm2, %v831_v1  ;;  %v836_v18 = vadd.f32 %v763_v51, %v157_v53  ;;  %v2271_v27 = vunpack.c.h.bf16 %v3499_v25  ;;  %v2150_v61 = vunpack.c.l.bf16 %v3941_v6  ;;  %v2335_v43 = vunpack.c.h.bf16 %v3504_v36  ;;  %v4396_v1 = vld [vmem:[#allocation24_spill] sm:$0xff] }
 0x142   :  { %867 = vst.msk [vmem:[#allocation2 + $0xd8] sm:$0xff] %vm31_vm2, %v802_v29  ;;  %899 = vst.msk [vmem:[#allocation2 + $0x1d8] sm:$0xff] %vm31_vm2, %v834_v47  ;;  %v2267_v49 = vunpack.c.h.bf16 %v3928_v41  ;;  %v2331_v14 = vunpack.c.h.bf16 %v3933_v16  ;;  %v2214_v28 = vunpack.c.l.bf16 %v3955_v59  ;;  %v2146_v0 = vunpack.c.l.bf16 %v3969_v11 }
 0x143   :  { %1878 = vst.msk [vmem:[%s4211_s7 + $0xd4] sm:$0xf] %vm1824_vm3, %v2077_v22  ;;  %v2210_v26 = vunpack.c.l.bf16 %v3974_v48  ;;  %v2151_v5 = vunpack.c.h.bf16 %v3941_v6  ;;  %v2215_v58 = vunpack.c.h.bf16 %v3955_v59  ;;  %v2278_v57 = vunpack.c.l.bf16 %v3986_v52 }
 0x144   :  { %865 = vst.msk [vmem:[#allocation2 + $0xc8] sm:$0xff] %vm31_vm2, %v800_v40  ;;  %897 = vst.msk [vmem:[#allocation2 + $0x1c8] sm:$0xff] %vm31_vm2, %v832_v32  ;;  %v2342_v62 = vunpack.c.l.bf16 %v3992_v50  ;;  %v2147_v30 = vunpack.c.h.bf16 %v3969_v11  ;;  %v2211_v46 = vunpack.c.h.bf16 %v3974_v48  ;;  %v4395_v7 = vunpack.c.l.bf16 %v4394_v2 }
 0x145   :  { %870 = vst.msk [vmem:[#allocation2 + $0xf0] sm:$0xff] %vm31_vm2, %v805_v19  ;;  %902 = vst.msk [vmem:[#allocation2 + $0x1f0] sm:$0xff] %vm31_vm2, %v837_v20  ;;  %v933_v55 = vld [vmem:[#allocation2 + $0xd0] sm:$0xff]  ;;  %v2274_v37 = vunpack.c.l.bf16 %v4003_v9  ;;  %v2338_v15 = vunpack.c.l.bf16 %v4008_v39  ;;  %v2279_v35 = vunpack.c.h.bf16 %v3986_v52  ;;  %v4397_v29 = vunpack.c.l.bf16 %v4396_v1 }
 0x146   :  { %868 = vst.msk [vmem:[#allocation2 + $0xe0] sm:$0xff] %vm31_vm2, %v803_v4  ;;  %900 = vst.msk [vmem:[#allocation2 + $0x1e0] sm:$0xff] %vm31_vm2, %v835_v44  ;;  %v1125_v23 = vadd.f32 %v4395_v7, %v933_v55  ;;  %v965_v24 = vld [vmem:[#allocation2 + $0x1d0] sm:$0xff]  ;;  %v2343_v51 = vunpack.c.h.bf16 %v3992_v50  ;;  %v2275_v22 = vunpack.c.h.bf16 %v4003_v9  ;;  %v2339_v47 = vunpack.c.h.bf16 %v4008_v39 }
 0x147   :  { %871 = vst.msk [vmem:[#allocation2 + $0xf8] sm:$0xff] %vm31_vm2, %v806_v42  ;;  %903 = vst.msk [vmem:[#allocation2 + $0x1f8] sm:$0xff] %vm31_vm2, %v838_v38  ;;  %v1157_v34 = vadd.f32 %v4397_v29, %v965_v24  ;;  %v4398_v32 = vunpack.c.l.bf16 %v3206_v12  ;;  %v4399_v20 = vunpack.c.l.bf16 %v3211_v54  ;;  %v4400_v44 = vunpack.c.h.bf16 %v4394_v2 }
 0x148   :  { %869 = vst.msk [vmem:[#allocation2 + $0xe8] sm:$0xff] %vm31_vm2, %v804_v8  ;;  %901 = vst.msk [vmem:[#allocation2 + $0x1e8] sm:$0xff] %vm31_vm2, %v836_v18  ;;  %v931_v13 = vld [vmem:[#allocation2 + $0xc0] sm:$0xff]  ;;  %v1196_v40 = vmul.f32 %v3819_v31, %v1125_v23  ;;  %v4401_v7 = vunpack.c.h.bf16 %v4396_v1 }
 0x149   :  { %v963_v3 = vld [vmem:[#allocation2 + $0x1c0] sm:$0xff]  ;;  %v934_v53 = vld [vmem:[#allocation2 + $0xd8] sm:$0xff]  ;;  %v1123_v19 = vadd.f32 %v4398_v32, %v931_v13  ;;  %v1228_v55 = vmul.f32 %v3819_v31, %v1157_v34 }
 0x14a   :  { %v1155_v4 = vadd.f32 %v4399_v20, %v963_v3  ;;  %v1126_v42 = vadd.f32 %v4400_v44, %v934_v53  ;;  %v966_v38 = vld [vmem:[#allocation2 + $0x1d8] sm:$0xff]  ;;  %v1267_v13 = vadd.f32 %v3849_v10, %v1196_v40 }
 0x14b   :  { %v932_v8 = vld [vmem:[#allocation2 + $0xc8] sm:$0xff]  ;;  %v1158_v24 = vadd.f32 %v4401_v7, %v966_v38  ;;  %v1194_v3 = vmul.f32 %v3819_v31, %v1123_v19  ;;  %v1299_v32 = vadd.f32 %v3849_v10, %v1228_v55 }
 0x14c   :  { %v964_v18 = vld [vmem:[#allocation2 + $0x1c8] sm:$0xff]  ;;  %v1124_v23 = vadd.f32 %v2139_v63, %v932_v8  ;;  %v1226_v2 = vmul.f32 %v3819_v31, %v1155_v4  ;;  %v1197_v53 = vmul.f32 %v3819_v31, %v1126_v42  ;;  %v1459_v54 = vadd.f32 %v2270_v60, %v1267_v13 }
 0x14d   :  { %v1156_v29 = vadd.f32 %v2203_v56, %v964_v18  ;;  %v1229_v34 = vmul.f32 %v3819_v31, %v1158_v24  ;;  %v1265_v63 = vadd.f32 %v3849_v10, %v1194_v3  ;;  %v1491_v19 = vadd.f32 %v2334_v45, %v1299_v32  ;;  %v937_v24 = vld [vmem:[#allocation2 + $0xf0] sm:$0xff] }
 0x14e   :  { %v1195_v1 = vmul.f32 %v3819_v31, %v1124_v23  ;;  %v1297_v56 = vadd.f32 %v3849_v10, %v1226_v2  ;;  %v1268_v40 = vadd.f32 %v3849_v10, %v1197_v53  ;;  %v1530_v42 = vmax.f32 %v1459_v54, %v3894_v17  ;;  %v938_v16 = vld [vmem:[#allocation2 + $0xf8] sm:$0xff] }
 0x14f   :  { %v1227_v12 = vmul.f32 %v3819_v31, %v1156_v29  ;;  %v1300_v20 = vadd.f32 %v3849_v10, %v1229_v34  ;;  %v1457_v60 = vadd.f32 %v2266_v21, %v1265_v63  ;;  %v1562_v18 = vmax.f32 %v1491_v19, %v3894_v17  ;;  %v970_v32 = vld [vmem:[#allocation2 + $0x1f8] sm:$0xff]  ;;  %v936_v34 = vld [vmem:[#allocation2 + $0xe8] sm:$0xff] }
 0x150   :  { %v1266_v4 = vadd.f32 %v3849_v10, %v1195_v1  ;;  %v1489_v38 = vadd.f32 %v2330_v33, %v1297_v56  ;;  %v1460_v8 = vadd.f32 %v2271_v27, %v1268_v40  ;;  %v2050_v23 = vpack.c.bf16 %v1530_v42, %v1530_v42  ;;  %v969_v27 = vld [vmem:[#allocation2 + $0x1f0] sm:$0xff]  ;;  %v968_v1 = vld [vmem:[#allocation2 + $0x1e8] sm:$0xff] }
 0x151   :  { %v1298_v44 = vadd.f32 %v3849_v10, %v1227_v12  ;;  %v1492_v45 = vadd.f32 %v2335_v43, %v1300_v20  ;;  %v1528_v21 = vmax.f32 %v1457_v60, %v3894_v17  ;;  %v2082_v29 = vpack.c.bf16 %v1562_v18, %v1562_v18  ;;  %v935_v43 = vld [vmem:[#allocation2 + $0xe0] sm:$0xff] }
 0x152   :  { %v1458_v55 = vadd.f32 %v2267_v49, %v1266_v4  ;;  %v1560_v33 = vmax.f32 %v1489_v38, %v3894_v17  ;;  %v1531_v25 = vmax.f32 %v1460_v8, %v3894_v17  ;;  %v967_v49 = vld [vmem:[#allocation2 + $0x1e0] sm:$0xff]  ;;  %1851 = vst.msk [vmem:[%s4211_s7 + $0x68] sm:$0xf] %vm1824_vm3, %v2050_v23  ;;  %v1129_v53 = vadd.f32 %v2150_v61, %v937_v24 }
 0x153   :  { %v1490_v7 = vadd.f32 %v2331_v14, %v1298_v44  ;;  %v1563_v13 = vmax.f32 %v1492_v45, %v3894_v17  ;;  %v2048_v14 = vpack.c.bf16 %v1528_v21, %v1528_v21  ;;  %1883 = vst.msk [vmem:[%s4211_s7 + $0xe8] sm:$0xf] %vm1824_vm3, %v2082_v29  ;;  %v1161_v56 = vadd.f32 %v2214_v28, %v969_v27 }
 0x154   :  { %v1529_v36 = vmax.f32 %v1458_v55, %v3894_v17  ;;  %v2080_v3 = vpack.c.bf16 %v1560_v33, %v1560_v33  ;;  %v2051_v2 = vpack.c.bf16 %v1531_v25, %v1531_v25  ;;  %v1200_v61 = vmul.f32 %v3819_v31, %v1129_v53 }
 0x155   :  { %v1561_v41 = vmax.f32 %v1490_v7, %v3894_v17  ;;  %v2083_v12 = vpack.c.bf16 %v1563_v13, %v1563_v13  ;;  %1849 = vst.msk [vmem:[%s4211_s7 + $0x60] sm:$0xf] %vm1824_vm3, %v2048_v14  ;;  %v1127_v28 = vadd.f32 %v2146_v0, %v935_v43  ;;  %v1159_v40 = vadd.f32 %v2210_v26, %v967_v49 }
 0x156   :  { %v2049_v54 = vpack.c.bf16 %v1529_v36, %v1529_v36  ;;  %1881 = vst.msk [vmem:[%s4211_s7 + $0xe0] sm:$0xf] %vm1824_vm3, %v2080_v3  ;;  %1852 = vst.msk [vmem:[%s4211_s7 + $0x6c] sm:$0xf] %vm1824_vm3, %v2051_v2  ;;  %v1130_v19 = vadd.f32 %v2151_v5, %v938_v16  ;;  %v1232_v0 = vmul.f32 %v3819_v31, %v1161_v56 }
 0x157   :  { %v2081_v63 = vpack.c.bf16 %v1561_v41, %v1561_v41  ;;  %1884 = vst.msk [vmem:[%s4211_s7 + $0xec] sm:$0xf] %vm1824_vm3, %v2083_v12  ;;  %v1162_v6 = vadd.f32 %v2215_v58, %v970_v32  ;;  %v1128_v26 = vadd.f32 %v2147_v30, %v936_v34  ;;  %v1160_v5 = vadd.f32 %v2211_v46, %v968_v1 }
 0x158   :  { %1850 = vst.msk [vmem:[%s4211_s7 + $0x64] sm:$0xf] %vm1824_vm3, %v2049_v54  ;;  %v1271_v20 = vadd.f32 %v3849_v10, %v1200_v61  ;;  %v1198_v4 = vmul.f32 %v3819_v31, %v1127_v28  ;;  %v1230_v44 = vmul.f32 %v3819_v31, %v1159_v40  ;;  %v1201_v42 = vmul.f32 %v3819_v31, %v1130_v19 }
 0x159   :  { %1882 = vst.msk [vmem:[%s4211_s7 + $0xe4] sm:$0xf] %vm1824_vm3, %v2081_v63  ;;  %v1303_v60 = vadd.f32 %v3849_v10, %v1232_v0  ;;  %v1233_v38 = vmul.f32 %v3819_v31, %v1162_v6  ;;  %v1199_v59 = vmul.f32 %v3819_v31, %v1128_v26  ;;  %v1231_v11 = vmul.f32 %v3819_v31, %v1160_v5 }
 0x15a   :  { %v1463_v48 = vadd.f32 %v2278_v57, %v1271_v20  ;;  %v1269_v58 = vadd.f32 %v3849_v10, %v1198_v4  ;;  %v1301_v30 = vadd.f32 %v3849_v10, %v1230_v44  ;;  %v1272_v46 = vadd.f32 %v3849_v10, %v1201_v42 }
 0x15b   :  { %v1495_v8 = vadd.f32 %v2342_v62, %v1303_v60  ;;  %v1304_v18 = vadd.f32 %v3849_v10, %v1233_v38  ;;  %v1270_v45 = vadd.f32 %v3849_v10, %v1199_v59  ;;  %v1302_v55 = vadd.f32 %v3849_v10, %v1231_v11 }
 0x15c   :  { %v1534_v31 = vmax.f32 %v1463_v48, %v3894_v17  ;;  %v1461_v57 = vadd.f32 %v2274_v37, %v1269_v58  ;;  %v1493_v7 = vadd.f32 %v2338_v15, %v1301_v30  ;;  %v1464_v24 = vadd.f32 %v2279_v35, %v1272_v46 }
 0x15d   :  { %v1566_v23 = vmax.f32 %v1495_v8, %v3894_v17  ;;  %v1496_v62 = vadd.f32 %v2343_v51, %v1304_v18  ;;  %v1462_v21 = vadd.f32 %v2275_v22, %v1270_v45  ;;  %v1494_v10 = vadd.f32 %v2339_v47, %v1302_v55 }
 0x15e   :  { %v2054_v33 = vpack.c.bf16 %v1534_v31, %v1534_v31  ;;  %v1532_v37 = vmax.f32 %v1461_v57, %v3894_v17  ;;  %v1564_v25 = vmax.f32 %v1493_v7, %v3894_v17  ;;  %v1535_v15 = vmax.f32 %v1464_v24, %v3894_v17 }
 0x15f   :  { %v2086_v52 = vpack.c.bf16 %v1566_v23, %v1566_v23  ;;  %v1567_v35 = vmax.f32 %v1496_v62, %v3894_v17  ;;  %v1533_v27 = vmax.f32 %v1462_v21, %v3894_v17  ;;  %v1565_v50 = vmax.f32 %v1494_v10, %v3894_v17 }
 0x160   :  { %1855 = vst.msk [vmem:[%s4211_s7 + $0x78] sm:$0xf] %vm1824_vm3, %v2054_v33  ;;  %v2052_v9 = vpack.c.bf16 %v1532_v37, %v1532_v37  ;;  %v2084_v39 = vpack.c.bf16 %v1564_v25, %v1564_v25  ;;  %v2055_v51 = vpack.c.bf16 %v1535_v15, %v1535_v15 }
 0x161   :  { %1887 = vst.msk [vmem:[%s4211_s7 + $0xf8] sm:$0xf] %vm1824_vm3, %v2086_v52  ;;  %v2087_v22 = vpack.c.bf16 %v1567_v35, %v1567_v35  ;;  %v2053_v47 = vpack.c.bf16 %v1533_v27, %v1533_v27  ;;  %v2085_v29 = vpack.c.bf16 %v1565_v50, %v1565_v50 }
 0x162   :  { %1853 = vst.msk [vmem:[%s4211_s7 + $0x70] sm:$0xf] %vm1824_vm3, %v2052_v9  ;;  %1885 = vst.msk [vmem:[%s4211_s7 + $0xf0] sm:$0xf] %vm1824_vm3, %v2084_v39 }
 0x163   :  { %1856 = vst.msk [vmem:[%s4211_s7 + $0x7c] sm:$0xf] %vm1824_vm3, %v2055_v51  ;;  %1888 = vst.msk [vmem:[%s4211_s7 + $0xfc] sm:$0xf] %vm1824_vm3, %v2087_v22 }
 0x164   :  { %1854 = vst.msk [vmem:[%s4211_s7 + $0x74] sm:$0xf] %vm1824_vm3, %v2053_v47  ;;  %1886 = vst.msk [vmem:[%s4211_s7 + $0xf4] sm:$0xf] %vm1824_vm3, %v2085_v29 }

</bundles_post_ra>
